<compile_context>
chip_gen: v7x
topology: tpu7x:2x2x1
jax: 0.10.0
libtpu: 0.0.40
codegen_flags: <defaults>
</compile_context>

<pallas_src>
import functools

import numpy as np
import jax
import jax.numpy as jnp
from jax.experimental import pallas as pl
from jax.experimental.pallas import tpu as pltpu


def _round_up(x, m):
    return ((x + m - 1) // m) * m


# ---------------------------------------------------------------------------
# Kernel 1: fused encoder (base_net pyramid + pools + GAP + RotationBlock)
# ---------------------------------------------------------------------------
def _encoder_kernel(img_ref, mm_ref,
                    w1_ref, b1_ref, w2_ref, b2_ref,
                    w3_ref, b3_ref, w4_ref, b4_ref,
                    p1_ref, p2_ref, p3_ref,
                    wc_ref, bc_ref, wf_ref, bf_ref,
                    feat_ref, f2_ref, r6_ref):
    f32 = jnp.float32
    bf16 = jnp.bfloat16

    def dense(x, w_ref, b_ref):
        return jnp.dot(x, w_ref[...], preferred_element_type=f32) + b_ref[...]

    def relu_bf16(x):
        return jnp.maximum(x, 0.0).astype(bf16)

    # ----- backbone: conv1x1(relu) -> pool(matmul) chain, all on the MXU ----
    img = img_ref[0]                                      # (1024, 8)  bf16
    h1 = relu_bf16(dense(img, w1_ref, b1_ref))            # (1024, 64)
    q1 = jnp.dot(p1_ref[...], h1, preferred_element_type=f32).astype(bf16)
    h2 = relu_bf16(dense(q1, w2_ref, b2_ref))             # (256, 128)
    q2 = jnp.dot(p2_ref[...], h2, preferred_element_type=f32)      # (64, 128)
    f2_ref[0] = q2                                        # res_layer2 (8x8x128)
    h3 = relu_bf16(dense(q2.astype(bf16), w3_ref, b3_ref))  # (64, 256)
    q3 = jnp.dot(p3_ref[...], h3, preferred_element_type=f32).astype(bf16)
    h4 = jnp.maximum(dense(q3, w4_ref, b4_ref), 0.0)      # (16, 512)
    # GAP over the 4x4 spatial grid (== GAP of the 2x2-pooled layer4 map).
    feat_ref[0] = jnp.mean(h4, axis=0, keepdims=True).astype(bf16)  # (1, 512)

    # ----- RotationBlock: 1x1 conv (1->32, relu), GAP, fc (32->6) -----------
    mm = mm_ref[0]                                        # (1024, 8) bf16
    hm = jnp.maximum(jnp.dot(mm, wc_ref[...], preferred_element_type=f32)
                     + bc_ref[...], 0.0)                  # (1024, 32)
    gm = jnp.mean(hm, axis=0, keepdims=True)              # (1, 32)
    r6_ref[0] = (jnp.dot(gm.astype(bf16), wf_ref[...],
                         preferred_element_type=f32) + bf_ref[...])  # (1, 8)


def fused_encoder(params, img_flat, mm_flat):
    B, HW, _ = img_flat.shape
    args = (img_flat, mm_flat,
            params["bb1_w"], params["bb1_b"],
            params["bb2_w"], params["bb2_b"],
            params["bb3_w"], params["bb3_b"],
            params["bb4_w"], params["bb4_b"],
            params["pool1"], params["pool2"], params["pool3"],
            params["pbc_w"], params["pbc_b"],
            params["pbf_w"], params["pbf_b"])

    def batched(a):
        return pl.BlockSpec((1,) + a.shape[1:], lambda b: (b, 0, 0))

    def full2d(a):
        return pl.BlockSpec(a.shape, lambda b: (0, 0))

    in_specs = [batched(img_flat), batched(mm_flat)] + [full2d(a) for a in args[2:]]
    feats, f2, r6 = pl.pallas_call(
        _encoder_kernel,
        out_shape=(jax.ShapeDtypeStruct((B, 1, 512), jnp.bfloat16),
                   jax.ShapeDtypeStruct((B, 64, 128), jnp.float32),
                   jax.ShapeDtypeStruct((B, 1, 8), jnp.float32)),
        grid=(B,),
        in_specs=in_specs,
        out_specs=(pl.BlockSpec((1, 1, 512), lambda b: (b, 0, 0)),
                   pl.BlockSpec((1, 64, 128), lambda b: (b, 0, 0)),
                   pl.BlockSpec((1, 1, 8), lambda b: (b, 0, 0))),
        compiler_params=pltpu.CompilerParams(
            dimension_semantics=("parallel",)),
    )(*args)
    return feats, f2, r6


# ---------------------------------------------------------------------------
# Kernel 2: fused per-batch heads (MANO chain + joints + atlas globals)
# ---------------------------------------------------------------------------
def _heads_kernel(x_ref, m1w_ref, m1b_ref, m2w_ref, m2b_ref, m3w_ref, m3b_ref,
                  mbw_ref, mjw_ref, agw_ref, agb_ref, atsw_ref, atsb_ref,
                  coeff_ref, offs_ref, joff_ref, g_ref, ts_ref):
    f32 = jnp.float32
    bf16 = jnp.bfloat16
    x = x_ref[...]                                                   # (8, 512)
    h = jnp.maximum(jnp.dot(x, m1w_ref[...], preferred_element_type=f32)
                    + m1b_ref[...], 0.0).astype(bf16)                # (8, 1024)
    h = jnp.maximum(jnp.dot(h, m2w_ref[...], preferred_element_type=f32)
                    + m2b_ref[...], 0.0).astype(bf16)                # (8, 256)
    coeffs = (jnp.dot(h, m3w_ref[...], preferred_element_type=f32)
              + m3b_ref[...])                                        # (8, 43)
    coeff_ref[...] = coeffs
    cb = coeffs.astype(bf16)
    offs_ref[...] = jnp.dot(cb, mbw_ref[...], preferred_element_type=f32)
    joff_ref[...] = jnp.dot(cb, mjw_ref[...], preferred_element_type=f32)
    # AtlasNet globals: first-layer bias (features @ W1_glob + b1) and trans/scale
    g_ref[...] = (jnp.dot(x, agw_ref[...], preferred_element_type=f32)
                  + agb_ref[...])
    ts_ref[...] = (jnp.dot(x, atsw_ref[...], preferred_element_type=f32)
                   + atsb_ref[...])


def batch_heads(params, features_bf16):
    B = features_bf16.shape[0]
    Mp = 8
    x = jnp.pad(features_bf16, ((0, Mp - B), (0, 0)))
    args = (x,
            params["m1_w"], params["m1_b"],
            params["m2_w"], params["m2_b"],
            params["m3_w"], params["m3_b"],
            params["mano_basis_w"], params["joint_w"],
            params["ag_w"], params["ag_b"],
            params["ats_w"], params["ats_b"])

    def full(a):
        return pl.BlockSpec(a.shape, lambda i: (0, 0))

    coeffs, offs, joff, gbias, ts = pl.pallas_call(
        _heads_kernel,
        out_shape=(jax.ShapeDtypeStruct((Mp, 43), jnp.float32),
                   jax.ShapeDtypeStruct((Mp, 778 * 3), jnp.float32),
                   jax.ShapeDtypeStruct((Mp, 48), jnp.float32),
                   jax.ShapeDtypeStruct((Mp, 256), jnp.float32),
                   jax.ShapeDtypeStruct((Mp, 4), jnp.float32)),
        grid=(1,),
        in_specs=[full(a) for a in args],
        out_specs=(pl.BlockSpec((Mp, 43), lambda i: (0, 0)),
                   pl.BlockSpec((Mp, 778 * 3), lambda i: (0, 0)),
                   pl.BlockSpec((Mp, 48), lambda i: (0, 0)),
                   pl.BlockSpec((Mp, 256), lambda i: (0, 0)),
                   pl.BlockSpec((Mp, 4), lambda i: (0, 0))),
        compiler_params=pltpu.CompilerParams(
            dimension_semantics=("arbitrary",)),
    )(*args)
    return coeffs[:B], offs[:B], joff[:B], gbias[:B], ts[:B]


# ---------------------------------------------------------------------------
# Kernel 3: AtlasNet per-point MLP (global feature folded into a per-batch bias)
# ---------------------------------------------------------------------------
def _atlas_kernel(x_ref, g_ref, w1_ref, w2_ref, b2_ref, o_ref):
    f32 = jnp.float32
    x = x_ref[0]                                              # (Npad, 136) bf16
    h = jnp.dot(x, w1_ref[...], preferred_element_type=f32) + g_ref[0]
    h = jnp.maximum(h, 0.0).astype(jnp.bfloat16)              # (Npad, 256)
    h = jnp.dot(h, w2_ref[...], preferred_element_type=f32) + b2_ref[...]
    o_ref[0] = jnp.maximum(h, 0.0)                            # (Npad, 128)


def atlas_pointwise(params, x_pp, gbias3):
    B, Npad, Kp = x_pp.shape
    return pl.pallas_call(
        _atlas_kernel,
        out_shape=jax.ShapeDtypeStruct((B, Npad, 128), jnp.float32),
        grid=(B,),
        in_specs=[
            pl.BlockSpec((1, Npad, Kp), lambda b: (b, 0, 0)),
            pl.BlockSpec((1, 1, 256), lambda b: (b, 0, 0)),
            pl.BlockSpec(params["a1p_w"].shape, lambda b: (0, 0)),
            pl.BlockSpec(params["a2_w"].shape, lambda b: (0, 0)),
            pl.BlockSpec(params["a2_b"].shape, lambda b: (0, 0)),
        ],
        out_specs=pl.BlockSpec((1, Npad, 128), lambda b: (b, 0, 0)),
        compiler_params=pltpu.CompilerParams(
            dimension_semantics=("parallel",)),
    )(x_pp, gbias3, params["a1p_w"], params["a2_w"], params["a2_b"])


# ---------------------------------------------------------------------------
# Plain-JAX glue (tiny ops: rot6d, projection/gather, keypoint assembly)
# ---------------------------------------------------------------------------
def rot6d_to_matrix(r6):
    a1, a2 = r6[:, :3], r6[:, 3:6]
    b1 = a1 / (jnp.linalg.norm(a1, axis=-1, keepdims=True) + 1e-6)
    a2p = a2 - jnp.sum(b1 * a2, axis=-1, keepdims=True) * b1
    b2 = a2p / (jnp.linalg.norm(a2p, axis=-1, keepdims=True) + 1e-6)
    b3 = jnp.cross(b1, b2)
    return jnp.stack([b1, b2, b3], axis=1)                       # [B,3,3]


def project(points, camera, feature_maps, img_size=32.0):
    """Perspective-project points and sample the feature map at them."""
    B, N, _ = points.shape
    H, W, C = feature_maps.shape[1:]
    uvz = jnp.einsum('bij,bnj->bni', camera, points)
    z = jnp.maximum(uvz[..., 2:3], 1e-6)
    uv = uvz[..., :2] / z
    # TODO(synk): bilinear grid_sample gather has no clean Pallas equivalent;
    # nearest-neighbour sampling done in plain JAX.
    u = jnp.clip(jnp.round(uv[..., 0] * (W / img_size)), 0, W - 1).astype(jnp.int32)
    v = jnp.clip(jnp.round(uv[..., 1] * (H / img_size)), 0, H - 1).astype(jnp.int32)
    flat = feature_maps.reshape(B, H * W, C)
    idx = jnp.broadcast_to((v * W + u)[..., None], (B, N, C))
    return jnp.take_along_axis(flat, idx, axis=1)                # [B,N,C]


KPID2VERTICES = {4: 744, 8: 320, 12: 443, 16: 555, 20: 672}
MANO_TO_KP = {0: 0, 1: 5, 2: 6, 3: 7, 4: 9, 5: 10, 6: 11, 7: 17, 8: 18,
              9: 19, 10: 13, 11: 14, 12: 15, 13: 1, 14: 2, 15: 3}


def assemble_keypoints(mesh_vertices, joints16):
    keypoints = [None] * 21
    for mano_id, my_id in MANO_TO_KP.items():
        keypoints[my_id] = joints16[:, mano_id, :]
    for my_id, vid in KPID2VERTICES.items():
        keypoints[my_id] = mesh_vertices[:, vid, :]   # mean of a single vertex
    return jnp.stack(keypoints, axis=1)                          # [B,21,3]


# ---------------------------------------------------------------------------
# Forward
# ---------------------------------------------------------------------------
def template_hoi_forward(params, image_crop, mask_crop, mix_mask_crop,
                         obj_coarse_pc, camera, center_2d, scale_2d, epoch):
    del center_2d, scale_2d, epoch          # unused (as in the reference forward)
    B = image_crop.shape[0]
    image = jnp.transpose(image_crop, (0, 2, 3, 1))      # NCHW -> NHWC
    mask = jnp.transpose(mask_crop, (0, 2, 3, 1))
    mix_mask = jnp.transpose(mix_mask_crop, (0, 2, 3, 1))
    H, W = image.shape[1:3]

    # Flatten spatial, cast to bf16 first, pad channels to a multiple of 8.
    img_flat = jnp.pad(image.reshape(B, H * W, 3).astype(jnp.bfloat16),
                       ((0, 0), (0, 0), (0, 5)))
    mm_flat = jnp.pad(mix_mask.reshape(B, H * W, 1).astype(jnp.bfloat16),
                      ((0, 0), (0, 0), (0, 7)))

    # Kernel 1: base_net + RotationBlock.  atlas_base_net = deepcopy(base_net)
    # sees the identical input => identical output: compute once, reuse.
    feats_bf16, f2_map, r6 = fused_encoder(params, img_flat, mm_flat)
    features = feats_bf16.reshape(B, 512)                # bf16, matmul-only use
    atlas_infeatures = features                          # noqa: F841

    # RotationBlock tail + point transform in plain jnp (micro-op).
    R = rot6d_to_matrix(r6.reshape(B, 8)[:, :6])
    rot_obj_coarse_pc = jnp.einsum('bij,bnj->bni', R, obj_coarse_pc)

    feature_maps = f2_map.reshape(B, 8, 8, 128)          # interpolate_feature_map
    point_feature = project(rot_obj_coarse_pc, camera, feature_maps)  # [B,642,128]

    # Kernel 2: MANO chain + joint regression + atlas global heads.
    coeffs, offs, joff, gbias, ts = batch_heads(params, features)
    hand_pose = coeffs[:, :33]
    hand_shape = coeffs[:, 33:43]
    # TODO(synk): real MANO layer (LBS over learned blendshapes) replaced by a
    # deterministic linear vertex basis; interface/shapes preserved.
    hand_verts = params["mano_template"][None] + 0.01 * offs.reshape(B, 778, 3)
    joints16 = params["joints_template"][None] + 0.01 * joff.reshape(B, 16, 3)
    hand_joints = assemble_keypoints(hand_verts, joints16)        # [B,21,3]

    # Kernel 3: AtlasNet per-point decoder ([verts | point_feature] only).
    N = rot_obj_coarse_pc.shape[1]
    Npad = _round_up(N, 8)
    x_pp = jnp.concatenate([rot_obj_coarse_pc, point_feature],
                           axis=-1).astype(jnp.bfloat16)          # [B,642,131]
    x_pp = jnp.pad(x_pp, ((0, 0), (0, Npad - N), (0, 136 - x_pp.shape[-1])))
    h2 = atlas_pointwise(params, x_pp, gbias.reshape(B, 1, 256))  # [B,Npad,128]
    h2 = h2[:, :N, :]
    delta = (jnp.einsum('bnk,kc->bnc', h2, params["a3_w"])
             + params["a3_b"]) / 100.0                            # out_factor

    pred_trans = ts[:, :3]
    pred_scale = 1.0 + ts[:, 3:4]
    pred_verts = ((rot_obj_coarse_pc + delta) * pred_scale[:, None, :]
                  + pred_trans[:, None, :])

    mask_point = project(pred_verts, camera, mask)
    return (pred_verts, pred_trans, pred_scale, hand_verts, hand_joints,
            hand_shape, hand_pose, mask_point, rot_obj_coarse_pc, delta)


# ---------------------------------------------------------------------------
# Deterministic parameter init (kernel-ready: bf16 weights, (1,N) f32 biases)
# ---------------------------------------------------------------------------
def _make_pool_matrix(H, W):
    Ho, Wo = H // 2, W // 2
    P = np.zeros((Ho * Wo, H * W), np.float32)
    for h in range(Ho):
        for w in range(Wo):
            r = h * Wo + w
            for dh in (0, 1):
                for dw in (0, 1):
                    P[r, (2 * h + dh) * W + (2 * w + dw)] = 0.25
    return jnp.asarray(P, jnp.bfloat16)


def init_params(key):
    keys = jax.random.split(key, 20)

    def dense(k, cin, cout):
        w = jax.random.normal(k, (cin, cout), jnp.float32) / jnp.sqrt(cin)
        b = jnp.zeros((cout,), jnp.float32)
        return w, b

    p = {}

    def put(name, w, b):
        p[name + "_w"] = w.astype(jnp.bfloat16)
        p[name + "_b"] = b[None].astype(jnp.float32)

    # Backbone (shared by base_net and its deepcopy atlas_base_net).
    # TODO(synk): pretrained resnet18 replaced by a deterministic 1x1-conv
    # pyramid with the same channel ladder (64/128/256/512) + 512-d GAP.
    w, b = dense(keys[0], 3, 64)
    p["bb1_w"] = jnp.pad(w, ((0, 5), (0, 0))).astype(jnp.bfloat16)
    p["bb1_b"] = b[None]
    put("bb2", *dense(keys[1], 64, 128))
    put("bb3", *dense(keys[2], 128, 256))
    put("bb4", *dense(keys[3], 256, 512))
    p["pool1"] = _make_pool_matrix(32, 32)
    p["pool2"] = _make_pool_matrix(16, 16)
    p["pool3"] = _make_pool_matrix(8, 8)
    # z_head is declared in the torch __init__ but never used in forward.
    put("z_head", *dense(keys[4], 64 + 128 + 256 + 512, 512))

    # RotationBlock: conv1x1 (1->32) + fc (32->6), identity 6D-rot bias init.
    wc, bc = dense(keys[5], 1, 32)
    p["pbc_w"] = jnp.pad(wc, ((0, 7), (0, 0))).astype(jnp.bfloat16)
    p["pbc_b"] = bc[None]
    wf, _ = dense(keys[6], 32, 6)
    p["pbf_w"] = jnp.pad(wf, ((0, 0), (0, 2))).astype(jnp.bfloat16)
    p["pbf_b"] = jnp.array([[1., 0., 0., 0., 1., 0., 0., 0.]], jnp.float32)

    # ManoBranch (base_neurons = [512, 1024, 256], ncomps=30, use_shape).
    put("m1", *dense(keys[7], 512, 1024))
    put("m2", *dense(keys[8], 1024, 256))
    wpz, bpz = dense(keys[9], 256, 33)
    wsh, bsh = dense(keys[10], 256, 10)
    p["m3_w"] = jnp.concatenate([wpz, wsh], axis=1).astype(jnp.bfloat16)
    p["m3_b"] = jnp.concatenate([bpz, bsh])[None]
    basis = jax.random.normal(keys[11], (43, 778 * 3), jnp.float32) * 0.01
    template = jax.random.normal(keys[12], (778, 3), jnp.float32) * 0.1
    jr = jnp.abs(jax.random.normal(keys[13], (778, 16), jnp.float32))
    jr = jr / jnp.sum(jr, axis=0, keepdims=True)
    p["mano_basis_w"] = basis.astype(jnp.bfloat16)
    p["mano_template"] = template
    # Joint regression folded into the coefficient basis (precomputed).
    p["joint_w"] = jnp.einsum('kvc,vj->kjc', basis.reshape(43, 778, 3),
                              jr).reshape(43, 48).astype(jnp.bfloat16)
    p["joints_template"] = jr.T @ template                       # (16, 3)

    # AtlasBranch template decoder (643 -> 256 -> 128 -> 3, out_factor=100).
    a1w, a1b = dense(keys[14], 3 + 512 + 128, 256)
    w_pts, w_glob, w_pf = a1w[:3], a1w[3:515], a1w[515:]
    a1p = jnp.pad(jnp.concatenate([w_pts, w_pf], axis=0), ((0, 5), (0, 0)))
    p["a1p_w"] = a1p.astype(jnp.bfloat16)                        # (136, 256)
    p["ag_w"] = w_glob.astype(jnp.bfloat16)                      # (512, 256)
    p["ag_b"] = a1b[None]
    put("a2", *dense(keys[15], 256, 128))
    a3w, a3b = dense(keys[16], 128, 3)
    p["a3_w"], p["a3_b"] = a3w, a3b                              # used in jnp
    wt, bt = dense(keys[17], 512, 3)
    ws, bs = dense(keys[18], 512, 1)
    p["ats_w"] = jnp.concatenate([wt, ws], axis=1).astype(jnp.bfloat16)
    p["ats_b"] = jnp.concatenate([bt, bs])[None]
    return p


if __name__ == "__main__":
    key = jax.random.PRNGKey(0)
    kp, k_img, k_mask, k_mix, k_pc = jax.random.split(key, 5)
    params = init_params(kp)

    B = 2
    image_crop = jax.random.normal(k_img, (B, 3, 32, 32), jnp.float32)
    mask_crop = (jax.random.uniform(k_mask, (B, 1, 32, 32)) > 0.5).astype(jnp.float32)
    mix_mask_crop = jax.random.uniform(k_mix, (B, 1, 32, 32), dtype=jnp.float32)
    obj_coarse_pc = (jax.random.normal(k_pc, (B, 642, 3), jnp.float32) * 0.3
                     + jnp.array([0.0, 0.0, 2.5], jnp.float32))
    f, c = 20.0, 16.0
    camera = jnp.broadcast_to(
        jnp.array([[f, 0.0, c], [0.0, f, c], [0.0, 0.0, 1.0]], jnp.float32),
        (B, 3, 3))
    center_2d = jnp.full((B, 2), 16.0, jnp.float32)
    scale_2d = jnp.full((B,), 1.0, jnp.float32)
    epoch = 0

    fwd = jax.jit(functools.partial(template_hoi_forward, params))
    out = fwd(image_crop, mask_crop, mix_mask_crop, obj_coarse_pc,
              camera, center_2d, scale_2d, epoch)
    jax.block_until_ready(out)
    print("KERNEL_OK")
</pallas_src>

<mosaic_0001>
module attributes {stable_mosaic.version = 11 : i64} {
  func.func @_encoder_kernel(%arg0: i32, %arg1: memref<1x1024x8xbf16, #tpu.memory_space<vmem>>, %arg2: memref<1x1024x8xbf16, #tpu.memory_space<vmem>>, %arg3: memref<8x64xbf16, #tpu.memory_space<vmem>>, %arg4: memref<1x64xf32, #tpu.memory_space<vmem>>, %arg5: memref<64x128xbf16, #tpu.memory_space<vmem>>, %arg6: memref<1x128xf32, #tpu.memory_space<vmem>>, %arg7: memref<128x256xbf16, #tpu.memory_space<vmem>>, %arg8: memref<1x256xf32, #tpu.memory_space<vmem>>, %arg9: memref<256x512xbf16, #tpu.memory_space<vmem>>, %arg10: memref<1x512xf32, #tpu.memory_space<vmem>>, %arg11: memref<256x1024xbf16, #tpu.memory_space<vmem>>, %arg12: memref<64x256xbf16, #tpu.memory_space<vmem>>, %arg13: memref<16x64xbf16, #tpu.memory_space<vmem>>, %arg14: memref<8x32xbf16, #tpu.memory_space<vmem>>, %arg15: memref<1x32xf32, #tpu.memory_space<vmem>>, %arg16: memref<32x8xbf16, #tpu.memory_space<vmem>>, %arg17: memref<1x8xf32, #tpu.memory_space<vmem>>, %arg18: memref<1x1x512xbf16, #tpu.memory_space<vmem>>, %arg19: memref<1x64x128xf32, #tpu.memory_space<vmem>>, %arg20: memref<1x1x8xf32, #tpu.memory_space<vmem>>) attributes {dimension_semantics = [#tpu.dimension_semantics<parallel>], iteration_bounds = array<i64: 2>, scalar_prefetch = 0 : i64, scratch_operands = 0 : i64, tpu.core_type = #tpu.core_type<tc>, window_params = [{transform_indices = @transform_0, window_bounds = array<i64: 1, 1024, 8>}, {transform_indices = @transform_1, window_bounds = array<i64: 1, 1024, 8>}, {pipeline_mode = #tpu.pipeline_mode<synchronous>, transform_indices = @transform_2, window_bounds = array<i64: 8, 64>}, {pipeline_mode = #tpu.pipeline_mode<synchronous>, transform_indices = @transform_3, window_bounds = array<i64: 1, 64>}, {pipeline_mode = #tpu.pipeline_mode<synchronous>, transform_indices = @transform_4, window_bounds = array<i64: 64, 128>}, {pipeline_mode = #tpu.pipeline_mode<synchronous>, transform_indices = @transform_5, window_bounds = array<i64: 1, 128>}, {pipeline_mode = #tpu.pipeline_mode<synchronous>, transform_indices = @transform_6, window_bounds = array<i64: 128, 256>}, {pipeline_mode = #tpu.pipeline_mode<synchronous>, transform_indices = @transform_7, window_bounds = array<i64: 1, 256>}, {pipeline_mode = #tpu.pipeline_mode<synchronous>, transform_indices = @transform_8, window_bounds = array<i64: 256, 512>}, {pipeline_mode = #tpu.pipeline_mode<synchronous>, transform_indices = @transform_9, window_bounds = array<i64: 1, 512>}, {pipeline_mode = #tpu.pipeline_mode<synchronous>, transform_indices = @transform_10, window_bounds = array<i64: 256, 1024>}, {pipeline_mode = #tpu.pipeline_mode<synchronous>, transform_indices = @transform_11, window_bounds = array<i64: 64, 256>}, {pipeline_mode = #tpu.pipeline_mode<synchronous>, transform_indices = @transform_12, window_bounds = array<i64: 16, 64>}, {pipeline_mode = #tpu.pipeline_mode<synchronous>, transform_indices = @transform_13, window_bounds = array<i64: 8, 32>}, {pipeline_mode = #tpu.pipeline_mode<synchronous>, transform_indices = @transform_14, window_bounds = array<i64: 1, 32>}, {pipeline_mode = #tpu.pipeline_mode<synchronous>, transform_indices = @transform_15, window_bounds = array<i64: 32, 8>}, {pipeline_mode = #tpu.pipeline_mode<synchronous>, transform_indices = @transform_16, window_bounds = array<i64: 1, 8>}, {transform_indices = @transform_17, window_bounds = array<i64: 1, 1, 512>}, {transform_indices = @transform_18, window_bounds = array<i64: 1, 64, 128>}, {transform_indices = @transform_19, window_bounds = array<i64: 1, 1, 8>}]} {
    %c0 = arith.constant 0 : index
    %c0_0 = arith.constant 0 : index
    %c0_1 = arith.constant 0 : index
    %0 = vector.load %arg1[%c0, %c0_0, %c0_1] : memref<1x1024x8xbf16, #tpu.memory_space<vmem>>, vector<1x1024x8xbf16>
    %1 = vector.shape_cast %0 : vector<1x1024x8xbf16> to vector<1024x8xbf16>
    %c0_2 = arith.constant 0 : index
    %c0_3 = arith.constant 0 : index
    %2 = vector.load %arg3[%c0_2, %c0_3] : memref<8x64xbf16, #tpu.memory_space<vmem>>, vector<8x64xbf16>
    %cst = arith.constant dense<0.000000e+00> : vector<1024x64xf32>
    %3 = tpu.matmul %1, %2, %cst {dimension_numbers = #tpu.dot_dimension_numbers<[1], [0], [0], [1], [0, 0, 1, 1], [], []>} : vector<1024x8xbf16>, vector<8x64xbf16>, vector<1024x64xf32> -> vector<1024x64xf32>
    %c0_4 = arith.constant 0 : index
    %c0_5 = arith.constant 0 : index
    %4 = vector.load %arg4[%c0_4, %c0_5] : memref<1x64xf32, #tpu.memory_space<vmem>>, vector<1x64xf32>
    %5 = vector.broadcast %4 : vector<1x64xf32> to vector<1024x64xf32>
    %6 = arith.addf %3, %5 : vector<1024x64xf32>
    %cst_6 = arith.constant 0.000000e+00 : f32
    %7 = vector.broadcast %cst_6 : f32 to vector<1024x64xf32>
    %8 = arith.maximumf %6, %7 : vector<1024x64xf32>
    %9 = arith.truncf %8 : vector<1024x64xf32> to vector<1024x64xbf16>
    %c0_7 = arith.constant 0 : index
    %c0_8 = arith.constant 0 : index
    %10 = vector.load %arg11[%c0_7, %c0_8] : memref<256x1024xbf16, #tpu.memory_space<vmem>>, vector<256x1024xbf16>
    %cst_9 = arith.constant dense<0.000000e+00> : vector<256x64xf32>
    %11 = tpu.matmul %10, %9, %cst_9 {dimension_numbers = #tpu.dot_dimension_numbers<[1], [0], [0], [1], [0, 0, 1, 1], [], []>} : vector<256x1024xbf16>, vector<1024x64xbf16>, vector<256x64xf32> -> vector<256x64xf32>
    %12 = arith.truncf %11 : vector<256x64xf32> to vector<256x64xbf16>
    %c0_10 = arith.constant 0 : index
    %c0_11 = arith.constant 0 : index
    %13 = vector.load %arg5[%c0_10, %c0_11] : memref<64x128xbf16, #tpu.memory_space<vmem>>, vector<64x128xbf16>
    %cst_12 = arith.constant dense<0.000000e+00> : vector<256x128xf32>
    %14 = tpu.matmul %12, %13, %cst_12 {dimension_numbers = #tpu.dot_dimension_numbers<[1], [0], [0], [1], [0, 0, 1, 1], [], []>} : vector<256x64xbf16>, vector<64x128xbf16>, vector<256x128xf32> -> vector<256x128xf32>
    %c0_13 = arith.constant 0 : index
    %c0_14 = arith.constant 0 : index
    %15 = vector.load %arg6[%c0_13, %c0_14] : memref<1x128xf32, #tpu.memory_space<vmem>>, vector<1x128xf32>
    %16 = vector.broadcast %15 : vector<1x128xf32> to vector<256x128xf32>
    %17 = arith.addf %14, %16 : vector<256x128xf32>
    %cst_15 = arith.constant 0.000000e+00 : f32
    %18 = vector.broadcast %cst_15 : f32 to vector<256x128xf32>
    %19 = arith.maximumf %17, %18 : vector<256x128xf32>
    %20 = arith.truncf %19 : vector<256x128xf32> to vector<256x128xbf16>
    %c0_16 = arith.constant 0 : index
    %c0_17 = arith.constant 0 : index
    %21 = vector.load %arg12[%c0_16, %c0_17] : memref<64x256xbf16, #tpu.memory_space<vmem>>, vector<64x256xbf16>
    %cst_18 = arith.constant dense<0.000000e+00> : vector<64x128xf32>
    %22 = tpu.matmul %21, %20, %cst_18 {dimension_numbers = #tpu.dot_dimension_numbers<[1], [0], [0], [1], [0, 0, 1, 1], [], []>} : vector<64x256xbf16>, vector<256x128xbf16>, vector<64x128xf32> -> vector<64x128xf32>
    %c0_19 = arith.constant 0 : index
    %c0_20 = arith.constant 0 : index
    %c0_21 = arith.constant 0 : index
    %23 = vector.load %arg19[%c0_19, %c0_20, %c0_21] : memref<1x64x128xf32, #tpu.memory_space<vmem>>, vector<1x64x128xf32>
    %24 = vector.shape_cast %23 : vector<1x64x128xf32> to vector<64x128xf32>
    %25 = vector.shape_cast %22 : vector<64x128xf32> to vector<1x64x128xf32>
    tpu.vector_store %arg19[%c0_19, %c0_20, %c0_21], %25 {strides = array<i32>} : memref<1x64x128xf32, #tpu.memory_space<vmem>>, vector<1x64x128xf32>,
    %26 = arith.truncf %22 : vector<64x128xf32> to vector<64x128xbf16>
    %c0_22 = arith.constant 0 : index
    %c0_23 = arith.constant 0 : index
    %27 = vector.load %arg7[%c0_22, %c0_23] : memref<128x256xbf16, #tpu.memory_space<vmem>>, vector<128x256xbf16>
    %cst_24 = arith.constant dense<0.000000e+00> : vector<64x256xf32>
    %28 = tpu.matmul %26, %27, %cst_24 {dimension_numbers = #tpu.dot_dimension_numbers<[1], [0], [0], [1], [0, 0, 1, 1], [], []>} : vector<64x128xbf16>, vector<128x256xbf16>, vector<64x256xf32> -> vector<64x256xf32>
    %c0_25 = arith.constant 0 : index
    %c0_26 = arith.constant 0 : index
    %29 = vector.load %arg8[%c0_25, %c0_26] : memref<1x256xf32, #tpu.memory_space<vmem>>, vector<1x256xf32>
    %30 = vector.broadcast %29 : vector<1x256xf32> to vector<64x256xf32>
    %31 = arith.addf %28, %30 : vector<64x256xf32>
    %cst_27 = arith.constant 0.000000e+00 : f32
    %32 = vector.broadcast %cst_27 : f32 to vector<64x256xf32>
    %33 = arith.maximumf %31, %32 : vector<64x256xf32>
    %34 = arith.truncf %33 : vector<64x256xf32> to vector<64x256xbf16>
    %c0_28 = arith.constant 0 : index
    %c0_29 = arith.constant 0 : index
    %35 = vector.load %arg13[%c0_28, %c0_29] : memref<16x64xbf16, #tpu.memory_space<vmem>>, vector<16x64xbf16>
    %cst_30 = arith.constant dense<0.000000e+00> : vector<16x256xf32>
    %36 = tpu.matmul %35, %34, %cst_30 {dimension_numbers = #tpu.dot_dimension_numbers<[1], [0], [0], [1], [0, 0, 1, 1], [], []>} : vector<16x64xbf16>, vector<64x256xbf16>, vector<16x256xf32> -> vector<16x256xf32>
    %37 = arith.truncf %36 : vector<16x256xf32> to vector<16x256xbf16>
    %c0_31 = arith.constant 0 : index
    %c0_32 = arith.constant 0 : index
    %38 = vector.load %arg9[%c0_31, %c0_32] : memref<256x512xbf16, #tpu.memory_space<vmem>>, vector<256x512xbf16>
    %cst_33 = arith.constant dense<0.000000e+00> : vector<16x512xf32>
    %39 = tpu.matmul %37, %38, %cst_33 {dimension_numbers = #tpu.dot_dimension_numbers<[1], [0], [0], [1], [0, 0, 1, 1], [], []>} : vector<16x256xbf16>, vector<256x512xbf16>, vector<16x512xf32> -> vector<16x512xf32>
    %c0_34 = arith.constant 0 : index
    %c0_35 = arith.constant 0 : index
    %40 = vector.load %arg10[%c0_34, %c0_35] : memref<1x512xf32, #tpu.memory_space<vmem>>, vector<1x512xf32>
    %41 = vector.broadcast %40 : vector<1x512xf32> to vector<16x512xf32>
    %42 = arith.addf %39, %41 : vector<16x512xf32>
    %cst_36 = arith.constant 0.000000e+00 : f32
    %43 = vector.broadcast %cst_36 : f32 to vector<16x512xf32>
    %44 = arith.maximumf %42, %43 : vector<16x512xf32>
    %cst_37 = arith.constant dense<0.000000e+00> : vector<512xf32>
    %45 = vector.multi_reduction <add>, %44, %cst_37 [0] : vector<16x512xf32> to vector<512xf32>
    %46 = vector.shape_cast %45 : vector<512xf32> to vector<1x512xf32>
    %cst_38 = arith.constant 1.600000e+01 : f32
    %47 = vector.broadcast %cst_38 : f32 to vector<1x512xf32>
    %48 = arith.divf %46, %47 : vector<1x512xf32>
    %49 = arith.truncf %48 : vector<1x512xf32> to vector<1x512xbf16>
    %c0_39 = arith.constant 0 : index
    %c0_40 = arith.constant 0 : index
    %c0_41 = arith.constant 0 : index
    %50 = vector.load %arg18[%c0_39, %c0_40, %c0_41] : memref<1x1x512xbf16, #tpu.memory_space<vmem>>, vector<1x1x512xbf16>
    %51 = vector.shape_cast %50 : vector<1x1x512xbf16> to vector<1x512xbf16>
    %52 = vector.shape_cast %49 : vector<1x512xbf16> to vector<1x1x512xbf16>
    tpu.vector_store %arg18[%c0_39, %c0_40, %c0_41], %52 {strides = array<i32>} : memref<1x1x512xbf16, #tpu.memory_space<vmem>>, vector<1x1x512xbf16>,
    %c0_42 = arith.constant 0 : index
    %c0_43 = arith.constant 0 : index
    %c0_44 = arith.constant 0 : index
    %53 = vector.load %arg2[%c0_42, %c0_43, %c0_44] : memref<1x1024x8xbf16, #tpu.memory_space<vmem>>, vector<1x1024x8xbf16>
    %54 = vector.shape_cast %53 : vector<1x1024x8xbf16> to vector<1024x8xbf16>
    %c0_45 = arith.constant 0 : index
    %c0_46 = arith.constant 0 : index
    %55 = vector.load %arg14[%c0_45, %c0_46] : memref<8x32xbf16, #tpu.memory_space<vmem>>, vector<8x32xbf16>
    %cst_47 = arith.constant dense<0.000000e+00> : vector<1024x32xf32>
    %56 = tpu.matmul %54, %55, %cst_47 {dimension_numbers = #tpu.dot_dimension_numbers<[1], [0], [0], [1], [0, 0, 1, 1], [], []>} : vector<1024x8xbf16>, vector<8x32xbf16>, vector<1024x32xf32> -> vector<1024x32xf32>
    %c0_48 = arith.constant 0 : index
    %c0_49 = arith.constant 0 : index
    %57 = vector.load %arg15[%c0_48, %c0_49] : memref<1x32xf32, #tpu.memory_space<vmem>>, vector<1x32xf32>
    %58 = vector.broadcast %57 : vector<1x32xf32> to vector<1024x32xf32>
    %59 = arith.addf %56, %58 : vector<1024x32xf32>
    %cst_50 = arith.constant 0.000000e+00 : f32
    %60 = vector.broadcast %cst_50 : f32 to vector<1024x32xf32>
    %61 = arith.maximumf %59, %60 : vector<1024x32xf32>
    %cst_51 = arith.constant dense<0.000000e+00> : vector<32xf32>
    %62 = vector.multi_reduction <add>, %61, %cst_51 [0] : vector<1024x32xf32> to vector<32xf32>
    %63 = vector.shape_cast %62 : vector<32xf32> to vector<1x32xf32>
    %cst_52 = arith.constant 1.024000e+03 : f32
    %64 = vector.broadcast %cst_52 : f32 to vector<1x32xf32>
    %65 = arith.divf %63, %64 : vector<1x32xf32>
    %66 = arith.truncf %65 : vector<1x32xf32> to vector<1x32xbf16>
    %c0_53 = arith.constant 0 : index
    %c0_54 = arith.constant 0 : index
    %67 = vector.load %arg16[%c0_53, %c0_54] : memref<32x8xbf16, #tpu.memory_space<vmem>>, vector<32x8xbf16>
    %cst_55 = arith.constant dense<0.000000e+00> : vector<1x8xf32>
    %68 = tpu.matmul %66, %67, %cst_55 {dimension_numbers = #tpu.dot_dimension_numbers<[1], [0], [0], [1], [0, 0, 1, 1], [], []>} : vector<1x32xbf16>, vector<32x8xbf16>, vector<1x8xf32> -> vector<1x8xf32>
    %c0_56 = arith.constant 0 : index
    %c0_57 = arith.constant 0 : index
    %69 = vector.load %arg17[%c0_56, %c0_57] : memref<1x8xf32, #tpu.memory_space<vmem>>, vector<1x8xf32>
    %70 = arith.addf %68, %69 : vector<1x8xf32>
    %c0_58 = arith.constant 0 : index
    %c0_59 = arith.constant 0 : index
    %c0_60 = arith.constant 0 : index
    %71 = vector.load %arg20[%c0_58, %c0_59, %c0_60] : memref<1x1x8xf32, #tpu.memory_space<vmem>>, vector<1x1x8xf32>
    %72 = vector.shape_cast %71 : vector<1x1x8xf32> to vector<1x8xf32>
    %73 = vector.shape_cast %70 : vector<1x8xf32> to vector<1x1x8xf32>
    tpu.vector_store %arg20[%c0_58, %c0_59, %c0_60], %73 {strides = array<i32>} : memref<1x1x8xf32, #tpu.memory_space<vmem>>, vector<1x1x8xf32>,
    return
  }
  func.func @transform_0(%arg0: i32) -> (i32, i32, i32) {
    %c0_i32 = arith.constant 0 : i32
    %c0_i32_0 = arith.constant 0 : i32
    %c0_i32_1 = arith.constant 0 : i32
    return %arg0, %c0_i32, %c0_i32_0 : i32, i32, i32
  }
  func.func @transform_1(%arg0: i32) -> (i32, i32, i32) {
    %c0_i32 = arith.constant 0 : i32
    %c0_i32_0 = arith.constant 0 : i32
    %c0_i32_1 = arith.constant 0 : i32
    return %arg0, %c0_i32, %c0_i32_0 : i32, i32, i32
  }
  func.func @transform_2(%arg0: i32) -> (i32, i32) {
    %c0_i32 = arith.constant 0 : i32
    %c0_i32_0 = arith.constant 0 : i32
    %c0_i32_1 = arith.constant 0 : i32
    return %c0_i32, %c0_i32_0 : i32, i32
  }
  func.func @transform_3(%arg0: i32) -> (i32, i32) {
    %c0_i32 = arith.constant 0 : i32
    %c0_i32_0 = arith.constant 0 : i32
    %c0_i32_1 = arith.constant 0 : i32
    return %c0_i32, %c0_i32_0 : i32, i32
  }
  func.func @transform_4(%arg0: i32) -> (i32, i32) {
    %c0_i32 = arith.constant 0 : i32
    %c0_i32_0 = arith.constant 0 : i32
    %c0_i32_1 = arith.constant 0 : i32
    return %c0_i32, %c0_i32_0 : i32, i32
  }
  func.func @transform_5(%arg0: i32) -> (i32, i32) {
    %c0_i32 = arith.constant 0 : i32
    %c0_i32_0 = arith.constant 0 : i32
    %c0_i32_1 = arith.constant 0 : i32
    return %c0_i32, %c0_i32_0 : i32, i32
  }
  func.func @transform_6(%arg0: i32) -> (i32, i32) {
    %c0_i32 = arith.constant 0 : i32
    %c0_i32_0 = arith.constant 0 : i32
    %c0_i32_1 = arith.constant 0 : i32
    return %c0_i32, %c0_i32_0 : i32, i32
  }
  func.func @transform_7(%arg0: i32) -> (i32, i32) {
    %c0_i32 = arith.constant 0 : i32
    %c0_i32_0 = arith.constant 0 : i32
    %c0_i32_1 = arith.constant 0 : i32
    return %c0_i32, %c0_i32_0 : i32, i32
  }
  func.func @transform_8(%arg0: i32) -> (i32, i32) {
    %c0_i32 = arith.constant 0 : i32
    %c0_i32_0 = arith.constant 0 : i32
    %c0_i32_1 = arith.constant 0 : i32
    return %c0_i32, %c0_i32_0 : i32, i32
  }
  func.func @transform_9(%arg0: i32) -> (i32, i32) {
    %c0_i32 = arith.constant 0 : i32
    %c0_i32_0 = arith.constant 0 : i32
    %c0_i32_1 = arith.constant 0 : i32
    return %c0_i32, %c0_i32_0 : i32, i32
  }
  func.func @transform_10(%arg0: i32) -> (i32, i32) {
    %c0_i32 = arith.constant 0 : i32
    %c0_i32_0 = arith.constant 0 : i32
    %c0_i32_1 = arith.constant 0 : i32
    return %c0_i32, %c0_i32_0 : i32, i32
  }
  func.func @transform_11(%arg0: i32) -> (i32, i32) {
    %c0_i32 = arith.constant 0 : i32
    %c0_i32_0 = arith.constant 0 : i32
    %c0_i32_1 = arith.constant 0 : i32
    return %c0_i32, %c0_i32_0 : i32, i32
  }
  func.func @transform_12(%arg0: i32) -> (i32, i32) {
    %c0_i32 = arith.constant 0 : i32
    %c0_i32_0 = arith.constant 0 : i32
    %c0_i32_1 = arith.constant 0 : i32
    return %c0_i32, %c0_i32_0 : i32, i32
  }
  func.func @transform_13(%arg0: i32) -> (i32, i32) {
    %c0_i32 = arith.constant 0 : i32
    %c0_i32_0 = arith.constant 0 : i32
    %c0_i32_1 = arith.constant 0 : i32
    return %c0_i32, %c0_i32_0 : i32, i32
  }
  func.func @transform_14(%arg0: i32) -> (i32, i32) {
    %c0_i32 = arith.constant 0 : i32
    %c0_i32_0 = arith.constant 0 : i32
    %c0_i32_1 = arith.constant 0 : i32
    return %c0_i32, %c0_i32_0 : i32, i32
  }
  func.func @transform_15(%arg0: i32) -> (i32, i32) {
    %c0_i32 = arith.constant 0 : i32
    %c0_i32_0 = arith.constant 0 : i32
    %c0_i32_1 = arith.constant 0 : i32
    return %c0_i32, %c0_i32_0 : i32, i32
  }
  func.func @transform_16(%arg0: i32) -> (i32, i32) {
    %c0_i32 = arith.constant 0 : i32
    %c0_i32_0 = arith.constant 0 : i32
    %c0_i32_1 = arith.constant 0 : i32
    return %c0_i32, %c0_i32_0 : i32, i32
  }
  func.func @transform_17(%arg0: i32) -> (i32, i32, i32) {
    %c0_i32 = arith.constant 0 : i32
    %c0_i32_0 = arith.constant 0 : i32
    %c0_i32_1 = arith.constant 0 : i32
    return %arg0, %c0_i32, %c0_i32_0 : i32, i32, i32
  }
  func.func @transform_18(%arg0: i32) -> (i32, i32, i32) {
    %c0_i32 = arith.constant 0 : i32
    %c0_i32_0 = arith.constant 0 : i32
    %c0_i32_1 = arith.constant 0 : i32
    return %arg0, %c0_i32, %c0_i32_0 : i32, i32, i32
  }
  func.func @transform_19(%arg0: i32) -> (i32, i32, i32) {
    %c0_i32 = arith.constant 0 : i32
    %c0_i32_0 = arith.constant 0 : i32
    %c0_i32_1 = arith.constant 0 : i32
    return %arg0, %c0_i32, %c0_i32_0 : i32, i32, i32
  }
}

module attributes {stable_mosaic.version = 11 : i64} {
  func.func @_heads_kernel(%arg0: i32, %arg1: memref<8x512xbf16, #tpu.memory_space<vmem>>, %arg2: memref<512x1024xbf16, #tpu.memory_space<vmem>>, %arg3: memref<1x1024xf32, #tpu.memory_space<vmem>>, %arg4: memref<1024x256xbf16, #tpu.memory_space<vmem>>, %arg5: memref<1x256xf32, #tpu.memory_space<vmem>>, %arg6: memref<256x43xbf16, #tpu.memory_space<vmem>>, %arg7: memref<1x43xf32, #tpu.memory_space<vmem>>, %arg8: memref<43x2334xbf16, #tpu.memory_space<vmem>>, %arg9: memref<43x48xbf16, #tpu.memory_space<vmem>>, %arg10: memref<512x256xbf16, #tpu.memory_space<vmem>>, %arg11: memref<1x256xf32, #tpu.memory_space<vmem>>, %arg12: memref<512x4xbf16, #tpu.memory_space<vmem>>, %arg13: memref<1x4xf32, #tpu.memory_space<vmem>>, %arg14: memref<8x43xf32, #tpu.memory_space<vmem>>, %arg15: memref<8x2334xf32, #tpu.memory_space<vmem>>, %arg16: memref<8x48xf32, #tpu.memory_space<vmem>>, %arg17: memref<8x256xf32, #tpu.memory_space<vmem>>, %arg18: memref<8x4xf32, #tpu.memory_space<vmem>>) attributes {dimension_semantics = [#tpu.dimension_semantics<arbitrary>], iteration_bounds = array<i64: 1>, scalar_prefetch = 0 : i64, scratch_operands = 0 : i64, tpu.core_type = #tpu.core_type<tc>, window_params = [{pipeline_mode = #tpu.pipeline_mode<synchronous>, transform_indices = @transform_0, window_bounds = array<i64: 8, 512>}, {pipeline_mode = #tpu.pipeline_mode<synchronous>, transform_indices = @transform_1, window_bounds = array<i64: 512, 1024>}, {pipeline_mode = #tpu.pipeline_mode<synchronous>, transform_indices = @transform_2, window_bounds = array<i64: 1, 1024>}, {pipeline_mode = #tpu.pipeline_mode<synchronous>, transform_indices = @transform_3, window_bounds = array<i64: 1024, 256>}, {pipeline_mode = #tpu.pipeline_mode<synchronous>, transform_indices = @transform_4, window_bounds = array<i64: 1, 256>}, {pipeline_mode = #tpu.pipeline_mode<synchronous>, transform_indices = @transform_5, window_bounds = array<i64: 256, 43>}, {pipeline_mode = #tpu.pipeline_mode<synchronous>, transform_indices = @transform_6, window_bounds = array<i64: 1, 43>}, {pipeline_mode = #tpu.pipeline_mode<synchronous>, transform_indices = @transform_7, window_bounds = array<i64: 43, 2334>}, {pipeline_mode = #tpu.pipeline_mode<synchronous>, transform_indices = @transform_8, window_bounds = array<i64: 43, 48>}, {pipeline_mode = #tpu.pipeline_mode<synchronous>, transform_indices = @transform_9, window_bounds = array<i64: 512, 256>}, {pipeline_mode = #tpu.pipeline_mode<synchronous>, transform_indices = @transform_10, window_bounds = array<i64: 1, 256>}, {pipeline_mode = #tpu.pipeline_mode<synchronous>, transform_indices = @transform_11, window_bounds = array<i64: 512, 4>}, {pipeline_mode = #tpu.pipeline_mode<synchronous>, transform_indices = @transform_12, window_bounds = array<i64: 1, 4>}, {pipeline_mode = #tpu.pipeline_mode<synchronous>, transform_indices = @transform_13, window_bounds = array<i64: 8, 43>}, {pipeline_mode = #tpu.pipeline_mode<synchronous>, transform_indices = @transform_14, window_bounds = array<i64: 8, 2334>}, {pipeline_mode = #tpu.pipeline_mode<synchronous>, transform_indices = @transform_15, window_bounds = array<i64: 8, 48>}, {pipeline_mode = #tpu.pipeline_mode<synchronous>, transform_indices = @transform_16, window_bounds = array<i64: 8, 256>}, {pipeline_mode = #tpu.pipeline_mode<synchronous>, transform_indices = @transform_17, window_bounds = array<i64: 8, 4>}]} {
    %c0 = arith.constant 0 : index
    %c0_0 = arith.constant 0 : index
    %0 = vector.load %arg1[%c0, %c0_0] : memref<8x512xbf16, #tpu.memory_space<vmem>>, vector<8x512xbf16>
    %c0_1 = arith.constant 0 : index
    %c0_2 = arith.constant 0 : index
    %1 = vector.load %arg2[%c0_1, %c0_2] : memref<512x1024xbf16, #tpu.memory_space<vmem>>, vector<512x1024xbf16>
    %cst = arith.constant dense<0.000000e+00> : vector<8x1024xf32>
    %2 = tpu.matmul %0, %1, %cst {dimension_numbers = #tpu.dot_dimension_numbers<[1], [0], [0], [1], [0, 0, 1, 1], [], []>} : vector<8x512xbf16>, vector<512x1024xbf16>, vector<8x1024xf32> -> vector<8x1024xf32>
    %c0_3 = arith.constant 0 : index
    %c0_4 = arith.constant 0 : index
    %3 = vector.load %arg3[%c0_3, %c0_4] : memref<1x1024xf32, #tpu.memory_space<vmem>>, vector<1x1024xf32>
    %4 = vector.broadcast %3 : vector<1x1024xf32> to vector<8x1024xf32>
    %5 = arith.addf %2, %4 : vector<8x1024xf32>
    %cst_5 = arith.constant 0.000000e+00 : f32
    %6 = vector.broadcast %cst_5 : f32 to vector<8x1024xf32>
    %7 = arith.maximumf %5, %6 : vector<8x1024xf32>
    %8 = arith.truncf %7 : vector<8x1024xf32> to vector<8x1024xbf16>
    %c0_6 = arith.constant 0 : index
    %c0_7 = arith.constant 0 : index
    %9 = vector.load %arg4[%c0_6, %c0_7] : memref<1024x256xbf16, #tpu.memory_space<vmem>>, vector<1024x256xbf16>
    %cst_8 = arith.constant dense<0.000000e+00> : vector<8x256xf32>
    %10 = tpu.matmul %8, %9, %cst_8 {dimension_numbers = #tpu.dot_dimension_numbers<[1], [0], [0], [1], [0, 0, 1, 1], [], []>} : vector<8x1024xbf16>, vector<1024x256xbf16>, vector<8x256xf32> -> vector<8x256xf32>
    %c0_9 = arith.constant 0 : index
    %c0_10 = arith.constant 0 : index
    %11 = vector.load %arg5[%c0_9, %c0_10] : memref<1x256xf32, #tpu.memory_space<vmem>>, vector<1x256xf32>
    %12 = vector.broadcast %11 : vector<1x256xf32> to vector<8x256xf32>
    %13 = arith.addf %10, %12 : vector<8x256xf32>
    %cst_11 = arith.constant 0.000000e+00 : f32
    %14 = vector.broadcast %cst_11 : f32 to vector<8x256xf32>
    %15 = arith.maximumf %13, %14 : vector<8x256xf32>
    %16 = arith.truncf %15 : vector<8x256xf32> to vector<8x256xbf16>
    %c0_12 = arith.constant 0 : index
    %c0_13 = arith.constant 0 : index
    %17 = vector.load %arg6[%c0_12, %c0_13] : memref<256x43xbf16, #tpu.memory_space<vmem>>, vector<256x43xbf16>
    %cst_14 = arith.constant dense<0.000000e+00> : vector<8x43xf32>
    %18 = tpu.matmul %16, %17, %cst_14 {dimension_numbers = #tpu.dot_dimension_numbers<[1], [0], [0], [1], [0, 0, 1, 1], [], []>} : vector<8x256xbf16>, vector<256x43xbf16>, vector<8x43xf32> -> vector<8x43xf32>
    %c0_15 = arith.constant 0 : index
    %c0_16 = arith.constant 0 : index
    %19 = vector.load %arg7[%c0_15, %c0_16] : memref<1x43xf32, #tpu.memory_space<vmem>>, vector<1x43xf32>
    %20 = vector.broadcast %19 : vector<1x43xf32> to vector<8x43xf32>
    %21 = arith.addf %18, %20 : vector<8x43xf32>
    %c0_17 = arith.constant 0 : index
    %c0_18 = arith.constant 0 : index
    %22 = vector.load %arg14[%c0_17, %c0_18] : memref<8x43xf32, #tpu.memory_space<vmem>>, vector<8x43xf32>
    tpu.vector_store %arg14[%c0_17, %c0_18], %21 {strides = array<i32>} : memref<8x43xf32, #tpu.memory_space<vmem>>, vector<8x43xf32>,
    %23 = arith.truncf %21 : vector<8x43xf32> to vector<8x43xbf16>
    %c0_19 = arith.constant 0 : index
    %c0_20 = arith.constant 0 : index
    %24 = vector.load %arg8[%c0_19, %c0_20] : memref<43x2334xbf16, #tpu.memory_space<vmem>>, vector<43x2334xbf16>
    %cst_21 = arith.constant dense<0.000000e+00> : vector<8x2334xf32>
    %25 = tpu.matmul %23, %24, %cst_21 {dimension_numbers = #tpu.dot_dimension_numbers<[1], [0], [0], [1], [0, 0, 1, 1], [], []>} : vector<8x43xbf16>, vector<43x2334xbf16>, vector<8x2334xf32> -> vector<8x2334xf32>
    %c0_22 = arith.constant 0 : index
    %c0_23 = arith.constant 0 : index
    %26 = vector.load %arg15[%c0_22, %c0_23] : memref<8x2334xf32, #tpu.memory_space<vmem>>, vector<8x2334xf32>
    tpu.vector_store %arg15[%c0_22, %c0_23], %25 {strides = array<i32>} : memref<8x2334xf32, #tpu.memory_space<vmem>>, vector<8x2334xf32>,
    %c0_24 = arith.constant 0 : index
    %c0_25 = arith.constant 0 : index
    %27 = vector.load %arg9[%c0_24, %c0_25] : memref<43x48xbf16, #tpu.memory_space<vmem>>, vector<43x48xbf16>
    %cst_26 = arith.constant dense<0.000000e+00> : vector<8x48xf32>
    %28 = tpu.matmul %23, %27, %cst_26 {dimension_numbers = #tpu.dot_dimension_numbers<[1], [0], [0], [1], [0, 0, 1, 1], [], []>} : vector<8x43xbf16>, vector<43x48xbf16>, vector<8x48xf32> -> vector<8x48xf32>
    %c0_27 = arith.constant 0 : index
    %c0_28 = arith.constant 0 : index
    %29 = vector.load %arg16[%c0_27, %c0_28] : memref<8x48xf32, #tpu.memory_space<vmem>>, vector<8x48xf32>
    tpu.vector_store %arg16[%c0_27, %c0_28], %28 {strides = array<i32>} : memref<8x48xf32, #tpu.memory_space<vmem>>, vector<8x48xf32>,
    %c0_29 = arith.constant 0 : index
    %c0_30 = arith.constant 0 : index
    %30 = vector.load %arg10[%c0_29, %c0_30] : memref<512x256xbf16, #tpu.memory_space<vmem>>, vector<512x256xbf16>
    %cst_31 = arith.constant dense<0.000000e+00> : vector<8x256xf32>
    %31 = tpu.matmul %0, %30, %cst_31 {dimension_numbers = #tpu.dot_dimension_numbers<[1], [0], [0], [1], [0, 0, 1, 1], [], []>} : vector<8x512xbf16>, vector<512x256xbf16>, vector<8x256xf32> -> vector<8x256xf32>
    %c0_32 = arith.constant 0 : index
    %c0_33 = arith.constant 0 : index
    %32 = vector.load %arg11[%c0_32, %c0_33] : memref<1x256xf32, #tpu.memory_space<vmem>>, vector<1x256xf32>
    %33 = vector.broadcast %32 : vector<1x256xf32> to vector<8x256xf32>
    %34 = arith.addf %31, %33 : vector<8x256xf32>
    %c0_34 = arith.constant 0 : index
    %c0_35 = arith.constant 0 : index
    %35 = vector.load %arg17[%c0_34, %c0_35] : memref<8x256xf32, #tpu.memory_space<vmem>>, vector<8x256xf32>
    tpu.vector_store %arg17[%c0_34, %c0_35], %34 {strides = array<i32>} : memref<8x256xf32, #tpu.memory_space<vmem>>, vector<8x256xf32>,
    %c0_36 = arith.constant 0 : index
    %c0_37 = arith.constant 0 : index
    %36 = vector.load %arg12[%c0_36, %c0_37] : memref<512x4xbf16, #tpu.memory_space<vmem>>, vector<512x4xbf16>
    %cst_38 = arith.constant dense<0.000000e+00> : vector<8x4xf32>
    %37 = tpu.matmul %0, %36, %cst_38 {dimension_numbers = #tpu.dot_dimension_numbers<[1], [0], [0], [1], [0, 0, 1, 1], [], []>} : vector<8x512xbf16>, vector<512x4xbf16>, vector<8x4xf32> -> vector<8x4xf32>
    %c0_39 = arith.constant 0 : index
    %c0_40 = arith.constant 0 : index
    %38 = vector.load %arg13[%c0_39, %c0_40] : memref<1x4xf32, #tpu.memory_space<vmem>>, vector<1x4xf32>
    %39 = vector.broadcast %38 : vector<1x4xf32> to vector<8x4xf32>
    %40 = arith.addf %37, %39 : vector<8x4xf32>
    %c0_41 = arith.constant 0 : index
    %c0_42 = arith.constant 0 : index
    %41 = vector.load %arg18[%c0_41, %c0_42] : memref<8x4xf32, #tpu.memory_space<vmem>>, vector<8x4xf32>
    tpu.vector_store %arg18[%c0_41, %c0_42], %40 {strides = array<i32>} : memref<8x4xf32, #tpu.memory_space<vmem>>, vector<8x4xf32>,
    return
  }
  func.func @transform_0(%arg0: i32) -> (i32, i32) {
    %c0_i32 = arith.constant 0 : i32
    %c0_i32_0 = arith.constant 0 : i32
    %c0_i32_1 = arith.constant 0 : i32
    return %c0_i32, %c0_i32_0 : i32, i32
  }
  func.func @transform_1(%arg0: i32) -> (i32, i32) {
    %c0_i32 = arith.constant 0 : i32
    %c0_i32_0 = arith.constant 0 : i32
    %c0_i32_1 = arith.constant 0 : i32
    return %c0_i32, %c0_i32_0 : i32, i32
  }
  func.func @transform_2(%arg0: i32) -> (i32, i32) {
    %c0_i32 = arith.constant 0 : i32
    %c0_i32_0 = arith.constant 0 : i32
    %c0_i32_1 = arith.constant 0 : i32
    return %c0_i32, %c0_i32_0 : i32, i32
  }
  func.func @transform_3(%arg0: i32) -> (i32, i32) {
    %c0_i32 = arith.constant 0 : i32
    %c0_i32_0 = arith.constant 0 : i32
    %c0_i32_1 = arith.constant 0 : i32
    return %c0_i32, %c0_i32_0 : i32, i32
  }
  func.func @transform_4(%arg0: i32) -> (i32, i32) {
    %c0_i32 = arith.constant 0 : i32
    %c0_i32_0 = arith.constant 0 : i32
    %c0_i32_1 = arith.constant 0 : i32
    return %c0_i32, %c0_i32_0 : i32, i32
  }
  func.func @transform_5(%arg0: i32) -> (i32, i32) {
    %c0_i32 = arith.constant 0 : i32
    %c0_i32_0 = arith.constant 0 : i32
    %c0_i32_1 = arith.constant 0 : i32
    return %c0_i32, %c0_i32_0 : i32, i32
  }
  func.func @transform_6(%arg0: i32) -> (i32, i32) {
    %c0_i32 = arith.constant 0 : i32
    %c0_i32_0 = arith.constant 0 : i32
    %c0_i32_1 = arith.constant 0 : i32
    return %c0_i32, %c0_i32_0 : i32, i32
  }
  func.func @transform_7(%arg0: i32) -> (i32, i32) {
    %c0_i32 = arith.constant 0 : i32
    %c0_i32_0 = arith.constant 0 : i32
    %c0_i32_1 = arith.constant 0 : i32
    return %c0_i32, %c0_i32_0 : i32, i32
  }
  func.func @transform_8(%arg0: i32) -> (i32, i32) {
    %c0_i32 = arith.constant 0 : i32
    %c0_i32_0 = arith.constant 0 : i32
    %c0_i32_1 = arith.constant 0 : i32
    return %c0_i32, %c0_i32_0 : i32, i32
  }
  func.func @transform_9(%arg0: i32) -> (i32, i32) {
    %c0_i32 = arith.constant 0 : i32
    %c0_i32_0 = arith.constant 0 : i32
    %c0_i32_1 = arith.constant 0 : i32
    return %c0_i32, %c0_i32_0 : i32, i32
  }
  func.func @transform_10(%arg0: i32) -> (i32, i32) {
    %c0_i32 = arith.constant 0 : i32
    %c0_i32_0 = arith.constant 0 : i32
    %c0_i32_1 = arith.constant 0 : i32
    return %c0_i32, %c0_i32_0 : i32, i32
  }
  func.func @transform_11(%arg0: i32) -> (i32, i32) {
    %c0_i32 = arith.constant 0 : i32
    %c0_i32_0 = arith.constant 0 : i32
    %c0_i32_1 = arith.constant 0 : i32
    return %c0_i32, %c0_i32_0 : i32, i32
  }
  func.func @transform_12(%arg0: i32) -> (i32, i32) {
    %c0_i32 = arith.constant 0 : i32
    %c0_i32_0 = arith.constant 0 : i32
    %c0_i32_1 = arith.constant 0 : i32
    return %c0_i32, %c0_i32_0 : i32, i32
  }
  func.func @transform_13(%arg0: i32) -> (i32, i32) {
    %c0_i32 = arith.constant 0 : i32
    %c0_i32_0 = arith.constant 0 : i32
    %c0_i32_1 = arith.constant 0 : i32
    return %c0_i32, %c0_i32_0 : i32, i32
  }
  func.func @transform_14(%arg0: i32) -> (i32, i32) {
    %c0_i32 = arith.constant 0 : i32
    %c0_i32_0 = arith.constant 0 : i32
    %c0_i32_1 = arith.constant 0 : i32
    return %c0_i32, %c0_i32_0 : i32, i32
  }
  func.func @transform_15(%arg0: i32) -> (i32, i32) {
    %c0_i32 = arith.constant 0 : i32
    %c0_i32_0 = arith.constant 0 : i32
    %c0_i32_1 = arith.constant 0 : i32
    return %c0_i32, %c0_i32_0 : i32, i32
  }
  func.func @transform_16(%arg0: i32) -> (i32, i32) {
    %c0_i32 = arith.constant 0 : i32
    %c0_i32_0 = arith.constant 0 : i32
    %c0_i32_1 = arith.constant 0 : i32
    return %c0_i32, %c0_i32_0 : i32, i32
  }
  func.func @transform_17(%arg0: i32) -> (i32, i32) {
    %c0_i32 = arith.constant 0 : i32
    %c0_i32_0 = arith.constant 0 : i32
    %c0_i32_1 = arith.constant 0 : i32
    return %c0_i32, %c0_i32_0 : i32, i32
  }
}

module attributes {stable_mosaic.version = 11 : i64} {
  func.func @_atlas_kernel(%arg0: i32, %arg1: memref<1x648x136xbf16, #tpu.memory_space<vmem>>, %arg2: memref<1x1x256xf32, #tpu.memory_space<vmem>>, %arg3: memref<136x256xbf16, #tpu.memory_space<vmem>>, %arg4: memref<256x128xbf16, #tpu.memory_space<vmem>>, %arg5: memref<1x128xf32, #tpu.memory_space<vmem>>, %arg6: memref<1x648x128xf32, #tpu.memory_space<vmem>>) attributes {dimension_semantics = [#tpu.dimension_semantics<parallel>], iteration_bounds = array<i64: 2>, scalar_prefetch = 0 : i64, scratch_operands = 0 : i64, tpu.core_type = #tpu.core_type<tc>, window_params = [{transform_indices = @transform_0, window_bounds = array<i64: 1, 648, 136>}, {transform_indices = @transform_1, window_bounds = array<i64: 1, 1, 256>}, {pipeline_mode = #tpu.pipeline_mode<synchronous>, transform_indices = @transform_2, window_bounds = array<i64: 136, 256>}, {pipeline_mode = #tpu.pipeline_mode<synchronous>, transform_indices = @transform_3, window_bounds = array<i64: 256, 128>}, {pipeline_mode = #tpu.pipeline_mode<synchronous>, transform_indices = @transform_4, window_bounds = array<i64: 1, 128>}, {transform_indices = @transform_5, window_bounds = array<i64: 1, 648, 128>}]} {
    %c0 = arith.constant 0 : index
    %c0_0 = arith.constant 0 : index
    %c0_1 = arith.constant 0 : index
    %0 = vector.load %arg1[%c0, %c0_0, %c0_1] : memref<1x648x136xbf16, #tpu.memory_space<vmem>>, vector<1x648x136xbf16>
    %1 = vector.shape_cast %0 : vector<1x648x136xbf16> to vector<648x136xbf16>
    %c0_2 = arith.constant 0 : index
    %c0_3 = arith.constant 0 : index
    %2 = vector.load %arg3[%c0_2, %c0_3] : memref<136x256xbf16, #tpu.memory_space<vmem>>, vector<136x256xbf16>
    %cst = arith.constant dense<0.000000e+00> : vector<648x256xf32>
    %3 = tpu.matmul %1, %2, %cst {dimension_numbers = #tpu.dot_dimension_numbers<[1], [0], [0], [1], [0, 0, 1, 1], [], []>} : vector<648x136xbf16>, vector<136x256xbf16>, vector<648x256xf32> -> vector<648x256xf32>
    %c0_4 = arith.constant 0 : index
    %c0_5 = arith.constant 0 : index
    %c0_6 = arith.constant 0 : index
    %4 = vector.load %arg2[%c0_4, %c0_5, %c0_6] : memref<1x1x256xf32, #tpu.memory_space<vmem>>, vector<1x1x256xf32>
    %5 = vector.shape_cast %4 : vector<1x1x256xf32> to vector<1x256xf32>
    %6 = vector.broadcast %5 : vector<1x256xf32> to vector<648x256xf32>
    %7 = arith.addf %3, %6 : vector<648x256xf32>
    %cst_7 = arith.constant 0.000000e+00 : f32
    %8 = vector.broadcast %cst_7 : f32 to vector<648x256xf32>
    %9 = arith.maximumf %7, %8 : vector<648x256xf32>
    %10 = arith.truncf %9 : vector<648x256xf32> to vector<648x256xbf16>
    %c0_8 = arith.constant 0 : index
    %c0_9 = arith.constant 0 : index
    %11 = vector.load %arg4[%c0_8, %c0_9] : memref<256x128xbf16, #tpu.memory_space<vmem>>, vector<256x128xbf16>
    %cst_10 = arith.constant dense<0.000000e+00> : vector<648x128xf32>
    %12 = tpu.matmul %10, %11, %cst_10 {dimension_numbers = #tpu.dot_dimension_numbers<[1], [0], [0], [1], [0, 0, 1, 1], [], []>} : vector<648x256xbf16>, vector<256x128xbf16>, vector<648x128xf32> -> vector<648x128xf32>
    %c0_11 = arith.constant 0 : index
    %c0_12 = arith.constant 0 : index
    %13 = vector.load %arg5[%c0_11, %c0_12] : memref<1x128xf32, #tpu.memory_space<vmem>>, vector<1x128xf32>
    %14 = vector.broadcast %13 : vector<1x128xf32> to vector<648x128xf32>
    %15 = arith.addf %12, %14 : vector<648x128xf32>
    %cst_13 = arith.constant 0.000000e+00 : f32
    %16 = vector.broadcast %cst_13 : f32 to vector<648x128xf32>
    %17 = arith.maximumf %15, %16 : vector<648x128xf32>
    %c0_14 = arith.constant 0 : index
    %c0_15 = arith.constant 0 : index
    %c0_16 = arith.constant 0 : index
    %18 = vector.load %arg6[%c0_14, %c0_15, %c0_16] : memref<1x648x128xf32, #tpu.memory_space<vmem>>, vector<1x648x128xf32>
    %19 = vector.shape_cast %18 : vector<1x648x128xf32> to vector<648x128xf32>
    %20 = vector.shape_cast %17 : vector<648x128xf32> to vector<1x648x128xf32>
    tpu.vector_store %arg6[%c0_14, %c0_15, %c0_16], %20 {strides = array<i32>} : memref<1x648x128xf32, #tpu.memory_space<vmem>>, vector<1x648x128xf32>,
    return
  }
  func.func @transform_0(%arg0: i32) -> (i32, i32, i32) {
    %c0_i32 = arith.constant 0 : i32
    %c0_i32_0 = arith.constant 0 : i32
    %c0_i32_1 = arith.constant 0 : i32
    return %arg0, %c0_i32, %c0_i32_0 : i32, i32, i32
  }
  func.func @transform_1(%arg0: i32) -> (i32, i32, i32) {
    %c0_i32 = arith.constant 0 : i32
    %c0_i32_0 = arith.constant 0 : i32
    %c0_i32_1 = arith.constant 0 : i32
    return %arg0, %c0_i32, %c0_i32_0 : i32, i32, i32
  }
  func.func @transform_2(%arg0: i32) -> (i32, i32) {
    %c0_i32 = arith.constant 0 : i32
    %c0_i32_0 = arith.constant 0 : i32
    %c0_i32_1 = arith.constant 0 : i32
    return %c0_i32, %c0_i32_0 : i32, i32
  }
  func.func @transform_3(%arg0: i32) -> (i32, i32) {
    %c0_i32 = arith.constant 0 : i32
    %c0_i32_0 = arith.constant 0 : i32
    %c0_i32_1 = arith.constant 0 : i32
    return %c0_i32, %c0_i32_0 : i32, i32
  }
  func.func @transform_4(%arg0: i32) -> (i32, i32) {
    %c0_i32 = arith.constant 0 : i32
    %c0_i32_0 = arith.constant 0 : i32
    %c0_i32_1 = arith.constant 0 : i32
    return %c0_i32, %c0_i32_0 : i32, i32
  }
  func.func @transform_5(%arg0: i32) -> (i32, i32, i32) {
    %c0_i32 = arith.constant 0 : i32
    %c0_i32_0 = arith.constant 0 : i32
    %c0_i32_1 = arith.constant 0 : i32
    return %arg0, %c0_i32, %c0_i32_0 : i32, i32, i32
  }
}

</mosaic_0001>

<bundles_post_ra>
// kernel: template_hoi_forward.3
= control target key start
LH: loop header
LB: loop body
LE: loop exit
PB: predicated region body
PF: predicated region fallthrough
CT: control target
= control target key end

     0   :  { %s10410_s0 = inlined_call_operand.vmem [shape: bf16[2,1024,8], index: 0, kind: input, shape index: {}]   ;;  %s10411_s1 = inlined_call_operand.vmem [shape: bf16[2,1024,8], index: 1, kind: input, shape index: {}]   ;;  %s10412_s2 = inlined_call_operand.vmem [shape: bf16[8,64], index: 2, kind: input, shape index: {}]   ;;  %s10413_s3 = inlined_call_operand.vmem [shape: f32[1,64], index: 3, kind: input, shape index: {}]   ;;  %s10414_s4 = inlined_call_operand.vmem [shape: bf16[64,128], index: 4, kind: input, shape index: {}]   ;;  %s10415_s5 = inlined_call_operand.vmem [shape: f32[1,128], index: 5, kind: input, shape index: {}]   ;;  %s10416_s6 = inlined_call_operand.vmem [shape: bf16[128,256], index: 6, kind: input, shape index: {}]   ;;  %s10417_s7 = inlined_call_operand.vmem [shape: f32[1,256], index: 7, kind: input, shape index: {}]   ;;  %s10418_s8 = inlined_call_operand.vmem [shape: bf16[256,512], index: 8, kind: input, shape index: {}]   ;;  %s10419_s9 = inlined_call_operand.vmem [shape: f32[1,512], index: 9, kind: input, shape index: {}]   ;;  %s10420_s10 = inlined_call_operand.vmem [shape: bf16[256,1024], index: 10, kind: input, shape index: {}]   ;;  %s10421_s11 = inlined_call_operand.vmem [shape: bf16[64,256], index: 11, kind: input, shape index: {}]   ;;  %s10422_s12 = inlined_call_operand.vmem [shape: bf16[16,64], index: 12, kind: input, shape index: {}]   ;;  %s10423_s13 = inlined_call_operand.vmem [shape: bf16[8,32], index: 13, kind: input, shape index: {}]   ;;  %s10424_s14 = inlined_call_operand.vmem [shape: f32[1,32], index: 14, kind: input, shape index: {}]   ;;  %s10425_s15 = inlined_call_operand.vmem [shape: bf16[32,8], index: 15, kind: input, shape index: {}]   ;;  %s10426_s16 = inlined_call_operand.vmem [shape: f32[1,8], index: 16, kind: input, shape index: {}]   ;;  %s10427_s17 = inlined_call_operand.vmem [shape: bf16[2,1,512], index: 17, kind: output, shape index: {0}]   ;;  %s10428_s18 = inlined_call_operand.vmem [shape: f32[2,64,128], index: 18, kind: output, shape index: {1}]   ;;  %s10429_s19 = inlined_call_operand.vmem [shape: f32[2,1,8], index: 19, kind: output, shape index: {2}]  }
   0x1   :  { %10432 = sst [smem:[#allocation19_spill]] %s10410_s0  ;;  %s8367_s0 = smov 0  }
   0x2   :  { %10433 = sst [smem:[#allocation20_spill]] %s10411_s1 }
   0x3   :  { %10434 = sst [smem:[#allocation21_spill]] %s10412_s2 }
   0x4   :  { %10435 = sst [smem:[#allocation22_spill]] %s10413_s3 }
   0x5 LB: > { %s6501_s30 = sadd.s32 4294967295, %s8261_s0   ;;  %p6505_p0 = scmp.ge.s32.totalorder %s8261_s0, 1  ;;  %s8261_s0 = sphi %s8367_s0, %s30_s0  }
   0x6   : > { %p552_p1 = scmp.lt.s32.totalorder %s8261_s0, 3 }
   0x8   : > { %p553_p2 = pnand %p6505_p0, %p552_p1 }
   0xa   : > { %556 = sbr.rel (%p553_p2) target bundleno = 2538 (0x9ea), region = 88 }
  0x11   : > { %s10436_s1 = sld [smem:[#allocation21_spill]]  ;;  %vm1292_vm0 = vcmask 1043456   ;;  %p620_p3 = scmp.lt.s32.totalorder %s6501_s30, 1  ;;  %vm1099_vm1 = vcmask 64512   ;;  %v8482_v43 = vld [vmem:[%s10420_s10] sm:$0xff]  ;;  %vm3500_vm2 = vcmask 523264  }
  0x12   : > { %s10437_s24 = sld [smem:[#allocation19_spill]]  ;;  %s10438_s27 = sld [smem:[#allocation20_spill]]  ;;  %v8487_v44 = vld [vmem:[%s10420_s10 + $0x20] sm:$0xff]  ;;  %vm6051_vm3 = vcmask 261120   ;;  %vm4709_vm4 = vcmask 1040384   ;;  %vm4712_vm6 = vcmask 1041409  }
  0x13   : > { %s10484_s30 = smov (!%p620_p3, %s6501_s30), 1  ;;  %v6643_v45 = vcombine.high %v8482_v43, %v8487_v44  ;;  %v6642_v46 = vcombine.low %v8482_v43, %v8487_v44  ;;  %s10439_s23 = sld [smem:[#allocation22_spill]]  ;;  %v2053_v43 = vld [vmem:[%s10420_s10 + $0xa0] sm:$0xff]  ;;  %vm4710_vm5 = vsmask.f32 256  ;;  %vm4716_vm9 = vcmask 1042434  }
  0x14   : > { %s7017_s22 = sshll.u32 %s10484_s30, 9  ;;  %vm4713_vm7 = vsmask.f32 1280  ;;  %vm9899_vm8 = vmand %vm4709_vm4, %vm4710_vm5  ;;  %vm4717_vm11 = vsmask.f32 2304  ;;  %vm4720_vm14 = vcmask 1043459  }
  0x15   : > { %2833 = vmatprep.mubr.bf16.mxu1 %v6643_v45  ;;  %vm9907_vm10 = vmand %vm4712_vm6, %vm4713_vm7  ;;  %s6510_s3 = sshll.u32 %s10484_s30, 2  ;;  %vm4721_vm15 = vsmask.f32 3328  ;;  %vm8266_vm4 = vmmov 0   ;;  %vm6376_vm5 = vcmask 57344  }
  0x16   : > { %vm4715_vm12 = vmor %vm9907_vm10, %vm9899_vm8  ;;  %s633_s29 = scalar_lea.vmem %s10427_s17, %s6510_s3 }
  0x17   : > { %v771_v0 = vld [vmem:[%s10436_s1] sm:$0xf]  ;;  %vm4718_vm13 = vmand %vm4716_vm9, %vm4717_vm11 }
  0x18   : > { %7971 = vmatprep.subr.msk.bf16.mxu0 %vm1292_vm0, %v771_v0  ;;  %v1294_v1 = vsel %vm1292_vm0, %v771_v0, 0  ;;  %s8388_s25 = scalar_lea.vmem %s10437_s24, %s7017_s22  ;;  %s8441_s28 = scalar_lea.vmem %s10438_s27, %s7017_s22 }
  0x19   : > { %7662 = vmatpush3.bf16.msra.mxu0 %v1294_v1  ;;  %v7986_v2 = vld [vmem:[%s8388_s25] sm:$0xff]   ;;  %v7987_v3 = vld [vmem:[%s8388_s25 + $0x8] sm:$0xff]   ;;  %v7988_v4 = vld [vmem:[%s8388_s25 + $0x10] sm:$0xff]   ;;  %s7019_s27 = sshll.u32 %s10484_s30, 6 }
  0x1a   : > { %7663 = vmatprep.mubr.msk.bf16.mxu0 %vm1099_vm1, %v7986_v2  ;;  %v7989_v5 = vld [vmem:[%s8388_s25 + $0x18] sm:$0xff]   ;;  %v7990_v6 = vld [vmem:[%s8388_s25 + $0x20] sm:$0xff]   ;;  %v7991_v7 = vld [vmem:[%s8388_s25 + $0x28] sm:$0xff]   ;;  %s9513_s21 = scalar_lea.vmem %s10428_s18, %s7019_s27  ;;  %s641_s27 = scalar_lea.vmem %s10429_s19, %s10484_s30 }
  0x1b   : > { %v7992_v8 = vld [vmem:[%s8388_s25 + $0x30] sm:$0xff]   ;;  %v7993_v9 = vld [vmem:[%s8388_s25 + $0x38] sm:$0xff]   ;;  %v7994_v10 = vld [vmem:[%s8388_s25 + $0x40] sm:$0xff]  }
  0x1c   : > { %7664 = vmatmul.mubr.msk.bf16.vlgmr.msra.gmra.mrb[0].mxu0 %vm1099_vm1, %v7987_v3  ;;  %v7995_v11 = vld [vmem:[%s8388_s25 + $0x48] sm:$0xff]   ;;  %v7996_v12 = vld [vmem:[%s8388_s25 + $0x50] sm:$0xff]   ;;  %v7997_v13 = vld [vmem:[%s8388_s25 + $0x58] sm:$0xff]  }
  0x1d   : > { %7667 = vmatprep.mubr.msk.bf16.mxu0 %vm1099_vm1, %v7988_v4  ;;  %v7998_v14 = vld [vmem:[%s8388_s25 + $0x60] sm:$0xff]   ;;  %v7999_v15 = vld [vmem:[%s8388_s25 + $0x68] sm:$0xff]   ;;  %v8000_v16 = vld [vmem:[%s8388_s25 + $0x70] sm:$0xff]  }
  0x1e   : > { %v8001_v17 = vld [vmem:[%s8388_s25 + $0x78] sm:$0xff]   ;;  %v8002_v18 = vld [vmem:[%s8388_s25 + $0x80] sm:$0xff]   ;;  %v8003_v19 = vld [vmem:[%s8388_s25 + $0x88] sm:$0xff]  }
  0x1f   : > { %v8004_v20 = vld [vmem:[%s8388_s25 + $0x90] sm:$0xff]   ;;  %v8005_v21 = vld [vmem:[%s8388_s25 + $0x98] sm:$0xff]   ;;  %v8006_v22 = vld [vmem:[%s8388_s25 + $0xa0] sm:$0xff]  }
  0x20   : > { %v8007_v23 = vld [vmem:[%s8388_s25 + $0xa8] sm:$0xff]   ;;  %v8008_v24 = vld [vmem:[%s8388_s25 + $0xb0] sm:$0xff]   ;;  %v8009_v25 = vld [vmem:[%s8388_s25 + $0xb8] sm:$0xff]  }
  0x21   : > { %v8010_v26 = vld [vmem:[%s8388_s25 + $0xc0] sm:$0xff]   ;;  %v8011_v27 = vld [vmem:[%s8388_s25 + $0xc8] sm:$0xff]   ;;  %v8012_v28 = vld [vmem:[%s8388_s25 + $0xd0] sm:$0xff]  }
  0x22   : > { %v8013_v29 = vld [vmem:[%s8388_s25 + $0xd8] sm:$0xff]   ;;  %v8014_v30 = vld [vmem:[%s8388_s25 + $0xe0] sm:$0xff]   ;;  %v8015_v31 = vld [vmem:[%s8388_s25 + $0xe8] sm:$0xff]  }
  0x23   : > { %v8016_v32 = vld [vmem:[%s8388_s25 + $0xf0] sm:$0xff]   ;;  %v8017_v33 = vld [vmem:[%s8388_s25 + $0xf8] sm:$0xff]   ;;  %v8018_v34 = vld [vmem:[%s8388_s25 + $0x100] sm:$0xff]  }
  0x24   : > { %7668 = vmatmul.mubr.msk.bf16.gmra.mrb[4].mxu0 %vm1099_vm1, %v7989_v5  ;;  %v8019_v35 = vld [vmem:[%s8388_s25 + $0x108] sm:$0xff]   ;;  %v8020_v36 = vld [vmem:[%s8388_s25 + $0x110] sm:$0xff]   ;;  %v8021_v37 = vld [vmem:[%s8388_s25 + $0x118] sm:$0xff]  }
  0x25   : > { %7671 = vmatprep.mubr.msk.bf16.mxu0 %vm1099_vm1, %v7990_v6  ;;  %v8022_v38 = vld [vmem:[%s8388_s25 + $0x120] sm:$0xff]   ;;  %v8023_v39 = vld [vmem:[%s8388_s25 + $0x128] sm:$0xff]   ;;  %v8024_v40 = vld [vmem:[%s8388_s25 + $0x130] sm:$0xff]  }
  0x26   : > { %v8025_v41 = vld [vmem:[%s8388_s25 + $0x138] sm:$0xff]   ;;  %v8026_v42 = vld [vmem:[%s8388_s25 + $0x140] sm:$0xff]   ;;  %v8027_v47 = vld [vmem:[%s8388_s25 + $0x148] sm:$0xff]  }
  0x27   : > { %v8028_v48 = vld [vmem:[%s8388_s25 + $0x150] sm:$0xff]   ;;  %v8029_v49 = vld [vmem:[%s8388_s25 + $0x158] sm:$0xff]   ;;  %v8030_v50 = vld [vmem:[%s8388_s25 + $0x160] sm:$0xff]  }
  0x28   : > { %v8031_v51 = vld [vmem:[%s8388_s25 + $0x168] sm:$0xff]   ;;  %v8032_v52 = vld [vmem:[%s8388_s25 + $0x170] sm:$0xff]   ;;  %v8033_v53 = vld [vmem:[%s8388_s25 + $0x178] sm:$0xff]  }
  0x29   : > { %v8034_v54 = vld [vmem:[%s8388_s25 + $0x180] sm:$0xff]   ;;  %v8035_v55 = vld [vmem:[%s8388_s25 + $0x188] sm:$0xff]   ;;  %v8036_v56 = vld [vmem:[%s8388_s25 + $0x190] sm:$0xff]  }
  0x2a   : > { %v8037_v57 = vld [vmem:[%s8388_s25 + $0x198] sm:$0xff]   ;;  %v8038_v58 = vld [vmem:[%s8388_s25 + $0x1a0] sm:$0xff]   ;;  %v8039_v59 = vld [vmem:[%s8388_s25 + $0x1a8] sm:$0xff]  }
  0x2b   : > { %v8040_v60 = vld [vmem:[%s8388_s25 + $0x1b0] sm:$0xff]   ;;  %v8523_v61 = vld [vmem:[%s10439_s23] ss:$0 sm:$0xff]  ;;  %v8041_v1 = vld [vmem:[%s8388_s25 + $0x1b8] sm:$0xff]  }
  0x2c   : > { %7672 = vmatmul.mubr.msk.bf16.gmra.mrb[8].mxu0 %vm1099_vm1, %v7991_v7  ;;  %v8042_v4 = vld [vmem:[%s8388_s25 + $0x1c0] sm:$0xff]  }
  0x2d   : > { %7675 = vmatprep.mubr.msk.bf16.mxu0 %vm1099_vm1, %v7992_v8 }
  0x34   : > { %7676 = vmatmul.mubr.msk.bf16.gmra.mrb[12].mxu0 %vm1099_vm1, %v7993_v9 }
  0x35   : > { %7679 = vmatprep.mubr.msk.bf16.mxu0 %vm1099_vm1, %v7994_v10 }
  0x3c   : > { %7680 = vmatmul.mubr.msk.bf16.gmra.mrb[16].mxu0 %vm1099_vm1, %v7995_v11 }
  0x3d   : > { %7683 = vmatprep.mubr.msk.bf16.mxu0 %vm1099_vm1, %v7996_v12 }
  0x44   : > { %7684 = vmatmul.mubr.msk.bf16.gmra.mrb[20].mxu0 %vm1099_vm1, %v7997_v13 }
  0x45   : > { %7687 = vmatprep.mubr.msk.bf16.mxu0 %vm1099_vm1, %v7998_v14 }
  0x4c   : > { %7688 = vmatmul.mubr.msk.bf16.gmra.mrb[24].mxu0 %vm1099_vm1, %v7999_v15 }
  0x4d   : > { %7691 = vmatprep.mubr.msk.bf16.mxu0 %vm1099_vm1, %v8000_v16 }
  0x54   : > { %7692 = vmatmul.mubr.msk.bf16.gmra.mrb[28].mxu0 %vm1099_vm1, %v8001_v17  ;;  %v8043_v17 = vld [vmem:[%s8388_s25 + $0x1c8] sm:$0xff]  }
  0x55   : > { %7695 = vmatprep.mubr.msk.bf16.mxu0 %vm1099_vm1, %v8002_v18 }
  0x5c   : > { %7696 = vmatmul.mubr.msk.bf16.gmra.mrb[32].mxu0 %vm1099_vm1, %v8003_v19 }
  0x5d   : > { %7699 = vmatprep.mubr.msk.bf16.mxu0 %vm1099_vm1, %v8004_v20  ;;  %v8044_v20 = vld [vmem:[%s8388_s25 + $0x1d0] sm:$0xff]  }
  0x64   : > { %7700 = vmatmul.mubr.msk.bf16.gmra.mrb[36].mxu0 %vm1099_vm1, %v8005_v21 }
  0x65   : > { %7703 = vmatprep.mubr.msk.bf16.mxu0 %vm1099_vm1, %v8006_v22 }
  0x6c   : > { %7704 = vmatmul.mubr.msk.bf16.gmra.mrb[40].mxu0 %vm1099_vm1, %v8007_v23 }
  0x6d   : > { %7707 = vmatprep.mubr.msk.bf16.mxu0 %vm1099_vm1, %v8008_v24 }
  0x74   : > { %7708 = vmatmul.mubr.msk.bf16.gmra.mrb[44].mxu0 %vm1099_vm1, %v8009_v25 }
  0x75   : > { %7711 = vmatprep.mubr.msk.bf16.mxu0 %vm1099_vm1, %v8010_v26 }
  0x7c   : > { %7712 = vmatmul.mubr.msk.bf16.gmra.mrb[48].mxu0 %vm1099_vm1, %v8011_v27 }
  0x7d   : > { %7715 = vmatprep.mubr.msk.bf16.mxu0 %vm1099_vm1, %v8012_v28 }
  0x84   : > { %7716 = vmatmul.mubr.msk.bf16.gmra.mrb[52].mxu0 %vm1099_vm1, %v8013_v29 }
  0x85   : > { %7719 = vmatprep.mubr.msk.bf16.mxu0 %vm1099_vm1, %v8014_v30 }
  0x8c   : > { %7720 = vmatmul.mubr.msk.bf16.gmra.mrb[56].mxu0 %vm1099_vm1, %v8015_v31 }
  0x8d   : > { %7723 = vmatprep.mubr.msk.bf16.mxu0 %vm1099_vm1, %v8016_v32 }
  0x94   : > { %7724 = vmatmul.mubr.msk.bf16.gmra.mrb[60].mxu0 %vm1099_vm1, %v8017_v33  ;;  %v8045_v33 = vld [vmem:[%s8388_s25 + $0x1d8] sm:$0xff]  }
  0x95   : > { %7727 = vmatprep.mubr.msk.bf16.mxu0 %vm1099_vm1, %v8018_v34 }
  0x9c   : > { %7728 = vmatmul.mubr.msk.bf16.gmra.mrb[64].mxu0 %vm1099_vm1, %v8019_v35 }
  0x9d   : > { %7731 = vmatprep.mubr.msk.bf16.mxu0 %vm1099_vm1, %v8020_v36  ;;  %v8046_v36 = vld [vmem:[%s8388_s25 + $0x1e0] sm:$0xff]  }
  0xa4   : > { %7732 = vmatmul.mubr.msk.bf16.gmra.mrb[68].mxu0 %vm1099_vm1, %v8021_v37 }
  0xa5   : > { %7735 = vmatprep.mubr.msk.bf16.mxu0 %vm1099_vm1, %v8022_v38 }
  0xac   : > { %7736 = vmatmul.mubr.msk.bf16.gmra.mrb[72].mxu0 %vm1099_vm1, %v8023_v39 }
  0xad   : > { %7739 = vmatprep.mubr.msk.bf16.mxu0 %vm1099_vm1, %v8024_v40 }
  0xb4   : > { %7740 = vmatmul.mubr.msk.bf16.gmra.mrb[76].mxu0 %vm1099_vm1, %v8025_v41 }
  0xb5   : > { %7743 = vmatprep.mubr.msk.bf16.mxu0 %vm1099_vm1, %v8026_v42 }
  0xbc   : > { %7744 = vmatmul.mubr.msk.bf16.gmra.mrb[80].mxu0 %vm1099_vm1, %v8027_v47 }
  0xbd   : > { %7747 = vmatprep.mubr.msk.bf16.mxu0 %vm1099_vm1, %v8028_v48 }
  0xc4   : > { %7748 = vmatmul.mubr.msk.bf16.gmra.mrb[84].mxu0 %vm1099_vm1, %v8029_v49 }
  0xc5   : > { %7751 = vmatprep.mubr.msk.bf16.mxu0 %vm1099_vm1, %v8030_v50 }
  0xcc   : > { %7752 = vmatmul.mubr.msk.bf16.gmra.mrb[88].mxu0 %vm1099_vm1, %v8031_v51 }
  0xcd   : > { %7755 = vmatprep.mubr.msk.bf16.mxu0 %vm1099_vm1, %v8032_v52  ;;  %v8047_v52 = vld [vmem:[%s8388_s25 + $0x1e8] sm:$0xff]  }
  0xd4   : > { %7756 = vmatmul.mubr.msk.bf16.gmra.mrb[92].mxu0 %vm1099_vm1, %v8033_v53 }
  0xd5   : > { %7759 = vmatprep.mubr.msk.bf16.mxu0 %vm1099_vm1, %v8034_v54 }
  0xdc   : > { %7760 = vmatmul.mubr.msk.bf16.gmra.mrb[96].mxu0 %vm1099_vm1, %v8035_v55  ;;  %v8048_v55 = vld [vmem:[%s8388_s25 + $0x1f0] sm:$0xff]  }
  0xdd   : > { %7763 = vmatprep.mubr.msk.bf16.mxu0 %vm1099_vm1, %v8036_v56 }
  0xe4   : > { %7764 = vmatmul.mubr.msk.bf16.gmra.mrb[100].mxu0 %vm1099_vm1, %v8037_v57 }
  0xe5   : > { %7767 = vmatprep.mubr.msk.bf16.mxu0 %vm1099_vm1, %v8038_v58 }
  0xec   : > { %7768 = vmatmul.mubr.msk.bf16.gmra.mrb[104].mxu0 %vm1099_vm1, %v8039_v59 }
  0xed   : > { %7771 = vmatprep.mubr.msk.bf16.mxu0 %vm1099_vm1, %v8040_v60 }
  0xef   : > { %v7665_v62 = vpop.f32.mrb[0].mxu0 }
  0xf0   : > { %v1339_v63 = vadd.f32 %v7665_v62, %v8523_v61  ;;  %v1330_v0 = vpop.f32.mrb[1].mxu0 }
  0xf1   : > { %v1331_v2 = vadd.f32 %v8523_v61, %v1330_v0  ;;  %v7666_v3 = vpop.f32.mrb[2].mxu0 }
  0xf2   : > { %v1342_v5 = vadd.f32 %v7666_v3, %v8523_v61  ;;  %v1333_v6 = vpop.f32.mrb[3].mxu0  ;;  %v1843_v8 = vmax.f32 %v1339_v63, 0.0 }
  0xf3   : > { %v1334_v7 = vadd.f32 %v8523_v61, %v1333_v6  ;;  %v1841_v10 = vmax.f32 %v1331_v2, 0.0 }
  0xf4   : > { %v1844_v9 = vmax.f32 %v1342_v5, 0.0  ;;  %7772 = vmatmul.mubr.msk.bf16.gmra.mrb[108].mxu0 %vm1099_vm1, %v8041_v1  ;;  %v8049_v5 = vld [vmem:[%s8388_s25 + $0x1f8] sm:$0xff]  }
  0xf5   : > { %7775 = vmatprep.mubr.msk.bf16.mxu0 %vm1099_vm1, %v8042_v4  ;;  %v1842_v11 = vmax.f32 %v1334_v7, 0.0 }
  0xf6   : > { %v8534_v12 = vpack.c.bf16 %v1844_v9, %v1843_v8 }
  0xf7   : > { %v7669_v13 = vpop.f32.mrb[4].mxu0  ;;  %v8536_v14 = vpack.c.bf16 %v1842_v11, %v1841_v10 }
  0xf8   : > { %v1355_v15 = vadd.f32 %v7669_v13, %v8523_v61  ;;  %v1346_v16 = vpop.f32.mrb[5].mxu0 }
  0xf9   : > { %v1347_v18 = vadd.f32 %v8523_v61, %v1346_v16  ;;  %v7670_v19 = vpop.f32.mrb[6].mxu0 }
  0xfa   : > { %v1358_v21 = vadd.f32 %v7670_v19, %v8523_v61  ;;  %v1349_v22 = vpop.f32.mrb[7].mxu0  ;;  %v1847_v24 = vmax.f32 %v1355_v15, 0.0 }
  0xfb   : > { %v1350_v23 = vadd.f32 %v8523_v61, %v1349_v22  ;;  %v1845_v26 = vmax.f32 %v1347_v18, 0.0 }
  0xfc   : > { %v1848_v25 = vmax.f32 %v1358_v21, 0.0  ;;  %7776 = vmatmul.mubr.msk.bf16.gmra.mrb[112].mxu0 %vm1099_vm1, %v8043_v17 }
  0xfd   : > { %v1846_v27 = vmax.f32 %v1350_v23, 0.0  ;;  %7779 = vmatprep.mubr.msk.bf16.mxu0 %vm1099_vm1, %v8044_v20 }
  0xfe   : > { %v8546_v28 = vpack.c.bf16 %v1848_v25, %v1847_v24 }
  0xff   : > { %v7673_v29 = vpop.f32.mrb[8].mxu0  ;;  %v8548_v30 = vpack.c.bf16 %v1846_v27, %v1845_v26 }
 0x100   : > { %v1371_v31 = vadd.f32 %v7673_v29, %v8523_v61  ;;  %v1362_v32 = vpop.f32.mrb[9].mxu0 }
 0x101   : > { %v1363_v34 = vadd.f32 %v8523_v61, %v1362_v32  ;;  %v7674_v35 = vpop.f32.mrb[10].mxu0 }
 0x102   : > { %v1374_v37 = vadd.f32 %v7674_v35, %v8523_v61  ;;  %v1365_v38 = vpop.f32.mrb[11].mxu0  ;;  %v1851_v40 = vmax.f32 %v1371_v31, 0.0 }
 0x103   : > { %v1366_v39 = vadd.f32 %v8523_v61, %v1365_v38  ;;  %v1849_v42 = vmax.f32 %v1363_v34, 0.0 }
 0x104   : > { %v1852_v41 = vmax.f32 %v1374_v37, 0.0  ;;  %7780 = vmatmul.mubr.msk.bf16.gmra.mrb[116].mxu0 %vm1099_vm1, %v8045_v33 }
 0x105   : > { %v1850_v45 = vmax.f32 %v1366_v39, 0.0  ;;  %7783 = vmatprep.mubr.msk.bf16.mxu0 %vm1099_vm1, %v8046_v36 }
 0x106   : > { %v8558_v47 = vpack.c.bf16 %v1852_v41, %v1851_v40 }
 0x107   : > { %v7677_v48 = vpop.f32.mrb[12].mxu0  ;;  %v8560_v49 = vpack.c.bf16 %v1850_v45, %v1849_v42 }
 0x108   : > { %v1387_v50 = vadd.f32 %v7677_v48, %v8523_v61  ;;  %v1378_v51 = vpop.f32.mrb[13].mxu0 }
 0x109   : > { %v1379_v53 = vadd.f32 %v8523_v61, %v1378_v51  ;;  %v7678_v54 = vpop.f32.mrb[14].mxu0 }
 0x10a   : > { %v1390_v56 = vadd.f32 %v7678_v54, %v8523_v61  ;;  %v1381_v57 = vpop.f32.mrb[15].mxu0  ;;  %v1855_v59 = vmax.f32 %v1387_v50, 0.0 }
 0x10b   : > { %v1382_v58 = vadd.f32 %v8523_v61, %v1381_v57  ;;  %v1853_v62 = vmax.f32 %v1379_v53, 0.0 }
 0x10c   : > { %v1856_v60 = vmax.f32 %v1390_v56, 0.0  ;;  %7784 = vmatmul.mubr.msk.bf16.gmra.mrb[120].mxu0 %vm1099_vm1, %v8047_v52 }
 0x10d   : > { %v1854_v63 = vmax.f32 %v1382_v58, 0.0  ;;  %7787 = vmatprep.mubr.msk.bf16.mxu0 %vm1099_vm1, %v8048_v55 }
 0x10e   : > { %v8570_v0 = vpack.c.bf16 %v1856_v60, %v1855_v59 }
 0x10f   : > { %v7681_v1 = vpop.f32.mrb[16].mxu0  ;;  %v8572_v2 = vpack.c.bf16 %v1854_v63, %v1853_v62 }
 0x110   : > { %v1403_v3 = vadd.f32 %v7681_v1, %v8523_v61  ;;  %v1394_v4 = vpop.f32.mrb[17].mxu0 }
 0x111   : > { %v7682_v6 = vpop.f32.mrb[18].mxu0  ;;  %v1395_v7 = vadd.f32 %v8523_v61, %v1394_v4 }
 0x112   : > { %v1406_v8 = vadd.f32 %v7682_v6, %v8523_v61  ;;  %v1397_v9 = vpop.f32.mrb[19].mxu0  ;;  %v1859_v11 = vmax.f32 %v1403_v3, 0.0 }
 0x113   : > { %v1398_v10 = vadd.f32 %v8523_v61, %v1397_v9  ;;  %v1857_v15 = vmax.f32 %v1395_v7, 0.0 }
 0x114   : > { %v1860_v13 = vmax.f32 %v1406_v8, 0.0  ;;  %7788 = vmatmul.mubr.msk.bf16.gmra.mrb[124].mxu0 %vm1099_vm1, %v8049_v5 }
 0x115   : > { %v1858_v16 = vmax.f32 %v1398_v10, 0.0 }
 0x116   : > { %v1978_v17 = vpack.c.bf16 %v1860_v13, %v1859_v11  ;;  %v2045_v13 = vld [vmem:[%s10420_s10 + $0x60] sm:$0xff] }
 0x117   : > { %v7685_v18 = vpop.f32.mrb[20].mxu0  ;;  %v1977_v19 = vpack.c.bf16 %v1858_v16, %v1857_v15 }
 0x118   : > { %v1419_v20 = vadd.f32 %v7685_v18, %v8523_v61  ;;  %v1410_v21 = vpop.f32.mrb[21].mxu0 }
 0x119   : > { %v1411_v22 = vadd.f32 %v8523_v61, %v1410_v21  ;;  %v7686_v23 = vpop.f32.mrb[22].mxu0  ;;  %7085 = vmatprep.subr.bf16.mxu1 %v1977_v19  ;;  %v8622_v21 = vld [vmem:[%s10420_s10 + $0x30] sm:$0xff] }
 0x11a   : > { %v1422_v24 = vadd.f32 %v7686_v23, %v8523_v61  ;;  %v1413_v25 = vpop.f32.mrb[23].mxu0  ;;  %7086 = vmatpush3.bf16.msra.mxu1 %v8536_v14  ;;  %v1863_v27 = vmax.f32 %v1419_v20, 0.0  ;;  %v8617_v20 = vld [vmem:[%s10420_s10 + $0x10] sm:$0xff] }
 0x11b   : > { %v1414_v26 = vadd.f32 %v8523_v61, %v1413_v25  ;;  %7087 = vmatprep.subr.bf16.mxu1 %v1978_v17  ;;  %v1861_v31 = vmax.f32 %v1411_v22, 0.0 }
 0x11c   : > { %v1864_v29 = vmax.f32 %v1422_v24, 0.0 }
 0x11d   : > { %v1862_v32 = vmax.f32 %v1414_v26, 0.0  ;;  %v6646_v26 = vcombine.low %v8617_v20, %v8622_v21 }
 0x11e   : > { %7088 = vmatpush3.bf16.msra.mxu1 %v8534_v12  ;;  %v1980_v33 = vpack.c.bf16 %v1864_v29, %v1863_v27 }
 0x11f   : > { %v7689_v34 = vpop.f32.mrb[24].mxu0  ;;  %v1979_v35 = vpack.c.bf16 %v1862_v32, %v1861_v31 }
 0x120   : > { %v1435_v36 = vadd.f32 %v7689_v34, %v8523_v61  ;;  %v1426_v37 = vpop.f32.mrb[25].mxu0  ;;  %v2049_v34 = vld [vmem:[%s10420_s10 + $0x80] sm:$0xff] }
 0x121   : > { %v1427_v38 = vadd.f32 %v8523_v61, %v1426_v37  ;;  %v7690_v39 = vpop.f32.mrb[26].mxu0  ;;  %7089 = vmatprep.subr.bf16.mxu1 %v1979_v35  ;;  %v6659_v37 = vcombine.high %v2049_v34, %v2053_v43 }
 0x122   : > { %v1438_v14 = vadd.f32 %v7690_v39, %v8523_v61  ;;  %v1429_v40 = vpop.f32.mrb[27].mxu0  ;;  %7090 = vmatpush3.bf16.msra.mxu1 %v8548_v30  ;;  %v1867_v42 = vmax.f32 %v1435_v36, 0.0 }
 0x123   : > { %v1430_v41 = vadd.f32 %v8523_v61, %v1429_v40  ;;  %7091 = vmatprep.subr.bf16.mxu1 %v1980_v33  ;;  %v1865_v45 = vmax.f32 %v1427_v38, 0.0 }
 0x124   : > { %v1868_v12 = vmax.f32 %v1438_v14, 0.0 }
 0x125   : > { %v1866_v48 = vmax.f32 %v1430_v41, 0.0 }
 0x126   : > { %7092 = vmatpush3.bf16.msra.mxu1 %v8546_v28  ;;  %v1982_v50 = vpack.c.bf16 %v1868_v12, %v1867_v42 }
 0x127   : > { %v7693_v51 = vpop.f32.mrb[28].mxu0  ;;  %v1981_v52 = vpack.c.bf16 %v1866_v48, %v1865_v45 }
 0x128   : > { %v1451_v53 = vadd.f32 %v7693_v51, %v8523_v61  ;;  %v1442_v54 = vpop.f32.mrb[29].mxu0 }
 0x129   : > { %v1443_v55 = vadd.f32 %v8523_v61, %v1442_v54  ;;  %v7694_v56 = vpop.f32.mrb[30].mxu0  ;;  %7093 = vmatprep.subr.bf16.mxu1 %v1981_v52  ;;  %v2057_v52 = vld [vmem:[%s10420_s10 + $0xc0] sm:$0xff] }
 0x12a   : > { %v1454_v30 = vadd.f32 %v7694_v56, %v8523_v61  ;;  %v1445_v57 = vpop.f32.mrb[31].mxu0  ;;  %7094 = vmatpush3.bf16.msra.mxu1 %v8560_v49  ;;  %v1871_v59 = vmax.f32 %v1451_v53, 0.0  ;;  %v2061_v53 = vld [vmem:[%s10420_s10 + $0xe0] sm:$0xff]  ;;  %v6658_v56 = vcombine.low %v2049_v34, %v2053_v43 }
 0x12b   : > { %v1446_v58 = vadd.f32 %v8523_v61, %v1445_v57  ;;  %7095 = vmatprep.subr.bf16.mxu1 %v1982_v50  ;;  %v1869_v60 = vmax.f32 %v1443_v55, 0.0  ;;  %v6667_v57 = vcombine.high %v2057_v52, %v2061_v53 }
 0x12c   : > { %v1872_v28 = vmax.f32 %v1454_v30, 0.0 }
 0x12d   : > { %v1870_v62 = vmax.f32 %v1446_v58, 0.0 }
 0x12e   : > { %7096 = vmatpush3.bf16.msra.mxu1 %v8558_v47  ;;  %v1984_v63 = vpack.c.bf16 %v1872_v28, %v1871_v59  ;;  %v2041_v47 = vld [vmem:[%s10420_s10 + $0x40] sm:$0xff] }
 0x12f   : > { %v7697_v1 = vpop.f32.mrb[32].mxu0  ;;  %v1983_v3 = vpack.c.bf16 %v1870_v62, %v1869_v60  ;;  %v6651_v18 = vcombine.high %v2041_v47, %v2045_v13  ;;  %v6650_v35 = vcombine.low %v2041_v47, %v2045_v13 }
 0x130   : > { %v1467_v4 = vadd.f32 %v7697_v1, %v8523_v61  ;;  %v1458_v5 = vpop.f32.mrb[33].mxu0 }
 0x131   : > { %v1459_v6 = vadd.f32 %v8523_v61, %v1458_v5  ;;  %v7698_v7 = vpop.f32.mrb[34].mxu0  ;;  %7097 = vmatprep.subr.bf16.mxu1 %v1983_v3 }
 0x132   : > { %v1875_v49 = vmax.f32 %v1467_v4, 0.0  ;;  %v1470_v8 = vadd.f32 %v7698_v7, %v8523_v61  ;;  %v1461_v9 = vpop.f32.mrb[35].mxu0  ;;  %7098 = vmatpush3.bf16.msra.mxu1 %v8572_v2  ;;  %v2065_v7 = vld [vmem:[%s10420_s10 + $0x100] sm:$0xff] }
 0x133   : > { %v1873_v10 = vmax.f32 %v1459_v6, 0.0  ;;  %v1462_v11 = vadd.f32 %v8523_v61, %v1461_v9  ;;  %7099 = vmatprep.subr.bf16.mxu1 %v1984_v63 }
 0x134   : > { %v1876_v15 = vmax.f32 %v1470_v8, 0.0 }
 0x135   : > { %v1874_v16 = vmax.f32 %v1462_v11, 0.0 }
 0x136   : > { %v8609_v17 = vpack.c.bf16 %v1876_v15, %v1875_v49  ;;  %7100 = vmatpush3.bf16.msra.mxu1 %v8570_v0  ;;  %v6647_v0 = vcombine.high %v8617_v20, %v8622_v21  ;;  %v2069_v49 = vld [vmem:[%s10420_s10 + $0x120] sm:$0xff]  ;;  %v2051_v20 = vld [vmem:[%s10420_s10 + $0x90] sm:$0xff] }
 0x137   : > { %v8612_v2 = vpack.c.bf16 %v1874_v16, %v1873_v10  ;;  %v7701_v19 = vpop.f32.mrb[36].mxu0  ;;  %v6666_v10 = vcombine.low %v2057_v52, %v2061_v53  ;;  %v6675_v47 = vcombine.high %v2065_v7, %v2069_v49  ;;  %v6674_v34 = vcombine.low %v2065_v7, %v2069_v49  ;;  %v2055_v21 = vld [vmem:[%s10420_s10 + $0xb0] sm:$0xff] }
 0x138   : > { %v1483_v22 = vadd.f32 %v7701_v19, %v8523_v61  ;;  %v1474_v23 = vpop.f32.mrb[37].mxu0  ;;  %3155 = vmatprep.mubr.bf16.mxu0 %v6647_v0 }
 0x139   : > { %v1475_v24 = vadd.f32 %v8523_v61, %v1474_v23  ;;  %v7702_v25 = vpop.f32.mrb[38].mxu0  ;;  %2834 = vmatmul.mubr.bf16.vlgmr.msra.gmra.mrb[0].mxu1 %v6642_v46 }
 0x13a   : > { %v1879_v27 = vmax.f32 %v1483_v22, 0.0  ;;  %v1486_v29 = vadd.f32 %v7702_v25, %v8523_v61  ;;  %v1477_v31 = vpop.f32.mrb[39].mxu0  ;;  %2841 = vmatprep.mubr.bf16.mxu1 %v6651_v18 }
 0x13b   : > { %v1877_v32 = vmax.f32 %v1475_v24, 0.0  ;;  %v1478_v33 = vadd.f32 %v8523_v61, %v1477_v31  ;;  %v2077_v31 = vld [vmem:[%s10420_s10 + $0x160] sm:$0xff] }
 0x13c   : > { %v1880_v44 = vmax.f32 %v1486_v29, 0.0  ;;  %v2073_v29 = vld [vmem:[%s10420_s10 + $0x140] sm:$0xff] }
 0x13d   : > { %v1878_v46 = vmax.f32 %v1478_v33, 0.0 }
 0x13e   : > { %v8641_v36 = vpack.c.bf16 %v1880_v44, %v1879_v27  ;;  %v6683_v44 = vcombine.high %v2073_v29, %v2077_v31 }
 0x13f   : > { %v8643_v38 = vpack.c.bf16 %v1878_v46, %v1877_v32  ;;  %v7705_v39 = vpop.f32.mrb[40].mxu0 }
 0x140   : > { %v1499_v14 = vadd.f32 %v7705_v39, %v8523_v61  ;;  %v1490_v40 = vpop.f32.mrb[41].mxu0 }
 0x141   : > { %v1491_v41 = vadd.f32 %v8523_v61, %v1490_v40  ;;  %v7706_v42 = vpop.f32.mrb[42].mxu0  ;;  %2842 = vmatmul.mubr.bf16.gmra.mrb[4].mxu1 %v6650_v35 }
 0x142   : > { %v1883_v12 = vmax.f32 %v1499_v14, 0.0  ;;  %v1502_v45 = vadd.f32 %v7706_v42, %v8523_v61  ;;  %v1493_v48 = vpop.f32.mrb[43].mxu0  ;;  %2849 = vmatprep.mubr.bf16.mxu1 %v6659_v37 }
 0x143   : > { %v1881_v50 = vmax.f32 %v1491_v41, 0.0  ;;  %v1494_v51 = vadd.f32 %v8523_v61, %v1493_v48 }
 0x144   : > { %v1884_v54 = vmax.f32 %v1502_v45, 0.0 }
 0x145   : > { %v1882_v55 = vmax.f32 %v1494_v51, 0.0  ;;  %v2085_v51 = vld [vmem:[%s10420_s10 + $0x1a0] sm:$0xff] }
 0x146   : > { %v8655_v30 = vpack.c.bf16 %v1884_v54, %v1883_v12  ;;  %v6682_v54 = vcombine.low %v2073_v29, %v2077_v31 }
 0x147   : > { %v8657_v58 = vpack.c.bf16 %v1882_v55, %v1881_v50  ;;  %v7709_v59 = vpop.f32.mrb[44].mxu0  ;;  %v2081_v50 = vld [vmem:[%s10420_s10 + $0x180] sm:$0xff] }
 0x148   : > { %v1515_v28 = vadd.f32 %v7709_v59, %v8523_v61  ;;  %v1506_v60 = vpop.f32.mrb[45].mxu0 }
 0x149   : > { %v1507_v62 = vadd.f32 %v8523_v61, %v1506_v60  ;;  %v7710_v63 = vpop.f32.mrb[46].mxu0  ;;  %2850 = vmatmul.mubr.bf16.gmra.mrb[8].mxu1 %v6658_v56 }
 0x14a   : > { %v1887_v1 = vmax.f32 %v1515_v28, 0.0  ;;  %v1518_v3 = vadd.f32 %v7710_v63, %v8523_v61  ;;  %v1509_v4 = vpop.f32.mrb[47].mxu0  ;;  %2857 = vmatprep.mubr.bf16.mxu1 %v6667_v57 }
 0x14b   : > { %v1885_v5 = vmax.f32 %v1507_v62, 0.0  ;;  %v1510_v6 = vadd.f32 %v8523_v61, %v1509_v4 }
 0x14c   : > { %v1888_v8 = vmax.f32 %v1518_v3, 0.0 }
 0x14d   : > { %v1886_v9 = vmax.f32 %v1510_v6, 0.0  ;;  %v2093_v6 = vld [vmem:[%s10420_s10 + $0x1e0] sm:$0xff] }
 0x14e   : > { %v8669_v11 = vpack.c.bf16 %v1888_v8, %v1887_v1  ;;  %v6690_v8 = vcombine.low %v2081_v50, %v2085_v51 }
 0x14f   : > { %v8671_v13 = vpack.c.bf16 %v1886_v9, %v1885_v5  ;;  %v7713_v15 = vpop.f32.mrb[48].mxu0  ;;  %v2089_v5 = vld [vmem:[%s10420_s10 + $0x1c0] sm:$0xff] }
 0x150   : > { %v1531_v16 = vadd.f32 %v7713_v15, %v8523_v61  ;;  %v1522_v18 = vpop.f32.mrb[49].mxu0 }
 0x151   : > { %v1523_v19 = vadd.f32 %v8523_v61, %v1522_v18  ;;  %v7714_v22 = vpop.f32.mrb[50].mxu0  ;;  %2858 = vmatmul.mubr.bf16.gmra.mrb[12].mxu1 %v6666_v10 }
 0x152   : > { %v1891_v23 = vmax.f32 %v1531_v16, 0.0  ;;  %v1534_v0 = vadd.f32 %v7714_v22, %v8523_v61  ;;  %v1525_v24 = vpop.f32.mrb[51].mxu0  ;;  %2865 = vmatprep.mubr.bf16.mxu1 %v6675_v47 }
 0x153   : > { %v1889_v25 = vmax.f32 %v1523_v19, 0.0  ;;  %v1526_v27 = vadd.f32 %v8523_v61, %v1525_v24 }
 0x154   : > { %v1892_v32 = vmax.f32 %v1534_v0, 0.0 }
 0x155   : > { %v1890_v33 = vmax.f32 %v1526_v27, 0.0  ;;  %v2101_v27 = vld [vmem:[%s10420_s10 + $0x220] sm:$0xff] }
 0x156   : > { %v1994_v43 = vpack.c.bf16 %v1892_v32, %v1891_v23  ;;  %v6698_v32 = vcombine.low %v2089_v5, %v2093_v6 }
 0x157   : > { %v1993_v46 = vpack.c.bf16 %v1890_v33, %v1889_v25  ;;  %v7717_v35 = vpop.f32.mrb[52].mxu0  ;;  %v2097_v25 = vld [vmem:[%s10420_s10 + $0x200] sm:$0xff] }
 0x158   : > { %v1547_v37 = vadd.f32 %v7717_v35, %v8523_v61  ;;  %v1538_v39 = vpop.f32.mrb[53].mxu0 }
 0x159   : > { %v1539_v14 = vadd.f32 %v8523_v61, %v1538_v39  ;;  %v7718_v40 = vpop.f32.mrb[54].mxu0  ;;  %2866 = vmatmul.mubr.bf16.gmra.mrb[16].mxu1 %v6674_v34  ;;  %7197 = vmatprep.subr.bf16.mxu1 %v1993_v46 }
 0x15a   : > { %v1895_v41 = vmax.f32 %v1547_v37, 0.0  ;;  %v1550_v42 = vadd.f32 %v7718_v40, %v8523_v61  ;;  %v1541_v12 = vpop.f32.mrb[55].mxu0  ;;  %7198 = vmatpush3.bf16.msra.mxu1 %v8612_v2  ;;  %2873 = vmatprep.mubr.bf16.mxu1 %v6683_v44  ;;  %v6691_v2 = vcombine.high %v2081_v50, %v2085_v51  ;;  %v6706_v50 = vcombine.low %v2097_v25, %v2101_v27 }
 0x15b   : > { %v1893_v45 = vmax.f32 %v1539_v14, 0.0  ;;  %v1542_v48 = vadd.f32 %v8523_v61, %v1541_v12  ;;  %7199 = vmatprep.subr.bf16.mxu1 %v1994_v43  ;;  %v2109_v12 = vld [vmem:[%s10420_s10 + $0x260] sm:$0xff] }
 0x15c   : > { %v1896_v52 = vmax.f32 %v1550_v42, 0.0  ;;  %v2105_v42 = vld [vmem:[%s10420_s10 + $0x240] sm:$0xff] }
 0x15d   : > { %v1894_v53 = vmax.f32 %v1542_v48, 0.0 }
 0x15e   : > { %v1996_v55 = vpack.c.bf16 %v1896_v52, %v1895_v41  ;;  %7200 = vmatpush3.bf16.msra.mxu1 %v8609_v17 }
 0x15f   : > { %v1995_v56 = vpack.c.bf16 %v1894_v53, %v1893_v45  ;;  %v7721_v57 = vpop.f32.mrb[56].mxu0 }
 0x160   : > { %v1563_v59 = vadd.f32 %v7721_v57, %v8523_v61  ;;  %v1554_v28 = vpop.f32.mrb[57].mxu0 }
 0x161   : > { %v1555_v60 = vadd.f32 %v8523_v61, %v1554_v28  ;;  %v7722_v62 = vpop.f32.mrb[58].mxu0  ;;  %2874 = vmatmul.mubr.bf16.gmra.mrb[20].mxu1 %v6682_v54  ;;  %7201 = vmatprep.subr.bf16.mxu1 %v1995_v56 }
 0x162   : > { %v1899_v63 = vmax.f32 %v1563_v59, 0.0  ;;  %v1566_v1 = vadd.f32 %v7722_v62, %v8523_v61  ;;  %v1557_v3 = vpop.f32.mrb[59].mxu0  ;;  %7202 = vmatpush3.bf16.msra.mxu1 %v8643_v38  ;;  %2881 = vmatprep.mubr.bf16.mxu1 %v6691_v2  ;;  %v6699_v38 = vcombine.high %v2089_v5, %v2093_v6 }
 0x163   : > { %v1897_v4 = vmax.f32 %v1555_v60, 0.0  ;;  %v1558_v17 = vadd.f32 %v8523_v61, %v1557_v3  ;;  %7203 = vmatprep.subr.bf16.mxu1 %v1996_v55 }
 0x164   : > { %v1900_v7 = vmax.f32 %v1566_v1, 0.0 }
 0x165   : > { %v1898_v49 = vmax.f32 %v1558_v17, 0.0 }
 0x166   : > { %v1998_v9 = vpack.c.bf16 %v1900_v7, %v1899_v63  ;;  %7204 = vmatpush3.bf16.msra.mxu1 %v8641_v36  ;;  %v2117_v63 = vld [vmem:[%s10420_s10 + $0x2a0] sm:$0xff] }
 0x167   : > { %v1997_v10 = vpack.c.bf16 %v1898_v49, %v1897_v4  ;;  %v7725_v47 = vpop.f32.mrb[60].mxu0  ;;  %v6714_v4 = vcombine.low %v2105_v42, %v2109_v12 }
 0x168   : > { %v1579_v15 = vadd.f32 %v7725_v47, %v8523_v61  ;;  %v1570_v16 = vpop.f32.mrb[61].mxu0 }
 0x169   : > { %v1571_v18 = vadd.f32 %v8523_v61, %v1570_v16  ;;  %v7726_v19 = vpop.f32.mrb[62].mxu0  ;;  %2882 = vmatmul.mubr.bf16.gmra.mrb[24].mxu1 %v6690_v8  ;;  %7205 = vmatprep.subr.bf16.mxu1 %v1997_v10 }
 0x16a   : > { %v1903_v22 = vmax.f32 %v1579_v15, 0.0  ;;  %v1582_v23 = vadd.f32 %v7726_v19, %v8523_v61  ;;  %v1573_v0 = vpop.f32.mrb[63].mxu0  ;;  %7206 = vmatpush3.bf16.msra.mxu1 %v8657_v58  ;;  %2889 = vmatprep.mubr.bf16.mxu1 %v6699_v38  ;;  %v6707_v58 = vcombine.high %v2097_v25, %v2101_v27  ;;  %v2121_v19 = vld [vmem:[%s10420_s10 + $0x2c0] sm:$0xff] }
 0x16b   : > { %v1901_v24 = vmax.f32 %v1571_v18, 0.0  ;;  %v1574_v36 = vadd.f32 %v8523_v61, %v1573_v0  ;;  %7207 = vmatprep.subr.bf16.mxu1 %v1998_v9 }
 0x16c   : > { %v1904_v29 = vmax.f32 %v1582_v23, 0.0 }
 0x16d   : > { %v1902_v31 = vmax.f32 %v1574_v36, 0.0 }
 0x16e   : > { %v2000_v33 = vpack.c.bf16 %v1904_v29, %v1903_v22  ;;  %7208 = vmatpush3.bf16.msra.mxu1 %v8655_v30  ;;  %v2125_v22 = vld [vmem:[%s10420_s10 + $0x2e0] sm:$0xff] }
 0x16f   : > { %v1999_v34 = vpack.c.bf16 %v1902_v31, %v1901_v24  ;;  %v7729_v43 = vpop.f32.mrb[64].mxu0  ;;  %v6731_v25 = vcombine.high %v2121_v19, %v2125_v22 }
 0x170   : > { %v1595_v44 = vadd.f32 %v7729_v43, %v8523_v61  ;;  %v1586_v46 = vpop.f32.mrb[65].mxu0 }
 0x171   : > { %v1587_v35 = vadd.f32 %v8523_v61, %v1586_v46  ;;  %v7730_v37 = vpop.f32.mrb[66].mxu0  ;;  %2890 = vmatmul.mubr.bf16.gmra.mrb[28].mxu1 %v6698_v32  ;;  %7209 = vmatprep.subr.bf16.mxu1 %v1999_v34 }
 0x172   : > { %v1907_v39 = vmax.f32 %v1595_v44, 0.0  ;;  %v1598_v14 = vadd.f32 %v7730_v37, %v8523_v61  ;;  %v1589_v40 = vpop.f32.mrb[67].mxu0  ;;  %7210 = vmatpush3.bf16.msra.mxu1 %v8671_v13  ;;  %2897 = vmatprep.mubr.bf16.mxu1 %v6707_v58  ;;  %v6715_v13 = vcombine.high %v2105_v42, %v2109_v12  ;;  %v2129_v37 = vld [vmem:[%s10420_s10 + $0x300] sm:$0xff] }
 0x173   : > { %v1905_v41 = vmax.f32 %v1587_v35, 0.0  ;;  %v1590_v30 = vadd.f32 %v8523_v61, %v1589_v40  ;;  %7211 = vmatprep.subr.bf16.mxu1 %v2000_v33 }
 0x174   : > { %v1908_v45 = vmax.f32 %v1598_v14, 0.0 }
 0x175   : > { %v1906_v48 = vmax.f32 %v1590_v30, 0.0 }
 0x176   : > { %v8730_v51 = vpack.c.bf16 %v1908_v45, %v1907_v39  ;;  %7212 = vmatpush3.bf16.msra.mxu1 %v8669_v11  ;;  %v2113_v11 = vld [vmem:[%s10420_s10 + $0x280] sm:$0xff] }
 0x177   : > { %v8733_v52 = vpack.c.bf16 %v1906_v48, %v1905_v41  ;;  %v7733_v53 = vpop.f32.mrb[68].mxu0  ;;  %v6723_v5 = vcombine.high %v2113_v11, %v2117_v63  ;;  %v6722_v24 = vcombine.low %v2113_v11, %v2117_v63  ;;  %v2133_v39 = vld [vmem:[%s10420_s10 + $0x320] sm:$0xff]  ;;  %v6730_v41 = vcombine.low %v2121_v19, %v2125_v22 }
 0x178   : > { %v1611_v54 = vadd.f32 %v7733_v53, %v8523_v61  ;;  %v1602_v55 = vpop.f32.mrb[69].mxu0  ;;  %v6739_v42 = vcombine.high %v2129_v37, %v2133_v39  ;;  %v6738_v11 = vcombine.low %v2129_v37, %v2133_v39 }
 0x179   : > { %v1603_v2 = vadd.f32 %v8523_v61, %v1602_v55  ;;  %v7734_v56 = vpop.f32.mrb[70].mxu0  ;;  %2898 = vmatmul.mubr.bf16.gmra.mrb[32].mxu1 %v6706_v50 }
 0x17a   : > { %v1911_v57 = vmax.f32 %v1611_v54, 0.0  ;;  %v1614_v59 = vadd.f32 %v7734_v56, %v8523_v61  ;;  %v1605_v28 = vpop.f32.mrb[71].mxu0  ;;  %2905 = vmatprep.mubr.bf16.mxu1 %v6715_v13 }
 0x17b   : > { %v1909_v60 = vmax.f32 %v1603_v2, 0.0  ;;  %v1606_v62 = vadd.f32 %v8523_v61, %v1605_v28  ;;  %v2141_v28 = vld [vmem:[%s10420_s10 + $0x360] sm:$0xff] }
 0x17c   : > { %v1912_v1 = vmax.f32 %v1614_v59, 0.0  ;;  %v2137_v59 = vld [vmem:[%s10420_s10 + $0x340] sm:$0xff] }
 0x17d   : > { %v1910_v3 = vmax.f32 %v1606_v62, 0.0 }
 0x17e   : > { %v8745_v17 = vpack.c.bf16 %v1912_v1, %v1911_v57  ;;  %v6747_v1 = vcombine.high %v2137_v59, %v2141_v28 }
 0x17f   : > { %v8747_v6 = vpack.c.bf16 %v1910_v3, %v1909_v60  ;;  %v7737_v7 = vpop.f32.mrb[72].mxu0 }
 0x180   : > { %v1627_v49 = vadd.f32 %v7737_v7, %v8523_v61  ;;  %v1618_v8 = vpop.f32.mrb[73].mxu0 }
 0x181   : > { %v1619_v9 = vadd.f32 %v8523_v61, %v1618_v8  ;;  %v7738_v38 = vpop.f32.mrb[74].mxu0  ;;  %2906 = vmatmul.mubr.bf16.gmra.mrb[36].mxu1 %v6714_v4 }
 0x182   : > { %v1915_v10 = vmax.f32 %v1627_v49, 0.0  ;;  %v1630_v47 = vadd.f32 %v7738_v38, %v8523_v61  ;;  %v1621_v15 = vpop.f32.mrb[75].mxu0  ;;  %2913 = vmatprep.mubr.bf16.mxu1 %v6723_v5 }
 0x183   : > { %v1913_v16 = vmax.f32 %v1619_v9, 0.0  ;;  %v1622_v18 = vadd.f32 %v8523_v61, %v1621_v15 }
 0x184   : > { %v1916_v23 = vmax.f32 %v1630_v47, 0.0 }
 0x185   : > { %v1914_v0 = vmax.f32 %v1622_v18, 0.0  ;;  %v2149_v18 = vld [vmem:[%s10420_s10 + $0x3a0] sm:$0xff] }
 0x186   : > { %v8759_v36 = vpack.c.bf16 %v1916_v23, %v1915_v10  ;;  %v6746_v23 = vcombine.low %v2137_v59, %v2141_v28 }
 0x187   : > { %v8761_v27 = vpack.c.bf16 %v1914_v0, %v1913_v16  ;;  %v7741_v29 = vpop.f32.mrb[76].mxu0  ;;  %v2145_v16 = vld [vmem:[%s10420_s10 + $0x380] sm:$0xff] }
 0x188   : > { %v1643_v31 = vadd.f32 %v7741_v29, %v8523_v61  ;;  %v1634_v32 = vpop.f32.mrb[77].mxu0 }
 0x189   : > { %v1635_v33 = vadd.f32 %v8523_v61, %v1634_v32  ;;  %v7742_v58 = vpop.f32.mrb[78].mxu0  ;;  %2914 = vmatmul.mubr.bf16.gmra.mrb[40].mxu1 %v6722_v24 }
 0x18a   : > { %v1919_v34 = vmax.f32 %v1643_v31, 0.0  ;;  %v1646_v43 = vadd.f32 %v7742_v58, %v8523_v61  ;;  %v1637_v44 = vpop.f32.mrb[79].mxu0  ;;  %2921 = vmatprep.mubr.bf16.mxu1 %v6731_v25 }
 0x18b   : > { %v1917_v46 = vmax.f32 %v1635_v33, 0.0  ;;  %v1638_v35 = vadd.f32 %v8523_v61, %v1637_v44 }
 0x18c   : > { %v1920_v14 = vmax.f32 %v1646_v43, 0.0 }
 0x18d   : > { %v1918_v40 = vmax.f32 %v1638_v35, 0.0  ;;  %v2157_v35 = vld [vmem:[%s10420_s10 + $0x3e0] sm:$0xff] }
 0x18e   : > { %v8773_v30 = vpack.c.bf16 %v1920_v14, %v1919_v34  ;;  %v6754_v14 = vcombine.low %v2145_v16, %v2149_v18 }
 0x18f   : > { %v8775_v12 = vpack.c.bf16 %v1918_v40, %v1917_v46  ;;  %v7745_v45 = vpop.f32.mrb[80].mxu0  ;;  %v2153_v46 = vld [vmem:[%s10420_s10 + $0x3c0] sm:$0xff] }
 0x190   : > { %v1659_v48 = vadd.f32 %v7745_v45, %v8523_v61  ;;  %v1650_v50 = vpop.f32.mrb[81].mxu0 }
 0x191   : > { %v1651_v13 = vadd.f32 %v8523_v61, %v1650_v50  ;;  %v7746_v53 = vpop.f32.mrb[82].mxu0  ;;  %2922 = vmatmul.mubr.bf16.gmra.mrb[44].mxu1 %v6730_v41 }
 0x192   : > { %v1923_v54 = vmax.f32 %v1659_v48, 0.0  ;;  %v1662_v55 = vadd.f32 %v7746_v53, %v8523_v61  ;;  %v1653_v2 = vpop.f32.mrb[83].mxu0  ;;  %2929 = vmatprep.mubr.bf16.mxu1 %v6739_v42 }
 0x193   : > { %v1921_v56 = vmax.f32 %v1651_v13, 0.0  ;;  %v1654_v57 = vadd.f32 %v8523_v61, %v1653_v2 }
 0x194   : > { %v1924_v60 = vmax.f32 %v1662_v55, 0.0 }
 0x195   : > { %v1922_v62 = vmax.f32 %v1654_v57, 0.0  ;;  %v2038_v57 = vld [vmem:[%s10420_s10 + $0x28] sm:$0xff] }
 0x196   : > { %v2010_v63 = vpack.c.bf16 %v1924_v60, %v1923_v54  ;;  %v6762_v60 = vcombine.low %v2153_v46, %v2157_v35 }
 0x197   : > { %v2009_v3 = vpack.c.bf16 %v1922_v62, %v1921_v56  ;;  %v7749_v4 = vpop.f32.mrb[84].mxu0  ;;  %v2034_v56 = vld [vmem:[%s10420_s10 + $0x8] sm:$0xff] }
 0x198   : > { %v1675_v5 = vadd.f32 %v7749_v4, %v8523_v61  ;;  %v1666_v7 = vpop.f32.mrb[85].mxu0 }
 0x199   : > { %v1667_v49 = vadd.f32 %v8523_v61, %v1666_v7  ;;  %v7750_v8 = vpop.f32.mrb[86].mxu0  ;;  %2930 = vmatmul.mubr.bf16.gmra.mrb[48].mxu1 %v6738_v11  ;;  %7309 = vmatprep.subr.bf16.mxu0 %v2009_v3  ;;  %v2042_v7 = vld [vmem:[%s10420_s10 + $0x48] sm:$0xff] }
 0x19a   : > { %v1927_v9 = vmax.f32 %v1675_v5, 0.0  ;;  %v1678_v38 = vadd.f32 %v7750_v8, %v8523_v61  ;;  %v1669_v10 = vpop.f32.mrb[87].mxu0  ;;  %7310 = vmatpush3.bf16.msra.mxu0 %v8733_v52  ;;  %2937 = vmatprep.mubr.bf16.mxu1 %v6747_v1  ;;  %v6755_v52 = vcombine.high %v2145_v16, %v2149_v18  ;;  %v6644_v16 = vcombine.low %v2034_v56, %v2038_v57 }
 0x19b   : > { %v1925_v47 = vmax.f32 %v1667_v49, 0.0  ;;  %v1670_v15 = vadd.f32 %v8523_v61, %v1669_v10  ;;  %7311 = vmatprep.subr.bf16.mxu0 %v2010_v63 }
 0x19c   : > { %v1928_v19 = vmax.f32 %v1678_v38, 0.0  ;;  %v2043_v38 = vld [vmem:[%s10420_s10 + $0x50] sm:$0xff] }
 0x19d   : > { %v1926_v22 = vmax.f32 %v1670_v15, 0.0 }
 0x19e   : > { %v2012_v0 = vpack.c.bf16 %v1928_v19, %v1927_v9  ;;  %7312 = vmatpush3.bf16.msra.mxu0 %v8730_v51  ;;  %v2046_v9 = vld [vmem:[%s10420_s10 + $0x68] sm:$0xff] }
 0x19f   : > { %v2011_v24 = vpack.c.bf16 %v1926_v22, %v1925_v47  ;;  %v7753_v25 = vpop.f32.mrb[88].mxu0  ;;  %v8842_v47 = vld [vmem:[%s10439_s23] ss:$0 sm:$0xff]  ;;  %v6653_v19 = vcombine.high %v2042_v7, %v2046_v9 }
 0x1a0   : > { %v1691_v29 = vadd.f32 %v7753_v25, %v8523_v61  ;;  %v1682_v31 = vpop.f32.mrb[89].mxu0 }
 0x1a1   : > { %v1683_v32 = vadd.f32 %v8523_v61, %v1682_v31  ;;  %v7754_v33 = vpop.f32.mrb[90].mxu0  ;;  %2938 = vmatmul.mubr.bf16.gmra.mrb[52].mxu1 %v6746_v23  ;;  %7313 = vmatprep.subr.bf16.mxu0 %v2011_v24 }
 0x1a2   : > { %v1931_v58 = vmax.f32 %v1691_v29, 0.0  ;;  %v1694_v34 = vadd.f32 %v7754_v33, %v8523_v61  ;;  %v1685_v43 = vpop.f32.mrb[91].mxu0  ;;  %7314 = vmatpush3.bf16.msra.mxu0 %v8747_v6  ;;  %2945 = vmatprep.mubr.bf16.mxu1 %v6755_v52  ;;  %v6763_v6 = vcombine.high %v2153_v46, %v2157_v35 }
 0x1a3   : > { %v1929_v44 = vmax.f32 %v1683_v32, 0.0  ;;  %v1686_v51 = vadd.f32 %v8523_v61, %v1685_v43  ;;  %7315 = vmatprep.subr.bf16.mxu0 %v2012_v0 }
 0x1a4   : > { %v1932_v37 = vmax.f32 %v1694_v34, 0.0  ;;  %v2054_v34 = vld [vmem:[%s10420_s10 + $0xa8] sm:$0xff] }
 0x1a5   : > { %v1930_v39 = vmax.f32 %v1686_v51, 0.0  ;;  %v6652_v51 = vcombine.low %v2042_v7, %v2046_v9 }
 0x1a6   : > { %v2014_v40 = vpack.c.bf16 %v1932_v37, %v1931_v58  ;;  %7316 = vmatpush3.bf16.msra.mxu0 %v8745_v17 }
 0x1a7   : > { %v2013_v41 = vpack.c.bf16 %v1930_v39, %v1929_v44  ;;  %v7757_v42 = vpop.f32.mrb[92].mxu0  ;;  %v6663_v39 = vcombine.high %v2051_v20, %v2055_v21 }
 0x1a8   : > { %v1707_v45 = vadd.f32 %v7757_v42, %v8523_v61  ;;  %v1698_v48 = vpop.f32.mrb[93].mxu0 }
 0x1a9   : > { %v1699_v50 = vadd.f32 %v8523_v61, %v1698_v48  ;;  %v7758_v13 = vpop.f32.mrb[94].mxu0  ;;  %2946 = vmatmul.mubr.bf16.gmra.mrb[56].mxu1 %v6754_v14  ;;  %7317 = vmatprep.subr.bf16.mxu0 %v2013_v41 }
 0x1aa   : > { %v1935_v53 = vmax.f32 %v1707_v45, 0.0  ;;  %v1710_v54 = vadd.f32 %v7758_v13, %v8523_v61  ;;  %v1701_v55 = vpop.f32.mrb[95].mxu0  ;;  %7318 = vmatpush3.bf16.msra.mxu0 %v8761_v27  ;;  %2953 = vmatprep.mubr.bf16.mxu1 %v6763_v6  ;;  %v6645_v27 = vcombine.high %v2034_v56, %v2038_v57 }
 0x1ab   : > { %v1933_v2 = vmax.f32 %v1699_v50, 0.0  ;;  %v1702_v17 = vadd.f32 %v8523_v61, %v1701_v55  ;;  %7319 = vmatprep.subr.bf16.mxu0 %v2014_v40  ;;  %v2058_v50 = vld [vmem:[%s10420_s10 + $0xc8] sm:$0xff] }
 0x1ac   : > { %v1936_v59 = vmax.f32 %v1710_v54, 0.0  ;;  %v2062_v55 = vld [vmem:[%s10420_s10 + $0xe8] sm:$0xff] }
 0x1ad   : > { %v1934_v28 = vmax.f32 %v1702_v17, 0.0  ;;  %v2063_v17 = vld [vmem:[%s10420_s10 + $0xf0] sm:$0xff] }
 0x1ae   : > { %v2016_v62 = vpack.c.bf16 %v1936_v59, %v1935_v53  ;;  %7320 = vmatpush3.bf16.msra.mxu0 %v8759_v36 }
 0x1af   : > { %v2015_v11 = vpack.c.bf16 %v1934_v28, %v1933_v2  ;;  %v7761_v63 = vpop.f32.mrb[96].mxu0  ;;  %v2059_v2 = vld [vmem:[%s10420_s10 + $0xd0] sm:$0xff] }
 0x1b0   : > { %v1723_v1 = vadd.f32 %v7761_v63, %v8523_v61  ;;  %v1714_v3 = vpop.f32.mrb[97].mxu0 }
 0x1b1   : > { %2954 = vmatmul.mubr.bf16.gmra.mrb[60].mxu1 %v6762_v60  ;;  %7321 = vmatprep.subr.bf16.mxu0 %v2015_v11  ;;  %v1715_v4 = vadd.f32 %v8523_v61, %v1714_v3  ;;  %v7762_v5 = vpop.f32.mrb[98].mxu0  ;;  %v6662_v60 = vcombine.low %v2051_v20, %v2055_v21  ;;  %v6671_v11 = vcombine.high %v2059_v2, %v2063_v17  ;;  %v2074_v20 = vld [vmem:[%s10420_s10 + $0x148] sm:$0xff] }
 0x1b2   : > { %7322 = vmatpush3.bf16.msra.mxu0 %v8775_v12  ;;  %2994 = vmatprep.mubr.bf16.mxu1 %v6645_v27  ;;  %v1939_v49 = vmax.f32 %v1723_v1, 0.0  ;;  %v1726_v36 = vadd.f32 %v7762_v5, %v8523_v61  ;;  %v1717_v8 = vpop.f32.mrb[99].mxu0  ;;  %v2047_v12 = vld [vmem:[%s10420_s10 + $0x70] sm:$0xff]  ;;  %v6669_v27 = vcombine.high %v2058_v50, %v2062_v55 }
 0x1b3   : > { %7323 = vmatprep.subr.bf16.mxu0 %v2016_v62  ;;  %v1937_v10 = vmax.f32 %v1715_v4, 0.0  ;;  %v1718_v61 = vadd.f32 %v8842_v47, %v1717_v8  ;;  %v6655_v22 = vcombine.high %v2043_v38, %v2047_v12  ;;  %v6654_v46 = vcombine.low %v2043_v38, %v2047_v12  ;;  %v2070_v12 = vld [vmem:[%s10420_s10 + $0x128] sm:$0xff] }
 0x1b4   : > { %v1940_v15 = vmax.f32 %v1726_v36, 0.0  ;;  %v2066_v36 = vld [vmem:[%s10420_s10 + $0x108] sm:$0xff] }
 0x1b5   : > { %v1938_v18 = vmax.f32 %v1718_v61, 0.0  ;;  %v2071_v61 = vld [vmem:[%s10420_s10 + $0x130] sm:$0xff] }
 0x1b6   : > { %7324 = vmatpush3.bf16.msra.mxu0 %v8773_v30  ;;  %v8846_v23 = vpack.c.bf16 %v1940_v15, %v1939_v49  ;;  %v2050_v30 = vld [vmem:[%s10420_s10 + $0x88] sm:$0xff] }
 0x1b7   : > { %v8848_v0 = vpack.c.bf16 %v1938_v18, %v1937_v10  ;;  %v7765_v52 = vpop.f32.mrb[100].mxu0  ;;  %v6661_v37 = vcombine.high %v2050_v30, %v2054_v34  ;;  %v6660_v28 = vcombine.low %v2050_v30, %v2054_v34  ;;  %v2067_v10 = vld [vmem:[%s10420_s10 + $0x110] sm:$0xff] }
 0x1b8   : > { %v1739_v24 = vadd.f32 %v8842_v47, %v7765_v52  ;;  %v1730_v25 = vpop.f32.mrb[101].mxu0 }
 0x1b9   : > { %2995 = vmatmul.mubr.bf16.vlgmr.msra.gmra.mrb[64].mxu1 %v6644_v16  ;;  %3156 = vmatmul.mubr.bf16.vlgmr.msra.gmra.mrb[128].mxu0 %v6646_v26  ;;  %v1731_v29 = vadd.f32 %v8842_v47, %v1730_v25  ;;  %v7766_v31 = vpop.f32.mrb[102].mxu0  ;;  %v6679_v25 = vcombine.high %v2067_v10, %v2071_v61 }
 0x1ba   : > { %3002 = vmatprep.mubr.bf16.mxu1 %v6653_v19  ;;  %3163 = vmatprep.mubr.bf16.mxu0 %v6655_v22  ;;  %v1943_v32 = vmax.f32 %v1739_v24, 0.0  ;;  %v1742_v33 = vadd.f32 %v8842_v47, %v7766_v31  ;;  %v1733_v58 = vpop.f32.mrb[103].mxu0  ;;  %v6668_v19 = vcombine.low %v2058_v50, %v2062_v55  ;;  %v6670_v22 = vcombine.low %v2059_v2, %v2063_v17 }
 0x1bb   : > { %v1941_v26 = vmax.f32 %v1731_v29, 0.0  ;;  %v1734_v43 = vadd.f32 %v8842_v47, %v1733_v58  ;;  %v6677_v24 = vcombine.high %v2066_v36, %v2070_v12 }
 0x1bc   : > { %v1944_v44 = vmax.f32 %v1742_v33, 0.0 }
 0x1bd   : > { %v1942_v35 = vmax.f32 %v1734_v43, 0.0 }
 0x1be   : > { %v8869_v14 = vpack.c.bf16 %v1944_v44, %v1943_v32  ;;  %v2078_v44 = vld [vmem:[%s10420_s10 + $0x168] sm:$0xff] }
 0x1bf   : > { %v8871_v40 = vpack.c.bf16 %v1942_v35, %v1941_v26  ;;  %v7769_v6 = vpop.f32.mrb[104].mxu0 }
 0x1c0   : > { %v1755_v41 = vadd.f32 %v8842_v47, %v7769_v6  ;;  %v1746_v42 = vpop.f32.mrb[105].mxu0  ;;  %v6676_v6 = vcombine.low %v2066_v36, %v2070_v12 }
 0x1c1   : > { %3003 = vmatmul.mubr.bf16.gmra.mrb[68].mxu1 %v6652_v51  ;;  %3164 = vmatmul.mubr.bf16.gmra.mrb[132].mxu0 %v6654_v46  ;;  %v1747_v45 = vadd.f32 %v8842_v47, %v1746_v42  ;;  %v7770_v48 = vpop.f32.mrb[106].mxu0  ;;  %v2075_v51 = vld [vmem:[%s10420_s10 + $0x150] sm:$0xff] }
 0x1c2   : > { %3010 = vmatprep.mubr.bf16.mxu1 %v6661_v37  ;;  %3171 = vmatprep.mubr.bf16.mxu0 %v6663_v39  ;;  %v1947_v13 = vmax.f32 %v1755_v41, 0.0  ;;  %v1758_v53 = vadd.f32 %v8842_v47, %v7770_v48  ;;  %v1749_v54 = vpop.f32.mrb[107].mxu0  ;;  %v2079_v46 = vld [vmem:[%s10420_s10 + $0x170] sm:$0xff]  ;;  %v6678_v41 = vcombine.low %v2067_v10, %v2071_v61 }
 0x1c3   : > { %v1945_v56 = vmax.f32 %v1747_v45, 0.0  ;;  %v1750_v57 = vadd.f32 %v8842_v47, %v1749_v54  ;;  %v6685_v45 = vcombine.high %v2074_v20, %v2078_v44  ;;  %v6687_v48 = vcombine.high %v2075_v51, %v2079_v46 }
 0x1c4   : > { %v1948_v59 = vmax.f32 %v1758_v53, 0.0 }
 0x1c5   : > { %v1946_v62 = vmax.f32 %v1750_v57, 0.0 }
 0x1c6   : > { %v8889_v63 = vpack.c.bf16 %v1948_v59, %v1947_v13 }
 0x1c7   : > { %v8891_v1 = vpack.c.bf16 %v1946_v62, %v1945_v56  ;;  %v7773_v3 = vpop.f32.mrb[108].mxu0  ;;  %v2082_v56 = vld [vmem:[%s10420_s10 + $0x188] sm:$0xff]  ;;  %v2083_v62 = vld [vmem:[%s10420_s10 + $0x190] sm:$0xff] }
 0x1c8   : > { %v1771_v4 = vadd.f32 %v8842_v47, %v7773_v3  ;;  %v1762_v5 = vpop.f32.mrb[109].mxu0 }
 0x1c9   : > { %3011 = vmatmul.mubr.bf16.gmra.mrb[72].mxu1 %v6660_v28  ;;  %3172 = vmatmul.mubr.bf16.gmra.mrb[136].mxu0 %v6662_v60  ;;  %v1763_v7 = vadd.f32 %v8842_v47, %v1762_v5  ;;  %v7774_v49 = vpop.f32.mrb[110].mxu0  ;;  %v2086_v60 = vld [vmem:[%s10420_s10 + $0x1a8] sm:$0xff]  ;;  %v6684_v5 = vcombine.low %v2074_v20, %v2078_v44 }
 0x1ca   : > { %3018 = vmatprep.mubr.bf16.mxu1 %v6669_v27  ;;  %3179 = vmatprep.mubr.bf16.mxu0 %v6671_v11  ;;  %v1951_v8 = vmax.f32 %v1771_v4, 0.0  ;;  %v1774_v9 = vadd.f32 %v8842_v47, %v7774_v49  ;;  %v1765_v38 = vpop.f32.mrb[111].mxu0  ;;  %v2087_v27 = vld [vmem:[%s10420_s10 + $0x1b0] sm:$0xff]  ;;  %v6693_v36 = vcombine.high %v2082_v56, %v2086_v60 }
 0x1cb   : > { %v1949_v15 = vmax.f32 %v1763_v7, 0.0  ;;  %v1766_v16 = vadd.f32 %v8842_v47, %v1765_v38  ;;  %v6686_v7 = vcombine.low %v2075_v51, %v2079_v46 }
 0x1cc   : > { %v1952_v18 = vmax.f32 %v1774_v9, 0.0 }
 0x1cd   : > { %v1950_v52 = vmax.f32 %v1766_v16, 0.0 }
 0x1ce   : > { %v8909_v29 = vpack.c.bf16 %v1952_v18, %v1951_v8  ;;  %v6695_v8 = vcombine.high %v2083_v62, %v2087_v27 }
 0x1cf   : > { %v8911_v31 = vpack.c.bf16 %v1950_v52, %v1949_v15  ;;  %v7777_v30 = vpop.f32.mrb[112].mxu0  ;;  %v2091_v52 = vld [vmem:[%s10420_s10 + $0x1d0] sm:$0xff] }
 0x1d0   : > { %v1787_v32 = vadd.f32 %v8842_v47, %v7777_v30  ;;  %v1778_v33 = vpop.f32.mrb[113].mxu0 }
 0x1d1   : > { %3019 = vmatmul.mubr.bf16.gmra.mrb[76].mxu1 %v6668_v19  ;;  %3180 = vmatmul.mubr.bf16.gmra.mrb[140].mxu0 %v6670_v22  ;;  %v1779_v58 = vadd.f32 %v8842_v47, %v1778_v33  ;;  %v7778_v34 = vpop.f32.mrb[114].mxu0  ;;  %v6692_v33 = vcombine.low %v2082_v56, %v2086_v60 }
 0x1d2   : > { %3026 = vmatprep.mubr.bf16.mxu1 %v6677_v24  ;;  %3187 = vmatprep.mubr.bf16.mxu0 %v6679_v25  ;;  %v1955_v21 = vmax.f32 %v1787_v32, 0.0  ;;  %v1790_v26 = vadd.f32 %v8842_v47, %v7778_v34  ;;  %v1781_v43 = vpop.f32.mrb[115].mxu0  ;;  %v2095_v24 = vld [vmem:[%s10420_s10 + $0x1f0] sm:$0xff] }
 0x1d3   : > { %v1953_v35 = vmax.f32 %v1779_v58, 0.0  ;;  %v1782_v37 = vadd.f32 %v8842_v47, %v1781_v43  ;;  %v6694_v58 = vcombine.low %v2083_v62, %v2087_v27 }
 0x1d4   : > { %v1956_v39 = vmax.f32 %v1790_v26, 0.0 }
 0x1d5   : > { %v1954_v42 = vmax.f32 %v1782_v37, 0.0 }
 0x1d6   : > { %v2026_v50 = vpack.c.bf16 %v1956_v39, %v1955_v21  ;;  %v6703_v21 = vcombine.high %v2091_v52, %v2095_v24 }
 0x1d7   : > { %v2025_v13 = vpack.c.bf16 %v1954_v42, %v1953_v35  ;;  %v7781_v53 = vpop.f32.mrb[116].mxu0  ;;  %v2099_v42 = vld [vmem:[%s10420_s10 + $0x210] sm:$0xff] }
 0x1d8   : > { %v1803_v54 = vadd.f32 %v8842_v47, %v7781_v53  ;;  %v1794_v55 = vpop.f32.mrb[117].mxu0 }
 0x1d9   : > { %3027 = vmatmul.mubr.bf16.gmra.mrb[80].mxu1 %v6676_v6  ;;  %3188 = vmatmul.mubr.bf16.gmra.mrb[144].mxu0 %v6678_v41  ;;  %v1795_v2 = vadd.f32 %v8842_v47, %v1794_v55  ;;  %v7782_v17 = vpop.f32.mrb[118].mxu0 }
 0x1da   : > { %3034 = vmatprep.mubr.bf16.mxu1 %v6685_v45  ;;  %3195 = vmatprep.mubr.bf16.mxu0 %v6687_v48  ;;  %v1959_v57 = vmax.f32 %v1803_v54, 0.0  ;;  %v1806_v59 = vadd.f32 %v8842_v47, %v7782_v17  ;;  %v1797_v28 = vpop.f32.mrb[119].mxu0  ;;  %v2103_v45 = vld [vmem:[%s10420_s10 + $0x230] sm:$0xff]  ;;  %v6702_v54 = vcombine.low %v2091_v52, %v2095_v24 }
 0x1db   : > { %v1957_v11 = vmax.f32 %v1795_v2, 0.0  ;;  %7421 = vmatprep.subr.bf16.mxu1 %v2025_v13  ;;  %v1798_v3 = vadd.f32 %v8842_v47, %v1797_v28  ;;  %v6711_v17 = vcombine.high %v2099_v42, %v2103_v45  ;;  %v6710_v60 = vcombine.low %v2099_v42, %v2103_v45  ;;  %v2146_v42 = vld [vmem:[%s10420_s10 + $0x388] sm:$0xff] }
 0x1dc   : > { %v1960_v4 = vmax.f32 %v1806_v59, 0.0  ;;  %7422 = vmatpush3.bf16.msra.mxu1 %v8848_v0  ;;  %v2090_v0 = vld [vmem:[%s10420_s10 + $0x1c8] sm:$0xff]  ;;  %v2107_v59 = vld [vmem:[%s10420_s10 + $0x250] sm:$0xff] }
 0x1dd   : > { %v1958_v49 = vmax.f32 %v1798_v3, 0.0  ;;  %7423 = vmatprep.subr.bf16.mxu1 %v2026_v50  ;;  %v2118_v3 = vld [vmem:[%s10420_s10 + $0x2a8] sm:$0xff] }
 0x1de   : > { %v2028_v9 = vpack.c.bf16 %v1960_v4, %v1959_v57  ;;  %v2150_v45 = vld [vmem:[%s10420_s10 + $0x3a8] sm:$0xff] }
 0x1df   : > { %v2027_v38 = vpack.c.bf16 %v1958_v49, %v1957_v11  ;;  %v7785_v12 = vpop.f32.mrb[120].mxu0  ;;  %v2114_v11 = vld [vmem:[%s10420_s10 + $0x288] sm:$0xff] }
 0x1e0   : > { %7424 = vmatpush3.bf16.msra.mxu1 %v8846_v23  ;;  %v1819_v10 = vadd.f32 %v8842_v47, %v7785_v12  ;;  %v1810_v61 = vpop.f32.mrb[121].mxu0  ;;  %v2094_v23 = vld [vmem:[%s10420_s10 + $0x1e8] sm:$0xff]  ;;  %v6724_v12 = vcombine.low %v2114_v11, %v2118_v3 }
 0x1e1   : > { %3035 = vmatmul.mubr.bf16.gmra.mrb[84].mxu1 %v6684_v5  ;;  %3196 = vmatmul.mubr.bf16.gmra.mrb[148].mxu0 %v6686_v7  ;;  %v1811_v15 = vadd.f32 %v8842_v47, %v1810_v61  ;;  %v7786_v16 = vpop.f32.mrb[122].mxu0  ;;  %v6701_v20 = vcombine.high %v2090_v0, %v2094_v23  ;;  %v6700_v53 = vcombine.low %v2090_v0, %v2094_v23  ;;  %v2134_v0 = vld [vmem:[%s10420_s10 + $0x328] sm:$0xff] }
 0x1e2   : > { %3042 = vmatprep.mubr.bf16.mxu1 %v6693_v36  ;;  %3203 = vmatprep.mubr.bf16.mxu0 %v6695_v8  ;;  %v1963_v18 = vmax.f32 %v1819_v10, 0.0  ;;  %v1822_v19 = vadd.f32 %v8842_v47, %v7786_v16  ;;  %v1813_v22 = vpop.f32.mrb[123].mxu0  ;;  %v6725_v7 = vcombine.high %v2114_v11, %v2118_v3  ;;  %v2122_v36 = vld [vmem:[%s10420_s10 + $0x2c8] sm:$0xff] }
 0x1e3   : > { %v1961_v25 = vmax.f32 %v1811_v15, 0.0  ;;  %7425 = vmatprep.subr.bf16.mxu1 %v2027_v38  ;;  %v1814_v30 = vadd.f32 %v8842_v47, %v1813_v22  ;;  %v2126_v8 = vld [vmem:[%s10420_s10 + $0x2e8] sm:$0xff]  ;;  %v2127_v38 = vld [vmem:[%s10420_s10 + $0x2f0] sm:$0xff] }
 0x1e4   : > { %v1964_v32 = vmax.f32 %v1822_v19, 0.0  ;;  %7426 = vmatpush3.bf16.msra.mxu1 %v8871_v40  ;;  %v2098_v40 = vld [vmem:[%s10420_s10 + $0x208] sm:$0xff]  ;;  %v6733_v61 = vcombine.high %v2122_v36, %v2126_v8  ;;  %v2135_v19 = vld [vmem:[%s10420_s10 + $0x330] sm:$0xff]  ;;  %v6732_v23 = vcombine.low %v2122_v36, %v2126_v8  ;;  %v2036_v36 = vld [vmem:[%s10420_s10 + $0x18] sm:$0xff] }
 0x1e5   : > { %v1962_v34 = vmax.f32 %v1814_v30, 0.0  ;;  %7427 = vmatprep.subr.bf16.mxu1 %v2028_v9  ;;  %v2123_v9 = vld [vmem:[%s10420_s10 + $0x2d0] sm:$0xff]  ;;  %v2130_v16 = vld [vmem:[%s10420_s10 + $0x308] sm:$0xff]  ;;  %v2040_v8 = vld [vmem:[%s10420_s10 + $0x38] sm:$0xff] }
 0x1e6   : > { %v2030_v26 = vpack.c.bf16 %v1964_v32, %v1963_v18  ;;  %v6735_v15 = vcombine.high %v2123_v9, %v2127_v38  ;;  %v2131_v18 = vld [vmem:[%s10420_s10 + $0x310] sm:$0xff]  ;;  %v6734_v52 = vcombine.low %v2123_v9, %v2127_v38 }
 0x1e7   : > { %v2029_v43 = vpack.c.bf16 %v1962_v34, %v1961_v25  ;;  %v7789_v44 = vpop.f32.mrb[124].mxu0  ;;  %v6741_v25 = vcombine.high %v2130_v16, %v2134_v0  ;;  %v6743_v30 = vcombine.high %v2131_v18, %v2135_v19 }
 0x1e8   : > { %7428 = vmatpush3.bf16.msra.mxu1 %v8869_v14  ;;  %v1835_v51 = vadd.f32 %v8842_v47, %v7789_v44  ;;  %v1826_v46 = vpop.f32.mrb[125].mxu0  ;;  %v2102_v14 = vld [vmem:[%s10420_s10 + $0x228] sm:$0xff] }
 0x1e9   : > { %3043 = vmatmul.mubr.bf16.gmra.mrb[88].mxu1 %v6692_v33  ;;  %3204 = vmatmul.mubr.bf16.gmra.mrb[152].mxu0 %v6694_v58  ;;  %v1827_v35 = vadd.f32 %v8842_v47, %v1826_v46  ;;  %v7790_v37 = vpop.f32.mrb[126].mxu0  ;;  %v6709_v2 = vcombine.high %v2098_v40, %v2102_v14  ;;  %v6708_v28 = vcombine.low %v2098_v40, %v2102_v14 }
 0x1ea   : > { %3050 = vmatprep.mubr.bf16.mxu1 %v6701_v20  ;;  %3211 = vmatprep.mubr.bf16.mxu0 %v6703_v21  ;;  %v1967_v39 = vmax.f32 %v1835_v51, 0.0  ;;  %v1838_v6 = vadd.f32 %v8842_v47, %v7790_v37  ;;  %v1829_v41 = vpop.f32.mrb[127].mxu0  ;;  %v2138_v20 = vld [vmem:[%s10420_s10 + $0x348] sm:$0xff]  ;;  %v6740_v51 = vcombine.low %v2130_v16, %v2134_v0  ;;  %v6742_v46 = vcombine.low %v2131_v18, %v2135_v19  ;;  %v2044_v19 = vld [vmem:[%s10420_s10 + $0x58] sm:$0xff] }
 0x1eb   : > { %v1965_v48 = vmax.f32 %v1827_v35, 0.0  ;;  %7429 = vmatprep.subr.bf16.mxu1 %v2029_v43  ;;  %v1830_v50 = vadd.f32 %v8842_v47, %v1829_v41  ;;  %v2106_v47 = vld [vmem:[%s10420_s10 + $0x248] sm:$0xff]  ;;  %v2143_v43 = vld [vmem:[%s10420_s10 + $0x370] sm:$0xff] }
 0x1ec   : > { %v1968_v13 = vmax.f32 %v1838_v6, 0.0  ;;  %7430 = vmatpush3.bf16.msra.mxu1 %v8891_v1  ;;  %v2110_v1 = vld [vmem:[%s10420_s10 + $0x268] sm:$0xff] }
 0x1ed   : > { %v1966_v55 = vmax.f32 %v1830_v50, 0.0  ;;  %7431 = vmatprep.subr.bf16.mxu1 %v2030_v26  ;;  %v6717_v62 = vcombine.high %v2106_v47, %v2110_v1  ;;  %v6716_v4 = vcombine.low %v2106_v47, %v2110_v1  ;;  %v2142_v21 = vld [vmem:[%s10420_s10 + $0x368] sm:$0xff]  ;;  %v2139_v26 = vld [vmem:[%s10420_s10 + $0x350] sm:$0xff] }
 0x1ee   : > { %v2032_v56 = vpack.c.bf16 %v1968_v13, %v1967_v39  ;;  %v6749_v37 = vcombine.high %v2138_v20, %v2142_v21  ;;  %v6751_v40 = vcombine.high %v2139_v26, %v2143_v43  ;;  %v2151_v50 = vld [vmem:[%s10420_s10 + $0x3b0] sm:$0xff] }
 0x1ef   : > { %v2031_v57 = vpack.c.bf16 %v1966_v55, %v1965_v48  ;;  %v2147_v48 = vld [vmem:[%s10420_s10 + $0x390] sm:$0xff] }
 0x1f0   : > { %7432 = vmatpush3.bf16.msra.mxu1 %v8889_v63  ;;  %v2111_v63 = vld [vmem:[%s10420_s10 + $0x270] sm:$0xff]  ;;  %v6758_v11 = vcombine.low %v2147_v48, %v2151_v50 }
 0x1f1   : > { %3051 = vmatmul.mubr.bf16.gmra.mrb[92].mxu1 %v6700_v53  ;;  %3212 = vmatmul.mubr.bf16.gmra.mrb[156].mxu0 %v6702_v54  ;;  %v6719_v27 = vcombine.high %v2107_v59, %v2111_v63  ;;  %v6718_v5 = vcombine.low %v2107_v59, %v2111_v63  ;;  %v6748_v53 = vcombine.low %v2138_v20, %v2142_v21  ;;  %v2154_v59 = vld [vmem:[%s10420_s10 + $0x3c8] sm:$0xff]  ;;  %v2052_v21 = vld [vmem:[%s10420_s10 + $0x98] sm:$0xff] }
 0x1f2   : > { %3058 = vmatprep.mubr.bf16.mxu1 %v6709_v2  ;;  %3219 = vmatprep.mubr.bf16.mxu0 %v6711_v17  ;;  %v6750_v54 = vcombine.low %v2139_v26, %v2143_v43  ;;  %v6757_v2 = vcombine.high %v2146_v42, %v2150_v45  ;;  %v6759_v17 = vcombine.high %v2147_v48, %v2151_v50  ;;  %v2158_v63 = vld [vmem:[%s10420_s10 + $0x3e8] sm:$0xff]  ;;  %v2056_v26 = vld [vmem:[%s10420_s10 + $0xb8] sm:$0xff] }
 0x1f3   : > { %7433 = vmatprep.subr.bf16.mxu1 %v2031_v57  ;;  %v6764_v38 = vcombine.low %v2154_v59, %v2158_v63  ;;  %v6664_v48 = vcombine.low %v2052_v21, %v2056_v26 }
 0x1f4   : > { %7434 = vmatpush3.bf16.msra.mxu1 %v8911_v31  ;;  %v2115_v31 = vld [vmem:[%s10420_s10 + $0x290] sm:$0xff] }
 0x1f5   : > { %7435 = vmatprep.subr.bf16.mxu1 %v2032_v56 }
 0x1f8   : > { %7436 = vmatpush3.bf16.msra.mxu1 %v8909_v29  ;;  %v2119_v29 = vld [vmem:[%s10420_s10 + $0x2b0] sm:$0xff] }
 0x1f9   : > { %3059 = vmatmul.mubr.bf16.gmra.mrb[96].mxu1 %v6708_v28  ;;  %3220 = vmatmul.mubr.bf16.gmra.mrb[160].mxu0 %v6710_v60  ;;  %v6727_v49 = vcombine.high %v2115_v31, %v2119_v29  ;;  %v6726_v10 = vcombine.low %v2115_v31, %v2119_v29  ;;  %v2155_v28 = vld [vmem:[%s10420_s10 + $0x3d0] sm:$0xff]  ;;  %v6765_v31 = vcombine.high %v2154_v59, %v2158_v63 }
 0x1fa   : > { %3066 = vmatprep.mubr.bf16.mxu1 %v6717_v62  ;;  %3227 = vmatprep.mubr.bf16.mxu0 %v6719_v27  ;;  %v2159_v60 = vld [vmem:[%s10420_s10 + $0x3f0] sm:$0xff]  ;;  %v6756_v27 = vcombine.low %v2146_v42, %v2150_v45  ;;  %v2064_v42 = vld [vmem:[%s10420_s10 + $0xf8] sm:$0xff] }
 0x1fb   : > { %v6767_v29 = vcombine.high %v2155_v28, %v2159_v60 }
 0x201   : > { %3067 = vmatmul.mubr.bf16.gmra.mrb[100].mxu1 %v6716_v4  ;;  %3228 = vmatmul.mubr.bf16.gmra.mrb[164].mxu0 %v6718_v5 }
 0x202   : > { %3074 = vmatprep.mubr.bf16.mxu1 %v6725_v7  ;;  %3235 = vmatprep.mubr.bf16.mxu0 %v6727_v49 }
 0x209   : > { %3075 = vmatmul.mubr.bf16.gmra.mrb[104].mxu1 %v6724_v12  ;;  %3236 = vmatmul.mubr.bf16.gmra.mrb[168].mxu0 %v6726_v10  ;;  %v6766_v12 = vcombine.low %v2155_v28, %v2159_v60 }
 0x20a   : > { %3082 = vmatprep.mubr.bf16.mxu1 %v6733_v61  ;;  %3243 = vmatprep.mubr.bf16.mxu0 %v6735_v15  ;;  %v6649_v61 = vcombine.high %v2036_v36, %v2040_v8 }
 0x20c   : > { %v7101_v22 = vpop.f32.mrb[0].mxu1 }
 0x20d   : > { %v7102_v24 = vpop.f32.mrb[1].mxu1 }
 0x20e   : > { %v9033_v32 = vadd.f32 %v7102_v24, %v7101_v22  ;;  %v7104_v33 = vpop.f32.mrb[2].mxu1  ;;  %v2048_v22 = vld [vmem:[%s10420_s10 + $0x78] sm:$0xff] }
 0x20f   : > { %v7105_v58 = vpop.f32.mrb[3].mxu1 }
 0x210   : > { %v9035_v34 = vadd.f32 %v7105_v58, %v7104_v33 }
 0x211   : > { %3083 = vmatmul.mubr.bf16.gmra.mrb[108].mxu1 %v6732_v23  ;;  %3244 = vmatmul.mubr.bf16.gmra.mrb[172].mxu0 %v6734_v52  ;;  %v6648_v52 = vcombine.low %v2036_v36, %v2040_v8 }
 0x212   : > { %3090 = vmatprep.mubr.bf16.mxu1 %v6741_v25  ;;  %3251 = vmatprep.mubr.bf16.mxu0 %v6743_v30  ;;  %v6657_v25 = vcombine.high %v2044_v19, %v2048_v22 }
 0x214   : > { %v7107_v44 = vpop.f32.mrb[4].mxu1 }
 0x215   : > { %v7108_v35 = vpop.f32.mrb[5].mxu1 }
 0x216   : > { %v9049_v39 = vadd.f32 %v7108_v35, %v7107_v44  ;;  %v7110_v6 = vpop.f32.mrb[6].mxu1  ;;  %v6656_v44 = vcombine.low %v2044_v19, %v2048_v22 }
 0x217   : > { %v7111_v41 = vpop.f32.mrb[7].mxu1 }
 0x218   : > { %v9051_v14 = vadd.f32 %v7111_v41, %v7110_v6  ;;  %v2060_v41 = vld [vmem:[%s10420_s10 + $0xd8] sm:$0xff] }
 0x219   : > { %3091 = vmatmul.mubr.bf16.gmra.mrb[112].mxu1 %v6740_v51  ;;  %3252 = vmatmul.mubr.bf16.gmra.mrb[176].mxu0 %v6742_v46  ;;  %v6665_v46 = vcombine.high %v2052_v21, %v2056_v26  ;;  %v6672_v59 = vcombine.low %v2060_v41, %v2064_v42 }
 0x21a   : > { %3098 = vmatprep.mubr.bf16.mxu1 %v6749_v37  ;;  %3259 = vmatprep.mubr.bf16.mxu0 %v6751_v40 }
 0x21c   : > { %v7113_v13 = vpop.f32.mrb[8].mxu1 }
 0x21d   : > { %v7114_v55 = vpop.f32.mrb[9].mxu1 }
 0x21e   : > { %v9065_v56 = vadd.f32 %v7114_v55, %v7113_v13  ;;  %v7116_v57 = vpop.f32.mrb[10].mxu1  ;;  %v6673_v13 = vcombine.high %v2060_v41, %v2064_v42  ;;  %v2100_v41 = vld [vmem:[%s10420_s10 + $0x218] sm:$0xff] }
 0x21f   : > { %v7117_v47 = vpop.f32.mrb[11].mxu1  ;;  %v2104_v42 = vld [vmem:[%s10420_s10 + $0x238] sm:$0xff] }
 0x220   : > { %v9067_v1 = vadd.f32 %v7117_v47, %v7116_v57  ;;  %v2072_v57 = vld [vmem:[%s10420_s10 + $0x138] sm:$0xff] }
 0x221   : > { %3099 = vmatmul.mubr.bf16.gmra.mrb[116].mxu1 %v6748_v53  ;;  %3260 = vmatmul.mubr.bf16.gmra.mrb[180].mxu0 %v6750_v54 }
 0x222   : > { %3106 = vmatprep.mubr.bf16.mxu1 %v6757_v2  ;;  %3267 = vmatprep.mubr.bf16.mxu0 %v6759_v17  ;;  %v2068_v17 = vld [vmem:[%s10420_s10 + $0x118] sm:$0xff] }
 0x223   : > { %v6681_v28 = vcombine.high %v2068_v17, %v2072_v57 }
 0x224   : > { %v7119_v62 = vpop.f32.mrb[12].mxu1 }
 0x225   : > { %v7120_v3 = vpop.f32.mrb[13].mxu1 }
 0x226   : > { %v9081_v4 = vadd.f32 %v7120_v3, %v7119_v62  ;;  %v7122_v5 = vpop.f32.mrb[14].mxu1  ;;  %v2076_v3 = vld [vmem:[%s10420_s10 + $0x158] sm:$0xff] }
 0x227   : > { %v7123_v7 = vpop.f32.mrb[15].mxu1 }
 0x228   : > { %v9083_v49 = vadd.f32 %v7123_v7, %v7122_v5  ;;  %v6680_v5 = vcombine.low %v2068_v17, %v2072_v57 }
 0x229   : > { %3107 = vmatmul.mubr.bf16.gmra.mrb[120].mxu1 %v6756_v27  ;;  %3268 = vmatmul.mubr.bf16.gmra.mrb[184].mxu0 %v6758_v11 }
 0x22a   : > { %3114 = vmatprep.mubr.bf16.mxu1 %v6765_v31  ;;  %3275 = vmatprep.mubr.bf16.mxu0 %v6767_v29  ;;  %v2080_v31 = vld [vmem:[%s10420_s10 + $0x178] sm:$0xff] }
 0x22b   : > { %v6689_v36 = vcombine.high %v2076_v3, %v2080_v31 }
 0x22c   : > { %v7125_v9 = vpop.f32.mrb[16].mxu1 }
 0x22d   : > { %v7126_v10 = vpop.f32.mrb[17].mxu1 }
 0x22e   : > { %v9091_v15 = vadd.f32 %v7126_v10, %v7125_v9  ;;  %v7128_v16 = vpop.f32.mrb[18].mxu1  ;;  %v2084_v10 = vld [vmem:[%s10420_s10 + $0x198] sm:$0xff] }
 0x22f   : > { %v7129_v0 = vpop.f32.mrb[19].mxu1 }
 0x230   : > { %v9093_v18 = vadd.f32 %v7129_v0, %v7128_v16  ;;  %v6688_v0 = vcombine.low %v2076_v3, %v2080_v31 }
 0x231   : > { %3115 = vmatmul.mubr.bf16.gmra.mrb[124].mxu1 %v6764_v38  ;;  %3276 = vmatmul.mubr.bf16.gmra.mrb[188].mxu0 %v6766_v12 }
 0x232   : > { %3316 = vmatprep.mubr.bf16.mxu1 %v6649_v61  ;;  %v2088_v61 = vld [vmem:[%s10420_s10 + $0x1b8] sm:$0xff] }
 0x233   : > { %v6697_v22 = vcombine.high %v2084_v10, %v2088_v61  ;;  %v6696_v26 = vcombine.low %v2084_v10, %v2088_v61 }
 0x234   : > { %v7131_v23 = vpop.f32.mrb[20].mxu1 }
 0x235   : > { %v7132_v24 = vpop.f32.mrb[21].mxu1 }
 0x236   : > { %v9101_v30 = vadd.f32 %v7132_v24, %v7131_v23  ;;  %v7134_v33 = vpop.f32.mrb[22].mxu1 }
 0x237   : > { %v7135_v58 = vpop.f32.mrb[23].mxu1 }
 0x238   : > { %v9103_v20 = vadd.f32 %v7135_v58, %v7134_v33  ;;  %v2092_v33 = vld [vmem:[%s10420_s10 + $0x1d8] sm:$0xff] }
 0x239   : > { %3317 = vmatmul.mubr.bf16.vlgmr.msra.gmra.mrb[128].mxu1 %v6648_v52  ;;  %v2096_v58 = vld [vmem:[%s10420_s10 + $0x1f8] sm:$0xff] }
 0x23a   : > { %3324 = vmatprep.mubr.bf16.mxu1 %v6657_v25 }
 0x23c   : > { %v7137_v43 = vpop.f32.mrb[24].mxu1 }
 0x23d   : > { %v7138_v51 = vpop.f32.mrb[25].mxu1 }
 0x23e   : > { %v9111_v35 = vadd.f32 %v7138_v51, %v7137_v43  ;;  %v7140_v37 = vpop.f32.mrb[26].mxu1 }
 0x23f   : > { %v7141_v40 = vpop.f32.mrb[27].mxu1 }
 0x240   : > { %v9113_v6 = vadd.f32 %v7141_v40, %v7140_v37 }
 0x241   : > { %3325 = vmatmul.mubr.bf16.gmra.mrb[132].mxu1 %v6656_v44  ;;  %v6705_v44 = vcombine.high %v2092_v33, %v2096_v58 }
 0x242   : > { %3332 = vmatprep.mubr.bf16.mxu1 %v6665_v46 }
 0x244   : > { %v7143_v45 = vpop.f32.mrb[28].mxu1 }
 0x245   : > { %v7144_v50 = vpop.f32.mrb[29].mxu1 }
 0x246   : > { %v9121_v53 = vadd.f32 %v7144_v50, %v7143_v45  ;;  %v7146_v54 = vpop.f32.mrb[30].mxu1 }
 0x247   : > { %v7147_v55 = vpop.f32.mrb[31].mxu1 }
 0x248   : > { %v9123_v2 = vadd.f32 %v7147_v55, %v7146_v54 }
 0x249   : > { %3333 = vmatmul.mubr.bf16.gmra.mrb[136].mxu1 %v6664_v48  ;;  %v6704_v48 = vcombine.low %v2092_v33, %v2096_v58 }
 0x24a   : > { %3340 = vmatprep.mubr.bf16.mxu1 %v6673_v13  ;;  %v6713_v13 = vcombine.high %v2100_v41, %v2104_v42 }
 0x24c   : > { %v7149_v47 = vpop.f32.mrb[32].mxu1 }
 0x24d   : > { %v7150_v63 = vpop.f32.mrb[33].mxu1 }
 0x24e   : > { %v9131_v60 = vadd.f32 %v7150_v63, %v7149_v47  ;;  %v7152_v62 = vpop.f32.mrb[34].mxu1  ;;  %v2108_v47 = vld [vmem:[%s10420_s10 + $0x258] sm:$0xff] }
 0x24f   : > { %v7153_v27 = vpop.f32.mrb[35].mxu1 }
 0x250   : > { %v9133_v11 = vadd.f32 %v7153_v27, %v7152_v62 }
 0x251   : > { %3341 = vmatmul.mubr.bf16.gmra.mrb[140].mxu1 %v6672_v59  ;;  %v2112_v59 = vld [vmem:[%s10420_s10 + $0x278] sm:$0xff] }
 0x252   : > { %3348 = vmatprep.mubr.bf16.mxu1 %v6681_v28  ;;  %v6712_v28 = vcombine.low %v2100_v41, %v2104_v42  ;;  %v6721_v27 = vcombine.high %v2108_v47, %v2112_v59  ;;  %v2132_v41 = vld [vmem:[%s10420_s10 + $0x318] sm:$0xff] }
 0x253   : > { %v2136_v42 = vld [vmem:[%s10420_s10 + $0x338] sm:$0xff] }
 0x254   : > { %v7155_v29 = vpop.f32.mrb[36].mxu1 }
 0x255   : > { %v7156_v7 = vpop.f32.mrb[37].mxu1 }
 0x256   : > { %v9141_v8 = vadd.f32 %v7156_v7, %v7155_v29  ;;  %v7158_v9 = vpop.f32.mrb[38].mxu1  ;;  %v2116_v7 = vld [vmem:[%s10420_s10 + $0x298] sm:$0xff] }
 0x257   : > { %v7159_v38 = vpop.f32.mrb[39].mxu1 }
 0x258   : > { %v9143_v12 = vadd.f32 %v7159_v38, %v7158_v9  ;;  %v6720_v38 = vcombine.low %v2108_v47, %v2112_v59 }
 0x259   : > { %3349 = vmatmul.mubr.bf16.gmra.mrb[144].mxu1 %v6680_v5 }
 0x25a   : > { %3356 = vmatprep.mubr.bf16.mxu1 %v6689_v36  ;;  %v2120_v36 = vld [vmem:[%s10420_s10 + $0x2b8] sm:$0xff] }
 0x25c   : > { %v7161_v16 = vpop.f32.mrb[40].mxu1 }
 0x25d   : > { %v7162_v19 = vpop.f32.mrb[41].mxu1 }
 0x25e   : > { %v9151_v23 = vadd.f32 %v7162_v19, %v7161_v16  ;;  %v7164_v52 = vpop.f32.mrb[42].mxu1 }
 0x25f   : > { %v7165_v24 = vpop.f32.mrb[43].mxu1 }
 0x260   : > { %v9153_v25 = vadd.f32 %v7165_v24, %v7164_v52  ;;  %v2124_v52 = vld [vmem:[%s10420_s10 + $0x2d8] sm:$0xff] }
 0x261   : > { %3357 = vmatmul.mubr.bf16.gmra.mrb[148].mxu1 %v6688_v0  ;;  %v6729_v0 = vcombine.high %v2116_v7, %v2120_v36  ;;  %v2128_v24 = vld [vmem:[%s10420_s10 + $0x2f8] sm:$0xff] }
 0x262   : > { %3364 = vmatprep.mubr.bf16.mxu1 %v6697_v22 }
 0x264   : > { %v7167_v21 = vpop.f32.mrb[44].mxu1 }
 0x265   : > { %v7168_v43 = vpop.f32.mrb[45].mxu1 }
 0x266   : > { %v9161_v51 = vadd.f32 %v7168_v43, %v7167_v21  ;;  %v7170_v46 = vpop.f32.mrb[46].mxu1  ;;  %v6728_v21 = vcombine.low %v2116_v7, %v2120_v36 }
 0x267   : > { %v7171_v37 = vpop.f32.mrb[47].mxu1 }
 0x268   : > { %v9163_v40 = vadd.f32 %v7171_v37, %v7170_v46 }
 0x269   : > { %3365 = vmatmul.mubr.bf16.gmra.mrb[152].mxu1 %v6696_v26 }
 0x26a   : > { %3372 = vmatprep.mubr.bf16.mxu1 %v6705_v44  ;;  %v6737_v44 = vcombine.high %v2124_v52, %v2128_v24 }
 0x26c   : > { %v7173_v45 = vpop.f32.mrb[48].mxu1 }
 0x26d   : > { %v7174_v50 = vpop.f32.mrb[49].mxu1 }
 0x26e   : > { %v9171_v54 = vadd.f32 %v7174_v50, %v7173_v45  ;;  %v7176_v55 = vpop.f32.mrb[50].mxu1  ;;  %v8050_v50 = vld [vmem:[%s10414_s4] sm:$0xff]  }
 0x26f   : > { %v7177_v17 = vpop.f32.mrb[51].mxu1  ;;  %7791 = vmatprep.subr.bf16.mxu0 %v8050_v50 }
 0x270   : > { %v9173_v57 = vadd.f32 %v7177_v17, %v7176_v55  ;;  %v6736_v17 = vcombine.low %v2124_v52, %v2128_v24  ;;  %7792 = vmatpush3.bf16.msra.mxu0 %v8050_v50 }
 0x271   : > { %3373 = vmatmul.mubr.bf16.gmra.mrb[156].mxu1 %v6704_v48 }
 0x272   : > { %3380 = vmatprep.mubr.bf16.mxu1 %v6713_v13 }
 0x274   : > { %v7179_v63 = vpop.f32.mrb[52].mxu1 }
 0x275   : > { %v7180_v62 = vpop.f32.mrb[53].mxu1 }
 0x276   : > { %v9181_v3 = vadd.f32 %v7180_v62, %v7179_v63  ;;  %v7182_v31 = vpop.f32.mrb[54].mxu1  ;;  %v6745_v62 = vcombine.high %v2132_v41, %v2136_v42 }
 0x277   : > { %v7183_v29 = vpop.f32.mrb[55].mxu1 }
 0x278   : > { %v9183_v5 = vadd.f32 %v7183_v29, %v7182_v31 }
 0x279   : > { %3381 = vmatmul.mubr.bf16.gmra.mrb[160].mxu1 %v6712_v28 }
 0x27a   : > { %3388 = vmatprep.mubr.bf16.mxu1 %v6721_v27 }
 0x27c   : > { %v7185_v9 = vpop.f32.mrb[56].mxu1 }
 0x27d   : > { %v7186_v10 = vpop.f32.mrb[57].mxu1 }
 0x27e   : > { %v9191_v61 = vadd.f32 %v7186_v10, %v7185_v9  ;;  %v7188_v16 = vpop.f32.mrb[58].mxu1  ;;  %v8051_v9 = vld [vmem:[%s10414_s4 + $0x8] sm:$0xff]  }
 0x27f   : > { %v7189_v19 = vpop.f32.mrb[59].mxu1  ;;  %7793 = vmatprep.subr.bf16.mxu0 %v8051_v9 }
 0x280   : > { %v9193_v22 = vadd.f32 %v7189_v19, %v7188_v16  ;;  %v2140_v16 = vld [vmem:[%s10420_s10 + $0x358] sm:$0xff]  ;;  %7794 = vmatpush3.bf16.msra.mxu0 %v8051_v9 }
 0x281   : > { %3389 = vmatmul.mubr.bf16.gmra.mrb[164].mxu1 %v6720_v38 }
 0x282   : > { %3396 = vmatprep.mubr.bf16.mxu1 %v6729_v0 }
 0x284   : > { %v7191_v33 = vpop.f32.mrb[60].mxu1 }
 0x285   : > { %v7192_v58 = vpop.f32.mrb[61].mxu1 }
 0x286   : > { %v9201_v26 = vadd.f32 %v7192_v58, %v7191_v33  ;;  %v7194_v43 = vpop.f32.mrb[62].mxu1  ;;  %v6744_v58 = vcombine.low %v2132_v41, %v2136_v42 }
 0x287   : > { %v7195_v46 = vpop.f32.mrb[63].mxu1 }
 0x288   : > { %v9203_v37 = vadd.f32 %v7195_v46, %v7194_v43 }
 0x289   : > { %3397 = vmatmul.mubr.bf16.gmra.mrb[168].mxu1 %v6728_v21 }
 0x28a   : > { %3404 = vmatprep.mubr.bf16.mxu1 %v6737_v44 }
 0x28c   : > { %v7213_v45 = vpop.f32.mrb[64].mxu1  ;;  %v7325_v48 = vpop.f32.mrb[128].mxu0 }
 0x28d   : > { %v7214_v13 = vpop.f32.mrb[65].mxu1  ;;  %v7326_v55 = vpop.f32.mrb[129].mxu0 }
 0x28e   : > { %v7215_v47 = vadd.f32 %v7214_v13, %v7213_v45  ;;  %v7216_v59 = vpop.f32.mrb[66].mxu1  ;;  %v7327_v63 = vadd.f32 %v7326_v55, %v7325_v48  ;;  %v7328_v28 = vpop.f32.mrb[130].mxu0 }
 0x28f   : > { %v7217_v27 = vpop.f32.mrb[67].mxu1  ;;  %v7329_v31 = vpop.f32.mrb[131].mxu0 }
 0x290   : > { %v2997_v29 = vadd.f32 %v7215_v47, %v9033_v32  ;;  %v7218_v7 = vadd.f32 %v7217_v27, %v7216_v59  ;;  %v7330_v36 = vadd.f32 %v7329_v31, %v7328_v28  ;;  %v2144_v32 = vld [vmem:[%s10420_s10 + $0x378] sm:$0xff] }
 0x291   : > { %3405 = vmatmul.mubr.bf16.gmra.mrb[172].mxu1 %v6736_v17  ;;  %v6753_v45 = vcombine.high %v2140_v16, %v2144_v32  ;;  %v8053_v47 = vld [vmem:[%s10414_s4 + $0x18] sm:$0xff]  }
 0x292   : > { %v3000_v38 = vadd.f32 %v7218_v7, %v9035_v34  ;;  %v9219_v10 = vadd.f32 %v7327_v63, %v2997_v29  ;;  %3412 = vmatprep.mubr.bf16.mxu1 %v6745_v62  ;;  %v8052_v34 = vld [vmem:[%s10414_s4 + $0x10] sm:$0xff]   ;;  %v2148_v59 = vld [vmem:[%s10420_s10 + $0x398] sm:$0xff] }
 0x293   : > { %7795 = vmatprep.subr.bf16.mxu0 %v8052_v34 }
 0x294   : > { %v9227_v0 = vadd.f32 %v7330_v36, %v3000_v38  ;;  %v7219_v19 = vpop.f32.mrb[68].mxu1  ;;  %v7331_v52 = vpop.f32.mrb[132].mxu0  ;;  %7796 = vmatpush3.bf16.msra.mxu0 %v8052_v34 }
 0x295   : > { %v7220_v24 = vpop.f32.mrb[69].mxu1  ;;  %v7332_v33 = vpop.f32.mrb[133].mxu0  ;;  %7797 = vmatprep.subr.bf16.mxu0 %v8053_v47 }
 0x296   : > { %v7221_v21 = vadd.f32 %v7220_v24, %v7219_v19  ;;  %v7222_v43 = vpop.f32.mrb[70].mxu1  ;;  %v7333_v44 = vadd.f32 %v7332_v33, %v7331_v52  ;;  %v7334_v46 = vpop.f32.mrb[134].mxu0 }
 0x297   : > { %v7223_v48 = vpop.f32.mrb[71].mxu1  ;;  %v7335_v50 = vpop.f32.mrb[135].mxu0 }
 0x298   : > { %v3005_v13 = vadd.f32 %v7221_v21, %v9049_v39  ;;  %v7224_v55 = vadd.f32 %v7223_v48, %v7222_v43  ;;  %v7336_v17 = vadd.f32 %v7335_v50, %v7334_v46  ;;  %v2152_v39 = vld [vmem:[%s10420_s10 + $0x3b8] sm:$0xff]  ;;  %7798 = vmatpush3.bf16.msra.mxu0 %v8053_v47 }
 0x299   : > { %3413 = vmatmul.mubr.bf16.gmra.mrb[176].mxu1 %v6744_v58  ;;  %v6761_v38 = vcombine.high %v2148_v59, %v2152_v39  ;;  %v6760_v48 = vcombine.low %v2148_v59, %v2152_v39 }
 0x29a   : > { %v3008_v41 = vadd.f32 %v7224_v55, %v9051_v14  ;;  %v9237_v42 = vadd.f32 %v7333_v44, %v3005_v13  ;;  %3420 = vmatprep.mubr.bf16.mxu1 %v6753_v45  ;;  %v6752_v14 = vcombine.low %v2140_v16, %v2144_v32  ;;  %v2156_v16 = vld [vmem:[%s10420_s10 + $0x3d8] sm:$0xff] }
 0x29b   : > { %v2160_v32 = vld [vmem:[%s10420_s10 + $0x3f8] sm:$0xff] }
 0x29c   : > { %v9245_v63 = vadd.f32 %v7336_v17, %v3008_v41  ;;  %v7225_v28 = vpop.f32.mrb[72].mxu1  ;;  %v7337_v62 = vpop.f32.mrb[136].mxu0  ;;  %v6769_v17 = vcombine.high %v2156_v16, %v2160_v32 }
 0x29d   : > { %v7226_v27 = vpop.f32.mrb[73].mxu1  ;;  %v7338_v31 = vpop.f32.mrb[137].mxu0 }
 0x29e   : > { %v7227_v29 = vadd.f32 %v7226_v27, %v7225_v28  ;;  %v7228_v7 = vpop.f32.mrb[74].mxu1  ;;  %v7339_v36 = vadd.f32 %v7338_v31, %v7337_v62  ;;  %v7340_v9 = vpop.f32.mrb[138].mxu0 }
 0x29f   : > { %v7229_v19 = vpop.f32.mrb[75].mxu1  ;;  %v7341_v52 = vpop.f32.mrb[139].mxu0 }
 0x2a0   : > { %v3013_v34 = vadd.f32 %v7227_v29, %v9065_v56  ;;  %v7230_v24 = vadd.f32 %v7229_v19, %v7228_v7  ;;  %v7342_v33 = vadd.f32 %v7341_v52, %v7340_v9  ;;  %v6768_v9 = vcombine.low %v2156_v16, %v2160_v32 }
 0x2a1   : > { %3421 = vmatmul.mubr.bf16.gmra.mrb[180].mxu1 %v6752_v14 }
 0x2a2   : > { %v3016_v58 = vadd.f32 %v7230_v24, %v9067_v1  ;;  %v9249_v21 = vadd.f32 %v7339_v36, %v3013_v34  ;;  %3428 = vmatprep.mubr.bf16.mxu1 %v6761_v38 }
 0x2a4   : > { %v9257_v43 = vadd.f32 %v7342_v33, %v3016_v58  ;;  %v7231_v44 = vpop.f32.mrb[76].mxu1  ;;  %v7343_v56 = vpop.f32.mrb[140].mxu0 }
 0x2a5   : > { %v7232_v46 = vpop.f32.mrb[77].mxu1  ;;  %v7344_v45 = vpop.f32.mrb[141].mxu0 }
 0x2a6   : > { %v7233_v50 = vadd.f32 %v7232_v46, %v7231_v44  ;;  %v7234_v1 = vpop.f32.mrb[78].mxu1  ;;  %v7345_v13 = vadd.f32 %v7344_v45, %v7343_v56  ;;  %v7346_v55 = vpop.f32.mrb[142].mxu0 }
 0x2a7   : > { %v7235_v47 = vpop.f32.mrb[79].mxu1  ;;  %v7347_v41 = vpop.f32.mrb[143].mxu0 }
 0x2a8   : > { %v3021_v28 = vadd.f32 %v7233_v50, %v9081_v4  ;;  %v7236_v62 = vadd.f32 %v7235_v47, %v7234_v1  ;;  %v7348_v27 = vadd.f32 %v7347_v41, %v7346_v55 }
 0x2a9   : > { %3429 = vmatmul.mubr.bf16.gmra.mrb[184].mxu1 %v6760_v48 }
 0x2aa   : > { %v3024_v31 = vadd.f32 %v7236_v62, %v9083_v49  ;;  %v9261_v14 = vadd.f32 %v7345_v13, %v3021_v28  ;;  %3436 = vmatprep.mubr.bf16.mxu1 %v6769_v17 }
 0x2ac   : > { %v9263_v29 = vadd.f32 %v7348_v27, %v3024_v31  ;;  %v7237_v59 = vpop.f32.mrb[80].mxu1  ;;  %v7349_v39 = vpop.f32.mrb[144].mxu0 }
 0x2ad   : > { %v7238_v7 = vpop.f32.mrb[81].mxu1  ;;  %v7350_v36 = vpop.f32.mrb[145].mxu0 }
 0x2ae   : > { %v7239_v38 = vadd.f32 %v7238_v7, %v7237_v59  ;;  %v7240_v19 = vpop.f32.mrb[82].mxu1  ;;  %v7351_v52 = vadd.f32 %v7350_v36, %v7349_v39  ;;  %v7352_v34 = vpop.f32.mrb[146].mxu0 }
 0x2af   : > { %v7241_v4 = vpop.f32.mrb[83].mxu1  ;;  %v7353_v24 = vpop.f32.mrb[147].mxu0 }
 0x2b0   : > { %v3029_v33 = vadd.f32 %v7239_v38, %v9091_v15  ;;  %v7242_v58 = vadd.f32 %v7241_v4, %v7240_v19  ;;  %v7354_v49 = vadd.f32 %v7353_v24, %v7352_v34 }
 0x2b1   : > { %3437 = vmatmul.mubr.bf16.gmra.mrb[188].mxu1 %v6768_v9 }
 0x2b2   : > { %v3032_v44 = vadd.f32 %v7242_v58, %v9093_v18  ;;  %v9267_v56 = vadd.f32 %v7351_v52, %v3029_v33 }
 0x2b4   : > { %v9269_v46 = vadd.f32 %v7354_v49, %v3032_v44  ;;  %v7243_v45 = vpop.f32.mrb[84].mxu1  ;;  %v7355_v48 = vpop.f32.mrb[148].mxu0 }
 0x2b5   : > { %v7244_v16 = vpop.f32.mrb[85].mxu1  ;;  %v7356_v32 = vpop.f32.mrb[149].mxu0 }
 0x2b6   : > { %v7245_v50 = vadd.f32 %v7244_v16, %v7243_v45  ;;  %v7246_v1 = vpop.f32.mrb[86].mxu1  ;;  %v7357_v13 = vadd.f32 %v7356_v32, %v7355_v48  ;;  %v7358_v55 = vpop.f32.mrb[150].mxu0 }
 0x2b7   : > { %v7247_v17 = vpop.f32.mrb[87].mxu1  ;;  %v7359_v47 = vpop.f32.mrb[151].mxu0 }
 0x2b8   : > { %v3037_v15 = vadd.f32 %v7245_v50, %v9101_v30  ;;  %v7248_v41 = vadd.f32 %v7247_v17, %v7246_v1  ;;  %v7360_v28 = vadd.f32 %v7359_v47, %v7358_v55 }
 0x2ba   : > { %v3040_v18 = vadd.f32 %v7248_v41, %v9103_v20  ;;  %v9273_v62 = vadd.f32 %v7357_v13, %v3037_v15 }
 0x2bc   : > { %v9275_v27 = vadd.f32 %v7360_v28, %v3040_v18  ;;  %v7249_v31 = vpop.f32.mrb[88].mxu1  ;;  %v7361_v59 = vpop.f32.mrb[152].mxu0 }
 0x2bd   : > { %v7250_v39 = vpop.f32.mrb[89].mxu1  ;;  %v7362_v7 = vpop.f32.mrb[153].mxu0 }
 0x2be   : > { %v7251_v36 = vadd.f32 %v7250_v39, %v7249_v31  ;;  %v7252_v9 = vpop.f32.mrb[90].mxu1  ;;  %v7363_v38 = vadd.f32 %v7362_v7, %v7361_v59  ;;  %v7364_v19 = vpop.f32.mrb[154].mxu0 }
 0x2bf   : > { %v7253_v52 = vpop.f32.mrb[91].mxu1  ;;  %v7365_v34 = vpop.f32.mrb[155].mxu0 }
 0x2c0   : > { %v3045_v30 = vadd.f32 %v7251_v36, %v9111_v35  ;;  %v7254_v4 = vadd.f32 %v7253_v52, %v7252_v9  ;;  %v7366_v24 = vadd.f32 %v7365_v34, %v7364_v19 }
 0x2c2   : > { %v3048_v20 = vadd.f32 %v7254_v4, %v9113_v6  ;;  %v9279_v33 = vadd.f32 %v7363_v38, %v3045_v30 }
 0x2c4   : > { %v9281_v58 = vadd.f32 %v7366_v24, %v3048_v20  ;;  %v7255_v49 = vpop.f32.mrb[92].mxu1  ;;  %v7367_v44 = vpop.f32.mrb[156].mxu0 }
 0x2c5   : > { %v7256_v45 = vpop.f32.mrb[93].mxu1  ;;  %v7368_v48 = vpop.f32.mrb[157].mxu0 }
 0x2c6   : > { %v7257_v16 = vadd.f32 %v7256_v45, %v7255_v49  ;;  %v7258_v32 = vpop.f32.mrb[94].mxu1  ;;  %v7369_v50 = vadd.f32 %v7368_v48, %v7367_v44  ;;  %v7370_v1 = vpop.f32.mrb[158].mxu0 }
 0x2c7   : > { %v7259_v13 = vpop.f32.mrb[95].mxu1  ;;  %v7371_v55 = vpop.f32.mrb[159].mxu0 }
 0x2c8   : > { %v3053_v35 = vadd.f32 %v7257_v16, %v9121_v53  ;;  %v7260_v17 = vadd.f32 %v7259_v13, %v7258_v32  ;;  %v7372_v47 = vadd.f32 %v7371_v55, %v7370_v1 }
 0x2ca   : > { %v3056_v6 = vadd.f32 %v7260_v17, %v9123_v2  ;;  %v9285_v15 = vadd.f32 %v7369_v50, %v3053_v35 }
 0x2cc   : > { %v9287_v41 = vadd.f32 %v7372_v47, %v3056_v6  ;;  %v7261_v28 = vpop.f32.mrb[96].mxu1  ;;  %v7373_v18 = vpop.f32.mrb[160].mxu0 }
 0x2cd   : > { %v7262_v31 = vpop.f32.mrb[97].mxu1  ;;  %v7374_v59 = vpop.f32.mrb[161].mxu0 }
 0x2ce   : > { %v7263_v39 = vadd.f32 %v7262_v31, %v7261_v28  ;;  %v7264_v7 = vpop.f32.mrb[98].mxu1  ;;  %v7375_v36 = vadd.f32 %v7374_v59, %v7373_v18  ;;  %v7376_v9 = vpop.f32.mrb[162].mxu0 }
 0x2cf   : > { %v7265_v38 = vpop.f32.mrb[99].mxu1  ;;  %v7377_v19 = vpop.f32.mrb[163].mxu0 }
 0x2d0   : > { %v3061_v53 = vadd.f32 %v7263_v39, %v9131_v60  ;;  %v7266_v52 = vadd.f32 %v7265_v38, %v7264_v7  ;;  %v7378_v34 = vadd.f32 %v7377_v19, %v7376_v9 }
 0x2d2   : > { %v3064_v2 = vadd.f32 %v7266_v52, %v9133_v11  ;;  %v9291_v30 = vadd.f32 %v7375_v36, %v3061_v53 }
 0x2d4   : > { %v9293_v4 = vadd.f32 %v7378_v34, %v3064_v2  ;;  %v7267_v24 = vpop.f32.mrb[100].mxu1  ;;  %v7379_v20 = vpop.f32.mrb[164].mxu0 }
 0x2d5   : > { %v7268_v49 = vpop.f32.mrb[101].mxu1  ;;  %v7380_v44 = vpop.f32.mrb[165].mxu0 }
 0x2d6   : > { %v7269_v45 = vadd.f32 %v7268_v49, %v7267_v24  ;;  %v7270_v48 = vpop.f32.mrb[102].mxu1  ;;  %v7381_v16 = vadd.f32 %v7380_v44, %v7379_v20  ;;  %v7382_v32 = vpop.f32.mrb[166].mxu0 }
 0x2d7   : > { %v7271_v50 = vpop.f32.mrb[103].mxu1  ;;  %v7383_v1 = vpop.f32.mrb[167].mxu0 }
 0x2d8   : > { %v3069_v60 = vadd.f32 %v7269_v45, %v9141_v8  ;;  %v7272_v13 = vadd.f32 %v7271_v50, %v7270_v48  ;;  %v7384_v55 = vadd.f32 %v7383_v1, %v7382_v32 }
 0x2da   : > { %v3072_v11 = vadd.f32 %v7272_v13, %v9143_v12  ;;  %v9297_v35 = vadd.f32 %v7381_v16, %v3069_v60 }
 0x2dc   : > { %v9299_v17 = vadd.f32 %v7384_v55, %v3072_v11  ;;  %v7273_v47 = vpop.f32.mrb[104].mxu1  ;;  %v7385_v6 = vpop.f32.mrb[168].mxu0 }
 0x2dd   : > { %v7274_v28 = vpop.f32.mrb[105].mxu1  ;;  %v7386_v18 = vpop.f32.mrb[169].mxu0 }
 0x2de   : > { %v7275_v31 = vadd.f32 %v7274_v28, %v7273_v47  ;;  %v7276_v59 = vpop.f32.mrb[106].mxu1  ;;  %v7387_v39 = vadd.f32 %v7386_v18, %v7385_v6  ;;  %v7388_v7 = vpop.f32.mrb[170].mxu0 }
 0x2df   : > { %v7277_v36 = vpop.f32.mrb[107].mxu1  ;;  %v7389_v9 = vpop.f32.mrb[171].mxu0 }
 0x2e0   : > { %v3077_v8 = vadd.f32 %v7275_v31, %v9151_v23  ;;  %v7278_v38 = vadd.f32 %v7277_v36, %v7276_v59  ;;  %v7390_v19 = vadd.f32 %v7389_v9, %v7388_v7 }
 0x2e2   : > { %v3080_v12 = vadd.f32 %v7278_v38, %v9153_v25  ;;  %v9303_v53 = vadd.f32 %v7387_v39, %v3077_v8 }
 0x2e4   : > { %v9305_v52 = vadd.f32 %v7390_v19, %v3080_v12  ;;  %v7279_v34 = vpop.f32.mrb[108].mxu1  ;;  %v7391_v2 = vpop.f32.mrb[172].mxu0 }
 0x2e5   : > { %v7280_v24 = vpop.f32.mrb[109].mxu1  ;;  %v7392_v20 = vpop.f32.mrb[173].mxu0 }
 0x2e6   : > { %v7281_v49 = vadd.f32 %v7280_v24, %v7279_v34  ;;  %v7282_v44 = vpop.f32.mrb[110].mxu1  ;;  %v7393_v45 = vadd.f32 %v7392_v20, %v7391_v2  ;;  %v7394_v48 = vpop.f32.mrb[174].mxu0 }
 0x2e7   : > { %v7283_v16 = vpop.f32.mrb[111].mxu1  ;;  %v7395_v32 = vpop.f32.mrb[175].mxu0 }
 0x2e8   : > { %v3085_v23 = vadd.f32 %v7281_v49, %v9161_v51  ;;  %v7284_v50 = vadd.f32 %v7283_v16, %v7282_v44  ;;  %v7396_v1 = vadd.f32 %v7395_v32, %v7394_v48 }
 0x2ea   : > { %v3088_v25 = vadd.f32 %v7284_v50, %v9163_v40  ;;  %v9309_v60 = vadd.f32 %v7393_v45, %v3085_v23 }
 0x2ec   : > { %v9311_v13 = vadd.f32 %v7396_v1, %v3088_v25  ;;  %v7285_v55 = vpop.f32.mrb[112].mxu1  ;;  %v7397_v11 = vpop.f32.mrb[176].mxu0 }
 0x2ed   : > { %v7286_v47 = vpop.f32.mrb[113].mxu1  ;;  %v7398_v6 = vpop.f32.mrb[177].mxu0 }
 0x2ee   : > { %v7287_v28 = vadd.f32 %v7286_v47, %v7285_v55  ;;  %v7288_v18 = vpop.f32.mrb[114].mxu1  ;;  %v7399_v31 = vadd.f32 %v7398_v6, %v7397_v11  ;;  %v7400_v59 = vpop.f32.mrb[178].mxu0 }
 0x2ef   : > { %v7289_v39 = vpop.f32.mrb[115].mxu1  ;;  %v7401_v7 = vpop.f32.mrb[179].mxu0 }
 0x2f0   : > { %v3093_v51 = vadd.f32 %v7287_v28, %v9171_v54  ;;  %v7290_v36 = vadd.f32 %v7289_v39, %v7288_v18  ;;  %v7402_v9 = vadd.f32 %v7401_v7, %v7400_v59 }
 0x2f2   : > { %v3096_v40 = vadd.f32 %v7290_v36, %v9173_v57  ;;  %v9315_v8 = vadd.f32 %v7399_v31, %v3093_v51 }
 0x2f4   : > { %v9317_v38 = vadd.f32 %v7402_v9, %v3096_v40  ;;  %v7291_v19 = vpop.f32.mrb[116].mxu1  ;;  %v7403_v12 = vpop.f32.mrb[180].mxu0 }
 0x2f5   : > { %v7292_v34 = vpop.f32.mrb[117].mxu1  ;;  %v7404_v2 = vpop.f32.mrb[181].mxu0 }
 0x2f6   : > { %v7293_v24 = vadd.f32 %v7292_v34, %v7291_v19  ;;  %v7294_v20 = vpop.f32.mrb[118].mxu1  ;;  %v7405_v49 = vadd.f32 %v7404_v2, %v7403_v12  ;;  %v7406_v44 = vpop.f32.mrb[182].mxu0 }
 0x2f7   : > { %v7295_v45 = vpop.f32.mrb[119].mxu1  ;;  %v7407_v48 = vpop.f32.mrb[183].mxu0 }
 0x2f8   : > { %v3101_v54 = vadd.f32 %v7293_v24, %v9181_v3  ;;  %v7296_v16 = vadd.f32 %v7295_v45, %v7294_v20  ;;  %v7408_v32 = vadd.f32 %v7407_v48, %v7406_v44 }
 0x2fa   : > { %v3104_v57 = vadd.f32 %v7296_v16, %v9183_v5  ;;  %v9321_v23 = vadd.f32 %v7405_v49, %v3101_v54 }
 0x2fc   : > { %v9323_v50 = vadd.f32 %v7408_v32, %v3104_v57  ;;  %v7297_v1 = vpop.f32.mrb[120].mxu1  ;;  %v7409_v25 = vpop.f32.mrb[184].mxu0 }
 0x2fd   : > { %v7298_v55 = vpop.f32.mrb[121].mxu1  ;;  %v7410_v11 = vpop.f32.mrb[185].mxu0 }
 0x2fe   : > { %v7299_v47 = vadd.f32 %v7298_v55, %v7297_v1  ;;  %v7300_v6 = vpop.f32.mrb[122].mxu1  ;;  %v7411_v28 = vadd.f32 %v7410_v11, %v7409_v25  ;;  %v7412_v18 = vpop.f32.mrb[186].mxu0 }
 0x2ff   : > { %v7301_v31 = vpop.f32.mrb[123].mxu1  ;;  %v7413_v59 = vpop.f32.mrb[187].mxu0 }
 0x300   : > { %v3109_v3 = vadd.f32 %v7299_v47, %v9191_v61  ;;  %v7302_v39 = vadd.f32 %v7301_v31, %v7300_v6  ;;  %v7414_v7 = vadd.f32 %v7413_v59, %v7412_v18 }
 0x302   : > { %v3112_v5 = vadd.f32 %v7302_v39, %v9193_v22  ;;  %v9327_v51 = vadd.f32 %v7411_v28, %v3109_v3 }
 0x304   : > { %v9329_v36 = vadd.f32 %v7414_v7, %v3112_v5  ;;  %v7303_v9 = vpop.f32.mrb[124].mxu1  ;;  %v7415_v40 = vpop.f32.mrb[188].mxu0 }
 0x305   : > { %v7304_v19 = vpop.f32.mrb[125].mxu1  ;;  %v7416_v12 = vpop.f32.mrb[189].mxu0 }
 0x306   : > { %v7305_v34 = vadd.f32 %v7304_v19, %v7303_v9  ;;  %v7306_v2 = vpop.f32.mrb[126].mxu1  ;;  %v7417_v24 = vadd.f32 %v7416_v12, %v7415_v40  ;;  %v7418_v20 = vpop.f32.mrb[190].mxu0 }
 0x307   : > { %v7307_v49 = vpop.f32.mrb[127].mxu1  ;;  %v7419_v44 = vpop.f32.mrb[191].mxu0 }
 0x308   : > { %v3117_v61 = vadd.f32 %v7305_v34, %v9201_v26  ;;  %v7308_v45 = vadd.f32 %v7307_v49, %v7306_v2  ;;  %v7420_v48 = vadd.f32 %v7419_v44, %v7418_v20 }
 0x30a   : > { %v3120_v22 = vadd.f32 %v7308_v45, %v9203_v37  ;;  %v9333_v54 = vadd.f32 %v7417_v24, %v3117_v61 }
 0x30c   : > { %v9335_v16 = vadd.f32 %v7420_v48, %v3120_v22  ;;  %v7437_v32 = vpop.f32.mrb[128].mxu1 }
 0x30d   : > { %v7438_v57 = vpop.f32.mrb[129].mxu1 }
 0x30e   : > { %v7439_v1 = vadd.f32 %v7438_v57, %v7437_v32  ;;  %v7440_v25 = vpop.f32.mrb[130].mxu1 }
 0x30f   : > { %v7441_v55 = vpop.f32.mrb[131].mxu1 }
 0x310   : > { %v3319_v11 = vadd.f32 %v7439_v1, %v9219_v10  ;;  %v7442_v47 = vadd.f32 %v7441_v55, %v7440_v25 }
 0x312   : > { %v3322_v6 = vadd.f32 %v7442_v47, %v9227_v0 }
 0x314   : > { %v3445_v26 = vpack.c.bf16 %v3322_v6, %v3319_v11  ;;  %v7443_v28 = vpop.f32.mrb[132].mxu1 }
 0x315   : > { %v7444_v18 = vpop.f32.mrb[133].mxu1 }
 0x316   : > { %v7445_v31 = vadd.f32 %v7444_v18, %v7443_v28  ;;  %v7446_v37 = vpop.f32.mrb[134].mxu1  ;;  %7799 = vmatprep.mubr.msk.bf16.mxu0 %vm3500_vm2, %v3445_v26 }
 0x317   : > { %v7447_v59 = vpop.f32.mrb[135].mxu1 }
 0x318   : > { %v3327_v3 = vadd.f32 %v7445_v31, %v9237_v42  ;;  %v7448_v39 = vadd.f32 %v7447_v59, %v7446_v37 }
 0x31a   : > { %v3330_v7 = vadd.f32 %v7448_v39, %v9245_v63 }
 0x31c   : > { %v3446_v5 = vpack.c.bf16 %v3330_v7, %v3327_v3  ;;  %v7449_v9 = vpop.f32.mrb[136].mxu1 }
 0x31d   : > { %v7450_v10 = vpop.f32.mrb[137].mxu1 }
 0x31e   : > { %v7451_v40 = vadd.f32 %v7450_v10, %v7449_v9  ;;  %v7452_v19 = vpop.f32.mrb[138].mxu1  ;;  %7800 = vmatmul.mubr.msk.bf16.vlgmr.msra.gmra.mrb[192].mxu0 %vm3500_vm2, %v3446_v5 }
 0x31f   : > { %v7453_v0 = vpop.f32.mrb[139].mxu1 }
 0x320   : > { %v3335_v12 = vadd.f32 %v7451_v40, %v9249_v21  ;;  %v7454_v34 = vadd.f32 %v7453_v0, %v7452_v19 }
 0x322   : > { %v3338_v2 = vadd.f32 %v7454_v34, %v9257_v43 }
 0x324   : > { %v3447_v24 = vpack.c.bf16 %v3338_v2, %v3335_v12  ;;  %v7455_v20 = vpop.f32.mrb[140].mxu1 }
 0x325   : > { %v7456_v49 = vpop.f32.mrb[141].mxu1 }
 0x326   : > { %v7457_v42 = vadd.f32 %v7456_v49, %v7455_v20  ;;  %v7458_v44 = vpop.f32.mrb[142].mxu1  ;;  %7803 = vmatprep.mubr.msk.bf16.mxu0 %vm3500_vm2, %v3447_v24 }
 0x327   : > { %v7459_v63 = vpop.f32.mrb[143].mxu1 }
 0x328   : > { %v3343_v61 = vadd.f32 %v7457_v42, %v9261_v14  ;;  %v7460_v45 = vadd.f32 %v7459_v63, %v7458_v44 }
 0x32a   : > { %v3346_v48 = vadd.f32 %v7460_v45, %v9263_v29 }
 0x32c   : > { %v3448_v22 = vpack.c.bf16 %v3346_v48, %v3343_v61  ;;  %v7461_v32 = vpop.f32.mrb[144].mxu1 }
 0x32d   : > { %v7462_v57 = vpop.f32.mrb[145].mxu1 }
 0x32e   : > { %v7463_v21 = vadd.f32 %v7462_v57, %v7461_v32  ;;  %v7464_v1 = vpop.f32.mrb[146].mxu1  ;;  %7804 = vmatmul.mubr.msk.bf16.gmra.mrb[196].mxu0 %vm3500_vm2, %v3448_v22 }
 0x32f   : > { %v7465_v43 = vpop.f32.mrb[147].mxu1 }
 0x330   : > { %v3351_v25 = vadd.f32 %v7463_v21, %v9267_v56  ;;  %v7466_v55 = vadd.f32 %v7465_v43, %v7464_v1 }
 0x332   : > { %v3354_v11 = vadd.f32 %v7466_v55, %v9269_v46 }
 0x334   : > { %v3449_v47 = vpack.c.bf16 %v3354_v11, %v3351_v25  ;;  %v7467_v6 = vpop.f32.mrb[148].mxu1 }
 0x335   : > { %v7468_v26 = vpop.f32.mrb[149].mxu1 }
 0x336   : > { %v7469_v14 = vadd.f32 %v7468_v26, %v7467_v6  ;;  %v7470_v28 = vpop.f32.mrb[150].mxu1  ;;  %7807 = vmatprep.mubr.msk.bf16.mxu0 %vm3500_vm2, %v3449_v47 }
 0x337   : > { %v7471_v29 = vpop.f32.mrb[151].mxu1 }
 0x338   : > { %v3359_v18 = vadd.f32 %v7469_v14, %v9273_v62  ;;  %v7472_v31 = vadd.f32 %v7471_v29, %v7470_v28 }
 0x33a   : > { %v3362_v37 = vadd.f32 %v7472_v31, %v9275_v27 }
 0x33c   : > { %v3450_v59 = vpack.c.bf16 %v3362_v37, %v3359_v18  ;;  %v7473_v3 = vpop.f32.mrb[152].mxu1 }
 0x33d   : > { %v7474_v39 = vpop.f32.mrb[153].mxu1 }
 0x33e   : > { %v7475_v56 = vadd.f32 %v7474_v39, %v7473_v3  ;;  %v7476_v7 = vpop.f32.mrb[154].mxu1  ;;  %7808 = vmatmul.mubr.msk.bf16.gmra.mrb[200].mxu0 %vm3500_vm2, %v3450_v59 }
 0x33f   : > { %v7477_v46 = vpop.f32.mrb[155].mxu1 }
 0x340   : > { %v3367_v5 = vadd.f32 %v7475_v56, %v9279_v33  ;;  %v7478_v9 = vadd.f32 %v7477_v46, %v7476_v7 }
 0x342   : > { %v3370_v10 = vadd.f32 %v7478_v9, %v9281_v58 }
 0x344   : > { %v3451_v40 = vpack.c.bf16 %v3370_v10, %v3367_v5  ;;  %v7479_v19 = vpop.f32.mrb[156].mxu1 }
 0x345   : > { %v7480_v0 = vpop.f32.mrb[157].mxu1 }
 0x346   : > { %v7481_v62 = vadd.f32 %v7480_v0, %v7479_v19  ;;  %v7482_v12 = vpop.f32.mrb[158].mxu1  ;;  %7811 = vmatprep.mubr.msk.bf16.mxu0 %vm3500_vm2, %v3451_v40 }
 0x347   : > { %v7483_v27 = vpop.f32.mrb[159].mxu1 }
 0x348   : > { %v3375_v34 = vadd.f32 %v7481_v62, %v9285_v15  ;;  %v7484_v2 = vadd.f32 %v7483_v27, %v7482_v12 }
 0x34a   : > { %v3378_v24 = vadd.f32 %v7484_v2, %v9287_v41 }
 0x34c   : > { %v3452_v20 = vpack.c.bf16 %v3378_v24, %v3375_v34  ;;  %v7485_v49 = vpop.f32.mrb[160].mxu1 }
 0x34d   : > { %v7486_v42 = vpop.f32.mrb[161].mxu1 }
 0x34e   : > { %v7487_v33 = vadd.f32 %v7486_v42, %v7485_v49  ;;  %v7488_v44 = vpop.f32.mrb[162].mxu1  ;;  %7812 = vmatmul.mubr.msk.bf16.gmra.mrb[204].mxu0 %vm3500_vm2, %v3452_v20 }
 0x34f   : > { %v7489_v58 = vpop.f32.mrb[163].mxu1 }
 0x350   : > { %v3383_v63 = vadd.f32 %v7487_v33, %v9291_v30  ;;  %v7490_v61 = vadd.f32 %v7489_v58, %v7488_v44 }
 0x352   : > { %v3386_v45 = vadd.f32 %v7490_v61, %v9293_v4 }
 0x354   : > { %v3453_v48 = vpack.c.bf16 %v3386_v45, %v3383_v63  ;;  %v7491_v22 = vpop.f32.mrb[164].mxu1 }
 0x355   : > { %v7492_v32 = vpop.f32.mrb[165].mxu1 }
 0x356   : > { %v7493_v15 = vadd.f32 %v7492_v32, %v7491_v22  ;;  %v7494_v57 = vpop.f32.mrb[166].mxu1  ;;  %7815 = vmatprep.mubr.msk.bf16.mxu0 %vm3500_vm2, %v3453_v48 }
 0x357   : > { %v7495_v41 = vpop.f32.mrb[167].mxu1 }
 0x358   : > { %v3391_v21 = vadd.f32 %v7493_v15, %v9297_v35  ;;  %v7496_v1 = vadd.f32 %v7495_v41, %v7494_v57 }
 0x35a   : > { %v3394_v43 = vadd.f32 %v7496_v1, %v9299_v17 }
 0x35c   : > { %v3454_v25 = vpack.c.bf16 %v3394_v43, %v3391_v21  ;;  %v7497_v55 = vpop.f32.mrb[168].mxu1 }
 0x35d   : > { %v7498_v11 = vpop.f32.mrb[169].mxu1 }
 0x35e   : > { %v7499_v30 = vadd.f32 %v7498_v11, %v7497_v55  ;;  %v7500_v47 = vpop.f32.mrb[170].mxu1  ;;  %7816 = vmatmul.mubr.msk.bf16.gmra.mrb[208].mxu0 %vm3500_vm2, %v3454_v25 }
 0x35f   : > { %v7501_v4 = vpop.f32.mrb[171].mxu1 }
 0x360   : > { %v3399_v6 = vadd.f32 %v7499_v30, %v9303_v53  ;;  %v7502_v26 = vadd.f32 %v7501_v4, %v7500_v47 }
 0x362   : > { %v3402_v14 = vadd.f32 %v7502_v26, %v9305_v52 }
 0x364   : > { %v3455_v28 = vpack.c.bf16 %v3402_v14, %v3399_v6  ;;  %v7503_v29 = vpop.f32.mrb[172].mxu1 }
 0x365   : > { %v7504_v18 = vpop.f32.mrb[173].mxu1 }
 0x366   : > { %v7505_v35 = vadd.f32 %v7504_v18, %v7503_v29  ;;  %v7506_v31 = vpop.f32.mrb[174].mxu1  ;;  %7819 = vmatprep.mubr.msk.bf16.mxu0 %vm3500_vm2, %v3455_v28 }
 0x367   : > { %v7507_v17 = vpop.f32.mrb[175].mxu1 }
 0x368   : > { %v3407_v37 = vadd.f32 %v7505_v35, %v9309_v60  ;;  %v7508_v59 = vadd.f32 %v7507_v17, %v7506_v31 }
 0x36a   : > { %v3410_v3 = vadd.f32 %v7508_v59, %v9311_v13 }
 0x36c   : > { %v3456_v39 = vpack.c.bf16 %v3410_v3, %v3407_v37  ;;  %v7509_v56 = vpop.f32.mrb[176].mxu1 }
 0x36d   : > { %v7510_v7 = vpop.f32.mrb[177].mxu1 }
 0x36e   : > { %v7511_v53 = vadd.f32 %v7510_v7, %v7509_v56  ;;  %v7512_v46 = vpop.f32.mrb[178].mxu1  ;;  %7820 = vmatmul.mubr.msk.bf16.gmra.mrb[212].mxu0 %vm3500_vm2, %v3456_v39 }
 0x36f   : > { %v7513_v52 = vpop.f32.mrb[179].mxu1 }
 0x370   : > { %v3415_v5 = vadd.f32 %v7511_v53, %v9315_v8  ;;  %v7514_v9 = vadd.f32 %v7513_v52, %v7512_v46 }
 0x372   : > { %v3418_v10 = vadd.f32 %v7514_v9, %v9317_v38 }
 0x374   : > { %v3457_v40 = vpack.c.bf16 %v3418_v10, %v3415_v5  ;;  %v7515_v19 = vpop.f32.mrb[180].mxu1 }
 0x375   : > { %v7516_v0 = vpop.f32.mrb[181].mxu1 }
 0x376   : > { %v7517_v60 = vadd.f32 %v7516_v0, %v7515_v19  ;;  %v7518_v62 = vpop.f32.mrb[182].mxu1  ;;  %7823 = vmatprep.mubr.msk.bf16.mxu0 %vm3500_vm2, %v3457_v40 }
 0x377   : > { %v7519_v13 = vpop.f32.mrb[183].mxu1 }
 0x378   : > { %v3423_v12 = vadd.f32 %v7517_v60, %v9321_v23  ;;  %v7520_v27 = vadd.f32 %v7519_v13, %v7518_v62 }
 0x37a   : > { %v3426_v34 = vadd.f32 %v7520_v27, %v9323_v50 }
 0x37c   : > { %v3458_v2 = vpack.c.bf16 %v3426_v34, %v3423_v12  ;;  %v7521_v24 = vpop.f32.mrb[184].mxu1 }
 0x37d   : > { %v7522_v20 = vpop.f32.mrb[185].mxu1 }
 0x37e   : > { %v7523_v8 = vadd.f32 %v7522_v20, %v7521_v24  ;;  %v7524_v49 = vpop.f32.mrb[186].mxu1  ;;  %7824 = vmatmul.mubr.msk.bf16.gmra.mrb[216].mxu0 %vm3500_vm2, %v3458_v2 }
 0x37f   : > { %v7525_v38 = vpop.f32.mrb[187].mxu1 }
 0x380   : > { %v3431_v42 = vadd.f32 %v7523_v8, %v9327_v51  ;;  %v7526_v33 = vadd.f32 %v7525_v38, %v7524_v49  ;;  %v9388_v51 = vld [vmem:[%s10415_s5] ss:$0 sm:$0xff] }
 0x382   : > { %v3434_v44 = vadd.f32 %v7526_v33, %v9329_v36  ;;  %v8056_v36 = vld [vmem:[%s10421_s11 + $0x4] ss:$8 sps:$4 sm:$0xff]  }
 0x383   : > { %3838 = vmatprep.mubr.bf16.mxu1 %v8056_v36 }
 0x384   : > { %v3459_v58 = vpack.c.bf16 %v3434_v44, %v3431_v42  ;;  %v7527_v63 = vpop.f32.mrb[188].mxu1 }
 0x385   : > { %v7528_v61 = vpop.f32.mrb[189].mxu1 }
 0x386   : > { %v7529_v23 = vadd.f32 %v7528_v61, %v7527_v63  ;;  %v7530_v45 = vpop.f32.mrb[190].mxu1  ;;  %7827 = vmatprep.mubr.msk.bf16.mxu0 %vm3500_vm2, %v3459_v58 }
 0x387   : > { %v7531_v50 = vpop.f32.mrb[191].mxu1 }
 0x388   : > { %v3439_v48 = vadd.f32 %v7529_v23, %v9333_v54  ;;  %v7532_v22 = vadd.f32 %v7531_v50, %v7530_v45 }
 0x38a   : > { %v3442_v32 = vadd.f32 %v7532_v22, %v9335_v16 }
 0x38c   : > { %v3460_v15 = vpack.c.bf16 %v3442_v32, %v3439_v48 }
 0x38e   : > { %7828 = vmatmul.mubr.msk.bf16.gmra.mrb[220].mxu0 %vm3500_vm2, %v3460_v15 }
 0x3f1   : > { %v7801_v57 = vpop.f32.mrb[192].mxu0 }
 0x3f2   : > { %v3592_v41 = vadd.f32 %v7801_v57, %v9388_v51  ;;  %v3583_v21 = vpop.f32.mrb[193].mxu0 }
 0x3f3   : > { %v3584_v54 = vadd.f32 %v9388_v51, %v3583_v21  ;;  %v7802_v16 = vpop.f32.mrb[194].mxu0 }
 0x3f4   : > { %v3595_v1 = vadd.f32 %v7802_v16, %v9388_v51  ;;  %v3586_v43 = vpop.f32.mrb[195].mxu0  ;;  %v3712_v55 = vmax.f32 %v3592_v41, 0.0 }
 0x3f5   : > { %v3587_v25 = vadd.f32 %v9388_v51, %v3586_v43  ;;  %v3710_v30 = vmax.f32 %v3584_v54, 0.0 }
 0x3f6   : > { %v3713_v11 = vmax.f32 %v3595_v1, 0.0 }
 0x3f7   : > { %v3711_v47 = vmax.f32 %v3587_v25, 0.0 }
 0x3f8   : > { %v3743_v4 = vpack.c.bf16 %v3713_v11, %v3712_v55 }
 0x3f9   : > { %v3742_v6 = vpack.c.bf16 %v3711_v47, %v3710_v30 }
 0x401   : > { %v7805_v26 = vpop.f32.mrb[196].mxu0 }
 0x402   : > { %v3608_v14 = vadd.f32 %v7805_v26, %v9388_v51  ;;  %v3599_v28 = vpop.f32.mrb[197].mxu0 }
 0x403   : > { %v3600_v29 = vadd.f32 %v9388_v51, %v3599_v28  ;;  %v7806_v18 = vpop.f32.mrb[198].mxu0 }
 0x404   : > { %v3611_v35 = vadd.f32 %v7806_v18, %v9388_v51  ;;  %v3602_v31 = vpop.f32.mrb[199].mxu0  ;;  %v3716_v37 = vmax.f32 %v3608_v14, 0.0 }
 0x405   : > { %v3603_v17 = vadd.f32 %v9388_v51, %v3602_v31  ;;  %v3714_v3 = vmax.f32 %v3600_v29, 0.0 }
 0x406   : > { %v3717_v59 = vmax.f32 %v3611_v35, 0.0 }
 0x407   : > { %v3715_v39 = vmax.f32 %v3603_v17, 0.0 }
 0x408   : > { %v9401_v56 = vpack.c.bf16 %v3717_v59, %v3716_v37 }
 0x409   : > { %v3744_v7 = vpack.c.bf16 %v3715_v39, %v3714_v3 }
 0x411   : > { %v7809_v53 = vpop.f32.mrb[200].mxu0 }
 0x412   : > { %v3624_v46 = vadd.f32 %v7809_v53, %v9388_v51  ;;  %v3615_v52 = vpop.f32.mrb[201].mxu0 }
 0x413   : > { %v3616_v5 = vadd.f32 %v9388_v51, %v3615_v52  ;;  %v7810_v9 = vpop.f32.mrb[202].mxu0 }
 0x414   : > { %v3627_v10 = vadd.f32 %v7810_v9, %v9388_v51  ;;  %v3618_v40 = vpop.f32.mrb[203].mxu0  ;;  %v3720_v0 = vmax.f32 %v3624_v46, 0.0 }
 0x415   : > { %v3619_v19 = vadd.f32 %v9388_v51, %v3618_v40  ;;  %v3718_v62 = vmax.f32 %v3616_v5, 0.0 }
 0x416   : > { %v3721_v60 = vmax.f32 %v3627_v10, 0.0 }
 0x417   : > { %v3719_v13 = vmax.f32 %v3619_v19, 0.0 }
 0x418   : > { %v9407_v12 = vpack.c.bf16 %v3721_v60, %v3720_v0 }
 0x419   : > { %v9409_v27 = vpack.c.bf16 %v3719_v13, %v3718_v62 }
 0x421   : > { %v7813_v34 = vpop.f32.mrb[204].mxu0 }
 0x422   : > { %v3640_v2 = vadd.f32 %v7813_v34, %v9388_v51  ;;  %v3631_v24 = vpop.f32.mrb[205].mxu0 }
 0x423   : > { %v3632_v20 = vadd.f32 %v9388_v51, %v3631_v24  ;;  %v7814_v8 = vpop.f32.mrb[206].mxu0 }
 0x424   : > { %v3643_v49 = vadd.f32 %v7814_v8, %v9388_v51  ;;  %v3634_v38 = vpop.f32.mrb[207].mxu0  ;;  %v3724_v33 = vmax.f32 %v3640_v2, 0.0 }
 0x425   : > { %v3635_v42 = vadd.f32 %v9388_v51, %v3634_v38  ;;  %v3722_v58 = vmax.f32 %v3632_v20, 0.0 }
 0x426   : > { %v3725_v44 = vmax.f32 %v3643_v49, 0.0 }
 0x427   : > { %v3723_v63 = vmax.f32 %v3635_v42, 0.0 }
 0x428   : > { %v9415_v61 = vpack.c.bf16 %v3725_v44, %v3724_v33  ;;  %v8054_v33 = vld [vmem:[%s10421_s11] ss:$8 sps:$4 sm:$0xff]  }
 0x429   : > { %v9417_v23 = vpack.c.bf16 %v3723_v63, %v3722_v58  ;;  %v8066_v44 = vld [vmem:[%s10416_s6] ss:$8 sps:$4 sm:$0xff]   ;;  %v8071_v58 = vld [vmem:[%s10416_s6 + $0x14] ss:$8 sps:$4 sm:$0xff]   ;;  %v8069_v63 = vld [vmem:[%s10416_s6 + $0x10] ss:$8 sps:$4 sm:$0xff]  }
 0x431   : > { %v7817_v45 = vpop.f32.mrb[208].mxu0 }
 0x432   : > { %v3656_v50 = vadd.f32 %v7817_v45, %v9388_v51  ;;  %v3647_v48 = vpop.f32.mrb[209].mxu0  ;;  %v8060_v45 = vld [vmem:[%s10421_s11 + $0x24] ss:$8 sps:$4 sm:$0xff]  }
 0x433   : > { %v3648_v22 = vadd.f32 %v9388_v51, %v3647_v48  ;;  %v7818_v32 = vpop.f32.mrb[210].mxu0  ;;  %v8077_v48 = vld [vmem:[%s10416_s6 + $0x34] ss:$8 sps:$4 sm:$0xff]  }
 0x434   : > { %v3659_v15 = vadd.f32 %v7818_v32, %v9388_v51  ;;  %v3650_v36 = vpop.f32.mrb[211].mxu0  ;;  %v3728_v41 = vmax.f32 %v3656_v50, 0.0  ;;  %v8072_v50 = vld [vmem:[%s10416_s6 + $0x20] ss:$8 sps:$4 sm:$0xff]   ;;  %v8080_v32 = vld [vmem:[%s10416_s6 + $0x44] ss:$8 sps:$4 sm:$0xff]  }
 0x435   : > { %v3651_v57 = vadd.f32 %v9388_v51, %v3650_v36  ;;  %v3726_v54 = vmax.f32 %v3648_v22, 0.0  ;;  %v8075_v22 = vld [vmem:[%s10416_s6 + $0x30] ss:$8 sps:$4 sm:$0xff]   ;;  %v8063_v36 = vld [vmem:[%s10421_s11 + $0x34] ss:$8 sps:$4 sm:$0xff]  }
 0x436   : > { %v3729_v21 = vmax.f32 %v3659_v15, 0.0  ;;  %v8062_v15 = vld [vmem:[%s10421_s11 + $0x20] ss:$8 sps:$4 sm:$0xff]  }
 0x437   : > { %v3727_v16 = vmax.f32 %v3651_v57, 0.0  ;;  %v8078_v57 = vld [vmem:[%s10416_s6 + $0x40] ss:$8 sps:$4 sm:$0xff]  }
 0x438   : > { %v3751_v1 = vpack.c.bf16 %v3729_v21, %v3728_v41  ;;  %v8083_v41 = vld [vmem:[%s10416_s6 + $0x54] ss:$8 sps:$4 sm:$0xff]   ;;  %v8081_v21 = vld [vmem:[%s10416_s6 + $0x50] ss:$8 sps:$4 sm:$0xff]  }
 0x439   : > { %v3750_v43 = vpack.c.bf16 %v3727_v16, %v3726_v54  ;;  %v8065_v54 = vld [vmem:[%s10421_s11 + $0x30] ss:$8 sps:$4 sm:$0xff]   ;;  %v8086_v16 = vld [vmem:[%s10416_s6 + $0x64] ss:$8 sps:$4 sm:$0xff]  }
 0x43b   : > { %7553 = vmatprep.subr.bf16.mxu1 %v3750_v43  ;;  %v8089_v43 = vld [vmem:[%s10416_s6 + $0x74] ss:$8 sps:$4 sm:$0xff]  }
 0x43c   : > { %7554 = vmatpush3.bf16.msra.mxu1 %v3742_v6 }
 0x43d   : > { %7555 = vmatprep.subr.bf16.mxu1 %v3751_v1  ;;  %v8084_v1 = vld [vmem:[%s10416_s6 + $0x60] ss:$8 sps:$4 sm:$0xff]  }
 0x440   : > { %7556 = vmatpush3.bf16.msra.mxu1 %v3743_v4 }
 0x441   : > { %v7821_v25 = vpop.f32.mrb[212].mxu0 }
 0x442   : > { %v3672_v55 = vadd.f32 %v7821_v25, %v9388_v51  ;;  %v3663_v11 = vpop.f32.mrb[213].mxu0  ;;  %v8087_v25 = vld [vmem:[%s10416_s6 + $0x70] ss:$8 sps:$4 sm:$0xff]  }
 0x443   : > { %v3664_v30 = vadd.f32 %v9388_v51, %v3663_v11  ;;  %v7822_v47 = vpop.f32.mrb[214].mxu0 }
 0x444   : > { %v3675_v26 = vadd.f32 %v7822_v47, %v9388_v51  ;;  %v3666_v14 = vpop.f32.mrb[215].mxu0  ;;  %v3732_v29 = vmax.f32 %v3672_v55, 0.0  ;;  %v8263_v55 = vmov 0  }
 0x445   : > { %v3667_v28 = vadd.f32 %v9388_v51, %v3666_v14  ;;  %v3730_v35 = vmax.f32 %v3664_v30, 0.0  ;;  %4130 = vmatprep.mubr.bf16.mxu0 %v8263_v55 }
 0x446   : > { %v3733_v18 = vmax.f32 %v3675_v26, 0.0 }
 0x447   : > { %v3731_v31 = vmax.f32 %v3667_v28, 0.0 }
 0x448   : > { %v3753_v17 = vpack.c.bf16 %v3733_v18, %v3732_v29 }
 0x449   : > { %v3752_v6 = vpack.c.bf16 %v3731_v31, %v3730_v35 }
 0x44b   : > { %7557 = vmatprep.subr.bf16.mxu1 %v3752_v6 }
 0x44c   : > { %7558 = vmatpush3.bf16.msra.mxu1 %v3744_v7 }
 0x44d   : > { %7559 = vmatprep.subr.bf16.mxu1 %v3753_v17 }
 0x450   : > { %7560 = vmatpush3.bf16.msra.mxu1 %v9401_v56 }
 0x451   : > { %v7825_v4 = vpop.f32.mrb[216].mxu0 }
 0x452   : > { %v3688_v37 = vadd.f32 %v7825_v4, %v9388_v51  ;;  %v3679_v59 = vpop.f32.mrb[217].mxu0 }
 0x453   : > { %v3680_v3 = vadd.f32 %v9388_v51, %v3679_v59  ;;  %v7826_v39 = vpop.f32.mrb[218].mxu0 }
 0x454   : > { %v3691_v53 = vadd.f32 %v7826_v39, %v9388_v51  ;;  %v3682_v46 = vpop.f32.mrb[219].mxu0  ;;  %v3736_v5 = vmax.f32 %v3688_v37, 0.0 }
 0x455   : > { %v3683_v52 = vadd.f32 %v9388_v51, %v3682_v46  ;;  %v3734_v10 = vmax.f32 %v3680_v3, 0.0 }
 0x456   : > { %v3737_v9 = vmax.f32 %v3691_v53, 0.0 }
 0x457   : > { %v3735_v40 = vmax.f32 %v3683_v52, 0.0 }
 0x458   : > { %v3755_v7 = vpack.c.bf16 %v3737_v9, %v3736_v5 }
 0x459   : > { %v3754_v19 = vpack.c.bf16 %v3735_v40, %v3734_v10 }
 0x45b   : > { %7561 = vmatprep.subr.bf16.mxu1 %v3754_v19 }
 0x45c   : > { %7562 = vmatpush3.bf16.msra.mxu1 %v9409_v27 }
 0x45d   : > { %7563 = vmatprep.subr.bf16.mxu1 %v3755_v7 }
 0x460   : > { %7564 = vmatpush3.bf16.msra.mxu1 %v9407_v12  ;;  %v8068_v12 = vld [vmem:[%s10416_s6 + $0x4] ss:$8 sps:$4 sm:$0xff]  }
 0x461   : > { %v7829_v56 = vpop.f32.mrb[220].mxu0 }
 0x462   : > { %v3704_v0 = vadd.f32 %v7829_v56, %v9388_v51  ;;  %v3695_v60 = vpop.f32.mrb[221].mxu0 }
 0x463   : > { %v3696_v62 = vadd.f32 %v9388_v51, %v3695_v60  ;;  %v7830_v13 = vpop.f32.mrb[222].mxu0  ;;  %v8094_v60 = vld [vmem:[%s10418_s8] ss:$16 sps:$4 sm:$0xff]  }
 0x464   : > { %v3707_v34 = vadd.f32 %v7830_v13, %v9388_v51  ;;  %v3698_v2 = vpop.f32.mrb[223].mxu0  ;;  %v3740_v20 = vmax.f32 %v3704_v0, 0.0  ;;  %v8100_v13 = vld [vmem:[%s10418_s8 + $0x20] ss:$16 sps:$4 sm:$0xff]  }
 0x465   : > { %v3699_v24 = vadd.f32 %v9388_v51, %v3698_v2  ;;  %v3738_v49 = vmax.f32 %v3696_v62, 0.0  ;;  %v8057_v51 = vld [vmem:[%s10421_s11 + $0x14] ss:$8 sps:$4 sm:$0xff]   ;;  %v8106_v2 = vld [vmem:[%s10418_s8 + $0x40] ss:$16 sps:$4 sm:$0xff]  }
 0x466   : > { %v3741_v8 = vmax.f32 %v3707_v34, 0.0  ;;  %v8096_v62 = vld [vmem:[%s10418_s8 + $0x4] ss:$16 sps:$4 sm:$0xff]  }
 0x467   : > { %v3739_v38 = vmax.f32 %v3699_v24, 0.0  ;;  %v8102_v34 = vld [vmem:[%s10418_s8 + $0x24] ss:$16 sps:$4 sm:$0xff]  }
 0x468   : > { %v3757_v27 = vpack.c.bf16 %v3741_v8, %v3740_v20  ;;  %v8108_v24 = vld [vmem:[%s10418_s8 + $0x44] ss:$16 sps:$4 sm:$0xff]   ;;  %v8112_v20 = vld [vmem:[%s10418_s8 + $0x60] ss:$16 sps:$4 sm:$0xff]  }
 0x469   : > { %v3756_v42 = vpack.c.bf16 %v3739_v38, %v3738_v49  ;;  %v8114_v8 = vld [vmem:[%s10418_s8 + $0x64] ss:$16 sps:$4 sm:$0xff]   ;;  %v8118_v49 = vld [vmem:[%s10418_s8 + $0x80] ss:$16 sps:$4 sm:$0xff]  }
 0x46a   : > { %v8120_v38 = vld [vmem:[%s10418_s8 + $0x84] ss:$16 sps:$4 sm:$0xff]  }
 0x46b   : > { %7565 = vmatprep.subr.bf16.mxu1 %v3756_v42  ;;  %v8126_v42 = vld [vmem:[%s10418_s8 + $0xa4] ss:$16 sps:$4 sm:$0xff]  }
 0x46c   : > { %7566 = vmatpush3.bf16.msra.mxu1 %v9417_v23  ;;  %v8059_v23 = vld [vmem:[%s10421_s11 + $0x10] ss:$8 sps:$4 sm:$0xff]  }
 0x46d   : > { %7567 = vmatprep.subr.bf16.mxu1 %v3757_v27  ;;  %v8124_v27 = vld [vmem:[%s10418_s8 + $0xa0] ss:$16 sps:$4 sm:$0xff]  }
 0x470   : > { %7568 = vmatpush3.bf16.msra.mxu1 %v9415_v61  ;;  %v8074_v61 = vld [vmem:[%s10416_s6 + $0x24] ss:$8 sps:$4 sm:$0xff]  }
 0x471   : > { %3991 = vmatprep.subr.bf16.mxu1 %v8068_v12  ;;  %v8130_v12 = vld [vmem:[%s10418_s8 + $0xc0] ss:$16 sps:$4 sm:$0xff]  }
 0x473   : > { %3839 = vmatmul.mubr.bf16.vlgmr.msra.gmra.mrb[192].mxu1 %v8054_v33  ;;  %v8132_v33 = vld [vmem:[%s10418_s8 + $0xc4] ss:$16 sps:$4 sm:$0xff]  }
 0x474   : > { %3846 = vmatprep.mubr.bf16.mxu1 %v8057_v51  ;;  %3992 = vmatpush1.bf16.msra.mxu1 %v8066_v44  ;;  %v8136_v51 = vld [vmem:[%s10418_s8 + $0xe0] ss:$16 sps:$4 sm:$0xff]   ;;  %v8138_v44 = vld [vmem:[%s10418_s8 + $0xe4] ss:$16 sps:$4 sm:$0xff]  }
 0x475   : > { %3993 = vmatprep.subr.bf16.mxu1 %v8071_v58  ;;  %v8142_v58 = vld [vmem:[%s10418_s8 + $0x100] ss:$16 sps:$4 sm:$0xff]  }
 0x478   : > { %3994 = vmatpush1.bf16.msra.mxu1 %v8069_v63  ;;  %v8144_v63 = vld [vmem:[%s10418_s8 + $0x104] ss:$16 sps:$4 sm:$0xff]  }
 0x479   : > { %3995 = vmatprep.subr.bf16.mxu1 %v8074_v61  ;;  %v8148_v61 = vld [vmem:[%s10418_s8 + $0x120] ss:$16 sps:$4 sm:$0xff]  }
 0x47b   : > { %3847 = vmatmul.mubr.bf16.gmra.mrb[196].mxu1 %v8059_v23  ;;  %v8150_v23 = vld [vmem:[%s10418_s8 + $0x124] ss:$16 sps:$4 sm:$0xff]  }
 0x47c   : > { %3854 = vmatprep.mubr.bf16.mxu1 %v8060_v45  ;;  %3996 = vmatpush1.bf16.msra.mxu1 %v8072_v50  ;;  %v8154_v45 = vld [vmem:[%s10418_s8 + $0x140] ss:$16 sps:$4 sm:$0xff]   ;;  %v8156_v50 = vld [vmem:[%s10418_s8 + $0x144] ss:$16 sps:$4 sm:$0xff]  }
 0x47d   : > { %3997 = vmatprep.subr.bf16.mxu1 %v8077_v48  ;;  %v8160_v48 = vld [vmem:[%s10418_s8 + $0x160] ss:$16 sps:$4 sm:$0xff]  }
 0x480   : > { %3998 = vmatpush1.bf16.msra.mxu1 %v8075_v22  ;;  %v8162_v22 = vld [vmem:[%s10418_s8 + $0x164] ss:$16 sps:$4 sm:$0xff]  }
 0x481   : > { %3999 = vmatprep.subr.bf16.mxu1 %v8080_v32  ;;  %v8166_v32 = vld [vmem:[%s10418_s8 + $0x180] ss:$16 sps:$4 sm:$0xff]  }
 0x483   : > { %3855 = vmatmul.mubr.bf16.gmra.mrb[200].mxu1 %v8062_v15  ;;  %v8168_v15 = vld [vmem:[%s10418_s8 + $0x184] ss:$16 sps:$4 sm:$0xff]  }
 0x484   : > { %3862 = vmatprep.mubr.bf16.mxu1 %v8063_v36  ;;  %4000 = vmatpush1.bf16.msra.mxu1 %v8078_v57  ;;  %v8172_v36 = vld [vmem:[%s10418_s8 + $0x1a0] ss:$16 sps:$4 sm:$0xff]   ;;  %v8174_v57 = vld [vmem:[%s10418_s8 + $0x1a4] ss:$16 sps:$4 sm:$0xff]  }
 0x485   : > { %4001 = vmatprep.subr.bf16.mxu1 %v8083_v41  ;;  %v3901_v41 = vlaneseq }
 0x488   : > { %4002 = vmatpush1.bf16.msra.mxu1 %v8081_v21  ;;  %v9607_v21 = vshrl.u32 %v3901_v41, 7  ;;  %v8090_v41 = vld [vmem:[%s10422_s12] sm:$0xff]  }
 0x489   : > { %4003 = vmatprep.subr.bf16.mxu1 %v8086_v16  ;;  %v3899_v16 = vld [vmem:[%s10417_s7] sm:$0x3] }
 0x48b   : > { %3863 = vmatmul.mubr.bf16.gmra.mrb[204].mxu1 %v8065_v54  ;;  %v3903_v54 = vsub.s32 0, %v9607_v21 }
 0x48c   : > { %4004 = vmatpush1.bf16.msra.mxu1 %v8084_v1  ;;  %4023 = vmatprep.mubr.bf16.mxu1 %v8263_v55  ;;  %v3907_v1 = vsub.s32 1, %v9607_v21 }
 0x48d   : > { %4005 = vmatprep.subr.bf16.mxu1 %v8089_v43  ;;  %v3904_v43 = vrot.slane %v3899_v16, %v3903_v54 }
 0x490   : > { %4006 = vmatpush1.bf16.msra.mxu1 %v8087_v25  ;;  %v3908_v25 = vrot.slane %v3899_v16, %v3907_v1  ;;  %v8091_v16 = vld [vmem:[%s10418_s8 + $0x8] ss:$16 sps:$4 sm:$0xff]  }
 0x491   : > { %4549 = vmatprep.subr.bf16.mxu1 %v8096_v62 }
 0x546   : > { %v7569_v11 = vpop.f32.mrb[192].mxu1 }
 0x547   : > { %v7570_v30 = vpop.f32.mrb[193].mxu1 }
 0x548   : > { %v7571_v47 = vadd.f32 %v7570_v30, %v7569_v11  ;;  %v7572_v26 = vpop.f32.mrb[194].mxu1 }
 0x549   : > { %v7573_v14 = vpop.f32.mrb[195].mxu1 }
 0x54a   : > { %3871 = vst [vmem:[%s9513_s21] sm:$0xff] %v7571_v47  ;;  %v7574_v28 = vadd.f32 %v7573_v14, %v7572_v26 }
 0x54c   : > { %3872 = vst [vmem:[%s9513_s21 + $0x8] sm:$0xff] %v7574_v28  ;;  %v3879_v29 = vpack.c.bf16 %v7574_v28, %v7571_v47 }
 0x54e   : > { %4024 = vmatmul.mubr.bf16.vlgmr.msra.gmra.mrb[208].mxu1 %v3879_v29  ;;  %v7575_v18 = vpop.f32.mrb[196].mxu1 }
 0x54f   : > { %v7576_v35 = vpop.f32.mrb[197].mxu1  ;;  %4033 = vmatprep.mubr.bf16.mxu1 %v8263_v55  ;;  %4550 = vmatpush1.bf16.msra.mxu1 %v8094_v60 }
 0x550   : > { %v7577_v31 = vadd.f32 %v7576_v35, %v7575_v18  ;;  %v7578_v17 = vpop.f32.mrb[198].mxu1  ;;  %4551 = vmatprep.subr.bf16.mxu1 %v8102_v34 }
 0x551   : > { %v7579_v6 = vpop.f32.mrb[199].mxu1 }
 0x552   : > { %3873 = vst [vmem:[%s9513_s21 + $0x10] sm:$0xff] %v7577_v31  ;;  %v7580_v4 = vadd.f32 %v7579_v6, %v7578_v17 }
 0x553   : > { %4552 = vmatpush1.bf16.msra.mxu1 %v8100_v13 }
 0x554   : > { %3874 = vst [vmem:[%s9513_s21 + $0x18] sm:$0xff] %v7580_v4  ;;  %v3880_v37 = vpack.c.bf16 %v7580_v4, %v7577_v31  ;;  %4553 = vmatprep.subr.bf16.mxu1 %v8108_v24 }
 0x556   : > { %4034 = vmatmul.mubr.bf16.gmra.mrb[212].mxu1 %v3880_v37  ;;  %v7581_v59 = vpop.f32.mrb[200].mxu1 }
 0x557   : > { %v7582_v3 = vpop.f32.mrb[201].mxu1  ;;  %4043 = vmatprep.mubr.bf16.mxu1 %v8263_v55  ;;  %4554 = vmatpush1.bf16.msra.mxu1 %v8106_v2 }
 0x558   : > { %v7583_v39 = vadd.f32 %v7582_v3, %v7581_v59  ;;  %v7584_v53 = vpop.f32.mrb[202].mxu1  ;;  %4555 = vmatprep.subr.bf16.mxu1 %v8114_v8 }
 0x559   : > { %v7585_v46 = vpop.f32.mrb[203].mxu1 }
 0x55a   : > { %3875 = vst [vmem:[%s9513_s21 + $0x20] sm:$0xff] %v7583_v39  ;;  %v7586_v52 = vadd.f32 %v7585_v46, %v7584_v53 }
 0x55b   : > { %4556 = vmatpush1.bf16.msra.mxu1 %v8112_v20 }
 0x55c   : > { %3876 = vst [vmem:[%s9513_s21 + $0x28] sm:$0xff] %v7586_v52  ;;  %v3881_v5 = vpack.c.bf16 %v7586_v52, %v7583_v39  ;;  %4557 = vmatprep.subr.bf16.mxu1 %v8120_v38 }
 0x55e   : > { %4044 = vmatmul.mubr.bf16.gmra.mrb[216].mxu1 %v3881_v5  ;;  %v7587_v9 = vpop.f32.mrb[204].mxu1 }
 0x55f   : > { %v7588_v10 = vpop.f32.mrb[205].mxu1  ;;  %4053 = vmatprep.mubr.bf16.mxu1 %v8263_v55  ;;  %4558 = vmatpush1.bf16.msra.mxu1 %v8118_v49 }
 0x560   : > { %v7589_v40 = vadd.f32 %v7588_v10, %v7587_v9  ;;  %v7590_v7 = vpop.f32.mrb[206].mxu1  ;;  %4559 = vmatprep.subr.bf16.mxu1 %v8126_v42 }
 0x561   : > { %v7591_v19 = vpop.f32.mrb[207].mxu1 }
 0x562   : > { %3877 = vst [vmem:[%s9513_s21 + $0x30] sm:$0xff] %v7589_v40  ;;  %v7592_v56 = vadd.f32 %v7591_v19, %v7590_v7 }
 0x563   : > { %4560 = vmatpush1.bf16.msra.mxu1 %v8124_v27 }
 0x564   : > { %3878 = vst [vmem:[%s9513_s21 + $0x38] sm:$0xff] %v7592_v56  ;;  %v3882_v0 = vpack.c.bf16 %v7592_v56, %v7589_v40  ;;  %4561 = vmatprep.subr.bf16.mxu1 %v8132_v33 }
 0x566   : > { %4054 = vmatmul.mubr.bf16.gmra.mrb[220].mxu1 %v3882_v0 }
 0x567   : > { %4562 = vmatpush1.bf16.msra.mxu1 %v8130_v12 }
 0x568   : > { %4563 = vmatprep.subr.bf16.mxu1 %v8138_v44 }
 0x56b   : > { %4564 = vmatpush1.bf16.msra.mxu1 %v8136_v51 }
 0x56c   : > { %4565 = vmatprep.subr.bf16.mxu1 %v8144_v63 }
 0x56f   : > { %4566 = vmatpush1.bf16.msra.mxu1 %v8142_v58 }
 0x570   : > { %4567 = vmatprep.subr.bf16.mxu1 %v8150_v23 }
 0x573   : > { %4568 = vmatpush1.bf16.msra.mxu1 %v8148_v61 }
 0x574   : > { %4569 = vmatprep.subr.bf16.mxu1 %v8156_v50 }
 0x577   : > { %4570 = vmatpush1.bf16.msra.mxu1 %v8154_v45 }
 0x578   : > { %4571 = vmatprep.subr.bf16.mxu1 %v8162_v22 }
 0x57b   : > { %4572 = vmatpush1.bf16.msra.mxu1 %v8160_v48 }
 0x57c   : > { %4573 = vmatprep.subr.bf16.mxu1 %v8168_v15 }
 0x57f   : > { %4574 = vmatpush1.bf16.msra.mxu1 %v8166_v32 }
 0x580   : > { %4575 = vmatprep.subr.bf16.mxu1 %v8174_v57  ;;  %v8093_v57 = vld [vmem:[%s10418_s8 + $0xc] ss:$16 sps:$4 sm:$0xff]  }
 0x583   : > { %4576 = vmatpush1.bf16.msra.mxu1 %v8172_v36 }
 0x621   : > { %v4025_v55 = vpop.f32.mrb[208].mxu1 }
 0x622   : > { %v4026_v11 = vadd.f32 %v4025_v55, %v3904_v43  ;;  %v4027_v30 = vpop.f32.mrb[209].mxu1  ;;  %v8105_v55 = vld [vmem:[%s10418_s8 + $0x4c] ss:$16 sps:$4 sm:$0xff]  }
 0x623   : > { %v4028_v47 = vadd.f32 %v4027_v30, %v3908_v25  ;;  %v4029_v26 = vpop.f32.mrb[210].mxu1  ;;  %v8111_v30 = vld [vmem:[%s10418_s8 + $0x6c] ss:$16 sps:$4 sm:$0xff]  }
 0x624   : > { %v4030_v14 = vadd.f32 %v4029_v26, %v3904_v43  ;;  %v4031_v28 = vpop.f32.mrb[211].mxu1  ;;  %v4064_v18 = vmax.f32 %v4026_v11, 0.0  ;;  %v8103_v11 = vld [vmem:[%s10418_s8 + $0x48] ss:$16 sps:$4 sm:$0xff]   ;;  %v8117_v26 = vld [vmem:[%s10418_s8 + $0x8c] ss:$16 sps:$4 sm:$0xff]  }
 0x625   : > { %v4032_v29 = vadd.f32 %v4031_v28, %v3908_v25  ;;  %v4065_v31 = vmax.f32 %v4028_v47, 0.0  ;;  %v8109_v47 = vld [vmem:[%s10418_s8 + $0x68] ss:$16 sps:$4 sm:$0xff]   ;;  %v8123_v28 = vld [vmem:[%s10418_s8 + $0xac] ss:$16 sps:$4 sm:$0xff]  }
 0x626   : > { %v4066_v35 = vmax.f32 %v4030_v14, 0.0  ;;  %v8115_v14 = vld [vmem:[%s10418_s8 + $0x88] ss:$16 sps:$4 sm:$0xff]  }
 0x627   : > { %v4067_v17 = vmax.f32 %v4032_v29, 0.0  ;;  %v8121_v29 = vld [vmem:[%s10418_s8 + $0xa8] ss:$16 sps:$4 sm:$0xff]  }
 0x628   : > { %v4080_v6 = vpack.c.bf16 %v4066_v35, %v4064_v18  ;;  %v8129_v18 = vld [vmem:[%s10418_s8 + $0xcc] ss:$16 sps:$4 sm:$0xff]   ;;  %v8127_v35 = vld [vmem:[%s10418_s8 + $0xc8] ss:$16 sps:$4 sm:$0xff]  }
 0x629   : > { %v4081_v4 = vpack.c.bf16 %v4067_v17, %v4065_v31  ;;  %v4035_v37 = vpop.f32.mrb[212].mxu1  ;;  %v8135_v31 = vld [vmem:[%s10418_s8 + $0xec] ss:$16 sps:$4 sm:$0xff]   ;;  %v8133_v17 = vld [vmem:[%s10418_s8 + $0xe8] ss:$16 sps:$4 sm:$0xff]  }
 0x62a   : > { %v4036_v59 = vadd.f32 %v4035_v37, %v3904_v43  ;;  %v4037_v3 = vpop.f32.mrb[213].mxu1  ;;  %v8147_v37 = vld [vmem:[%s10418_s8 + $0x12c] ss:$16 sps:$4 sm:$0xff]  }
 0x62b   : > { %4098 = vmatprep.subr.bf16.mxu0 %v4081_v4  ;;  %v4038_v39 = vadd.f32 %v4037_v3, %v3908_v25  ;;  %v4039_v53 = vpop.f32.mrb[214].mxu1  ;;  %v8139_v4 = vld [vmem:[%s10418_s8 + $0x108] ss:$16 sps:$4 sm:$0xff]   ;;  %v8153_v3 = vld [vmem:[%s10418_s8 + $0x14c] ss:$16 sps:$4 sm:$0xff]  }
 0x62c   : > { %4099 = vmatpush1.bf16.msra.mxu0 %v4080_v6  ;;  %v4040_v46 = vadd.f32 %v4039_v53, %v3904_v43  ;;  %v4041_v52 = vpop.f32.mrb[215].mxu1  ;;  %v4068_v9 = vmax.f32 %v4036_v59, 0.0  ;;  %v8141_v6 = vld [vmem:[%s10418_s8 + $0x10c] ss:$16 sps:$4 sm:$0xff]   ;;  %v8145_v59 = vld [vmem:[%s10418_s8 + $0x128] ss:$16 sps:$4 sm:$0xff]  }
 0x62d   : > { %v4042_v5 = vadd.f32 %v4041_v52, %v3908_v25  ;;  %v4069_v40 = vmax.f32 %v4038_v39, 0.0  ;;  %v8151_v39 = vld [vmem:[%s10418_s8 + $0x148] ss:$16 sps:$4 sm:$0xff]   ;;  %v8159_v53 = vld [vmem:[%s10418_s8 + $0x16c] ss:$16 sps:$4 sm:$0xff]  }
 0x62e   : > { %v4070_v10 = vmax.f32 %v4040_v46, 0.0  ;;  %v8157_v46 = vld [vmem:[%s10418_s8 + $0x168] ss:$16 sps:$4 sm:$0xff]   ;;  %v8165_v52 = vld [vmem:[%s10418_s8 + $0x18c] ss:$16 sps:$4 sm:$0xff]  }
 0x62f   : > { %v4071_v7 = vmax.f32 %v4042_v5, 0.0  ;;  %v8163_v5 = vld [vmem:[%s10418_s8 + $0x188] ss:$16 sps:$4 sm:$0xff]  }
 0x630   : > { %v4082_v19 = vpack.c.bf16 %v4070_v10, %v4068_v9  ;;  %v8171_v9 = vld [vmem:[%s10418_s8 + $0x1ac] ss:$16 sps:$4 sm:$0xff]   ;;  %v8169_v10 = vld [vmem:[%s10418_s8 + $0x1a8] ss:$16 sps:$4 sm:$0xff]  }
 0x631   : > { %v4083_v56 = vpack.c.bf16 %v4071_v7, %v4069_v40  ;;  %v4045_v0 = vpop.f32.mrb[216].mxu1  ;;  %v8177_v40 = vld [vmem:[%s10418_s8 + $0x1cc] ss:$16 sps:$4 sm:$0xff]   ;;  %v8175_v7 = vld [vmem:[%s10418_s8 + $0x1c8] ss:$16 sps:$4 sm:$0xff]  }
 0x632   : > { %v4046_v60 = vadd.f32 %v4045_v0, %v3904_v43  ;;  %v4047_v62 = vpop.f32.mrb[217].mxu1  ;;  %v8183_v0 = vld [vmem:[%s10418_s8 + $0x1ec] ss:$16 sps:$4 sm:$0xff]  }
 0x633   : > { %4100 = vmatprep.subr.bf16.mxu0 %v4083_v56  ;;  %v4048_v13 = vadd.f32 %v4047_v62, %v3908_v25  ;;  %v4049_v34 = vpop.f32.mrb[218].mxu1  ;;  %v8178_v56 = vld [vmem:[%s10418_s8 + $0x1c0] ss:$16 sps:$4 sm:$0xff]   ;;  %v8181_v62 = vld [vmem:[%s10418_s8 + $0x1e8] ss:$16 sps:$4 sm:$0xff]  }
 0x634   : > { %4101 = vmatpush1.bf16.msra.mxu0 %v4082_v19  ;;  %v4050_v2 = vadd.f32 %v4049_v34, %v3904_v43  ;;  %v4051_v24 = vpop.f32.mrb[219].mxu1  ;;  %v4072_v8 = vmax.f32 %v4046_v60, 0.0  ;;  %v8180_v19 = vld [vmem:[%s10418_s8 + $0x1c4] ss:$16 sps:$4 sm:$0xff]   ;;  %v4855_v34 = vld [vmem:[%s10423_s13] sm:$0xf] }
 0x635   : > { %v4052_v20 = vadd.f32 %v4051_v24, %v3908_v25  ;;  %v4073_v38 = vmax.f32 %v4048_v13, 0.0  ;;  %4577 = vmatprep.subr.bf16.mxu1 %v8180_v19  ;;  %v8186_v60 = vld [vmem:[%s10418_s8 + $0x1e4] ss:$16 sps:$4 sm:$0xff]   ;;  %v8184_v13 = vld [vmem:[%s10418_s8 + $0x1e0] ss:$16 sps:$4 sm:$0xff]   ;;  %v8240_v19 = vld [vmem:[%s8441_s28 + $0x1a8] sm:$0xff]  }
 0x636   : > { %v4074_v49 = vmax.f32 %v4050_v2, 0.0  ;;  %4578 = vmatpush1.bf16.msra.mxu1 %v8178_v56  ;;  %v8211_v56 = vld [vmem:[%s8441_s28 + $0xc0] sm:$0xff]  }
 0x637   : > { %v4075_v27 = vmax.f32 %v4052_v20, 0.0  ;;  %4579 = vmatprep.subr.bf16.mxu1 %v8186_v60  ;;  %v8212_v60 = vld [vmem:[%s8441_s28 + $0xc8] sm:$0xff]  }
 0x638   : > { %v4084_v42 = vpack.c.bf16 %v4074_v49, %v4072_v8 }
 0x639   : > { %v4085_v12 = vpack.c.bf16 %v4075_v27, %v4073_v38  ;;  %v4055_v33 = vpop.f32.mrb[220].mxu1  ;;  %v8187_v27 = vld [vmem:[%s8441_s28] sm:$0xff]  }
 0x63a   : > { %v4056_v51 = vadd.f32 %v4055_v33, %v3904_v43  ;;  %v4057_v44 = vpop.f32.mrb[221].mxu1  ;;  %4580 = vmatpush1.bf16.msra.mxu1 %v8184_v13  ;;  %v8188_v33 = vld [vmem:[%s8441_s28 + $0x8] sm:$0xff]   ;;  %v8213_v13 = vld [vmem:[%s8441_s28 + $0xd0] sm:$0xff]  }
 0x63b   : > { %4102 = vmatprep.subr.bf16.mxu0 %v4085_v12  ;;  %v4058_v58 = vadd.f32 %v4057_v44, %v3908_v25  ;;  %v4059_v63 = vpop.f32.mrb[222].mxu1  ;;  %7973 = vmatprep.subr.msk.bf16.mxu1 %vm1292_vm0, %v4855_v34  ;;  %v8217_v12 = vld [vmem:[%s8441_s28 + $0xf0] sm:$0xff]  }
 0x63c   : > { %4103 = vmatpush1.bf16.msra.mxu0 %v4084_v42  ;;  %v4060_v61 = vadd.f32 %v4059_v63, %v3904_v43  ;;  %v4061_v23 = vpop.f32.mrb[223].mxu1  ;;  %v4076_v50 = vmax.f32 %v4056_v51, 0.0  ;;  %v8099_v43 = vld [vmem:[%s10418_s8 + $0x2c] ss:$16 sps:$4 sm:$0xff]   ;;  %v5376_v42 = vsel %vm1292_vm0, %v4855_v34, 0  ;;  %v8189_v44 = vld [vmem:[%s8441_s28 + $0x10] sm:$0xff]  }
 0x63d   : > { %v4062_v45 = vadd.f32 %v4061_v23, %v3908_v25  ;;  %v4077_v22 = vmax.f32 %v4058_v58, 0.0  ;;  %v8097_v25 = vld [vmem:[%s10418_s8 + $0x28] ss:$16 sps:$4 sm:$0xff]   ;;  %v8219_v58 = vld [vmem:[%s8441_s28 + $0x100] sm:$0xff]  }
 0x63e   : > { %v4078_v48 = vmax.f32 %v4060_v61, 0.0  ;;  %v8218_v51 = vld [vmem:[%s8441_s28 + $0xf8] sm:$0xff]   ;;  %v8220_v61 = vld [vmem:[%s8441_s28 + $0x108] sm:$0xff]   ;;  %v8191_v23 = vld [vmem:[%s8441_s28 + $0x20] sm:$0xff]  }
 0x63f   : > { %v4079_v32 = vmax.f32 %v4062_v45, 0.0  ;;  %v8190_v63 = vld [vmem:[%s8441_s28 + $0x18] sm:$0xff]   ;;  %v8221_v45 = vld [vmem:[%s8441_s28 + $0x110] sm:$0xff]  }
 0x640   : > { %v4086_v15 = vpack.c.bf16 %v4078_v48, %v4076_v50  ;;  %v8192_v50 = vld [vmem:[%s8441_s28 + $0x28] sm:$0xff]   ;;  %v8222_v48 = vld [vmem:[%s8441_s28 + $0x118] sm:$0xff]  }
 0x641   : > { %v4087_v36 = vpack.c.bf16 %v4079_v32, %v4077_v22  ;;  %v8193_v22 = vld [vmem:[%s8441_s28 + $0x30] sm:$0xff]   ;;  %v8223_v32 = vld [vmem:[%s8441_s28 + $0x120] sm:$0xff]  }
 0x643   : > { %4104 = vmatprep.subr.bf16.mxu0 %v4087_v36  ;;  %v8224_v36 = vld [vmem:[%s8441_s28 + $0x128] sm:$0xff]  }
 0x644   : > { %4105 = vmatpush1.bf16.msra.mxu0 %v4086_v15  ;;  %v8194_v15 = vld [vmem:[%s8441_s28 + $0x38] sm:$0xff]  }
 0x645   : > { %4592 = vmatprep.subr.bf16.mxu0 %v8093_v57  ;;  %v8195_v57 = vld [vmem:[%s8441_s28 + $0x40] sm:$0xff]  }
 0x647   : > { %6816 = vmatmul.mubr.msk.bf16.vlgmr.msra.gmra.mrb[224].mxu0 %vm3500_vm2, %v8090_v41  ;;  %v8225_v41 = vld [vmem:[%s8441_s28 + $0x130] sm:$0xff]  }
 0x648   : > { %4593 = vmatpush1.bf16.msra.mxu0 %v8091_v16  ;;  %v8196_v16 = vld [vmem:[%s8441_s28 + $0x48] sm:$0xff]  }
 0x649   : > { %4594 = vmatprep.subr.bf16.mxu0 %v8099_v43  ;;  %v8226_v43 = vld [vmem:[%s8441_s28 + $0x138] sm:$0xff]  }
 0x64c   : > { %4595 = vmatpush1.bf16.msra.mxu0 %v8097_v25  ;;  %v8197_v25 = vld [vmem:[%s8441_s28 + $0x50] sm:$0xff]  }
 0x64d   : > { %4596 = vmatprep.subr.bf16.mxu0 %v8105_v55  ;;  %v8227_v55 = vld [vmem:[%s8441_s28 + $0x140] sm:$0xff]  }
 0x650   : > { %4597 = vmatpush1.bf16.msra.mxu0 %v8103_v11  ;;  %v8198_v11 = vld [vmem:[%s8441_s28 + $0x58] sm:$0xff]  }
 0x651   : > { %4598 = vmatprep.subr.bf16.mxu0 %v8111_v30  ;;  %v8228_v30 = vld [vmem:[%s8441_s28 + $0x148] sm:$0xff]  }
 0x654   : > { %4599 = vmatpush1.bf16.msra.mxu0 %v8109_v47  ;;  %v8199_v47 = vld [vmem:[%s8441_s28 + $0x60] sm:$0xff]  }
 0x655   : > { %4600 = vmatprep.subr.bf16.mxu0 %v8117_v26  ;;  %v8229_v26 = vld [vmem:[%s8441_s28 + $0x150] sm:$0xff]  }
 0x658   : > { %4601 = vmatpush1.bf16.msra.mxu0 %v8115_v14  ;;  %v8200_v14 = vld [vmem:[%s8441_s28 + $0x68] sm:$0xff]  }
 0x659   : > { %4602 = vmatprep.subr.bf16.mxu0 %v8123_v28  ;;  %v8230_v28 = vld [vmem:[%s8441_s28 + $0x158] sm:$0xff]  }
 0x65c   : > { %4603 = vmatpush1.bf16.msra.mxu0 %v8121_v29  ;;  %v8201_v29 = vld [vmem:[%s8441_s28 + $0x70] sm:$0xff]  }
 0x65d   : > { %4604 = vmatprep.subr.bf16.mxu0 %v8129_v18  ;;  %v8231_v18 = vld [vmem:[%s8441_s28 + $0x160] sm:$0xff]  }
 0x660   : > { %4605 = vmatpush1.bf16.msra.mxu0 %v8127_v35  ;;  %v8202_v35 = vld [vmem:[%s8441_s28 + $0x78] sm:$0xff]  }
 0x661   : > { %4606 = vmatprep.subr.bf16.mxu0 %v8135_v31  ;;  %v8232_v31 = vld [vmem:[%s8441_s28 + $0x168] sm:$0xff]  }
 0x664   : > { %4607 = vmatpush1.bf16.msra.mxu0 %v8133_v17  ;;  %v8203_v17 = vld [vmem:[%s8441_s28 + $0x80] sm:$0xff]  }
 0x665   : > { %4608 = vmatprep.subr.bf16.mxu0 %v8141_v6  ;;  %v8233_v6 = vld [vmem:[%s8441_s28 + $0x170] sm:$0xff]  }
 0x668   : > { %4609 = vmatpush1.bf16.msra.mxu0 %v8139_v4  ;;  %v8204_v4 = vld [vmem:[%s8441_s28 + $0x88] sm:$0xff]  }
 0x669   : > { %4610 = vmatprep.subr.bf16.mxu0 %v8147_v37  ;;  %v8234_v37 = vld [vmem:[%s8441_s28 + $0x178] sm:$0xff]  }
 0x66c   : > { %4611 = vmatpush1.bf16.msra.mxu0 %v8145_v59  ;;  %v8205_v59 = vld [vmem:[%s8441_s28 + $0x90] sm:$0xff]  }
 0x66d   : > { %4612 = vmatprep.subr.bf16.mxu0 %v8153_v3  ;;  %v8235_v3 = vld [vmem:[%s8441_s28 + $0x180] sm:$0xff]  }
 0x670   : > { %4613 = vmatpush1.bf16.msra.mxu0 %v8151_v39  ;;  %v8206_v39 = vld [vmem:[%s8441_s28 + $0x98] sm:$0xff]  }
 0x671   : > { %4614 = vmatprep.subr.bf16.mxu0 %v8159_v53  ;;  %v8236_v53 = vld [vmem:[%s8441_s28 + $0x188] sm:$0xff]  }
 0x674   : > { %4615 = vmatpush1.bf16.msra.mxu0 %v8157_v46  ;;  %v8207_v46 = vld [vmem:[%s8441_s28 + $0xa0] sm:$0xff]  }
 0x675   : > { %4616 = vmatprep.subr.bf16.mxu0 %v8165_v52  ;;  %v8237_v52 = vld [vmem:[%s8441_s28 + $0x190] sm:$0xff]  }
 0x678   : > { %4617 = vmatpush1.bf16.msra.mxu0 %v8163_v5  ;;  %v8208_v5 = vld [vmem:[%s8441_s28 + $0xa8] sm:$0xff]  }
 0x679   : > { %4618 = vmatprep.subr.bf16.mxu0 %v8171_v9  ;;  %v8238_v9 = vld [vmem:[%s8441_s28 + $0x198] sm:$0xff]  }
 0x67c   : > { %4619 = vmatpush1.bf16.msra.mxu0 %v8169_v10  ;;  %v8209_v10 = vld [vmem:[%s8441_s28 + $0xb0] sm:$0xff]  }
 0x67d   : > { %4620 = vmatprep.subr.bf16.mxu0 %v8177_v40  ;;  %v8239_v40 = vld [vmem:[%s8441_s28 + $0x1a0] sm:$0xff]  }
 0x680   : > { %4621 = vmatpush1.bf16.msra.mxu0 %v8175_v7  ;;  %v8210_v7 = vld [vmem:[%s8441_s28 + $0xb8] sm:$0xff]  }
 0x681   : > { %4622 = vmatprep.subr.bf16.mxu0 %v8183_v0  ;;  %v8241_v0 = vld [vmem:[%s8441_s28 + $0x1b0] sm:$0xff]  }
 0x684   : > { %4623 = vmatpush1.bf16.msra.mxu0 %v8181_v62  ;;  %v8242_v62 = vld [vmem:[%s8441_s28 + $0x1b8] sm:$0xff]  }
 0x685   : > { %7972 = vmatprep.subr.msk.bf16.mxu0 %vm1292_vm0, %v4855_v34  ;;  %v8243_v34 = vld [vmem:[%s8441_s28 + $0x1c0] sm:$0xff]   ;;  %vm9936_vm0 = vmor %vm4718_vm13, %vm4715_vm12 }
 0x71a   : > { %v4132_v2 = vpop.f32.mrb[224].mxu0 }
 0x71b   : > { %v4134_v24 = vpop.f32.mrb[225].mxu0 }
 0x71c   : > { %v4136_v20 = vpop.f32.mrb[226].mxu0 }
 0x71d   : > { %v4141_v8 = vpack.c.bf16 %v4136_v20, %v4132_v2  ;;  %v4138_v49 = vpop.f32.mrb[227].mxu0  ;;  %v8214_v2 = vld [vmem:[%s8441_s28 + $0xd8] sm:$0xff]   ;;  %v8215_v20 = vld [vmem:[%s8441_s28 + $0xe0] sm:$0xff]  }
 0x71e   : > { %v4142_v38 = vpack.c.bf16 %v4138_v49, %v4134_v24  ;;  %v8244_v24 = vld [vmem:[%s8441_s28 + $0x1c8] sm:$0xff]  }
 0x71f   : > { %v8216_v49 = vld [vmem:[%s8441_s28 + $0xe8] sm:$0xff]  }
 0x720   : > { %4624 = vmatprep.mubr.bf16.mxu0 %v4142_v38  ;;  %4581 = vmatprep.mubr.bf16.mxu1 %v4142_v38  ;;  %v8246_v38 = vld [vmem:[%s8441_s28 + $0x1d8] sm:$0xff]  }
 0x721   : > { %4625 = vmatmul.mubr.bf16.vlgmr.msra.gmra.mrb[228].mxu0 %v4141_v8  ;;  %4582 = vmatmul.mubr.bf16.vlgmr.msra.gmra.mrb[224].mxu1 %v4141_v8  ;;  %v8245_v8 = vld [vmem:[%s8441_s28 + $0x1d0] sm:$0xff]  }
 0x722   : > { %7832 = vmatpush3.bf16.msra.mxu0 %v5376_v42  ;;  %7833 = vmatprep.mubr.msk.bf16.mxu0 %vm1099_vm1, %v8187_v27  ;;  %v8247_v27 = vld [vmem:[%s8441_s28 + $0x1e0] sm:$0xff]  }
 0x723   : > { %7970 = vmatpush3.bf16.msra.mxu1 %v5376_v42  ;;  %7893 = vmatprep.mubr.msk.bf16.mxu1 %vm1099_vm1, %v8217_v12  ;;  %v8248_v42 = vld [vmem:[%s8441_s28 + $0x1e8] sm:$0xff]   ;;  %v8249_v12 = vld [vmem:[%s8441_s28 + $0x1f0] sm:$0xff]  }
 0x729   : > { %7834 = vmatmul.mubr.msk.bf16.vlgmr.msra.gmra.mrb[232].mxu0 %vm1099_vm1, %v8188_v33  ;;  %7894 = vmatmul.mubr.msk.bf16.vlgmr.msra.gmra.mrb[228].mxu1 %vm1099_vm1, %v8218_v51  ;;  %v8250_v33 = vld [vmem:[%s8441_s28 + $0x1f8] sm:$0xff]   ;;  %v4219_v51 = vsub.s32 2, %v9607_v21 }
 0x72a   : > { %7837 = vmatprep.mubr.msk.bf16.mxu0 %vm1099_vm1, %v8189_v44  ;;  %7897 = vmatprep.mubr.msk.bf16.mxu1 %vm1099_vm1, %v8219_v58  ;;  %v4207_v44 = vld [vmem:[%s10419_s9] sm:$0xf]  ;;  %v4223_v58 = vsub.s32 3, %v9607_v21 }
 0x731   : > { %7838 = vmatmul.mubr.msk.bf16.gmra.mrb[236].mxu0 %vm1099_vm1, %v8190_v63  ;;  %7898 = vmatmul.mubr.msk.bf16.gmra.mrb[232].mxu1 %vm1099_vm1, %v8220_v61  ;;  %v4212_v63 = vrot.slane %v4207_v44, %v3903_v54  ;;  %v4220_v61 = vrot.slane %v4207_v44, %v4219_v51 }
 0x732   : > { %7841 = vmatprep.mubr.msk.bf16.mxu0 %vm1099_vm1, %v8191_v23  ;;  %7901 = vmatprep.mubr.msk.bf16.mxu1 %vm1099_vm1, %v8221_v45  ;;  %v4216_v23 = vrot.slane %v4207_v44, %v3907_v1  ;;  %v4224_v45 = vrot.slane %v4207_v44, %v4223_v58 }
 0x739   : > { %7842 = vmatmul.mubr.msk.bf16.gmra.mrb[240].mxu0 %vm1099_vm1, %v8192_v50  ;;  %7902 = vmatmul.mubr.msk.bf16.gmra.mrb[236].mxu1 %vm1099_vm1, %v8222_v48 }
 0x73a   : > { %7845 = vmatprep.mubr.msk.bf16.mxu0 %vm1099_vm1, %v8193_v22  ;;  %7905 = vmatprep.mubr.msk.bf16.mxu1 %vm1099_vm1, %v8223_v32  ;;  %v8264_v22 = vmov 1966171168  }
 0x73b   : > { %v4687_v32 = vunpack.c.l.s4 %v8264_v22 }
 0x741   : > { %7846 = vmatmul.mubr.msk.bf16.gmra.mrb[244].mxu0 %vm1099_vm1, %v8194_v15  ;;  %7906 = vmatmul.mubr.msk.bf16.gmra.mrb[240].mxu1 %vm1099_vm1, %v8224_v36 }
 0x742   : > { %7849 = vmatprep.mubr.msk.bf16.mxu0 %vm1099_vm1, %v8195_v57  ;;  %7909 = vmatprep.mubr.msk.bf16.mxu1 %vm1099_vm1, %v8225_v41 }
 0x749   : > { %7850 = vmatmul.mubr.msk.bf16.gmra.mrb[248].mxu0 %vm1099_vm1, %v8196_v16  ;;  %7910 = vmatmul.mubr.msk.bf16.gmra.mrb[244].mxu1 %vm1099_vm1, %v8226_v43 }
 0x74a   : > { %7853 = vmatprep.mubr.msk.bf16.mxu0 %vm1099_vm1, %v8197_v25  ;;  %7913 = vmatprep.mubr.msk.bf16.mxu1 %vm1099_vm1, %v8227_v55 }
 0x751   : > { %7854 = vmatmul.mubr.msk.bf16.gmra.mrb[252].mxu0 %vm1099_vm1, %v8198_v11  ;;  %7914 = vmatmul.mubr.msk.bf16.gmra.mrb[248].mxu1 %vm1099_vm1, %v8228_v30 }
 0x752   : > { %7857 = vmatprep.mubr.msk.bf16.mxu0 %vm1099_vm1, %v8199_v47  ;;  %7917 = vmatprep.mubr.msk.bf16.mxu1 %vm1099_vm1, %v8229_v26 }
 0x759   : > { %7858 = vmatmul.mubr.msk.bf16.gmra.mrb[0].mxu0 %vm1099_vm1, %v8200_v14  ;;  %7918 = vmatmul.mubr.msk.bf16.gmra.mrb[252].mxu1 %vm1099_vm1, %v8230_v28  ;;  %v4688_v14 = vunpack.c.0.s8 %v4687_v32 }
 0x75a   : > { %7861 = vmatprep.mubr.msk.bf16.mxu0 %vm1099_vm1, %v8201_v29  ;;  %7921 = vmatprep.mubr.msk.bf16.mxu1 %vm1099_vm1, %v8231_v18 }
 0x761   : > { %7862 = vmatmul.mubr.msk.bf16.gmra.mrb[4].mxu0 %vm1099_vm1, %v8202_v35  ;;  %7922 = vmatmul.mubr.msk.bf16.gmra.mrb[0].mxu1 %vm1099_vm1, %v8232_v31 }
 0x762   : > { %7865 = vmatprep.mubr.msk.bf16.mxu0 %vm1099_vm1, %v8203_v17  ;;  %7925 = vmatprep.mubr.msk.bf16.mxu1 %vm1099_vm1, %v8233_v6 }
 0x769   : > { %7866 = vmatmul.mubr.msk.bf16.gmra.mrb[8].mxu0 %vm1099_vm1, %v8204_v4  ;;  %7926 = vmatmul.mubr.msk.bf16.gmra.mrb[4].mxu1 %vm1099_vm1, %v8234_v37 }
 0x76a   : > { %7869 = vmatprep.mubr.msk.bf16.mxu0 %vm1099_vm1, %v8205_v59  ;;  %7929 = vmatprep.mubr.msk.bf16.mxu1 %vm1099_vm1, %v8235_v3  ;;  %v9876_v3 = vld [vmem:[%s10424_s14] ss:$0 sm:$0xff] }
 0x771   : > { %7870 = vmatmul.mubr.msk.bf16.gmra.mrb[12].mxu0 %vm1099_vm1, %v8206_v39  ;;  %7930 = vmatmul.mubr.msk.bf16.gmra.mrb[8].mxu1 %vm1099_vm1, %v8236_v53 }
 0x772   : > { %7873 = vmatprep.mubr.msk.bf16.mxu0 %vm1099_vm1, %v8207_v46  ;;  %7933 = vmatprep.mubr.msk.bf16.mxu1 %vm1099_vm1, %v8237_v52 }
 0x779   : > { %7874 = vmatmul.mubr.msk.bf16.gmra.mrb[16].mxu0 %vm1099_vm1, %v8208_v5  ;;  %7934 = vmatmul.mubr.msk.bf16.gmra.mrb[12].mxu1 %vm1099_vm1, %v8238_v9 }
 0x77a   : > { %7877 = vmatprep.mubr.msk.bf16.mxu0 %vm1099_vm1, %v8209_v10  ;;  %7937 = vmatprep.mubr.msk.bf16.mxu1 %vm1099_vm1, %v8239_v40  ;;  %v9881_v10 = vsub.s32 %v4688_v14, %v9607_v21 }
 0x781   : > { %7878 = vmatmul.mubr.msk.bf16.gmra.mrb[20].mxu0 %vm1099_vm1, %v8210_v7  ;;  %7938 = vmatmul.mubr.msk.bf16.gmra.mrb[16].mxu1 %vm1099_vm1, %v8240_v19 }
 0x782   : > { %7881 = vmatprep.mubr.msk.bf16.mxu0 %vm1099_vm1, %v8211_v56  ;;  %7941 = vmatprep.mubr.msk.bf16.mxu1 %vm1099_vm1, %v8241_v0 }
 0x789   : > { %7882 = vmatmul.mubr.msk.bf16.gmra.mrb[24].mxu0 %vm1099_vm1, %v8212_v60  ;;  %7942 = vmatmul.mubr.msk.bf16.gmra.mrb[20].mxu1 %vm1099_vm1, %v8242_v62 }
 0x78a   : > { %7885 = vmatprep.mubr.msk.bf16.mxu0 %vm1099_vm1, %v8213_v13  ;;  %7945 = vmatprep.mubr.msk.bf16.mxu1 %vm1099_vm1, %v8243_v34 }
 0x791   : > { %7886 = vmatmul.mubr.msk.bf16.gmra.mrb[28].mxu0 %vm1099_vm1, %v8214_v2  ;;  %7946 = vmatmul.mubr.msk.bf16.gmra.mrb[24].mxu1 %vm1099_vm1, %v8244_v24 }
 0x792   : > { %7889 = vmatprep.mubr.msk.bf16.mxu0 %vm1099_vm1, %v8215_v20  ;;  %7949 = vmatprep.mubr.msk.bf16.mxu1 %vm1099_vm1, %v8245_v8 }
 0x799   : > { %7890 = vmatmul.mubr.msk.bf16.gmra.mrb[32].mxu0 %vm1099_vm1, %v8216_v49  ;;  %7950 = vmatmul.mubr.msk.bf16.gmra.mrb[28].mxu1 %vm1099_vm1, %v8246_v38 }
 0x79a   : > { %7953 = vmatprep.mubr.msk.bf16.mxu1 %vm1099_vm1, %v8247_v27 }
 0x7a1   : > { %7954 = vmatmul.mubr.msk.bf16.gmra.mrb[32].mxu1 %vm1099_vm1, %v8248_v42 }
 0x7a2   : > { %7957 = vmatprep.mubr.msk.bf16.mxu1 %vm1099_vm1, %v8249_v12 }
 0x7a9   : > { %7958 = vmatmul.mubr.msk.bf16.gmra.mrb[36].mxu1 %vm1099_vm1, %v8250_v33  ;;  %vm9949_vm1 = vmand %vm4720_vm14, %vm4721_vm15 }
 0x7aa   : > { %vm4723_vm2 = vmor %vm9949_vm1, %vm9936_vm0 }
 0x7f4   : > { %v4583_v50 = vpop.f32.mrb[224].mxu1  ;;  %v4626_v48 = vpop.f32.mrb[228].mxu0 }
 0x7f5   : > { %v4584_v15 = vadd.f32 %v4583_v50, %v4212_v63  ;;  %v4627_v36 = vadd.f32 %v4626_v48, %v4220_v61  ;;  %v4585_v57 = vpop.f32.mrb[225].mxu1  ;;  %v4628_v41 = vpop.f32.mrb[229].mxu0 }
 0x7f6   : > { %v4586_v16 = vadd.f32 %v4585_v57, %v4216_v23  ;;  %v4629_v43 = vadd.f32 %v4628_v41, %v4224_v45  ;;  %v4587_v25 = vpop.f32.mrb[226].mxu1  ;;  %v4630_v55 = vpop.f32.mrb[230].mxu0 }
 0x7f7   : > { %v4588_v11 = vadd.f32 %v4587_v25, %v4212_v63  ;;  %v4631_v30 = vadd.f32 %v4630_v55, %v4220_v61  ;;  %v4589_v54 = vpop.f32.mrb[227].mxu1  ;;  %v4632_v47 = vpop.f32.mrb[231].mxu0  ;;  %v4635_v28 = vmax.f32 %v4584_v15, 0.0  ;;  %v4637_v29 = vmax.f32 %v4627_v36, 0.0 }
 0x7f8   : > { %v4590_v26 = vadd.f32 %v4589_v54, %v4216_v23  ;;  %v4633_v1 = vadd.f32 %v4632_v47, %v4224_v45  ;;  %v4636_v31 = vmax.f32 %v4586_v16, 0.0  ;;  %v4638_v17 = vmax.f32 %v4629_v43, 0.0 }
 0x7f9   : > { %v4639_v18 = vmax.f32 %v4588_v11, 0.0  ;;  %v4641_v35 = vmax.f32 %v4631_v30, 0.0 }
 0x7fa   : > { %v4640_v6 = vmax.f32 %v4590_v26, 0.0  ;;  %v4642_v4 = vmax.f32 %v4633_v1, 0.0 }
 0x7fb   : > { %v4643_v37 = vadd.f32 %v4639_v18, %v4635_v28  ;;  %v4657_v59 = vadd.f32 %v4641_v35, %v4637_v29 }
 0x7fc   : > { %v4650_v39 = vadd.f32 %v4640_v6, %v4636_v31  ;;  %v4664_v53 = vadd.f32 %v4642_v4, %v4638_v17  ;;  %v7835_v46 = vpop.f32.mrb[232].mxu0  ;;  %v9878_v52 = vpop.f32.mrb[228].mxu1 }
 0x7fd   : > { %v4644_v5 = vrot.slane %v4643_v37, 4  ;;  %v4658_v9 = vrot.slane %v4657_v59, 4  ;;  %v5412_v40 = vpop.f32.mrb[233].mxu0  ;;  %v9883_v7 = vpop.f32.mrb[229].mxu1  ;;  %v5421_v0 = vadd.f32 %v7835_v46, %v9876_v3 }
 0x7fe   : > { %v4651_v19 = vrot.slane %v4650_v39, 4  ;;  %v4665_v56 = vrot.slane %v4664_v53, 4  ;;  %v5413_v60 = vadd.f32 %v9876_v3, %v5412_v40  ;;  %v7836_v62 = vpop.f32.mrb[234].mxu0  ;;  %v9887_v13 = vpop.f32.mrb[230].mxu1 }
 0x7ff   : > { %v4645_v34 = vadd.f32 %v4644_v5, %v4643_v37  ;;  %v4659_v2 = vadd.f32 %v4658_v9, %v4657_v59  ;;  %v5424_v24 = vadd.f32 %v7836_v62, %v9876_v3  ;;  %v5415_v21 = vpop.f32.mrb[235].mxu0  ;;  %v9890_v20 = vpop.f32.mrb[231].mxu1  ;;  %v5925_v44 = vmax.f32 %v5421_v0, 0.0 }
 0x800   : > { %v4652_v8 = vadd.f32 %v4651_v19, %v4650_v39  ;;  %v4666_v49 = vadd.f32 %v4665_v56, %v4664_v53  ;;  %v5923_v38 = vmax.f32 %v5413_v60, 0.0  ;;  %v5416_v27 = vadd.f32 %v9876_v3, %v5415_v21 }
 0x801   : > { %v4646_v42 = vrot.slane %v4645_v34, 2  ;;  %v4660_v12 = vrot.slane %v4659_v2, 2  ;;  %v5926_v23 = vmax.f32 %v5424_v24, 0.0  ;;  %v6055_v54 = vsel %vm6051_vm3, %v5925_v44, 0.0 }
 0x802   : > { %v4653_v33 = vrot.slane %v4652_v8, 2  ;;  %v4667_v51 = vrot.slane %v4666_v49, 2  ;;  %v5924_v58 = vmax.f32 %v5416_v27, 0.0  ;;  %v6052_v48 = vsel %vm6051_vm3, %v5923_v38, 0.0 }
 0x803   : > { %v4647_v63 = vadd.f32 %v4646_v42, %v4645_v34  ;;  %v4661_v61 = vadd.f32 %v4660_v12, %v4659_v2  ;;  %v6057_v6 = vsel %vm6051_vm3, %v5926_v23, 0.0 }
 0x804   : > { %v4654_v45 = vadd.f32 %v4653_v33, %v4652_v8  ;;  %v4668_v50 = vadd.f32 %v4667_v51, %v4666_v49  ;;  %v6053_v22 = vsel %vm6051_vm3, %v5924_v58, 0.0  ;;  %v7839_v32 = vpop.f32.mrb[236].mxu0  ;;  %v9895_v15 = vpop.f32.mrb[232].mxu1 }
 0x805   : > { %v4648_v36 = vrot.slane %v4647_v63, 1  ;;  %v4662_v57 = vrot.slane %v4661_v61, 1  ;;  %v6054_v16 = vadd.f32 %v6053_v22, %v6052_v48  ;;  %v5428_v43 = vpop.f32.mrb[237].mxu0  ;;  %v9903_v25 = vpop.f32.mrb[233].mxu1  ;;  %v5437_v53 = vadd.f32 %v7839_v32, %v9876_v3  ;;  %v4724_v22 = vld [vmem:[%s633_s29] sm:$0xf] }
 0x806   : > { %v4655_v55 = vrot.slane %v4654_v45, 1  ;;  %v4669_v11 = vrot.slane %v4668_v50, 1  ;;  %v5429_v47 = vadd.f32 %v9876_v3, %v5428_v43  ;;  %v7840_v26 = vpop.f32.mrb[238].mxu0  ;;  %v9913_v14 = vpop.f32.mrb[234].mxu1 }
 0x807   : > { %v4649_v1 = vadd.f32 %v4648_v36, %v4647_v63  ;;  %v4663_v28 = vadd.f32 %v4662_v57, %v4661_v61  ;;  %v6056_v29 = vadd.f32 %v6055_v54, %v6054_v16  ;;  %v5431_v18 = vpop.f32.mrb[239].mxu0  ;;  %v9915_v35 = vpop.f32.mrb[235].mxu1  ;;  %v5440_v19 = vadd.f32 %v7840_v26, %v9876_v3 }
 0x808   : > { %v4656_v31 = vadd.f32 %v4655_v55, %v4654_v45  ;;  %v4670_v17 = vadd.f32 %v4669_v11, %v4668_v50  ;;  %v5927_v4 = vmax.f32 %v5429_v47, 0.0  ;;  %v5432_v56 = vadd.f32 %v9876_v3, %v5431_v18 }
 0x809   : > { %v4672_v37 = vmul.f32 0.0625, %v4649_v1  ;;  %v4674_v59 = vmul.f32 0.0625, %v4663_v28  ;;  %v6058_v39 = vadd.f32 %v6057_v6, %v6056_v29  ;;  %v5929_v24 = vmax.f32 %v5437_v53, 0.0 }
 0x80a   : > { %v4673_v46 = vmul.f32 0.0625, %v4656_v31  ;;  %v4675_v5 = vmul.f32 0.0625, %v4670_v17  ;;  %v6059_v9 = vsel %vm6051_vm3, %v5927_v4, 0.0  ;;  %v5928_v21 = vmax.f32 %v5432_v56, 0.0 }
 0x80b   : > { %v6060_v40 = vadd.f32 %v6059_v9, %v6058_v39  ;;  %v5930_v44 = vmax.f32 %v5440_v19, 0.0  ;;  %v6063_v32 = vsel %vm6051_vm3, %v5929_v24, 0.0 }
 0x80c   : > { %v6881_v0 = vpack.c.bf16 %v4673_v46, %v4672_v37  ;;  %v6882_v60 = vpack.c.bf16 %v4675_v5, %v4674_v59  ;;  %v7843_v62 = vpop.f32.mrb[240].mxu0  ;;  %v9929_v34 = vpop.f32.mrb[236].mxu1  ;;  %v6061_v58 = vsel %vm6051_vm3, %v5928_v21, 0.0 }
 0x80d   : > { %v5444_v8 = vpop.f32.mrb[241].mxu0  ;;  %v9940_v49 = vpop.f32.mrb[237].mxu1  ;;  %v6062_v45 = vadd.f32 %v6061_v58, %v6060_v40  ;;  %v5453_v36 = vadd.f32 %v7843_v62, %v9876_v3  ;;  %v6065_v43 = vsel %vm6051_vm3, %v5930_v44, 0.0 }
 0x80e   : > { %v4692_v38 = vrot.slane %v6881_v0, %v9881_v10  ;;  %v4699_v27 = vrot.slane %v6882_v60, %v9881_v10  ;;  %v5445_v12 = vadd.f32 %v9876_v3, %v5444_v8  ;;  %v7844_v33 = vpop.f32.mrb[242].mxu0  ;;  %v9954_v51 = vpop.f32.mrb[238].mxu1 }
 0x80f   : > { %v5447_v63 = vpop.f32.mrb[243].mxu0  ;;  %v9957_v61 = vpop.f32.mrb[239].mxu1  ;;  %v6064_v41 = vadd.f32 %v6063_v32, %v6062_v45  ;;  %v5456_v11 = vadd.f32 %v7844_v33, %v9876_v3  ;;  %v5933_v1 = vmax.f32 %v5453_v36, 0.0 }
 0x810   : > { %v4700_v23 = vcombine.low %v4692_v38, %v4699_v27  ;;  %v5931_v50 = vmax.f32 %v5445_v12, 0.0  ;;  %v5448_v48 = vadd.f32 %v9876_v3, %v5447_v63 }
 0x811   : > { %v6066_v54 = vadd.f32 %v6065_v43, %v6064_v41  ;;  %v5934_v4 = vmax.f32 %v5456_v11, 0.0  ;;  %v6071_v5 = vsel %vm6051_vm3, %v5933_v1, 0.0 }
 0x812   : > { %v4707_v57 = vrot.slane %v4700_v23, %v9881_v10  ;;  %v5932_v16 = vmax.f32 %v5448_v48, 0.0  ;;  %v6067_v55 = vsel %vm6051_vm3, %v5931_v50, 0.0 }
 0x813   : > { %v6068_v10 = vadd.f32 %v6067_v55, %v6066_v54  ;;  %v6073_v56 = vsel %vm6051_vm3, %v5934_v4, 0.0 }
 0x814   : > { %v4725_v30 = vsel %vm4723_vm2, %v4707_v57, %v4724_v22  ;;  %v7847_v47 = vpop.f32.mrb[244].mxu0  ;;  %v9970_v26 = vpop.f32.mrb[240].mxu1  ;;  %v6069_v28 = vsel %vm6051_vm3, %v5932_v16, 0.0 }
 0x815   : > { %4726 = vst [vmem:[%s633_s29] sm:$0xf] %v4725_v30  ;;  %v5460_v29 = vpop.f32.mrb[245].mxu0  ;;  %v9973_v18 = vpop.f32.mrb[241].mxu1  ;;  %v6070_v39 = vadd.f32 %v6069_v28, %v6068_v10  ;;  %v5469_v9 = vadd.f32 %v7847_v47, %v9876_v3 }
 0x816   : > { %v5461_v31 = vadd.f32 %v9876_v3, %v5460_v29  ;;  %v7848_v17 = vpop.f32.mrb[246].mxu0  ;;  %v9976_v6 = vpop.f32.mrb[242].mxu1 }
 0x817   : > { %v5463_v37 = vpop.f32.mrb[247].mxu0  ;;  %v9978_v59 = vpop.f32.mrb[243].mxu1  ;;  %v6072_v40 = vadd.f32 %v6071_v5, %v6070_v39  ;;  %v5472_v60 = vadd.f32 %v7848_v17, %v9876_v3  ;;  %v5937_v21 = vmax.f32 %v5469_v9, 0.0 }
 0x818   : > { %v5935_v53 = vmax.f32 %v5461_v31, 0.0  ;;  %v5464_v46 = vadd.f32 %v9876_v3, %v5463_v37 }
 0x819   : > { %v6074_v62 = vadd.f32 %v6073_v56, %v6072_v40  ;;  %v5938_v58 = vmax.f32 %v5472_v60, 0.0  ;;  %v6079_v22 = vsel %vm6051_vm3, %v5937_v21, 0.0 }
 0x81a   : > { %v5936_v19 = vmax.f32 %v5464_v46, 0.0  ;;  %v6075_v0 = vsel %vm6051_vm3, %v5935_v53, 0.0 }
 0x81b   : > { %v6076_v42 = vadd.f32 %v6075_v0, %v6074_v62  ;;  %v6081_v41 = vsel %vm6051_vm3, %v5938_v58, 0.0 }
 0x81c   : > { %v7851_v2 = vpop.f32.mrb[248].mxu0  ;;  %v9986_v24 = vpop.f32.mrb[244].mxu1  ;;  %v6077_v8 = vsel %vm6051_vm3, %v5936_v19, 0.0 }
 0x81d   : > { %v5476_v38 = vpop.f32.mrb[249].mxu0  ;;  %v9989_v27 = vpop.f32.mrb[245].mxu1  ;;  %v6078_v45 = vadd.f32 %v6077_v8, %v6076_v42  ;;  %v5485_v32 = vadd.f32 %v7851_v2, %v9876_v3 }
 0x81e   : > { %v5477_v12 = vadd.f32 %v9876_v3, %v5476_v38  ;;  %v7852_v33 = vpop.f32.mrb[250].mxu0  ;;  %v9992_v44 = vpop.f32.mrb[246].mxu1 }
 0x81f   : > { %v5479_v63 = vpop.f32.mrb[251].mxu0  ;;  %v9994_v23 = vpop.f32.mrb[247].mxu1  ;;  %v6080_v36 = vadd.f32 %v6079_v22, %v6078_v45  ;;  %v5488_v43 = vadd.f32 %v7852_v33, %v9876_v3  ;;  %v5941_v54 = vmax.f32 %v5485_v32, 0.0 }
 0x820   : > { %v5939_v50 = vmax.f32 %v5477_v12, 0.0  ;;  %v5480_v48 = vadd.f32 %v9876_v3, %v5479_v63 }
 0x821   : > { %v6082_v55 = vadd.f32 %v6081_v41, %v6080_v36  ;;  %v5942_v4 = vmax.f32 %v5488_v43, 0.0  ;;  %v6087_v9 = vsel %vm6051_vm3, %v5941_v54, 0.0  ;;  %v8251_v54 = vld [vmem:[%s10425_s15] sm:$0xff]  }
 0x822   : > { %v5940_v57 = vmax.f32 %v5480_v48, 0.0  ;;  %v6083_v16 = vsel %vm6051_vm3, %v5939_v50, 0.0 }
 0x823   : > { %v6084_v29 = vadd.f32 %v6083_v16, %v6082_v55  ;;  %v6089_v0 = vsel %vm6051_vm3, %v5942_v4, 0.0  ;;  %v10431_v4 = vmov 0.0  }
 0x824   : > { %v7855_v11 = vpop.f32.mrb[252].mxu0  ;;  %v10002_v30 = vpop.f32.mrb[248].mxu1  ;;  %v6085_v47 = vsel %vm6051_vm3, %v5940_v57, 0.0  ;;  %7961 = vmatprep.subr.bf16.mxu0 %v10431_v4 }
 0x825   : > { %v5492_v1 = vpop.f32.mrb[253].mxu0  ;;  %v10005_v28 = vpop.f32.mrb[249].mxu1  ;;  %v6086_v53 = vadd.f32 %v6085_v47, %v6084_v29  ;;  %v5501_v40 = vadd.f32 %v7855_v11, %v9876_v3  ;;  %7962 = vmatpush3.bf16.msra.mxu0 %v8251_v54 }
 0x826   : > { %v5493_v10 = vadd.f32 %v9876_v3, %v5492_v1  ;;  %v7856_v31 = vpop.f32.mrb[254].mxu0  ;;  %v10008_v17 = vpop.f32.mrb[250].mxu1  ;;  %7963 = vmatprep.subr.bf16.mxu0 %v10431_v4 }
 0x827   : > { %v5495_v37 = vpop.f32.mrb[255].mxu0  ;;  %v10010_v39 = vpop.f32.mrb[251].mxu1  ;;  %v6088_v19 = vadd.f32 %v6087_v9, %v6086_v53  ;;  %v5504_v62 = vadd.f32 %v7856_v31, %v9876_v3  ;;  %v5945_v38 = vmax.f32 %v5501_v40, 0.0 }
 0x828   : > { %v5943_v46 = vmax.f32 %v5493_v10, 0.0  ;;  %v5496_v5 = vadd.f32 %v9876_v3, %v5495_v37 }
 0x829   : > { %v6090_v2 = vadd.f32 %v6089_v0, %v6088_v19  ;;  %v5946_v48 = vmax.f32 %v5504_v62, 0.0  ;;  %v6095_v16 = vsel %vm6051_vm3, %v5945_v38, 0.0 }
 0x82a   : > { %v5944_v56 = vmax.f32 %v5496_v5, 0.0  ;;  %v6091_v60 = vsel %vm6051_vm3, %v5943_v46, 0.0 }
 0x82b   : > { %v6092_v58 = vadd.f32 %v6091_v60, %v6090_v2  ;;  %v6097_v47 = vsel %vm6051_vm3, %v5946_v48, 0.0 }
 0x82c   : > { %v7859_v21 = vpop.f32.mrb[0].mxu0  ;;  %v10018_v8 = vpop.f32.mrb[252].mxu1  ;;  %v6093_v42 = vsel %vm6051_vm3, %v5944_v56, 0.0 }
 0x82d   : > { %v5508_v12 = vpop.f32.mrb[1].mxu0  ;;  %v10021_v33 = vpop.f32.mrb[253].mxu1  ;;  %v6094_v36 = vadd.f32 %v6093_v42, %v6092_v58  ;;  %v5517_v43 = vadd.f32 %v7859_v21, %v9876_v3 }
 0x82e   : > { %v5509_v63 = vadd.f32 %v9876_v3, %v5508_v12  ;;  %v7860_v45 = vpop.f32.mrb[2].mxu0  ;;  %v10024_v50 = vpop.f32.mrb[254].mxu1 }
 0x82f   : > { %v5511_v22 = vpop.f32.mrb[3].mxu0  ;;  %v10026_v32 = vpop.f32.mrb[255].mxu1  ;;  %v6096_v55 = vadd.f32 %v6095_v16, %v6094_v36  ;;  %v5520_v29 = vadd.f32 %v7860_v45, %v9876_v3  ;;  %v5949_v53 = vmax.f32 %v5517_v43, 0.0 }
 0x830   : > { %v5947_v57 = vmax.f32 %v5509_v63, 0.0  ;;  %v5512_v41 = vadd.f32 %v9876_v3, %v5511_v22 }
 0x831   : > { %v6098_v10 = vadd.f32 %v6097_v47, %v6096_v55  ;;  %v5950_v60 = vmax.f32 %v5520_v29, 0.0  ;;  %v6103_v12 = vsel %vm6051_vm3, %v5949_v53, 0.0 }
 0x832   : > { %v5948_v11 = vmax.f32 %v5512_v41, 0.0  ;;  %v6099_v1 = vsel %vm6051_vm3, %v5947_v57, 0.0 }
 0x833   : > { %v6100_v40 = vadd.f32 %v6099_v1, %v6098_v10  ;;  %v6105_v48 = vsel %vm6051_vm3, %v5950_v60, 0.0 }
 0x834   : > { %v7863_v31 = vpop.f32.mrb[4].mxu0  ;;  %v10038_v37 = vpop.f32.mrb[0].mxu1  ;;  %v6101_v46 = vsel %vm6051_vm3, %v5948_v11, 0.0 }
 0x835   : > { %v5524_v5 = vpop.f32.mrb[5].mxu0  ;;  %v10041_v9 = vpop.f32.mrb[1].mxu1  ;;  %v6102_v21 = vadd.f32 %v6101_v46, %v6100_v40  ;;  %v5533_v58 = vadd.f32 %v7863_v31, %v9876_v3 }
 0x836   : > { %v5525_v19 = vadd.f32 %v9876_v3, %v5524_v5  ;;  %v7864_v56 = vpop.f32.mrb[6].mxu0  ;;  %v10044_v0 = vpop.f32.mrb[2].mxu1 }
 0x837   : > { %v5527_v62 = vpop.f32.mrb[7].mxu0  ;;  %v10047_v2 = vpop.f32.mrb[3].mxu1  ;;  %v6104_v63 = vadd.f32 %v6103_v12, %v6102_v21  ;;  %v5536_v36 = vadd.f32 %v7864_v56, %v9876_v3  ;;  %v5953_v43 = vmax.f32 %v5533_v58, 0.0 }
 0x838   : > { %v5951_v38 = vmax.f32 %v5525_v19, 0.0  ;;  %v5528_v42 = vadd.f32 %v9876_v3, %v5527_v62 }
 0x839   : > { %v6106_v57 = vadd.f32 %v6105_v48, %v6104_v63  ;;  %v5954_v31 = vmax.f32 %v5536_v36, 0.0  ;;  %v6111_v56 = vsel %vm6051_vm3, %v5953_v43, 0.0 }
 0x83a   : > { %v5952_v45 = vmax.f32 %v5528_v42, 0.0  ;;  %v6107_v22 = vsel %vm6051_vm3, %v5951_v38, 0.0 }
 0x83b   : > { %v6108_v47 = vadd.f32 %v6107_v22, %v6106_v57  ;;  %v6113_v38 = vsel %vm6051_vm3, %v5954_v31, 0.0 }
 0x83c   : > { %v7867_v41 = vpop.f32.mrb[8].mxu0  ;;  %v10055_v16 = vpop.f32.mrb[4].mxu1  ;;  %v6109_v55 = vsel %vm6051_vm3, %v5952_v45, 0.0 }
 0x83d   : > { %v5540_v11 = vpop.f32.mrb[9].mxu0  ;;  %v10058_v54 = vpop.f32.mrb[5].mxu1  ;;  %v6110_v5 = vadd.f32 %v6109_v55, %v6108_v47  ;;  %v5549_v60 = vadd.f32 %v7867_v41, %v9876_v3 }
 0x83e   : > { %v5541_v1 = vadd.f32 %v9876_v3, %v5540_v11  ;;  %v7868_v29 = vpop.f32.mrb[10].mxu0  ;;  %v10061_v10 = vpop.f32.mrb[6].mxu1 }
 0x83f   : > { %v5543_v53 = vpop.f32.mrb[11].mxu0  ;;  %v10063_v46 = vpop.f32.mrb[7].mxu1  ;;  %v6112_v62 = vadd.f32 %v6111_v56, %v6110_v5  ;;  %v5552_v12 = vadd.f32 %v7868_v29, %v9876_v3  ;;  %v5957_v48 = vmax.f32 %v5549_v60, 0.0 }
 0x840   : > { %v5955_v40 = vmax.f32 %v5541_v1, 0.0  ;;  %v5544_v19 = vadd.f32 %v9876_v3, %v5543_v53 }
 0x841   : > { %v6114_v58 = vadd.f32 %v6113_v38, %v6112_v62  ;;  %v5958_v47 = vmax.f32 %v5552_v12, 0.0 }
 0x842   : > { %v5956_v21 = vmax.f32 %v5544_v19, 0.0  ;;  %v6115_v42 = vsel %vm6051_vm3, %v5955_v40, 0.0  ;;  %v6119_v40 = vsel %vm6051_vm3, %v5957_v48, 0.0 }
 0x843   : > { %v6116_v43 = vadd.f32 %v6115_v42, %v6114_v58  ;;  %v6121_v62 = vsel %vm6051_vm3, %v5958_v47, 0.0 }
 0x844   : > { %v7871_v63 = vpop.f32.mrb[12].mxu0  ;;  %v10071_v45 = vpop.f32.mrb[8].mxu1  ;;  %v6117_v22 = vsel %vm6051_vm3, %v5956_v21, 0.0 }
 0x845   : > { %v5556_v36 = vpop.f32.mrb[13].mxu0  ;;  %v10074_v57 = vpop.f32.mrb[9].mxu1  ;;  %v6118_v29 = vadd.f32 %v6117_v22, %v6116_v43  ;;  %v5565_v19 = vadd.f32 %v7871_v63, %v9876_v3 }
 0x846   : > { %v5557_v41 = vadd.f32 %v9876_v3, %v5556_v36  ;;  %v7872_v55 = vpop.f32.mrb[14].mxu0  ;;  %v10077_v11 = vpop.f32.mrb[10].mxu1 }
 0x847   : > { %v5559_v1 = vpop.f32.mrb[15].mxu0  ;;  %v10079_v31 = vpop.f32.mrb[11].mxu1  ;;  %v6120_v56 = vadd.f32 %v6119_v40, %v6118_v29  ;;  %v5568_v38 = vadd.f32 %v7872_v55, %v9876_v3  ;;  %v5961_v22 = vmax.f32 %v5565_v19, 0.0 }
 0x848   : > { %v5959_v53 = vmax.f32 %v5557_v41, 0.0  ;;  %v5560_v5 = vadd.f32 %v9876_v3, %v5559_v1 }
 0x849   : > { %v6122_v42 = vadd.f32 %v6121_v62, %v6120_v56  ;;  %v5962_v47 = vmax.f32 %v5568_v38, 0.0  ;;  %v6127_v19 = vsel %vm6051_vm3, %v5961_v22, 0.0 }
 0x84a   : > { %v5960_v60 = vmax.f32 %v5560_v5, 0.0  ;;  %v6123_v21 = vsel %vm6051_vm3, %v5959_v53, 0.0 }
 0x84b   : > { %v6124_v48 = vadd.f32 %v6123_v21, %v6122_v42  ;;  %v6129_v21 = vsel %vm6051_vm3, %v5962_v47, 0.0 }
 0x84c   : > { %v7875_v12 = vpop.f32.mrb[16].mxu0  ;;  %v10087_v58 = vpop.f32.mrb[12].mxu1  ;;  %v6125_v36 = vsel %vm6051_vm3, %v5960_v60, 0.0 }
 0x84d   : > { %10448 = vst [vmem:[#allocation2_spill] sm:$0xff] %v10087_v58  ;;  %v5572_v43 = vpop.f32.mrb[17].mxu0  ;;  %v10090_v41 = vpop.f32.mrb[13].mxu1  ;;  %v6126_v55 = vadd.f32 %v6125_v36, %v6124_v48  ;;  %v5581_v60 = vadd.f32 %v7875_v12, %v9876_v3 }
 0x84e   : > { %v5573_v63 = vadd.f32 %v9876_v3, %v5572_v43  ;;  %v7876_v1 = vpop.f32.mrb[18].mxu0  ;;  %v10093_v29 = vpop.f32.mrb[14].mxu1 }
 0x84f   : > { %10449 = vst [vmem:[#allocation3_spill] sm:$0xff] %v10093_v29  ;;  %v5575_v53 = vpop.f32.mrb[19].mxu0  ;;  %v10095_v5 = vpop.f32.mrb[15].mxu1  ;;  %v6128_v62 = vadd.f32 %v6127_v19, %v6126_v55  ;;  %v5584_v43 = vadd.f32 %v7876_v1, %v9876_v3  ;;  %v5965_v36 = vmax.f32 %v5581_v60, 0.0 }
 0x850   : > { %10450 = vst [vmem:[#allocation4_spill] sm:$0xff] %v10095_v5  ;;  %v5963_v40 = vmax.f32 %v5573_v63, 0.0  ;;  %v5576_v56 = vadd.f32 %v9876_v3, %v5575_v53 }
 0x851   : > { %v6130_v38 = vadd.f32 %v6129_v21, %v6128_v62  ;;  %v5966_v47 = vmax.f32 %v5584_v43, 0.0  ;;  %v6135_v60 = vsel %vm6051_vm3, %v5965_v36, 0.0 }
 0x852   : > { %v5964_v4 = vmax.f32 %v5576_v56, 0.0  ;;  %v6131_v42 = vsel %vm6051_vm3, %v5963_v40, 0.0 }
 0x853   : > { %v6132_v22 = vadd.f32 %v6131_v42, %v6130_v38  ;;  %v6137_v42 = vsel %vm6051_vm3, %v5966_v47, 0.0 }
 0x854   : > { %v7879_v29 = vpop.f32.mrb[20].mxu0  ;;  %v10103_v58 = vpop.f32.mrb[16].mxu1  ;;  %v6133_v48 = vsel %vm6051_vm3, %v5964_v4, 0.0 }
 0x855   : > { %10451 = vst [vmem:[#allocation5_spill] sm:$0xff] %v10103_v58  ;;  %v5588_v63 = vpop.f32.mrb[21].mxu0  ;;  %v10106_v53 = vpop.f32.mrb[17].mxu1  ;;  %v6134_v1 = vadd.f32 %v6133_v48, %v6132_v22  ;;  %v5597_v4 = vadd.f32 %v7879_v29, %v9876_v3 }
 0x856   : > { %10452 = vst [vmem:[#allocation6_spill] sm:$0xff] %v10106_v53  ;;  %v5589_v12 = vadd.f32 %v9876_v3, %v5588_v63  ;;  %v7880_v55 = vpop.f32.mrb[22].mxu0  ;;  %v10109_v56 = vpop.f32.mrb[18].mxu1 }
 0x857   : > { %10453 = vst [vmem:[#allocation7_spill] sm:$0xff] %v10109_v56  ;;  %v5591_v40 = vpop.f32.mrb[23].mxu0  ;;  %v10111_v19 = vpop.f32.mrb[19].mxu1  ;;  %v6136_v58 = vadd.f32 %v6135_v60, %v6134_v1  ;;  %v5600_v63 = vadd.f32 %v7880_v55, %v9876_v3  ;;  %v5969_v48 = vmax.f32 %v5597_v4, 0.0 }
 0x858   : > { %10454 = vst [vmem:[#allocation8_spill] sm:$0xff] %v10111_v19  ;;  %v5967_v62 = vmax.f32 %v5589_v12, 0.0  ;;  %v5592_v21 = vadd.f32 %v9876_v3, %v5591_v40 }
 0x859   : > { %v6138_v43 = vadd.f32 %v6137_v42, %v6136_v58  ;;  %v5970_v47 = vmax.f32 %v5600_v63, 0.0  ;;  %v6143_v4 = vsel %vm6051_vm3, %v5969_v48, 0.0 }
 0x85a   : > { %v5968_v53 = vmax.f32 %v5592_v21, 0.0  ;;  %v6139_v38 = vsel %vm6051_vm3, %v5967_v62, 0.0 }
 0x85b   : > { %v6140_v36 = vadd.f32 %v6139_v38, %v6138_v43  ;;  %v6145_v38 = vsel %vm6051_vm3, %v5970_v47, 0.0 }
 0x85c   : > { %v7883_v56 = vpop.f32.mrb[24].mxu0  ;;  %v10119_v5 = vpop.f32.mrb[20].mxu1  ;;  %v6141_v22 = vsel %vm6051_vm3, %v5968_v53, 0.0 }
 0x85d   : > { %10455 = vst [vmem:[#allocation9_spill] sm:$0xff] %v10119_v5  ;;  %v5604_v12 = vpop.f32.mrb[25].mxu0  ;;  %v10122_v40 = vpop.f32.mrb[21].mxu1  ;;  %v6142_v58 = vadd.f32 %v6141_v22, %v6140_v36  ;;  %v5613_v53 = vadd.f32 %v7883_v56, %v9876_v3 }
 0x85e   : > { %10456 = vst [vmem:[#allocation10_spill] sm:$0xff] %v10122_v40  ;;  %v5605_v29 = vadd.f32 %v9876_v3, %v5604_v12  ;;  %v7884_v1 = vpop.f32.mrb[26].mxu0  ;;  %v10125_v21 = vpop.f32.mrb[22].mxu1 }
 0x85f   : > { %10457 = vst [vmem:[#allocation11_spill] sm:$0xff] %v10125_v21  ;;  %v5607_v62 = vpop.f32.mrb[27].mxu0  ;;  %v10127_v60 = vpop.f32.mrb[23].mxu1  ;;  %v6144_v5 = vadd.f32 %v6143_v4, %v6142_v58  ;;  %v5616_v12 = vadd.f32 %v7884_v1, %v9876_v3  ;;  %v5973_v22 = vmax.f32 %v5613_v53, 0.0 }
 0x860   : > { %10458 = vst [vmem:[#allocation12_spill] sm:$0xff] %v10127_v60  ;;  %v5971_v55 = vmax.f32 %v5605_v29, 0.0  ;;  %v5608_v42 = vadd.f32 %v9876_v3, %v5607_v62 }
 0x861   : > { %v6146_v63 = vadd.f32 %v6145_v38, %v6144_v5  ;;  %v5974_v47 = vmax.f32 %v5616_v12, 0.0  ;;  %v6151_v53 = vsel %vm6051_vm3, %v5973_v22, 0.0 }
 0x862   : > { %v5972_v40 = vmax.f32 %v5608_v42, 0.0  ;;  %v6147_v43 = vsel %vm6051_vm3, %v5971_v55, 0.0 }
 0x863   : > { %v6148_v48 = vadd.f32 %v6147_v43, %v6146_v63  ;;  %v6153_v43 = vsel %vm6051_vm3, %v5974_v47, 0.0 }
 0x864   : > { %v7887_v21 = vpop.f32.mrb[28].mxu0  ;;  %v10135_v19 = vpop.f32.mrb[24].mxu1  ;;  %v6149_v36 = vsel %vm6051_vm3, %v5972_v40, 0.0 }
 0x865   : > { %10459 = vst [vmem:[#allocation13_spill] sm:$0xff] %v10135_v19  ;;  %v5620_v29 = vpop.f32.mrb[29].mxu0  ;;  %v10138_v62 = vpop.f32.mrb[25].mxu1  ;;  %v6150_v5 = vadd.f32 %v6149_v36, %v6148_v48  ;;  %v5629_v40 = vadd.f32 %v7887_v21, %v9876_v3 }
 0x866   : > { %10460 = vst [vmem:[#allocation14_spill] sm:$0xff] %v10138_v62  ;;  %v5621_v56 = vadd.f32 %v9876_v3, %v5620_v29  ;;  %v7888_v58 = vpop.f32.mrb[30].mxu0  ;;  %v10141_v42 = vpop.f32.mrb[26].mxu1 }
 0x867   : > { %10461 = vst [vmem:[#allocation15_spill] sm:$0xff] %v10141_v42  ;;  %v5623_v55 = vpop.f32.mrb[31].mxu0  ;;  %v10143_v4 = vpop.f32.mrb[27].mxu1  ;;  %v6152_v19 = vadd.f32 %v6151_v53, %v6150_v5  ;;  %v5632_v29 = vadd.f32 %v7888_v58, %v9876_v3  ;;  %v5977_v36 = vmax.f32 %v5629_v40, 0.0 }
 0x868   : > { %v5975_v1 = vmax.f32 %v5621_v56, 0.0  ;;  %v5624_v38 = vadd.f32 %v9876_v3, %v5623_v55 }
 0x869   : > { %v6154_v12 = vadd.f32 %v6153_v43, %v6152_v19  ;;  %v5978_v47 = vmax.f32 %v5632_v29, 0.0  ;;  %v6159_v40 = vsel %vm6051_vm3, %v5977_v36, 0.0  ;;  %v8252_v29 = vld [vmem:[%s10425_s15 + $0x8] sm:$0xff]  }
 0x86a   : > { %v5976_v62 = vmax.f32 %v5624_v38, 0.0  ;;  %v6155_v63 = vsel %vm6051_vm3, %v5975_v1, 0.0  ;;  %7964 = vmatpush3.bf16.msra.mxu0 %v8252_v29 }
 0x86b   : > { %v6156_v22 = vadd.f32 %v6155_v63, %v6154_v12  ;;  %v5653_v63 = vadd.f32 %v9876_v3, %v9883_v7  ;;  %v6161_v12 = vsel %vm6051_vm3, %v5978_v47, 0.0  ;;  %v5656_v47 = vadd.f32 %v9876_v3, %v9890_v20 }
 0x86c   : > { %v7891_v42 = vpop.f32.mrb[32].mxu0  ;;  %v10151_v60 = vpop.f32.mrb[28].mxu1  ;;  %v6157_v48 = vsel %vm6051_vm3, %v5976_v62, 0.0  ;;  %v5669_v20 = vadd.f32 %v9876_v3, %v9903_v25 }
 0x86d   : > { %10462 = vst [vmem:[#allocation16_spill] sm:$0xff] %v10151_v60  ;;  %v5636_v56 = vpop.f32.mrb[33].mxu0  ;;  %v10154_v55 = vpop.f32.mrb[29].mxu1  ;;  %v6158_v19 = vadd.f32 %v6157_v48, %v6156_v22  ;;  %v5645_v62 = vadd.f32 %v7891_v42, %v9876_v3 }
 0x86e   : > { %10463 = vst [vmem:[#allocation17_spill] sm:$0xff] %v10154_v55  ;;  %v5637_v21 = vadd.f32 %v9876_v3, %v5636_v56  ;;  %v7892_v5 = vpop.f32.mrb[34].mxu0  ;;  %v10157_v38 = vpop.f32.mrb[30].mxu1 }
 0x86f   : > { %v5639_v1 = vpop.f32.mrb[35].mxu0  ;;  %v10159_v53 = vpop.f32.mrb[31].mxu1  ;;  %v6160_v60 = vadd.f32 %v6159_v40, %v6158_v19  ;;  %v5648_v56 = vadd.f32 %v7892_v5, %v9876_v3  ;;  %v5981_v42 = vmax.f32 %v5645_v62, 0.0  ;;  %v5983_v19 = vmax.f32 %v5653_v63, 0.0 }
 0x870   : > { %v5979_v58 = vmax.f32 %v5637_v21, 0.0  ;;  %v5640_v43 = vadd.f32 %v9876_v3, %v5639_v1  ;;  %v5661_v62 = vadd.f32 %v9878_v52, %v9876_v3  ;;  %v5664_v63 = vadd.f32 %v9887_v13, %v9876_v3 }
 0x871   : > { %v6162_v22 = vadd.f32 %v6161_v12, %v6160_v60  ;;  %v5982_v40 = vmax.f32 %v5648_v56, 0.0  ;;  %v6167_v60 = vsel %vm6051_vm3, %v5981_v42, 0.0  ;;  %v5672_v13 = vadd.f32 %v9876_v3, %v9915_v35 }
 0x872   : > { %v5980_v55 = vmax.f32 %v5640_v43, 0.0  ;;  %v6163_v48 = vsel %vm6051_vm3, %v5979_v58, 0.0  ;;  %v5685_v35 = vadd.f32 %v9876_v3, %v9940_v49 }
 0x873   : > { %v6164_v7 = vadd.f32 %v6163_v48, %v6162_v22  ;;  %v6169_v12 = vsel %vm6051_vm3, %v5982_v40, 0.0  ;;  %v5984_v48 = vmax.f32 %v5656_v47, 0.0  ;;  %v5987_v40 = vmax.f32 %v5669_v20, 0.0 }
 0x874   : > { %v10172_v36 = vpop.f32.mrb[32].mxu1  ;;  %v6165_v21 = vsel %vm6051_vm3, %v5980_v55, 0.0  ;;  %v6171_v55 = vsel %vm6051_vm3, %v5983_v19, 0.0 }
 0x875   : > { %v10175_v1 = vpop.f32.mrb[33].mxu1  ;;  %v6166_v5 = vadd.f32 %v6165_v21, %v6164_v7  ;;  %v5985_v21 = vmax.f32 %v5661_v62, 0.0  ;;  %v6173_v19 = vsel %vm6051_vm3, %v5984_v48, 0.0  ;;  %v5677_v62 = vadd.f32 %v9895_v15, %v9876_v3 }
 0x876   : > { %v10177_v43 = vpop.f32.mrb[34].mxu1  ;;  %v5988_v48 = vmax.f32 %v5672_v13, 0.0  ;;  %v5688_v15 = vadd.f32 %v9876_v3, %v9957_v61 }
 0x877   : > { %v10181_v58 = vpop.f32.mrb[35].mxu1  ;;  %v6168_v29 = vadd.f32 %v6167_v60, %v6166_v5  ;;  %v5986_v5 = vmax.f32 %v5664_v63, 0.0  ;;  %v6175_v25 = vsel %vm6051_vm3, %v5985_v21, 0.0  ;;  %v6179_v63 = vsel %vm6051_vm3, %v5987_v40, 0.0 }
 0x878   : > { %v6181_v21 = vsel %vm6051_vm3, %v5988_v48, 0.0 }
 0x879   : > { %v6170_v56 = vadd.f32 %v6169_v12, %v6168_v29  ;;  %v6177_v12 = vsel %vm6051_vm3, %v5986_v5, 0.0  ;;  %v5693_v5 = vadd.f32 %v9929_v34, %v9876_v3  ;;  %v5704_v34 = vadd.f32 %v9876_v3, %v9978_v59 }
 0x87b   : > { %v6172_v7 = vadd.f32 %v6171_v55, %v6170_v56  ;;  %v5680_v55 = vadd.f32 %v9913_v14, %v9876_v3  ;;  %v5989_v56 = vmax.f32 %v5677_v62, 0.0  ;;  %v5992_v62 = vmax.f32 %v5688_v15, 0.0 }
 0x87c   : > { %v10192_v22 = vpop.f32.mrb[36].mxu1  ;;  %v5993_v61 = vmax.f32 %v5693_v5, 0.0  ;;  %v5717_v15 = vadd.f32 %v9876_v3, %v9989_v27 }
 0x87d   : > { %v10194_v42 = vpop.f32.mrb[37].mxu1  ;;  %v6174_v60 = vadd.f32 %v6173_v19, %v6172_v7  ;;  %v5990_v19 = vmax.f32 %v5680_v55, 0.0  ;;  %v6183_v14 = vsel %vm6051_vm3, %v5989_v56, 0.0  ;;  %v6189_v48 = vsel %vm6051_vm3, %v5992_v62, 0.0 }
 0x87e   : > { %v10196_v52 = vpop.f32.mrb[38].mxu1  ;;  %v5725_v62 = vadd.f32 %v9986_v24, %v9876_v3  ;;  %v10253_v24 = vld [vmem:[%s10424_s14] ss:$0 sm:$0xff] }
 0x87f   : > { %10464 = vst [vmem:[#allocation18_spill] sm:$0xff] %v10196_v52  ;;  %v10201_v47 = vpop.f32.mrb[39].mxu1  ;;  %v6176_v29 = vadd.f32 %v6175_v25, %v6174_v60  ;;  %v5991_v52 = vmax.f32 %v5685_v35, 0.0  ;;  %v6185_v40 = vsel %vm6051_vm3, %v5990_v19, 0.0  ;;  %v5696_v25 = vadd.f32 %v9954_v51, %v9876_v3 }
 0x880   : > { %v5709_v51 = vadd.f32 %v9970_v26, %v9876_v3 }
 0x881   : > { %v6178_v20 = vadd.f32 %v6177_v12, %v6176_v29  ;;  %v6187_v49 = vsel %vm6051_vm3, %v5991_v52, 0.0  ;;  %v5701_v29 = vadd.f32 %v9876_v3, %v9973_v18  ;;  %v6191_v52 = vsel %vm6051_vm3, %v5993_v61, 0.0 }
 0x882   : > { %v5712_v18 = vadd.f32 %v9976_v6, %v9876_v3  ;;  %v5997_v59 = vmax.f32 %v5709_v51, 0.0  ;;  %v5720_v6 = vadd.f32 %v9876_v3, %v9994_v23  ;;  %v6001_v23 = vmax.f32 %v5725_v62, 0.0 }
 0x883   : > { %v6180_v7 = vadd.f32 %v6179_v63, %v6178_v20  ;;  %v5994_v63 = vmax.f32 %v5696_v25, 0.0  ;;  %v5995_v35 = vmax.f32 %v5701_v29, 0.0  ;;  %v5728_v29 = vadd.f32 %v9992_v44, %v9876_v3 }
 0x884   : > { %v6199_v25 = vsel %vm6051_vm3, %v5997_v59, 0.0  ;;  %v5736_v44 = vadd.f32 %v10253_v24, %v10010_v39 }
 0x885   : > { %v6182_v60 = vadd.f32 %v6181_v21, %v6180_v7  ;;  %v6193_v7 = vsel %vm6051_vm3, %v5994_v63, 0.0  ;;  %v6195_v19 = vsel %vm6051_vm3, %v5995_v35, 0.0  ;;  %v5996_v21 = vmax.f32 %v5704_v34, 0.0 }
 0x886   : > { %v5733_v63 = vadd.f32 %v9876_v3, %v10005_v28  ;;  %v6002_v34 = vmax.f32 %v5728_v29, 0.0  ;;  %v5741_v3 = vadd.f32 %v10253_v24, %v10002_v30  ;;  %v5752_v30 = vadd.f32 %v10253_v24, %v10026_v32 }
 0x887   : > { %v6184_v13 = vadd.f32 %v6183_v14, %v6182_v60  ;;  %v10465_v14 = vmov 0.0   ;;  %v6197_v26 = vsel %vm6051_vm3, %v5996_v21, 0.0  ;;  %v6004_v21 = vmax.f32 %v5736_v44, 0.0 }
 0x888   : > { %7965 = vmatprep.mubr.msk.bf16.mxu0 %vm8266_vm4, %v10465_v14  ;;  %v6209_v28 = vsel %vm6051_vm3, %v6002_v34, 0.0  ;;  %v6005_v39 = vmax.f32 %v5741_v3, 0.0  ;;  %v6008_v62 = vmax.f32 %v5752_v30, 0.0  ;;  %v5781_v44 = vadd.f32 %v10253_v24, %v10058_v54 }
 0x889   : > { %v6186_v55 = vadd.f32 %v6185_v40, %v6184_v13  ;;  %v5998_v40 = vmax.f32 %v5712_v18, 0.0  ;;  %v5999_v13 = vmax.f32 %v5717_v15, 0.0  ;;  %v5749_v15 = vadd.f32 %v10253_v24, %v10021_v33 }
 0x88a   : > { %v5760_v33 = vadd.f32 %v10253_v24, %v10024_v50  ;;  %v5792_v54 = vadd.f32 %v10253_v24, %v10061_v10 }
 0x88b   : > { %v6188_v12 = vadd.f32 %v6187_v49, %v6186_v55  ;;  %v6201_v55 = vsel %vm6051_vm3, %v5998_v40, 0.0  ;;  %v6203_v61 = vsel %vm6051_vm3, %v5999_v13, 0.0  ;;  %v6007_v40 = vmax.f32 %v5749_v15, 0.0 }
 0x88c   : > { %v6215_v13 = vsel %vm6051_vm3, %v6005_v39, 0.0 }
 0x88d   : > { %v6190_v20 = vadd.f32 %v6189_v48, %v6188_v12  ;;  %v6000_v12 = vmax.f32 %v5720_v6, 0.0 }
 0x88f   : > { %v6192_v56 = vadd.f32 %v6191_v52, %v6190_v20  ;;  %v6205_v20 = vsel %vm6051_vm3, %v6000_v12, 0.0  ;;  %v6003_v52 = vmax.f32 %v5733_v63, 0.0  ;;  %v6221_v12 = vsel %vm6051_vm3, %v6008_v62, 0.0 }
 0x890   : > { %v5813_v62 = vadd.f32 %v10253_v24, %v10090_v41 }
 0x891   : > { %v6194_v60 = vadd.f32 %v6193_v7, %v6192_v56  ;;  %v6207_v56 = vsel %vm6051_vm3, %v6001_v23, 0.0  ;;  %v6211_v7 = vsel %vm6051_vm3, %v6003_v52, 0.0  ;;  %v5773_v23 = vadd.f32 %v10253_v24, %v10038_v37 }
 0x892   : > { %v5784_v37 = vadd.f32 %v10253_v24, %v10063_v46 }
 0x893   : > { %v6196_v5 = vadd.f32 %v6195_v19, %v6194_v60  ;;  %v5744_v19 = vadd.f32 %v10253_v24, %v10008_v17  ;;  %v5757_v17 = vadd.f32 %v10253_v24, %v10018_v8  ;;  %v5768_v8 = vadd.f32 %v10253_v24, %v10047_v2 }
 0x894   : > { %v6013_v2 = vmax.f32 %v5773_v23, 0.0  ;;  %v6016_v39 = vmax.f32 %v5784_v37, 0.0  ;;  %v10468_v23 = vld [vmem:[#allocation3_spill] sm:$0xff] }
 0x895   : > { %v6198_v49 = vadd.f32 %v6197_v26, %v6196_v5  ;;  %v6006_v14 = vmax.f32 %v5744_v19, 0.0  ;;  %v6213_v5 = vsel %vm6051_vm3, %v6004_v21, 0.0  ;;  %v6009_v32 = vmax.f32 %v5757_v17, 0.0 }
 0x896   : > { %v6012_v52 = vmax.f32 %v5768_v8, 0.0  ;;  %v6231_v19 = vsel %vm6051_vm3, %v6013_v2, 0.0  ;;  %v6237_v30 = vsel %vm6051_vm3, %v6016_v39, 0.0  ;;  %v5805_v17 = vadd.f32 %v10253_v24, %v10071_v45  ;;  %v10466_v45 = vld [vmem:[#allocation4_spill] sm:$0xff]  ;;  %v10472_v39 = vld [vmem:[#allocation7_spill] sm:$0xff] }
 0x897   : > { %v6200_v27 = vadd.f32 %v6199_v25, %v6198_v49  ;;  %v6217_v49 = vsel %vm6051_vm3, %v6006_v14, 0.0  ;;  %v6219_v25 = vsel %vm6051_vm3, %v6007_v40, 0.0  ;;  %v6223_v50 = vsel %vm6051_vm3, %v6009_v32, 0.0 }
 0x898   : > { %v6018_v40 = vmax.f32 %v5792_v54, 0.0  ;;  %v5824_v41 = vadd.f32 %v10253_v24, %v10468_v23  ;;  %v5864_v23 = vadd.f32 %v10253_v24, %v10143_v4 }
 0x899   : > { %v6202_v48 = vadd.f32 %v6201_v55, %v6200_v27  ;;  %v5765_v27 = vadd.f32 %v10253_v24, %v10041_v9 }
 0x89b   : > { %v6204_v35 = vadd.f32 %v6203_v61, %v6202_v48  ;;  %v6010_v61 = vmax.f32 %v5760_v33, 0.0  ;;  %v6011_v63 = vmax.f32 %v5765_v27, 0.0 }
 0x89d   : > { %v6206_v51 = vadd.f32 %v6205_v20, %v6204_v35  ;;  %v6225_v35 = vsel %vm6051_vm3, %v6010_v61, 0.0  ;;  %v6227_v9 = vsel %vm6051_vm3, %v6011_v63, 0.0  ;;  %v5776_v20 = vadd.f32 %v10253_v24, %v10044_v0 }
 0x89e   : > { %v5789_v0 = vadd.f32 %v10253_v24, %v10055_v16  ;;  %v5800_v16 = vadd.f32 %v10253_v24, %v10079_v31  ;;  %v6021_v31 = vmax.f32 %v5805_v17, 0.0  ;;  %v6023_v61 = vmax.f32 %v5813_v62, 0.0  ;;  %v10474_v17 = vld [vmem:[#allocation12_spill] sm:$0xff] }
 0x89f   : > { %v6208_v18 = vadd.f32 %v6207_v56, %v6206_v51  ;;  %v6014_v3 = vmax.f32 %v5776_v20, 0.0  ;;  %v10469_v20 = vld [vmem:[#allocation6_spill] sm:$0xff] }
 0x8a0   : > { %v6017_v46 = vmax.f32 %v5789_v0, 0.0  ;;  %v6247_v8 = vsel %vm6051_vm3, %v6021_v31, 0.0  ;;  %v10471_v0 = vld [vmem:[#allocation5_spill] sm:$0xff] }
 0x8a1   : > { %v6210_v60 = vadd.f32 %v6209_v28, %v6208_v18  ;;  %v6229_v28 = vsel %vm6051_vm3, %v6012_v52, 0.0  ;;  %v6015_v18 = vmax.f32 %v5781_v44, 0.0  ;;  %v6233_v15 = vsel %vm6051_vm3, %v6014_v3, 0.0 }
 0x8a2   : > { %v6239_v10 = vsel %vm6051_vm3, %v6017_v46, 0.0  ;;  %v5829_v52 = vadd.f32 %v10253_v24, %v10469_v20  ;;  %v10473_v46 = vld [vmem:[#allocation10_spill] sm:$0xff] }
 0x8a3   : > { %v6212_v59 = vadd.f32 %v6211_v7, %v6210_v60  ;;  %v6235_v60 = vsel %vm6051_vm3, %v6015_v18, 0.0  ;;  %v10470_v18 = vld [vmem:[#allocation8_spill] sm:$0xff] }
 0x8a4   : > { %v5832_v37 = vadd.f32 %v10253_v24, %v10470_v18 }
 0x8a5   : > { %v6214_v26 = vadd.f32 %v6213_v5, %v6212_v59  ;;  %v5797_v59 = vadd.f32 %v10253_v24, %v10074_v57 }
 0x8a7   : > { %v6216_v6 = vadd.f32 %v6215_v13, %v6214_v26  ;;  %v6019_v26 = vmax.f32 %v5797_v59, 0.0  ;;  %v5840_v59 = vadd.f32 %v10253_v24, %v10472_v39 }
 0x8a9   : > { %v6218_v29 = vadd.f32 %v6217_v49, %v6216_v6  ;;  %v6241_v6 = vsel %vm6051_vm3, %v6018_v40, 0.0  ;;  %v6243_v57 = vsel %vm6051_vm3, %v6019_v26, 0.0  ;;  %v5808_v49 = vadd.f32 %v10253_v24, %v10077_v11 }
 0x8ab   : > { %v6220_v55 = vadd.f32 %v6219_v25, %v6218_v29  ;;  %v6020_v25 = vmax.f32 %v5800_v16, 0.0  ;;  %v6022_v32 = vmax.f32 %v5808_v49, 0.0  ;;  %v6030_v16 = vmax.f32 %v5840_v59, 0.0  ;;  %v10475_v49 = vld [vmem:[#allocation9_spill] sm:$0xff] }
 0x8ad   : > { %v6222_v48 = vadd.f32 %v6221_v12, %v6220_v55  ;;  %v6245_v55 = vsel %vm6051_vm3, %v6020_v25, 0.0  ;;  %v5816_v12 = vadd.f32 %v10253_v24, %v10466_v45  ;;  %v5853_v25 = vadd.f32 %v10253_v24, %v10475_v49 }
 0x8af   : > { %v6224_v34 = vadd.f32 %v6223_v50, %v6222_v48  ;;  %v10467_v48 = vld [vmem:[#allocation2_spill] sm:$0xff] }
 0x8b0   : > { %v5821_v11 = vadd.f32 %v10253_v24, %v10467_v48 }
 0x8b1   : > { %v6226_v51 = vadd.f32 %v6225_v35, %v6224_v34  ;;  %v6249_v35 = vsel %vm6051_vm3, %v6022_v32, 0.0  ;;  %v6251_v34 = vsel %vm6051_vm3, %v6023_v61, 0.0  ;;  %v10477_v61 = vld [vmem:[#allocation14_spill] sm:$0xff] }
 0x8b2   : > { %v5861_v45 = vadd.f32 %v10253_v24, %v10477_v61 }
 0x8b3   : > { %v6228_v56 = vadd.f32 %v6227_v9, %v6226_v51  ;;  %v6024_v9 = vmax.f32 %v5816_v12, 0.0  ;;  %v6025_v51 = vmax.f32 %v5821_v11, 0.0 }
 0x8b5   : > { %v6230_v7 = vadd.f32 %v6229_v28, %v6228_v56  ;;  %v6026_v56 = vmax.f32 %v5824_v41, 0.0  ;;  %v6253_v3 = vsel %vm6051_vm3, %v6024_v9, 0.0  ;;  %v6027_v28 = vmax.f32 %v5829_v52, 0.0 }
 0x8b7   : > { %v6232_v21 = vadd.f32 %v6231_v19, %v6230_v7  ;;  %v6255_v19 = vsel %vm6051_vm3, %v6025_v51, 0.0  ;;  %v6257_v54 = vsel %vm6051_vm3, %v6026_v56, 0.0  ;;  %v10479_v51 = vld [vmem:[#allocation15_spill] sm:$0xff]  ;;  %v6036_v56 = vmax.f32 %v5864_v23, 0.0 }
 0x8b9   : > { %v6234_v14 = vadd.f32 %v6233_v15, %v6232_v21  ;;  %v5837_v21 = vadd.f32 %v10253_v24, %v10471_v0 }
 0x8bb   : > { %v6236_v5 = vadd.f32 %v6235_v60, %v6234_v14  ;;  %v6259_v60 = vsel %vm6051_vm3, %v6027_v28, 0.0  ;;  %v6028_v14 = vmax.f32 %v5832_v37, 0.0 }
 0x8bd   : > { %v6238_v13 = vadd.f32 %v6237_v30, %v6236_v5  ;;  %v5845_v5 = vadd.f32 %v10253_v24, %v10473_v46  ;;  %v6029_v30 = vmax.f32 %v5837_v21, 0.0  ;;  %v5880_v21 = vadd.f32 %v10253_v24, %v10159_v53 }
 0x8bf   : > { %v6240_v33 = vadd.f32 %v6239_v10, %v6238_v13  ;;  %v6261_v13 = vsel %vm6051_vm3, %v6028_v14, 0.0  ;;  %v6031_v10 = vmax.f32 %v5845_v5, 0.0  ;;  %v5888_v14 = vadd.f32 %v10253_v24, %v10157_v38 }
 0x8c1   : > { %v6242_v27 = vadd.f32 %v6241_v6, %v6240_v33  ;;  %v5848_v6 = vadd.f32 %v10253_v24, %v10474_v17  ;;  %v6267_v32 = vsel %vm6051_vm3, %v6031_v10, 0.0 }
 0x8c3   : > { %v6244_v29 = vadd.f32 %v6243_v57, %v6242_v27  ;;  %v6263_v57 = vsel %vm6051_vm3, %v6029_v30, 0.0  ;;  %v10476_v27 = vld [vmem:[#allocation11_spill] sm:$0xff]  ;;  %v5893_v30 = vadd.f32 %v10253_v24, %v10175_v1 }
 0x8c4   : > { %v5856_v31 = vadd.f32 %v10253_v24, %v10476_v27 }
 0x8c5   : > { %v6246_v63 = vadd.f32 %v6245_v55, %v6244_v29  ;;  %v6265_v29 = vsel %vm6051_vm3, %v6030_v16, 0.0  ;;  %v6032_v55 = vmax.f32 %v5848_v6, 0.0  ;;  %v6043_v17 = vmax.f32 %v5893_v30, 0.0 }
 0x8c6   : > { %v6034_v48 = vmax.f32 %v5856_v31, 0.0  ;;  %v5896_v6 = vadd.f32 %v10253_v24, %v10181_v58  ;;  %v5909_v31 = vadd.f32 %v10253_v24, %v10194_v42 }
 0x8c7   : > { %v6248_v50 = vadd.f32 %v6247_v8, %v6246_v63  ;;  %v6033_v63 = vmax.f32 %v5853_v25, 0.0  ;;  %v6269_v11 = vsel %vm6051_vm3, %v6032_v55, 0.0  ;;  %v6291_v1 = vsel %vm6051_vm3, %v6043_v17, 0.0 }
 0x8c8   : > { %v6273_v20 = vsel %vm6051_vm3, %v6034_v48, 0.0  ;;  %v6044_v27 = vmax.f32 %v5896_v6, 0.0 }
 0x8c9   : > { %v6250_v44 = vadd.f32 %v6249_v35, %v6248_v50  ;;  %v6035_v50 = vmax.f32 %v5861_v45, 0.0  ;;  %v6271_v35 = vsel %vm6051_vm3, %v6033_v63, 0.0  ;;  %v6047_v45 = vmax.f32 %v5909_v31, 0.0 }
 0x8ca   : > { %v6293_v61 = vsel %vm6051_vm3, %v6044_v27, 0.0 }
 0x8cb   : > { %v6252_v2 = vadd.f32 %v6251_v34, %v6250_v44  ;;  %v10478_v34 = vld [vmem:[#allocation13_spill] sm:$0xff]  ;;  %v6275_v44 = vsel %vm6051_vm3, %v6035_v50, 0.0  ;;  %v6299_v42 = vsel %vm6051_vm3, %v6047_v45, 0.0 }
 0x8cc   : > { %v5869_v9 = vadd.f32 %v10253_v24, %v10478_v34 }
 0x8cd   : > { %v6254_v7 = vadd.f32 %v6253_v3, %v6252_v2  ;;  %v5872_v2 = vadd.f32 %v10253_v24, %v10479_v51  ;;  %v10480_v3 = vld [vmem:[#allocation17_spill] sm:$0xff] }
 0x8ce   : > { %v5877_v28 = vadd.f32 %v10253_v24, %v10480_v3  ;;  %v6037_v4 = vmax.f32 %v5869_v9, 0.0 }
 0x8cf   : > { %v6256_v15 = vadd.f32 %v6255_v19, %v6254_v7  ;;  %v6038_v7 = vmax.f32 %v5872_v2, 0.0  ;;  %v6277_v19 = vsel %vm6051_vm3, %v6036_v56, 0.0 }
 0x8d0   : > { %v6039_v0 = vmax.f32 %v5877_v28, 0.0 }
 0x8d1   : > { %v6258_v40 = vadd.f32 %v6257_v54, %v6256_v15  ;;  %v6279_v15 = vsel %vm6051_vm3, %v6037_v4, 0.0  ;;  %v6281_v46 = vsel %vm6051_vm3, %v6038_v7, 0.0  ;;  %v6320_v7 = vld [vmem:[%s10426_s16] sm:$0x1] }
 0x8d2   : > { %v6283_v5 = vsel %vm6051_vm3, %v6039_v0, 0.0 }
 0x8d3   : > { %v6260_v26 = vadd.f32 %v6259_v60, %v6258_v40  ;;  %v10481_v60 = vld [vmem:[#allocation16_spill] sm:$0xff]  ;;  %v6040_v40 = vmax.f32 %v5880_v21, 0.0 }
 0x8d4   : > { %v5885_v39 = vadd.f32 %v10253_v24, %v10481_v60 }
 0x8d5   : > { %v6262_v33 = vadd.f32 %v6261_v13, %v6260_v26  ;;  %v6042_v13 = vmax.f32 %v5888_v14, 0.0  ;;  %v6285_v10 = vsel %vm6051_vm3, %v6040_v40, 0.0 }
 0x8d6   : > { %v6041_v53 = vmax.f32 %v5885_v39, 0.0 }
 0x8d7   : > { %v6264_v62 = vadd.f32 %v6263_v57, %v6262_v33  ;;  %v5901_v57 = vadd.f32 %v10253_v24, %v10172_v36  ;;  %v6289_v49 = vsel %vm6051_vm3, %v6042_v13, 0.0  ;;  %v5912_v36 = vadd.f32 %v10253_v24, %v10201_v47 }
 0x8d8   : > { %v6287_v38 = vsel %vm6051_vm3, %v6041_v53, 0.0 }
 0x8d9   : > { %v6266_v12 = vadd.f32 %v6265_v29, %v6264_v62  ;;  %v5904_v62 = vadd.f32 %v10253_v24, %v10177_v43  ;;  %v6045_v58 = vmax.f32 %v5901_v57, 0.0  ;;  %v5917_v43 = vadd.f32 %v10253_v24, %v10192_v22 }
 0x8da   : > { %v6048_v23 = vmax.f32 %v5912_v36, 0.0 }
 0x8db   : > { %v6268_v8 = vadd.f32 %v6267_v32, %v6266_v12  ;;  %v6046_v55 = vmax.f32 %v5904_v62, 0.0  ;;  %v6295_v63 = vsel %vm6051_vm3, %v6045_v58, 0.0 }
 0x8dc   : > { %v6301_v47 = vsel %vm6051_vm3, %v6048_v23, 0.0 }
 0x8dd   : > { %v6270_v41 = vadd.f32 %v6269_v11, %v6268_v8  ;;  %v6297_v48 = vsel %vm6051_vm3, %v6046_v55, 0.0  ;;  %v10482_v11 = vld [vmem:[#allocation18_spill] sm:$0xff] }
 0x8de   : > { %v5920_v50 = vadd.f32 %v10253_v24, %v10482_v11 }
 0x8df   : > { %v6272_v52 = vadd.f32 %v6271_v35, %v6270_v41  ;;  %v6049_v35 = vmax.f32 %v5917_v43, 0.0 }
 0x8e0   : > { %v6050_v9 = vmax.f32 %v5920_v50, 0.0 }
 0x8e1   : > { %v6274_v18 = vadd.f32 %v6273_v20, %v6272_v52  ;;  %v6303_v52 = vsel %vm6051_vm3, %v6049_v35, 0.0 }
 0x8e3   : > { %v6276_v37 = vadd.f32 %v6275_v44, %v6274_v18  ;;  %v6305_v44 = vsel %vm6051_vm3, %v6050_v9, 0.0 }
 0x8e5   : > { %v6278_v54 = vadd.f32 %v6277_v19, %v6276_v37 }
 0x8e7   : > { %v6280_v59 = vadd.f32 %v6279_v15, %v6278_v54 }
 0x8e9   : > { %v6282_v26 = vadd.f32 %v6281_v46, %v6280_v59 }
 0x8eb   : > { %v6284_v16 = vadd.f32 %v6283_v5, %v6282_v26 }
 0x8ed   : > { %v6286_v33 = vadd.f32 %v6285_v10, %v6284_v16 }
 0x8ef   : > { %v6288_v25 = vadd.f32 %v6287_v38, %v6286_v33 }
 0x8f1   : > { %v6290_v29 = vadd.f32 %v6289_v49, %v6288_v25 }
 0x8f3   : > { %v6292_v32 = vadd.f32 %v6291_v1, %v6290_v29 }
 0x8f5   : > { %v6294_v12 = vadd.f32 %v6293_v61, %v6292_v32 }
 0x8f7   : > { %v6296_v8 = vadd.f32 %v6295_v63, %v6294_v12 }
 0x8f9   : > { %v6298_v41 = vadd.f32 %v6297_v48, %v6296_v8 }
 0x8fb   : > { %v6300_v34 = vadd.f32 %v6299_v42, %v6298_v41 }
 0x8fd   : > { %v6302_v20 = vadd.f32 %v6301_v47, %v6300_v34 }
 0x8ff   : > { %v6304_v22 = vadd.f32 %v6303_v52, %v6302_v20 }
 0x901   : > { %v6306_v51 = vadd.f32 %v6305_v44, %v6304_v22 }
 0x903   : > { %v6307_v2 = vrot.slane %v6306_v51, 4 }
 0x905   : > { %v6308_v56 = vadd.f32 %v6307_v2, %v6306_v51 }
 0x907   : > { %v6309_v3 = vrot.slane %v6308_v56, 2 }
 0x909   : > { %v6310_v28 = vadd.f32 %v6309_v3, %v6308_v56 }
 0x90b   : > { %v6311_v24 = vrot.slane %v6310_v28, 1 }
 0x90d   : > { %v6312_v18 = vadd.f32 %v6311_v24, %v6310_v28 }
 0x90f   : > { %v6314_v4 = vmul.f32 0.0009765625, %v6312_v18 }
 0x911   : > { %v6315_v37 = vpack.c.bf16 %v6314_v4, %v6314_v4 }
 0x913   : > { %7966 = vmatmul.mubr.msk.bf16.vlgmr.msra.gmra.mrb[36].mxu0 %vm6051_vm3, %v6315_v37 }
 0x9e6   : > { %v6370_v19 = vpop.f32.mrb[36].mxu0 }
 0x9e7   : > { %v6371_v0 = vadd.f32 %v6370_v19, %v6320_v7  ;;  %v7967_v21 = vpop.f32.mrb[37].mxu0 }
 0x9e8   : > { %v6373_v54 = vpop.f32.mrb[38].mxu0 }
 0x9e9   : > { %6377 = vst.msk [vmem:[%s641_s27] sm:$0x1] %vm6376_vm5, %v6371_v0  ;;  %v7968_v15 = vpop.f32.mrb[39].mxu0 }
 0x9ea PF: > { %s30_s0 = sadd.s32 1, %s8261_s0  }
 0x9eb   : > { %p27_p4 = scmp.ge.s32.totalorder %s30_s0, 4  }
 0x9ed   :  { %29 = sbr.rel (!%p27_p4) target bundleno = 5 (0x5), region = 145 }

// kernel: template_hoi_forward.4
= control target key start
LH: loop header
LB: loop body
LE: loop exit
PB: predicated region body
PF: predicated region fallthrough
CT: control target
= control target key end

     0   :  { %vm3446_vm0 = vcmask 1044480   ;;  %vm3447_vm1 = vcmask 1045504   ;;  %vm3111_vm2 = vcmask 351232   ;;  %vm5994_vm3 = vmmov 0   ;;  %s7982_s1 = inlined_call_operand.vmem [shape: bf16[512,1024], index: 1, kind: input, shape index: {}]   ;;  %s7983_s0 = inlined_call_operand.vmem [shape: bf16[8,512], index: 0, kind: input, shape index: {}]   ;;  %s7984_s3 = inlined_call_operand.vmem [shape: bf16[1024,256], index: 3, kind: input, shape index: {}]   ;;  %s7985_s2 = inlined_call_operand.vmem [shape: f32[1,1024], index: 2, kind: input, shape index: {}]   ;;  %s7986_s5 = inlined_call_operand.vmem [shape: bf16[256,43], index: 5, kind: input, shape index: {}]   ;;  %s7987_s7 = inlined_call_operand.vmem [shape: bf16[43,2334], index: 7, kind: input, shape index: {}]   ;;  %s7988_s4 = inlined_call_operand.vmem [shape: f32[1,256], index: 4, kind: input, shape index: {}, may-alias: {4,10}]   ;;  %s7989_s8 = inlined_call_operand.vmem [shape: bf16[43,48], index: 8, kind: input, shape index: {}]   ;;  %s7990_s9 = inlined_call_operand.vmem [shape: bf16[512,256], index: 9, kind: input, shape index: {}]   ;;  %s7991_s6 = inlined_call_operand.vmem [shape: f32[1,43], index: 6, kind: input, shape index: {}]   ;;  %s7992_s13 = inlined_call_operand.vmem [shape: f32[8,43], index: 13, kind: output, shape index: {0}]   ;;  %s7993_s11 = inlined_call_operand.vmem [shape: bf16[512,4], index: 11, kind: input, shape index: {}]   ;;  %s7994_s14 = inlined_call_operand.vmem [shape: f32[8,2334], index: 14, kind: output, shape index: {1}]   ;;  %s7995_s12 = inlined_call_operand.vmem [shape: f32[1,4], index: 12, kind: input, shape index: {}]   ;;  %s7996_s17 = inlined_call_operand.vmem [shape: f32[8,4], index: 17, kind: output, shape index: {4}]   ;;  %s7997_s15 = inlined_call_operand.vmem [shape: f32[8,48], index: 15, kind: output, shape index: {2}]   ;;  %s7998_s10 = inlined_call_operand.vmem [shape: f32[1,256], index: 10, kind: input, shape index: {}, may-alias: {4,10}]   ;;  %s7999_s16 = inlined_call_operand.vmem [shape: f32[8,256], index: 16, kind: output, shape index: {3}]  }
   0x1   :  { %8002 = sst [smem:[#allocation2_spill]] %s7982_s1  ;;  %vm4827_vm4 = vcmask 31744   ;;  %vm3934_vm5 = vcmask 244736   ;;  %vm4002_vm6 = vcmask 392192  }
   0x2   :  { %8003 = sst [smem:[#allocation3_spill]] %s7983_s0  ;;  %s8004_s26 = sld [smem:[#allocation2_spill]] }
   0x3   :  { %s8005_s27 = sld [smem:[#allocation3_spill]] }
   0x8   :  { %v52_v0 = vld [vmem:[%s8004_s26] sm:$0xff]  ;;  %v53_v2 = vld [vmem:[%s8004_s26 + $0x8] sm:$0xff] }
   0x9   :  { %v56_v1 = vld [vmem:[%s8004_s26 + $0x20] sm:$0xff]  ;;  %v57_v4 = vld [vmem:[%s8004_s26 + $0x28] sm:$0xff] }
   0xa   :  { %v4854_v3 = vcombine.high %v52_v0, %v56_v1  ;;  %v4853_v5 = vcombine.low %v52_v0, %v56_v1  ;;  %v60_v6 = vld [vmem:[%s8004_s26 + $0x40] sm:$0xff]  ;;  %v4856_v8 = vcombine.high %v53_v2, %v57_v4  ;;  %v4855_v9 = vcombine.low %v53_v2, %v57_v4  ;;  %v61_v11 = vld [vmem:[%s8004_s26 + $0x48] sm:$0xff] }
   0xb   :  { %v64_v7 = vld [vmem:[%s8004_s26 + $0x60] sm:$0xff]  ;;  %v65_v12 = vld [vmem:[%s8004_s26 + $0x68] sm:$0xff] }
   0xc   :  { %v4862_v10 = vcombine.high %v60_v6, %v64_v7  ;;  %v68_v13 = vld [vmem:[%s8004_s26 + $0x80] sm:$0xff]  ;;  %1644 = vmatprep.subr.bf16.mxu0 %v4854_v3  ;;  %v4864_v14 = vcombine.high %v61_v11, %v65_v12  ;;  %v69_v16 = vld [vmem:[%s8004_s26 + $0x88] sm:$0xff]  ;;  %1726 = vmatprep.subr.bf16.mxu1 %v4856_v8  ;;  %v4861_v18 = vcombine.low %v60_v6, %v64_v7 }
   0xd   :  { %v72_v15 = vld [vmem:[%s8004_s26 + $0xa0] sm:$0xff]  ;;  %v73_v17 = vld [vmem:[%s8004_s26 + $0xa8] sm:$0xff]  ;;  %1645 = vmatpush1.bf16.msra.mxu0 %v4853_v5  ;;  %1727 = vmatpush1.bf16.msra.mxu1 %v4855_v9  ;;  %v4863_v19 = vcombine.low %v61_v11, %v65_v12 }
   0xe   :  { %1646 = vmatprep.subr.bf16.mxu0 %v4862_v10  ;;  %v4870_v20 = vcombine.high %v68_v13, %v72_v15  ;;  %1728 = vmatprep.subr.bf16.mxu1 %v4864_v14  ;;  %v4872_v21 = vcombine.high %v69_v16, %v73_v17  ;;  %v76_v22 = vld [vmem:[%s8004_s26 + $0xc0] sm:$0xff]  ;;  %v77_v24 = vld [vmem:[%s8004_s26 + $0xc8] sm:$0xff]  ;;  %v4869_v26 = vcombine.low %v68_v13, %v72_v15 }
   0xf   :  { %v80_v23 = vld [vmem:[%s8004_s26 + $0xe0] sm:$0xff]  ;;  %v81_v25 = vld [vmem:[%s8004_s26 + $0xe8] sm:$0xff]  ;;  %v4871_v27 = vcombine.low %v69_v16, %v73_v17 }
  0x10   :  { %v4878_v28 = vcombine.high %v76_v22, %v80_v23  ;;  %v4880_v29 = vcombine.high %v77_v24, %v81_v25  ;;  %v84_v30 = vld [vmem:[%s8004_s26 + $0x100] sm:$0xff]  ;;  %v85_v32 = vld [vmem:[%s8004_s26 + $0x108] sm:$0xff]  ;;  %v4877_v34 = vcombine.low %v76_v22, %v80_v23  ;;  %v4879_v35 = vcombine.low %v77_v24, %v81_v25 }
  0x11   :  { %1647 = vmatpush1.bf16.msra.mxu0 %v4861_v18  ;;  %1729 = vmatpush1.bf16.msra.mxu1 %v4863_v19  ;;  %v88_v31 = vld [vmem:[%s8004_s26 + $0x120] sm:$0xff]  ;;  %v89_v33 = vld [vmem:[%s8004_s26 + $0x128] sm:$0xff] }
  0x12   :  { %1648 = vmatprep.subr.bf16.mxu0 %v4870_v20  ;;  %1730 = vmatprep.subr.bf16.mxu1 %v4872_v21  ;;  %v4886_v36 = vcombine.high %v84_v30, %v88_v31  ;;  %v4888_v37 = vcombine.high %v85_v32, %v89_v33  ;;  %v92_v38 = vld [vmem:[%s8004_s26 + $0x140] sm:$0xff]  ;;  %v93_v40 = vld [vmem:[%s8004_s26 + $0x148] sm:$0xff]  ;;  %v4885_v42 = vcombine.low %v84_v30, %v88_v31 }
  0x13   :  { %v96_v39 = vld [vmem:[%s8004_s26 + $0x160] sm:$0xff]  ;;  %v97_v41 = vld [vmem:[%s8004_s26 + $0x168] sm:$0xff]  ;;  %v4887_v43 = vcombine.low %v85_v32, %v89_v33 }
  0x14   :  { %v4894_v44 = vcombine.high %v92_v38, %v96_v39  ;;  %v4896_v45 = vcombine.high %v93_v40, %v97_v41  ;;  %v100_v46 = vld [vmem:[%s8004_s26 + $0x180] sm:$0xff]  ;;  %v101_v48 = vld [vmem:[%s8004_s26 + $0x188] sm:$0xff]  ;;  %v4893_v50 = vcombine.low %v92_v38, %v96_v39  ;;  %v4895_v51 = vcombine.low %v93_v40, %v97_v41 }
  0x15   :  { %1649 = vmatpush1.bf16.msra.mxu0 %v4869_v26  ;;  %1731 = vmatpush1.bf16.msra.mxu1 %v4871_v27  ;;  %v104_v47 = vld [vmem:[%s8004_s26 + $0x1a0] sm:$0xff]  ;;  %v105_v49 = vld [vmem:[%s8004_s26 + $0x1a8] sm:$0xff] }
  0x16   :  { %1650 = vmatprep.subr.bf16.mxu0 %v4878_v28  ;;  %1732 = vmatprep.subr.bf16.mxu1 %v4880_v29  ;;  %v4902_v52 = vcombine.high %v100_v46, %v104_v47  ;;  %v6172_v53 = vld [vmem:[%s8005_s27] sm:$0xff]  ;;  %v4904_v54 = vcombine.high %v101_v48, %v105_v49  ;;  %v109_v58 = vld [vmem:[%s8004_s26 + $0x1c8] sm:$0xff]  ;;  %v4901_v60 = vcombine.low %v100_v46, %v104_v47 }
  0x17   :  { %v108_v55 = vld [vmem:[%s8004_s26 + $0x1c0] sm:$0xff]  ;;  %v6182_v57 = vcombine.high %v6172_v53, %v6172_v53  ;;  %v113_v59 = vld [vmem:[%s8004_s26 + $0x1e8] sm:$0xff]  ;;  %v4903_v61 = vcombine.low %v101_v48, %v105_v49 }
  0x18   :  { %v112_v56 = vld [vmem:[%s8004_s26 + $0x1e0] sm:$0xff]  ;;  %v4912_v63 = vcombine.high %v109_v58, %v113_v59  ;;  %v117_v2 = vld [vmem:[%s8004_s26 + $0x208] sm:$0xff]  ;;  %v4911_v5 = vcombine.low %v109_v58, %v113_v59 }
  0x19   :  { %1651 = vmatpush1.bf16.msra.mxu0 %v4877_v34  ;;  %1733 = vmatpush1.bf16.msra.mxu1 %v4879_v35  ;;  %v4910_v62 = vcombine.high %v108_v55, %v112_v56  ;;  %v116_v0 = vld [vmem:[%s8004_s26 + $0x200] sm:$0xff]  ;;  %v121_v3 = vld [vmem:[%s8004_s26 + $0x228] sm:$0xff]  ;;  %v4909_v4 = vcombine.low %v108_v55, %v112_v56 }
  0x1a   :  { %1652 = vmatprep.subr.bf16.mxu0 %v4886_v36  ;;  %1734 = vmatprep.subr.bf16.mxu1 %v4888_v37  ;;  %v120_v1 = vld [vmem:[%s8004_s26 + $0x220] sm:$0xff]  ;;  %v4920_v7 = vcombine.high %v117_v2, %v121_v3  ;;  %v125_v10 = vld [vmem:[%s8004_s26 + $0x248] sm:$0xff]  ;;  %v4919_v13 = vcombine.low %v117_v2, %v121_v3 }
  0x1b   :  { %1676 = vmatprep.mubr.bf16.mxu0 %v6182_v57  ;;  %1758 = vmatprep.mubr.bf16.mxu1 %v6182_v57  ;;  %v4918_v6 = vcombine.high %v116_v0, %v120_v1  ;;  %v124_v8 = vld [vmem:[%s8004_s26 + $0x240] sm:$0xff]  ;;  %v129_v11 = vld [vmem:[%s8004_s26 + $0x268] sm:$0xff]  ;;  %v4917_v12 = vcombine.low %v116_v0, %v120_v1 }
  0x1c   :  { %v128_v9 = vld [vmem:[%s8004_s26 + $0x260] sm:$0xff]  ;;  %v4928_v15 = vcombine.high %v125_v10, %v129_v11  ;;  %v133_v18 = vld [vmem:[%s8004_s26 + $0x288] sm:$0xff]  ;;  %v4927_v21 = vcombine.low %v125_v10, %v129_v11 }
  0x1d   :  { %1653 = vmatpush1.bf16.msra.mxu0 %v4885_v42  ;;  %1735 = vmatpush1.bf16.msra.mxu1 %v4887_v43  ;;  %v4926_v14 = vcombine.high %v124_v8, %v128_v9  ;;  %v132_v16 = vld [vmem:[%s8004_s26 + $0x280] sm:$0xff]  ;;  %v137_v19 = vld [vmem:[%s8004_s26 + $0x2a8] sm:$0xff]  ;;  %v4925_v20 = vcombine.low %v124_v8, %v128_v9 }
  0x1e   :  { %1654 = vmatprep.subr.bf16.mxu0 %v4894_v44  ;;  %1736 = vmatprep.subr.bf16.mxu1 %v4896_v45  ;;  %v136_v17 = vld [vmem:[%s8004_s26 + $0x2a0] sm:$0xff]  ;;  %v4936_v23 = vcombine.high %v133_v18, %v137_v19  ;;  %v141_v26 = vld [vmem:[%s8004_s26 + $0x2c8] sm:$0xff]  ;;  %v4935_v29 = vcombine.low %v133_v18, %v137_v19 }
  0x1f   :  { %v4934_v22 = vcombine.high %v132_v16, %v136_v17  ;;  %v140_v24 = vld [vmem:[%s8004_s26 + $0x2c0] sm:$0xff]  ;;  %v145_v27 = vld [vmem:[%s8004_s26 + $0x2e8] sm:$0xff]  ;;  %v4933_v28 = vcombine.low %v132_v16, %v136_v17 }
  0x20   :  { %v144_v25 = vld [vmem:[%s8004_s26 + $0x2e0] sm:$0xff]  ;;  %v4944_v31 = vcombine.high %v141_v26, %v145_v27  ;;  %v149_v34 = vld [vmem:[%s8004_s26 + $0x308] sm:$0xff]  ;;  %v4943_v37 = vcombine.low %v141_v26, %v145_v27 }
  0x21   :  { %1655 = vmatpush1.bf16.msra.mxu0 %v4893_v50  ;;  %1737 = vmatpush1.bf16.msra.mxu1 %v4895_v51  ;;  %v4942_v30 = vcombine.high %v140_v24, %v144_v25  ;;  %v148_v32 = vld [vmem:[%s8004_s26 + $0x300] sm:$0xff]  ;;  %v153_v35 = vld [vmem:[%s8004_s26 + $0x328] sm:$0xff]  ;;  %v4941_v36 = vcombine.low %v140_v24, %v144_v25 }
  0x22   :  { %1656 = vmatprep.subr.bf16.mxu0 %v4902_v52  ;;  %1738 = vmatprep.subr.bf16.mxu1 %v4904_v54  ;;  %v152_v33 = vld [vmem:[%s8004_s26 + $0x320] sm:$0xff]  ;;  %v4952_v39 = vcombine.high %v149_v34, %v153_v35  ;;  %v157_v42 = vld [vmem:[%s8004_s26 + $0x348] sm:$0xff]  ;;  %v4951_v45 = vcombine.low %v149_v34, %v153_v35 }
  0x23   :  { %v4950_v38 = vcombine.high %v148_v32, %v152_v33  ;;  %v156_v40 = vld [vmem:[%s8004_s26 + $0x340] sm:$0xff]  ;;  %v161_v43 = vld [vmem:[%s8004_s26 + $0x368] sm:$0xff]  ;;  %v4949_v44 = vcombine.low %v148_v32, %v152_v33 }
  0x24   :  { %v160_v41 = vld [vmem:[%s8004_s26 + $0x360] sm:$0xff]  ;;  %v4960_v47 = vcombine.high %v157_v42, %v161_v43  ;;  %v165_v50 = vld [vmem:[%s8004_s26 + $0x388] sm:$0xff]  ;;  %v4959_v54 = vcombine.low %v157_v42, %v161_v43 }
  0x25   :  { %1657 = vmatpush1.bf16.msra.mxu0 %v4901_v60  ;;  %1739 = vmatpush1.bf16.msra.mxu1 %v4903_v61  ;;  %v4958_v46 = vcombine.high %v156_v40, %v160_v41  ;;  %v164_v48 = vld [vmem:[%s8004_s26 + $0x380] sm:$0xff]  ;;  %v169_v51 = vld [vmem:[%s8004_s26 + $0x3a8] sm:$0xff]  ;;  %v4957_v52 = vcombine.low %v156_v40, %v160_v41 }
  0x26   :  { %1658 = vmatprep.subr.bf16.mxu0 %v4910_v62  ;;  %1740 = vmatprep.subr.bf16.mxu1 %v4912_v63  ;;  %v168_v49 = vld [vmem:[%s8004_s26 + $0x3a0] sm:$0xff]  ;;  %v4968_v56 = vcombine.high %v165_v50, %v169_v51  ;;  %v173_v60 = vld [vmem:[%s8004_s26 + $0x3c8] sm:$0xff]  ;;  %v4967_v63 = vcombine.low %v165_v50, %v169_v51 }
  0x27   :  { %v4966_v55 = vcombine.high %v164_v48, %v168_v49  ;;  %v172_v58 = vld [vmem:[%s8004_s26 + $0x3c0] sm:$0xff]  ;;  %v177_v61 = vld [vmem:[%s8004_s26 + $0x3e8] sm:$0xff]  ;;  %v4965_v62 = vcombine.low %v164_v48, %v168_v49 }
  0x28   :  { %v176_v59 = vld [vmem:[%s8004_s26 + $0x3e0] sm:$0xff]  ;;  %v4976_v1 = vcombine.high %v173_v60, %v177_v61 }
  0x29   :  { %1659 = vmatpush1.bf16.msra.mxu0 %v4909_v4  ;;  %1741 = vmatpush1.bf16.msra.mxu1 %v4911_v5  ;;  %v4974_v0 = vcombine.high %v172_v58, %v176_v59  ;;  %v180_v2 = vld [vmem:[%s8004_s26 + $0x400] sm:$0xff]  ;;  %v181_v4 = vld [vmem:[%s8004_s26 + $0x408] sm:$0xff] }
  0x2a   :  { %1660 = vmatprep.subr.bf16.mxu0 %v4918_v6  ;;  %1742 = vmatprep.subr.bf16.mxu1 %v4920_v7  ;;  %v184_v3 = vld [vmem:[%s8004_s26 + $0x420] sm:$0xff]  ;;  %v185_v5 = vld [vmem:[%s8004_s26 + $0x428] sm:$0xff]  ;;  %v4973_v6 = vcombine.low %v172_v58, %v176_v59  ;;  %v4975_v7 = vcombine.low %v173_v60, %v177_v61 }
  0x2b   :  { %v4982_v8 = vcombine.high %v180_v2, %v184_v3  ;;  %v4984_v9 = vcombine.high %v181_v4, %v185_v5  ;;  %v188_v10 = vld [vmem:[%s8004_s26 + $0x440] sm:$0xff]  ;;  %v4981_v16 = vcombine.low %v180_v2, %v184_v3  ;;  %v4983_v17 = vcombine.low %v181_v4, %v185_v5 }
  0x2c   :  { %v192_v11 = vld [vmem:[%s8004_s26 + $0x460] sm:$0xff] }
  0x2d   :  { %1661 = vmatpush1.bf16.msra.mxu0 %v4917_v12  ;;  %1743 = vmatpush1.bf16.msra.mxu1 %v4919_v13  ;;  %v6308_v12 = vcombine.low %v6172_v53, %v6172_v53  ;;  %v189_v13 = vld [vmem:[%s8004_s26 + $0x448] sm:$0xff]  ;;  %v4990_v53 = vcombine.high %v188_v10, %v192_v11  ;;  %v196_v19 = vld [vmem:[%s8004_s26 + $0x480] sm:$0xff]  ;;  %v4989_v24 = vcombine.low %v188_v10, %v192_v11 }
  0x2e   :  { %1662 = vmatprep.subr.bf16.mxu0 %v4926_v14  ;;  %1744 = vmatprep.subr.bf16.mxu1 %v4928_v15  ;;  %v193_v14 = vld [vmem:[%s8004_s26 + $0x468] sm:$0xff] }
  0x2f   :  { %v6319_v15 = vld [vmem:[%s8005_s27 + $0x8] sm:$0xff]  ;;  %v4992_v18 = vcombine.high %v189_v13, %v193_v14  ;;  %v4991_v25 = vcombine.low %v189_v13, %v193_v14 }
  0x31   :  { %1663 = vmatpush1.bf16.msra.mxu0 %v4925_v20  ;;  %1745 = vmatpush1.bf16.msra.mxu1 %v4927_v21  ;;  %v200_v20 = vld [vmem:[%s8004_s26 + $0x4a0] sm:$0xff]  ;;  %v6329_v21 = vcombine.high %v6319_v15, %v6319_v15 }
  0x32   :  { %1664 = vmatprep.subr.bf16.mxu0 %v4934_v22  ;;  %1746 = vmatprep.subr.bf16.mxu1 %v4936_v23  ;;  %v197_v22 = vld [vmem:[%s8004_s26 + $0x488] sm:$0xff]  ;;  %v4998_v26 = vcombine.high %v196_v19, %v200_v20  ;;  %v4997_v32 = vcombine.low %v196_v19, %v200_v20 }
  0x33   :  { %v201_v23 = vld [vmem:[%s8004_s26 + $0x4a8] sm:$0xff] }
  0x34   :  { %v5000_v27 = vcombine.high %v197_v22, %v201_v23  ;;  %v4999_v33 = vcombine.low %v197_v22, %v201_v23 }
  0x35   :  { %1665 = vmatpush1.bf16.msra.mxu0 %v4933_v28  ;;  %1747 = vmatpush1.bf16.msra.mxu1 %v4935_v29  ;;  %v204_v28 = vld [vmem:[%s8004_s26 + $0x4c0] sm:$0xff] }
  0x36   :  { %1666 = vmatprep.subr.bf16.mxu0 %v4942_v30  ;;  %1748 = vmatprep.subr.bf16.mxu1 %v4944_v31  ;;  %v208_v29 = vld [vmem:[%s8004_s26 + $0x4e0] sm:$0xff]  ;;  %v205_v30 = vld [vmem:[%s8004_s26 + $0x4c8] sm:$0xff] }
  0x37   :  { %v209_v31 = vld [vmem:[%s8004_s26 + $0x4e8] sm:$0xff]  ;;  %v5006_v34 = vcombine.high %v204_v28, %v208_v29  ;;  %v5005_v40 = vcombine.low %v204_v28, %v208_v29 }
  0x38   :  { %v5008_v35 = vcombine.high %v205_v30, %v209_v31  ;;  %v5007_v41 = vcombine.low %v205_v30, %v209_v31 }
  0x39   :  { %1667 = vmatpush1.bf16.msra.mxu0 %v4941_v36  ;;  %1749 = vmatpush1.bf16.msra.mxu1 %v4943_v37  ;;  %v212_v36 = vld [vmem:[%s8004_s26 + $0x500] sm:$0xff] }
  0x3a   :  { %1668 = vmatprep.subr.bf16.mxu0 %v4950_v38  ;;  %1750 = vmatprep.subr.bf16.mxu1 %v4952_v39  ;;  %v216_v37 = vld [vmem:[%s8004_s26 + $0x520] sm:$0xff]  ;;  %v213_v38 = vld [vmem:[%s8004_s26 + $0x508] sm:$0xff] }
  0x3b   :  { %v217_v39 = vld [vmem:[%s8004_s26 + $0x528] sm:$0xff]  ;;  %v5014_v42 = vcombine.high %v212_v36, %v216_v37  ;;  %v5013_v48 = vcombine.low %v212_v36, %v216_v37 }
  0x3c   :  { %v5016_v43 = vcombine.high %v213_v38, %v217_v39  ;;  %v5015_v49 = vcombine.low %v213_v38, %v217_v39 }
  0x3d   :  { %1669 = vmatpush1.bf16.msra.mxu0 %v4949_v44  ;;  %1751 = vmatpush1.bf16.msra.mxu1 %v4951_v45  ;;  %v220_v44 = vld [vmem:[%s8004_s26 + $0x540] sm:$0xff] }
  0x3e   :  { %1670 = vmatprep.subr.bf16.mxu0 %v4958_v46  ;;  %1752 = vmatprep.subr.bf16.mxu1 %v4960_v47  ;;  %v224_v45 = vld [vmem:[%s8004_s26 + $0x560] sm:$0xff]  ;;  %v221_v46 = vld [vmem:[%s8004_s26 + $0x548] sm:$0xff] }
  0x3f   :  { %v225_v47 = vld [vmem:[%s8004_s26 + $0x568] sm:$0xff]  ;;  %v5022_v50 = vcombine.high %v220_v44, %v224_v45  ;;  %v5021_v58 = vcombine.low %v220_v44, %v224_v45 }
  0x40   :  { %v5024_v51 = vcombine.high %v221_v46, %v225_v47  ;;  %v5023_v59 = vcombine.low %v221_v46, %v225_v47 }
  0x41   :  { %1671 = vmatpush1.bf16.msra.mxu0 %v4957_v52  ;;  %1753 = vmatpush1.bf16.msra.mxu1 %v4959_v54  ;;  %v228_v52 = vld [vmem:[%s8004_s26 + $0x580] sm:$0xff] }
  0x42   :  { %1672 = vmatprep.subr.bf16.mxu0 %v4966_v55  ;;  %1754 = vmatprep.subr.bf16.mxu1 %v4968_v56  ;;  %v232_v54 = vld [vmem:[%s8004_s26 + $0x5a0] sm:$0xff]  ;;  %v229_v55 = vld [vmem:[%s8004_s26 + $0x588] sm:$0xff] }
  0x43   :  { %v233_v56 = vld [vmem:[%s8004_s26 + $0x5a8] sm:$0xff]  ;;  %v5030_v60 = vcombine.high %v228_v52, %v232_v54  ;;  %v5029_v2 = vcombine.low %v228_v52, %v232_v54 }
  0x44   :  { %v5032_v61 = vcombine.high %v229_v55, %v233_v56  ;;  %v5031_v3 = vcombine.low %v229_v55, %v233_v56 }
  0x45   :  { %1673 = vmatpush1.bf16.msra.mxu0 %v4965_v62  ;;  %1755 = vmatpush1.bf16.msra.mxu1 %v4967_v63  ;;  %v236_v62 = vld [vmem:[%s8004_s26 + $0x5c0] sm:$0xff] }
  0x46   :  { %1674 = vmatprep.subr.bf16.mxu0 %v4974_v0  ;;  %1756 = vmatprep.subr.bf16.mxu1 %v4976_v1  ;;  %v240_v63 = vld [vmem:[%s8004_s26 + $0x5e0] sm:$0xff]  ;;  %v237_v0 = vld [vmem:[%s8004_s26 + $0x5c8] sm:$0xff] }
  0x47   :  { %v241_v1 = vld [vmem:[%s8004_s26 + $0x5e8] sm:$0xff]  ;;  %v5038_v4 = vcombine.high %v236_v62, %v240_v63  ;;  %v5037_v10 = vcombine.low %v236_v62, %v240_v63 }
  0x48   :  { %v5040_v5 = vcombine.high %v237_v0, %v241_v1  ;;  %v5039_v11 = vcombine.low %v237_v0, %v241_v1 }
  0x49   :  { %1675 = vmatpush1.bf16.msra.mxu0 %v4973_v6  ;;  %1757 = vmatpush1.bf16.msra.mxu1 %v4975_v7  ;;  %v244_v6 = vld [vmem:[%s8004_s26 + $0x600] sm:$0xff] }
  0x4a   :  { %1685 = vmatprep.subr.bf16.mxu0 %v4982_v8  ;;  %1767 = vmatprep.subr.bf16.mxu1 %v4984_v9  ;;  %v248_v7 = vld [vmem:[%s8004_s26 + $0x620] sm:$0xff]  ;;  %v245_v8 = vld [vmem:[%s8004_s26 + $0x608] sm:$0xff] }
  0x4b   :  { %v249_v9 = vld [vmem:[%s8004_s26 + $0x628] sm:$0xff]  ;;  %v5046_v13 = vcombine.high %v244_v6, %v248_v7  ;;  %v5045_v19 = vcombine.low %v244_v6, %v248_v7 }
  0x4c   :  { %1677 = vmatmul.mubr.bf16.vlgmr.msra.gmra.mrb[0].mxu0 %v6308_v12  ;;  %1759 = vmatmul.mubr.bf16.vlgmr.msra.gmra.mrb[0].mxu1 %v6308_v12  ;;  %v5048_v14 = vcombine.high %v245_v8, %v249_v9  ;;  %v5047_v20 = vcombine.low %v245_v8, %v249_v9 }
  0x4d   :  { %1686 = vmatpush1.bf16.msra.mxu0 %v4981_v16  ;;  %1768 = vmatpush1.bf16.msra.mxu1 %v4983_v17  ;;  %v252_v16 = vld [vmem:[%s8004_s26 + $0x640] sm:$0xff] }
  0x4e   :  { %1687 = vmatprep.subr.bf16.mxu0 %v4990_v53  ;;  %1769 = vmatprep.subr.bf16.mxu1 %v4992_v18  ;;  %v256_v17 = vld [vmem:[%s8004_s26 + $0x660] sm:$0xff]  ;;  %v253_v53 = vld [vmem:[%s8004_s26 + $0x648] sm:$0xff] }
  0x4f   :  { %1717 = vmatprep.mubr.bf16.mxu0 %v6329_v21  ;;  %1799 = vmatprep.mubr.bf16.mxu1 %v6329_v21  ;;  %v257_v18 = vld [vmem:[%s8004_s26 + $0x668] sm:$0xff]  ;;  %v5054_v22 = vcombine.high %v252_v16, %v256_v17  ;;  %v5053_v28 = vcombine.low %v252_v16, %v256_v17 }
  0x50   :  { %v5056_v23 = vcombine.high %v253_v53, %v257_v18  ;;  %v5055_v29 = vcombine.low %v253_v53, %v257_v18 }
  0x51   :  { %1688 = vmatpush1.bf16.msra.mxu0 %v4989_v24  ;;  %1770 = vmatpush1.bf16.msra.mxu1 %v4991_v25  ;;  %v260_v24 = vld [vmem:[%s8004_s26 + $0x680] sm:$0xff] }
  0x52   :  { %1689 = vmatprep.subr.bf16.mxu0 %v4998_v26  ;;  %1771 = vmatprep.subr.bf16.mxu1 %v5000_v27  ;;  %v264_v25 = vld [vmem:[%s8004_s26 + $0x6a0] sm:$0xff]  ;;  %v261_v26 = vld [vmem:[%s8004_s26 + $0x688] sm:$0xff] }
  0x53   :  { %v265_v27 = vld [vmem:[%s8004_s26 + $0x6a8] sm:$0xff]  ;;  %v5062_v30 = vcombine.high %v260_v24, %v264_v25  ;;  %v5061_v36 = vcombine.low %v260_v24, %v264_v25  ;;  %v67_v24 = vld [vmem:[%s8004_s26 + $0x78] sm:$0xff] }
  0x54   :  { %v5064_v31 = vcombine.high %v261_v26, %v265_v27  ;;  %v5063_v37 = vcombine.low %v261_v26, %v265_v27 }
  0x55   :  { %1690 = vmatpush1.bf16.msra.mxu0 %v4997_v32  ;;  %1772 = vmatpush1.bf16.msra.mxu1 %v4999_v33  ;;  %v268_v32 = vld [vmem:[%s8004_s26 + $0x6c0] sm:$0xff] }
  0x56   :  { %1691 = vmatprep.subr.bf16.mxu0 %v5006_v34  ;;  %1773 = vmatprep.subr.bf16.mxu1 %v5008_v35  ;;  %v272_v33 = vld [vmem:[%s8004_s26 + $0x6e0] sm:$0xff]  ;;  %v269_v34 = vld [vmem:[%s8004_s26 + $0x6c8] sm:$0xff] }
  0x57   :  { %v273_v35 = vld [vmem:[%s8004_s26 + $0x6e8] sm:$0xff]  ;;  %v5070_v38 = vcombine.high %v268_v32, %v272_v33  ;;  %v5069_v44 = vcombine.low %v268_v32, %v272_v33 }
  0x58   :  { %v5072_v39 = vcombine.high %v269_v34, %v273_v35  ;;  %v5071_v45 = vcombine.low %v269_v34, %v273_v35  ;;  %v78_v35 = vld [vmem:[%s8004_s26 + $0xd0] sm:$0xff] }
  0x59   :  { %1692 = vmatpush1.bf16.msra.mxu0 %v5005_v40  ;;  %1774 = vmatpush1.bf16.msra.mxu1 %v5007_v41  ;;  %v276_v40 = vld [vmem:[%s8004_s26 + $0x700] sm:$0xff] }
  0x5a   :  { %1693 = vmatprep.subr.bf16.mxu0 %v5014_v42  ;;  %1775 = vmatprep.subr.bf16.mxu1 %v5016_v43  ;;  %v280_v41 = vld [vmem:[%s8004_s26 + $0x720] sm:$0xff]  ;;  %v277_v42 = vld [vmem:[%s8004_s26 + $0x708] sm:$0xff] }
  0x5b   :  { %v281_v43 = vld [vmem:[%s8004_s26 + $0x728] sm:$0xff]  ;;  %v5078_v46 = vcombine.high %v276_v40, %v280_v41  ;;  %v5077_v52 = vcombine.low %v276_v40, %v280_v41  ;;  %v86_v41 = vld [vmem:[%s8004_s26 + $0x110] sm:$0xff] }
  0x5c   :  { %v5080_v47 = vcombine.high %v277_v42, %v281_v43  ;;  %v5079_v54 = vcombine.low %v277_v42, %v281_v43  ;;  %v90_v42 = vld [vmem:[%s8004_s26 + $0x130] sm:$0xff] }
  0x5d   :  { %1694 = vmatpush1.bf16.msra.mxu0 %v5013_v48  ;;  %1776 = vmatpush1.bf16.msra.mxu1 %v5015_v49  ;;  %v284_v48 = vld [vmem:[%s8004_s26 + $0x740] sm:$0xff] }
  0x5e   :  { %1695 = vmatprep.subr.bf16.mxu0 %v5022_v50  ;;  %1777 = vmatprep.subr.bf16.mxu1 %v5024_v51  ;;  %v288_v49 = vld [vmem:[%s8004_s26 + $0x760] sm:$0xff]  ;;  %v285_v50 = vld [vmem:[%s8004_s26 + $0x748] sm:$0xff] }
  0x5f   :  { %v289_v51 = vld [vmem:[%s8004_s26 + $0x768] sm:$0xff]  ;;  %v5086_v55 = vcombine.high %v284_v48, %v288_v49  ;;  %v5085_v62 = vcombine.low %v284_v48, %v288_v49  ;;  %v94_v49 = vld [vmem:[%s8004_s26 + $0x150] sm:$0xff] }
  0x60   :  { %v5088_v56 = vcombine.high %v285_v50, %v289_v51  ;;  %v5087_v63 = vcombine.low %v285_v50, %v289_v51  ;;  %v98_v50 = vld [vmem:[%s8004_s26 + $0x170] sm:$0xff] }
  0x61   :  { %1696 = vmatpush1.bf16.msra.mxu0 %v5021_v58  ;;  %1778 = vmatpush1.bf16.msra.mxu1 %v5023_v59  ;;  %v292_v58 = vld [vmem:[%s8004_s26 + $0x780] sm:$0xff] }
  0x62   :  { %1697 = vmatprep.subr.bf16.mxu0 %v5030_v60  ;;  %1779 = vmatprep.subr.bf16.mxu1 %v5032_v61  ;;  %v296_v59 = vld [vmem:[%s8004_s26 + $0x7a0] sm:$0xff]  ;;  %v293_v60 = vld [vmem:[%s8004_s26 + $0x788] sm:$0xff] }
  0x63   :  { %v297_v61 = vld [vmem:[%s8004_s26 + $0x7a8] sm:$0xff]  ;;  %v5094_v0 = vcombine.high %v292_v58, %v296_v59  ;;  %v5093_v6 = vcombine.low %v292_v58, %v296_v59  ;;  %v4889_v58 = vcombine.low %v86_v41, %v90_v42  ;;  %v102_v59 = vld [vmem:[%s8004_s26 + $0x190] sm:$0xff] }
  0x64   :  { %v5096_v1 = vcombine.high %v293_v60, %v297_v61  ;;  %v5095_v7 = vcombine.low %v293_v60, %v297_v61  ;;  %v106_v60 = vld [vmem:[%s8004_s26 + $0x1b0] sm:$0xff] }
  0x65   :  { %1698 = vmatpush1.bf16.msra.mxu0 %v5029_v2  ;;  %1780 = vmatpush1.bf16.msra.mxu1 %v5031_v3  ;;  %v300_v2 = vld [vmem:[%s8004_s26 + $0x7c0] sm:$0xff] }
  0x66   :  { %1699 = vmatprep.subr.bf16.mxu0 %v5038_v4  ;;  %1781 = vmatprep.subr.bf16.mxu1 %v5040_v5  ;;  %v304_v3 = vld [vmem:[%s8004_s26 + $0x7e0] sm:$0xff]  ;;  %v301_v4 = vld [vmem:[%s8004_s26 + $0x7c8] sm:$0xff] }
  0x67   :  { %v305_v5 = vld [vmem:[%s8004_s26 + $0x7e8] sm:$0xff]  ;;  %v5102_v8 = vcombine.high %v300_v2, %v304_v3  ;;  %v5101_v16 = vcombine.low %v300_v2, %v304_v3  ;;  %v4897_v2 = vcombine.low %v94_v49, %v98_v50  ;;  %v110_v3 = vld [vmem:[%s8004_s26 + $0x1d0] sm:$0xff] }
  0x68   :  { %v5104_v9 = vcombine.high %v301_v4, %v305_v5  ;;  %v5103_v17 = vcombine.low %v301_v4, %v305_v5  ;;  %v114_v4 = vld [vmem:[%s8004_s26 + $0x1f0] sm:$0xff] }
  0x69   :  { %1700 = vmatpush1.bf16.msra.mxu0 %v5037_v10  ;;  %1782 = vmatpush1.bf16.msra.mxu1 %v5039_v11  ;;  %v54_v10 = vld [vmem:[%s8004_s26 + $0x10] sm:$0xff] }
  0x6a   :  { %1701 = vmatprep.subr.bf16.mxu0 %v5046_v13  ;;  %1783 = vmatprep.subr.bf16.mxu1 %v5048_v14  ;;  %v58_v11 = vld [vmem:[%s8004_s26 + $0x30] sm:$0xff]  ;;  %v55_v13 = vld [vmem:[%s8004_s26 + $0x18] sm:$0xff] }
  0x6b   :  { %v59_v14 = vld [vmem:[%s8004_s26 + $0x38] sm:$0xff]  ;;  %v4858_v53 = vcombine.high %v54_v10, %v58_v11  ;;  %v4857_v25 = vcombine.low %v54_v10, %v58_v11  ;;  %v4905_v10 = vcombine.low %v102_v59, %v106_v60  ;;  %v118_v11 = vld [vmem:[%s8004_s26 + $0x210] sm:$0xff] }
  0x6c   :  { %v4860_v18 = vcombine.high %v55_v13, %v59_v14  ;;  %v4859_v26 = vcombine.low %v55_v13, %v59_v14  ;;  %v122_v13 = vld [vmem:[%s8004_s26 + $0x230] sm:$0xff] }
  0x6d   :  { %1702 = vmatpush1.bf16.msra.mxu0 %v5045_v19  ;;  %1784 = vmatpush1.bf16.msra.mxu1 %v5047_v20  ;;  %v62_v19 = vld [vmem:[%s8004_s26 + $0x50] sm:$0xff] }
  0x6e   :  { %1703 = vmatprep.subr.bf16.mxu0 %v5054_v22  ;;  %1785 = vmatprep.subr.bf16.mxu1 %v5056_v23  ;;  %v66_v20 = vld [vmem:[%s8004_s26 + $0x70] sm:$0xff]  ;;  %v6517_v22 = vcombine.low %v6319_v15, %v6319_v15  ;;  %v63_v23 = vld [vmem:[%s8004_s26 + $0x58] sm:$0xff] }
  0x6f   :  { %v4866_v27 = vcombine.high %v62_v19, %v66_v20  ;;  %v70_v15 = vld [vmem:[%s8004_s26 + $0x90] sm:$0xff]  ;;  %v4865_v32 = vcombine.low %v62_v19, %v66_v20  ;;  %v4867_v33 = vcombine.low %v63_v23, %v67_v24  ;;  %v4913_v19 = vcombine.low %v110_v3, %v114_v4 }
  0x70   :  { %v126_v20 = vld [vmem:[%s8004_s26 + $0x250] sm:$0xff] }
  0x71   :  { %1704 = vmatpush1.bf16.msra.mxu0 %v5053_v28  ;;  %1786 = vmatpush1.bf16.msra.mxu1 %v5055_v29  ;;  %v4868_v28 = vcombine.high %v63_v23, %v67_v24  ;;  %v74_v29 = vld [vmem:[%s8004_s26 + $0xb0] sm:$0xff] }
  0x72   :  { %1705 = vmatprep.subr.bf16.mxu0 %v5062_v30  ;;  %1787 = vmatprep.subr.bf16.mxu1 %v5064_v31  ;;  %v71_v30 = vld [vmem:[%s8004_s26 + $0x98] sm:$0xff]  ;;  %v4874_v34 = vcombine.high %v70_v15, %v74_v29  ;;  %v4873_v40 = vcombine.low %v70_v15, %v74_v29  ;;  %v130_v23 = vld [vmem:[%s8004_s26 + $0x270] sm:$0xff]  ;;  %v4921_v15 = vcombine.low %v118_v11, %v122_v13 }
  0x73   :  { %v75_v31 = vld [vmem:[%s8004_s26 + $0xb8] sm:$0xff]  ;;  %v134_v29 = vld [vmem:[%s8004_s26 + $0x290] sm:$0xff] }
  0x74   :  { %v4875_v43 = vcombine.low %v71_v30, %v75_v31 }
  0x75   :  { %1706 = vmatpush1.bf16.msra.mxu0 %v5061_v36  ;;  %1788 = vmatpush1.bf16.msra.mxu1 %v5063_v37  ;;  %v4876_v36 = vcombine.high %v71_v30, %v75_v31  ;;  %v82_v37 = vld [vmem:[%s8004_s26 + $0xf0] sm:$0xff] }
  0x76   :  { %1707 = vmatprep.subr.bf16.mxu0 %v5070_v38  ;;  %1789 = vmatprep.subr.bf16.mxu1 %v5072_v39  ;;  %v79_v38 = vld [vmem:[%s8004_s26 + $0xd8] sm:$0xff]  ;;  %v4881_v48 = vcombine.low %v78_v35, %v82_v37  ;;  %v138_v30 = vld [vmem:[%s8004_s26 + $0x2b0] sm:$0xff] }
  0x77   :  { %v83_v39 = vld [vmem:[%s8004_s26 + $0xf8] sm:$0xff] }
  0x78   :  { %v4883_v51 = vcombine.low %v79_v38, %v83_v39 }
  0x79   :  { %1708 = vmatpush1.bf16.msra.mxu0 %v5069_v44  ;;  %1790 = vmatpush1.bf16.msra.mxu1 %v5071_v45  ;;  %v4882_v44 = vcombine.high %v78_v35, %v82_v37  ;;  %v87_v45 = vld [vmem:[%s8004_s26 + $0x118] sm:$0xff]  ;;  %v142_v37 = vld [vmem:[%s8004_s26 + $0x2d0] sm:$0xff] }
  0x7a   :  { %1709 = vmatprep.subr.bf16.mxu0 %v5078_v46  ;;  %1791 = vmatprep.subr.bf16.mxu1 %v5080_v47  ;;  %v91_v46 = vld [vmem:[%s8004_s26 + $0x138] sm:$0xff]  ;;  %v4884_v47 = vcombine.high %v79_v38, %v83_v39  ;;  %v146_v38 = vld [vmem:[%s8004_s26 + $0x2f0] sm:$0xff] }
  0x7b   :  { %v4891_v61 = vcombine.low %v87_v45, %v91_v46 }
  0x7d   :  { %1710 = vmatpush1.bf16.msra.mxu0 %v5077_v52  ;;  %1792 = vmatpush1.bf16.msra.mxu1 %v5079_v54  ;;  %v4890_v52 = vcombine.high %v86_v41, %v90_v42  ;;  %v95_v54 = vld [vmem:[%s8004_s26 + $0x158] sm:$0xff] }
  0x7e   :  { %1711 = vmatprep.subr.bf16.mxu0 %v5086_v55  ;;  %1793 = vmatprep.subr.bf16.mxu1 %v5088_v56  ;;  %v99_v55 = vld [vmem:[%s8004_s26 + $0x178] sm:$0xff]  ;;  %v4892_v56 = vcombine.high %v87_v45, %v91_v46  ;;  %v150_v45 = vld [vmem:[%s8004_s26 + $0x310] sm:$0xff] }
  0x7f   :  { %v4899_v5 = vcombine.low %v95_v54, %v99_v55  ;;  %v143_v41 = vld [vmem:[%s8004_s26 + $0x2d8] sm:$0xff]  ;;  %v154_v46 = vld [vmem:[%s8004_s26 + $0x330] sm:$0xff] }
  0x80   :  { %v147_v42 = vld [vmem:[%s8004_s26 + $0x2f8] sm:$0xff] }
  0x81   :  { %1712 = vmatpush1.bf16.msra.mxu0 %v5085_v62  ;;  %1794 = vmatpush1.bf16.msra.mxu1 %v5087_v63  ;;  %v4898_v62 = vcombine.high %v94_v49, %v98_v50  ;;  %v103_v63 = vld [vmem:[%s8004_s26 + $0x198] sm:$0xff] }
  0x82   :  { %1713 = vmatprep.subr.bf16.mxu0 %v5094_v0  ;;  %1795 = vmatprep.subr.bf16.mxu1 %v5096_v1  ;;  %v107_v0 = vld [vmem:[%s8004_s26 + $0x1b8] sm:$0xff]  ;;  %v4900_v1 = vcombine.high %v95_v54, %v99_v55  ;;  %v158_v54 = vld [vmem:[%s8004_s26 + $0x350] sm:$0xff] }
  0x83   :  { %v4907_v14 = vcombine.low %v103_v63, %v107_v0  ;;  %v151_v49 = vld [vmem:[%s8004_s26 + $0x318] sm:$0xff]  ;;  %v162_v55 = vld [vmem:[%s8004_s26 + $0x370] sm:$0xff] }
  0x84   :  { %v155_v50 = vld [vmem:[%s8004_s26 + $0x338] sm:$0xff] }
  0x85   :  { %1714 = vmatpush1.bf16.msra.mxu0 %v5093_v6  ;;  %1796 = vmatpush1.bf16.msra.mxu1 %v5095_v7  ;;  %v4906_v6 = vcombine.high %v102_v59, %v106_v60  ;;  %v111_v7 = vld [vmem:[%s8004_s26 + $0x1d8] sm:$0xff] }
  0x86   :  { %1715 = vmatprep.subr.bf16.mxu0 %v5102_v8  ;;  %1797 = vmatprep.subr.bf16.mxu1 %v5104_v9  ;;  %v115_v8 = vld [vmem:[%s8004_s26 + $0x1f8] sm:$0xff]  ;;  %v4908_v9 = vcombine.high %v103_v63, %v107_v0  ;;  %v166_v63 = vld [vmem:[%s8004_s26 + $0x390] sm:$0xff] }
  0x87   :  { %v4915_v24 = vcombine.low %v111_v7, %v115_v8  ;;  %v159_v59 = vld [vmem:[%s8004_s26 + $0x358] sm:$0xff]  ;;  %v170_v0 = vld [vmem:[%s8004_s26 + $0x3b0] sm:$0xff] }
  0x88   :  { %v163_v60 = vld [vmem:[%s8004_s26 + $0x378] sm:$0xff] }
  0x89   :  { %1716 = vmatpush1.bf16.msra.mxu0 %v5101_v16  ;;  %1798 = vmatpush1.bf16.msra.mxu1 %v5103_v17  ;;  %v4914_v16 = vcombine.high %v110_v3, %v114_v4  ;;  %v119_v17 = vld [vmem:[%s8004_s26 + $0x218] sm:$0xff] }
  0x8a   :  { %1808 = vmatprep.subr.bf16.mxu0 %v4858_v53  ;;  %1890 = vmatprep.subr.bf16.mxu1 %v4860_v18  ;;  %v123_v53 = vld [vmem:[%s8004_s26 + $0x238] sm:$0xff]  ;;  %v4916_v18 = vcombine.high %v111_v7, %v115_v8  ;;  %v174_v7 = vld [vmem:[%s8004_s26 + $0x3d0] sm:$0xff] }
  0x8b   :  { %v4923_v31 = vcombine.low %v119_v17, %v123_v53  ;;  %v167_v3 = vld [vmem:[%s8004_s26 + $0x398] sm:$0xff]  ;;  %v178_v8 = vld [vmem:[%s8004_s26 + $0x3f0] sm:$0xff] }
  0x8c   :  { %1718 = vmatmul.mubr.bf16.vlgmr.msra.gmra.mrb[0].mxu0 %v6517_v22  ;;  %1800 = vmatmul.mubr.bf16.vlgmr.msra.gmra.mrb[0].mxu1 %v6517_v22  ;;  %v171_v4 = vld [vmem:[%s8004_s26 + $0x3b8] sm:$0xff] }
  0x8d   :  { %1809 = vmatpush1.bf16.msra.mxu0 %v4857_v25  ;;  %1891 = vmatpush1.bf16.msra.mxu1 %v4859_v26  ;;  %v4922_v25 = vcombine.high %v118_v11, %v122_v13  ;;  %v127_v26 = vld [vmem:[%s8004_s26 + $0x258] sm:$0xff] }
  0x8e   :  { %1810 = vmatprep.subr.bf16.mxu0 %v4866_v27  ;;  %1892 = vmatprep.subr.bf16.mxu1 %v4868_v28  ;;  %v131_v27 = vld [vmem:[%s8004_s26 + $0x278] sm:$0xff]  ;;  %v4924_v28 = vcombine.high %v119_v17, %v123_v53  ;;  %v4971_v17 = vcombine.low %v167_v3, %v171_v4  ;;  %v4978_v53 = vcombine.high %v174_v7, %v178_v8 }
  0x8f   :  { %1840 = vmatprep.mubr.bf16.mxu0 %v6182_v57  ;;  %1922 = vmatprep.mubr.bf16.mxu1 %v6182_v57  ;;  %v4932_v35 = vcombine.high %v127_v26, %v131_v27  ;;  %v4931_v39 = vcombine.low %v127_v26, %v131_v27  ;;  %v175_v11 = vld [vmem:[%s8004_s26 + $0x3d8] sm:$0xff] }
  0x90   :  { %v179_v13 = vld [vmem:[%s8004_s26 + $0x3f8] sm:$0xff] }
  0x91   :  { %1811 = vmatpush1.bf16.msra.mxu0 %v4865_v32  ;;  %1893 = vmatpush1.bf16.msra.mxu1 %v4867_v33  ;;  %v4930_v32 = vcombine.high %v126_v20, %v130_v23  ;;  %v135_v33 = vld [vmem:[%s8004_s26 + $0x298] sm:$0xff]  ;;  %v4979_v26 = vcombine.low %v175_v11, %v179_v13 }
  0x92   :  { %1812 = vmatprep.subr.bf16.mxu0 %v4874_v34  ;;  %1894 = vmatprep.subr.bf16.mxu1 %v4876_v36  ;;  %v139_v34 = vld [vmem:[%s8004_s26 + $0x2b8] sm:$0xff]  ;;  %v4929_v36 = vcombine.low %v126_v20, %v130_v23  ;;  %v186_v20 = vld [vmem:[%s8004_s26 + $0x430] sm:$0xff] }
  0x93   :  { %v183_v23 = vld [vmem:[%s8004_s26 + $0x418] sm:$0xff] }
  0x95   :  { %1813 = vmatpush1.bf16.msra.mxu0 %v4873_v40  ;;  %1895 = vmatpush1.bf16.msra.mxu1 %v4875_v43  ;;  %v4938_v40 = vcombine.high %v134_v29, %v138_v30  ;;  %v4940_v43 = vcombine.high %v135_v33, %v139_v34 }
  0x96   :  { %1814 = vmatprep.subr.bf16.mxu0 %v4882_v44  ;;  %1896 = vmatprep.subr.bf16.mxu1 %v4884_v47  ;;  %v4937_v44 = vcombine.low %v134_v29, %v138_v30  ;;  %v4939_v47 = vcombine.low %v135_v33, %v139_v34  ;;  %v194_v29 = vld [vmem:[%s8004_s26 + $0x470] sm:$0xff]  ;;  %v191_v30 = vld [vmem:[%s8004_s26 + $0x458] sm:$0xff] }
  0x99   :  { %1815 = vmatpush1.bf16.msra.mxu0 %v4881_v48  ;;  %1897 = vmatpush1.bf16.msra.mxu1 %v4883_v51  ;;  %v4946_v48 = vcombine.high %v142_v37, %v146_v38  ;;  %v4948_v51 = vcombine.high %v143_v41, %v147_v42 }
  0x9a   :  { %1816 = vmatprep.subr.bf16.mxu0 %v4890_v52  ;;  %1898 = vmatprep.subr.bf16.mxu1 %v4892_v56  ;;  %v4945_v52 = vcombine.low %v142_v37, %v146_v38  ;;  %v4947_v56 = vcombine.low %v143_v41, %v147_v42  ;;  %v202_v37 = vld [vmem:[%s8004_s26 + $0x4b0] sm:$0xff]  ;;  %v199_v38 = vld [vmem:[%s8004_s26 + $0x498] sm:$0xff] }
  0x9d   :  { %1817 = vmatpush1.bf16.msra.mxu0 %v4889_v58  ;;  %1899 = vmatpush1.bf16.msra.mxu1 %v4891_v61  ;;  %v4954_v58 = vcombine.high %v150_v45, %v154_v46  ;;  %v4956_v61 = vcombine.high %v151_v49, %v155_v50 }
  0x9e   :  { %1818 = vmatprep.subr.bf16.mxu0 %v4898_v62  ;;  %1900 = vmatprep.subr.bf16.mxu1 %v4900_v1  ;;  %v4953_v62 = vcombine.low %v150_v45, %v154_v46  ;;  %v4955_v1 = vcombine.low %v151_v49, %v155_v50  ;;  %v210_v45 = vld [vmem:[%s8004_s26 + $0x4f0] sm:$0xff]  ;;  %v207_v46 = vld [vmem:[%s8004_s26 + $0x4d8] sm:$0xff] }
  0xa1   :  { %1819 = vmatpush1.bf16.msra.mxu0 %v4897_v2  ;;  %1901 = vmatpush1.bf16.msra.mxu1 %v4899_v5  ;;  %v4962_v2 = vcombine.high %v158_v54, %v162_v55  ;;  %v4964_v5 = vcombine.high %v159_v59, %v163_v60 }
  0xa2   :  { %1820 = vmatprep.subr.bf16.mxu0 %v4906_v6  ;;  %1902 = vmatprep.subr.bf16.mxu1 %v4908_v9  ;;  %v4961_v6 = vcombine.low %v158_v54, %v162_v55  ;;  %v4963_v9 = vcombine.low %v159_v59, %v163_v60  ;;  %v218_v54 = vld [vmem:[%s8004_s26 + $0x530] sm:$0xff]  ;;  %v215_v55 = vld [vmem:[%s8004_s26 + $0x518] sm:$0xff] }
  0xa5   :  { %1821 = vmatpush1.bf16.msra.mxu0 %v4905_v10  ;;  %1903 = vmatpush1.bf16.msra.mxu1 %v4907_v14  ;;  %v4970_v10 = vcombine.high %v166_v63, %v170_v0  ;;  %v4972_v14 = vcombine.high %v167_v3, %v171_v4 }
  0xa6   :  { %1822 = vmatprep.subr.bf16.mxu0 %v4914_v16  ;;  %1904 = vmatprep.subr.bf16.mxu1 %v4916_v18  ;;  %v4969_v16 = vcombine.low %v166_v63, %v170_v0  ;;  %v4980_v18 = vcombine.high %v175_v11, %v179_v13  ;;  %v226_v63 = vld [vmem:[%s8004_s26 + $0x570] sm:$0xff]  ;;  %v223_v0 = vld [vmem:[%s8004_s26 + $0x558] sm:$0xff] }
  0xa9   :  { %1823 = vmatpush1.bf16.msra.mxu0 %v4913_v19  ;;  %1905 = vmatpush1.bf16.msra.mxu1 %v4915_v24  ;;  %v182_v19 = vld [vmem:[%s8004_s26 + $0x410] sm:$0xff]  ;;  %v187_v24 = vld [vmem:[%s8004_s26 + $0x438] sm:$0xff] }
  0xaa   :  { %1824 = vmatprep.subr.bf16.mxu0 %v4922_v25  ;;  %1906 = vmatprep.subr.bf16.mxu1 %v4924_v28  ;;  %v4977_v25 = vcombine.low %v174_v7, %v178_v8  ;;  %v4986_v27 = vcombine.high %v182_v19, %v186_v20  ;;  %v4988_v28 = vcombine.high %v183_v23, %v187_v24  ;;  %v234_v7 = vld [vmem:[%s8004_s26 + $0x5b0] sm:$0xff]  ;;  %v231_v8 = vld [vmem:[%s8004_s26 + $0x598] sm:$0xff] }
  0xab   :  { %v4987_v33 = vcombine.low %v183_v23, %v187_v24 }
  0xad   :  { %1825 = vmatpush1.bf16.msra.mxu0 %v4921_v15  ;;  %1907 = vmatpush1.bf16.msra.mxu1 %v4923_v31  ;;  %v190_v15 = vld [vmem:[%s8004_s26 + $0x450] sm:$0xff]  ;;  %v195_v31 = vld [vmem:[%s8004_s26 + $0x478] sm:$0xff] }
  0xae   :  { %1826 = vmatprep.subr.bf16.mxu0 %v4930_v32  ;;  %1908 = vmatprep.subr.bf16.mxu1 %v4932_v35  ;;  %v4985_v32 = vcombine.low %v182_v19, %v186_v20  ;;  %v4994_v34 = vcombine.high %v190_v15, %v194_v29  ;;  %v4996_v35 = vcombine.high %v191_v30, %v195_v31 }
  0xaf   :  { %v4995_v41 = vcombine.low %v191_v30, %v195_v31 }
  0xb1   :  { %1827 = vmatpush1.bf16.msra.mxu0 %v4929_v36  ;;  %1909 = vmatpush1.bf16.msra.mxu1 %v4931_v39  ;;  %v198_v36 = vld [vmem:[%s8004_s26 + $0x490] sm:$0xff]  ;;  %v203_v39 = vld [vmem:[%s8004_s26 + $0x4b8] sm:$0xff] }
  0xb2   :  { %1828 = vmatprep.subr.bf16.mxu0 %v4938_v40  ;;  %1910 = vmatprep.subr.bf16.mxu1 %v4940_v43  ;;  %v4993_v40 = vcombine.low %v190_v15, %v194_v29  ;;  %v5002_v42 = vcombine.high %v198_v36, %v202_v37  ;;  %v5004_v43 = vcombine.high %v199_v38, %v203_v39 }
  0xb3   :  { %v5003_v49 = vcombine.low %v199_v38, %v203_v39 }
  0xb5   :  { %1829 = vmatpush1.bf16.msra.mxu0 %v4937_v44  ;;  %1911 = vmatpush1.bf16.msra.mxu1 %v4939_v47  ;;  %v206_v44 = vld [vmem:[%s8004_s26 + $0x4d0] sm:$0xff]  ;;  %v211_v47 = vld [vmem:[%s8004_s26 + $0x4f8] sm:$0xff] }
  0xb6   :  { %1830 = vmatprep.subr.bf16.mxu0 %v4946_v48  ;;  %1912 = vmatprep.subr.bf16.mxu1 %v4948_v51  ;;  %v5001_v48 = vcombine.low %v198_v36, %v202_v37  ;;  %v5010_v50 = vcombine.high %v206_v44, %v210_v45  ;;  %v5012_v51 = vcombine.high %v207_v46, %v211_v47 }
  0xb7   :  { %v5011_v59 = vcombine.low %v207_v46, %v211_v47 }
  0xb9   :  { %1831 = vmatpush1.bf16.msra.mxu0 %v4945_v52  ;;  %1913 = vmatpush1.bf16.msra.mxu1 %v4947_v56  ;;  %v214_v52 = vld [vmem:[%s8004_s26 + $0x510] sm:$0xff]  ;;  %v219_v56 = vld [vmem:[%s8004_s26 + $0x538] sm:$0xff] }
  0xba   :  { %1832 = vmatprep.subr.bf16.mxu0 %v4954_v58  ;;  %1914 = vmatprep.subr.bf16.mxu1 %v4956_v61  ;;  %v5009_v58 = vcombine.low %v206_v44, %v210_v45  ;;  %v5018_v60 = vcombine.high %v214_v52, %v218_v54  ;;  %v5020_v61 = vcombine.high %v215_v55, %v219_v56 }
  0xbb   :  { %v5019_v3 = vcombine.low %v215_v55, %v219_v56 }
  0xbd   :  { %1833 = vmatpush1.bf16.msra.mxu0 %v4953_v62  ;;  %1915 = vmatpush1.bf16.msra.mxu1 %v4955_v1  ;;  %v222_v62 = vld [vmem:[%s8004_s26 + $0x550] sm:$0xff]  ;;  %v227_v1 = vld [vmem:[%s8004_s26 + $0x578] sm:$0xff] }
  0xbe   :  { %1834 = vmatprep.subr.bf16.mxu0 %v4962_v2  ;;  %1916 = vmatprep.subr.bf16.mxu1 %v4964_v5  ;;  %v5017_v2 = vcombine.low %v214_v52, %v218_v54  ;;  %v5026_v4 = vcombine.high %v222_v62, %v226_v63  ;;  %v5028_v5 = vcombine.high %v223_v0, %v227_v1 }
  0xbf   :  { %v5027_v11 = vcombine.low %v223_v0, %v227_v1 }
  0xc1   :  { %1835 = vmatpush1.bf16.msra.mxu0 %v4961_v6  ;;  %1917 = vmatpush1.bf16.msra.mxu1 %v4963_v9  ;;  %v230_v6 = vld [vmem:[%s8004_s26 + $0x590] sm:$0xff]  ;;  %v235_v9 = vld [vmem:[%s8004_s26 + $0x5b8] sm:$0xff] }
  0xc2   :  { %1836 = vmatprep.subr.bf16.mxu0 %v4970_v10  ;;  %1918 = vmatprep.subr.bf16.mxu1 %v4972_v14  ;;  %v5025_v10 = vcombine.low %v222_v62, %v226_v63  ;;  %v5034_v13 = vcombine.high %v230_v6, %v234_v7  ;;  %v5036_v14 = vcombine.high %v231_v8, %v235_v9 }
  0xc3   :  { %v5033_v19 = vcombine.low %v230_v6, %v234_v7  ;;  %v5035_v20 = vcombine.low %v231_v8, %v235_v9 }
  0xc5   :  { %1837 = vmatpush1.bf16.msra.mxu0 %v4969_v16  ;;  %1919 = vmatpush1.bf16.msra.mxu1 %v4971_v17  ;;  %v238_v16 = vld [vmem:[%s8004_s26 + $0x5d0] sm:$0xff] }
  0xc6   :  { %1838 = vmatprep.subr.bf16.mxu0 %v4978_v53  ;;  %1920 = vmatprep.subr.bf16.mxu1 %v4980_v18  ;;  %v242_v17 = vld [vmem:[%s8004_s26 + $0x5f0] sm:$0xff]  ;;  %v239_v53 = vld [vmem:[%s8004_s26 + $0x5d8] sm:$0xff] }
  0xc7   :  { %v243_v18 = vld [vmem:[%s8004_s26 + $0x5f8] sm:$0xff]  ;;  %v5042_v23 = vcombine.high %v238_v16, %v242_v17  ;;  %v5041_v15 = vcombine.low %v238_v16, %v242_v17 }
  0xc8   :  { %v5044_v24 = vcombine.high %v239_v53, %v243_v18  ;;  %v5043_v29 = vcombine.low %v239_v53, %v243_v18 }
  0xc9   :  { %1839 = vmatpush1.bf16.msra.mxu0 %v4977_v25  ;;  %1921 = vmatpush1.bf16.msra.mxu1 %v4979_v26  ;;  %v246_v25 = vld [vmem:[%s8004_s26 + $0x610] sm:$0xff] }
  0xca   :  { %1849 = vmatprep.subr.bf16.mxu0 %v4986_v27  ;;  %1931 = vmatprep.subr.bf16.mxu1 %v4988_v28  ;;  %v250_v26 = vld [vmem:[%s8004_s26 + $0x630] sm:$0xff]  ;;  %v247_v27 = vld [vmem:[%s8004_s26 + $0x618] sm:$0xff] }
  0xcb   :  { %v251_v28 = vld [vmem:[%s8004_s26 + $0x638] sm:$0xff]  ;;  %v5050_v30 = vcombine.high %v246_v25, %v250_v26  ;;  %v5049_v36 = vcombine.low %v246_v25, %v250_v26 }
  0xcc   :  { %1841 = vmatmul.mubr.bf16.vlgmr.msra.gmra.mrb[4].mxu0 %v6308_v12  ;;  %1923 = vmatmul.mubr.bf16.vlgmr.msra.gmra.mrb[4].mxu1 %v6308_v12  ;;  %v5052_v31 = vcombine.high %v247_v27, %v251_v28  ;;  %v5051_v37 = vcombine.low %v247_v27, %v251_v28 }
  0xcd   :  { %1850 = vmatpush1.bf16.msra.mxu0 %v4985_v32  ;;  %1932 = vmatpush1.bf16.msra.mxu1 %v4987_v33  ;;  %v254_v32 = vld [vmem:[%s8004_s26 + $0x650] sm:$0xff] }
  0xce   :  { %1851 = vmatprep.subr.bf16.mxu0 %v4994_v34  ;;  %1933 = vmatprep.subr.bf16.mxu1 %v4996_v35  ;;  %v258_v33 = vld [vmem:[%s8004_s26 + $0x670] sm:$0xff]  ;;  %v255_v34 = vld [vmem:[%s8004_s26 + $0x658] sm:$0xff] }
  0xcf   :  { %1881 = vmatprep.mubr.bf16.mxu0 %v6329_v21  ;;  %1963 = vmatprep.mubr.bf16.mxu1 %v6329_v21  ;;  %v259_v35 = vld [vmem:[%s8004_s26 + $0x678] sm:$0xff]  ;;  %v5058_v38 = vcombine.high %v254_v32, %v258_v33  ;;  %v5057_v44 = vcombine.low %v254_v32, %v258_v33 }
  0xd0   :  { %v5060_v39 = vcombine.high %v255_v34, %v259_v35  ;;  %v5059_v45 = vcombine.low %v255_v34, %v259_v35  ;;  %v5573_v32 = vld [vmem:[%s7984_s3 + $0x14] ss:$8 sps:$4 sm:$0xff]   ;;  %v5571_v33 = vld [vmem:[%s7984_s3 + $0x10] ss:$8 sps:$4 sm:$0xff]   ;;  %v5576_v34 = vld [vmem:[%s7984_s3 + $0x24] ss:$8 sps:$4 sm:$0xff]  }
  0xd1   :  { %1852 = vmatpush1.bf16.msra.mxu0 %v4993_v40  ;;  %1934 = vmatpush1.bf16.msra.mxu1 %v4995_v41  ;;  %v262_v40 = vld [vmem:[%s8004_s26 + $0x690] sm:$0xff]  ;;  %v5574_v35 = vld [vmem:[%s7984_s3 + $0x20] ss:$8 sps:$4 sm:$0xff]  }
  0xd2   :  { %1853 = vmatprep.subr.bf16.mxu0 %v5002_v42  ;;  %1935 = vmatprep.subr.bf16.mxu1 %v5004_v43  ;;  %v266_v41 = vld [vmem:[%s8004_s26 + $0x6b0] sm:$0xff]  ;;  %v263_v42 = vld [vmem:[%s8004_s26 + $0x698] sm:$0xff] }
  0xd3   :  { %v267_v43 = vld [vmem:[%s8004_s26 + $0x6b8] sm:$0xff]  ;;  %v5066_v46 = vcombine.high %v262_v40, %v266_v41  ;;  %v5065_v52 = vcombine.low %v262_v40, %v266_v41 }
  0xd4   :  { %v5068_v47 = vcombine.high %v263_v42, %v267_v43  ;;  %v5067_v54 = vcombine.low %v263_v42, %v267_v43  ;;  %v5585_v40 = vld [vmem:[%s7984_s3 + $0x54] ss:$8 sps:$4 sm:$0xff]   ;;  %v5583_v41 = vld [vmem:[%s7984_s3 + $0x50] ss:$8 sps:$4 sm:$0xff]   ;;  %v5588_v42 = vld [vmem:[%s7984_s3 + $0x64] ss:$8 sps:$4 sm:$0xff]  }
  0xd5   :  { %1854 = vmatpush1.bf16.msra.mxu0 %v5001_v48  ;;  %1936 = vmatpush1.bf16.msra.mxu1 %v5003_v49  ;;  %v270_v48 = vld [vmem:[%s8004_s26 + $0x6d0] sm:$0xff]  ;;  %v5586_v43 = vld [vmem:[%s7984_s3 + $0x60] ss:$8 sps:$4 sm:$0xff]  }
  0xd6   :  { %1855 = vmatprep.subr.bf16.mxu0 %v5010_v50  ;;  %1937 = vmatprep.subr.bf16.mxu1 %v5012_v51  ;;  %v274_v49 = vld [vmem:[%s8004_s26 + $0x6f0] sm:$0xff]  ;;  %v271_v50 = vld [vmem:[%s8004_s26 + $0x6d8] sm:$0xff] }
  0xd7   :  { %v275_v51 = vld [vmem:[%s8004_s26 + $0x6f8] sm:$0xff]  ;;  %v5074_v55 = vcombine.high %v270_v48, %v274_v49  ;;  %v5073_v62 = vcombine.low %v270_v48, %v274_v49 }
  0xd8   :  { %v5076_v56 = vcombine.high %v271_v50, %v275_v51  ;;  %v5075_v63 = vcombine.low %v271_v50, %v275_v51  ;;  %v5597_v48 = vld [vmem:[%s7984_s3 + $0x94] ss:$8 sps:$4 sm:$0xff]   ;;  %v5595_v49 = vld [vmem:[%s7984_s3 + $0x90] ss:$8 sps:$4 sm:$0xff]   ;;  %v5600_v50 = vld [vmem:[%s7984_s3 + $0xa4] ss:$8 sps:$4 sm:$0xff]  }
  0xd9   :  { %1856 = vmatpush1.bf16.msra.mxu0 %v5009_v58  ;;  %1938 = vmatpush1.bf16.msra.mxu1 %v5011_v59  ;;  %v278_v58 = vld [vmem:[%s8004_s26 + $0x710] sm:$0xff]  ;;  %v5598_v51 = vld [vmem:[%s7984_s3 + $0xa0] ss:$8 sps:$4 sm:$0xff]  }
  0xda   :  { %1857 = vmatprep.subr.bf16.mxu0 %v5018_v60  ;;  %1939 = vmatprep.subr.bf16.mxu1 %v5020_v61  ;;  %v282_v59 = vld [vmem:[%s8004_s26 + $0x730] sm:$0xff]  ;;  %v279_v60 = vld [vmem:[%s8004_s26 + $0x718] sm:$0xff] }
  0xdb   :  { %v283_v61 = vld [vmem:[%s8004_s26 + $0x738] sm:$0xff]  ;;  %v5082_v0 = vcombine.high %v278_v58, %v282_v59  ;;  %v5081_v6 = vcombine.low %v278_v58, %v282_v59 }
  0xdc   :  { %v5084_v1 = vcombine.high %v279_v60, %v283_v61  ;;  %v5083_v7 = vcombine.low %v279_v60, %v283_v61  ;;  %v5609_v58 = vld [vmem:[%s7984_s3 + $0xd4] ss:$8 sps:$4 sm:$0xff]   ;;  %v5607_v59 = vld [vmem:[%s7984_s3 + $0xd0] ss:$8 sps:$4 sm:$0xff]   ;;  %v5612_v60 = vld [vmem:[%s7984_s3 + $0xe4] ss:$8 sps:$4 sm:$0xff]  }
  0xdd   :  { %1858 = vmatpush1.bf16.msra.mxu0 %v5017_v2  ;;  %1940 = vmatpush1.bf16.msra.mxu1 %v5019_v3  ;;  %v286_v2 = vld [vmem:[%s8004_s26 + $0x750] sm:$0xff]  ;;  %v5610_v61 = vld [vmem:[%s7984_s3 + $0xe0] ss:$8 sps:$4 sm:$0xff]  }
  0xde   :  { %1859 = vmatprep.subr.bf16.mxu0 %v5026_v4  ;;  %1941 = vmatprep.subr.bf16.mxu1 %v5028_v5  ;;  %v290_v3 = vld [vmem:[%s8004_s26 + $0x770] sm:$0xff]  ;;  %v287_v4 = vld [vmem:[%s8004_s26 + $0x758] sm:$0xff] }
  0xdf   :  { %v291_v5 = vld [vmem:[%s8004_s26 + $0x778] sm:$0xff]  ;;  %v5090_v8 = vcombine.high %v286_v2, %v290_v3  ;;  %v5089_v16 = vcombine.low %v286_v2, %v290_v3 }
  0xe0   :  { %v5092_v9 = vcombine.high %v287_v4, %v291_v5  ;;  %v5091_v17 = vcombine.low %v287_v4, %v291_v5  ;;  %v7002_v4 = vld [vmem:[%s7985_s2] sm:$0xff] }
  0xe1   :  { %1860 = vmatpush1.bf16.msra.mxu0 %v5025_v10  ;;  %1942 = vmatpush1.bf16.msra.mxu1 %v5027_v11  ;;  %v294_v10 = vld [vmem:[%s8004_s26 + $0x790] sm:$0xff] }
  0xe2   :  { %1861 = vmatprep.subr.bf16.mxu0 %v5034_v13  ;;  %1943 = vmatprep.subr.bf16.mxu1 %v5036_v14  ;;  %v298_v11 = vld [vmem:[%s8004_s26 + $0x7b0] sm:$0xff]  ;;  %v295_v13 = vld [vmem:[%s8004_s26 + $0x798] sm:$0xff] }
  0xe3   :  { %v299_v14 = vld [vmem:[%s8004_s26 + $0x7b8] sm:$0xff]  ;;  %v5098_v53 = vcombine.high %v294_v10, %v298_v11  ;;  %v5097_v25 = vcombine.low %v294_v10, %v298_v11 }
  0xe4   :  { %v5100_v18 = vcombine.high %v295_v13, %v299_v14  ;;  %v5099_v26 = vcombine.low %v295_v13, %v299_v14 }
  0xe5   :  { %1862 = vmatpush1.bf16.msra.mxu0 %v5033_v19  ;;  %1944 = vmatpush1.bf16.msra.mxu1 %v5035_v20  ;;  %v302_v19 = vld [vmem:[%s8004_s26 + $0x7d0] sm:$0xff] }
  0xe6   :  { %1863 = vmatprep.subr.bf16.mxu0 %v5042_v23  ;;  %1945 = vmatprep.subr.bf16.mxu1 %v5044_v24  ;;  %v306_v20 = vld [vmem:[%s8004_s26 + $0x7f0] sm:$0xff]  ;;  %v303_v23 = vld [vmem:[%s8004_s26 + $0x7d8] sm:$0xff] }
  0xe7   :  { %v307_v24 = vld [vmem:[%s8004_s26 + $0x7f8] sm:$0xff]  ;;  %v5106_v27 = vcombine.high %v302_v19, %v306_v20 }
  0xe8   :  { %v5108_v28 = vcombine.high %v303_v23, %v307_v24 }
  0xe9   :  { %1864 = vmatpush1.bf16.msra.mxu0 %v5041_v15  ;;  %1946 = vmatpush1.bf16.msra.mxu1 %v5043_v29  ;;  %v5105_v15 = vcombine.low %v302_v19, %v306_v20  ;;  %v5107_v29 = vcombine.low %v303_v23, %v307_v24 }
  0xea   :  { %1865 = vmatprep.subr.bf16.mxu0 %v5050_v30  ;;  %1947 = vmatprep.subr.bf16.mxu1 %v5052_v31  ;;  %v5570_v30 = vld [vmem:[%s7984_s3 + $0x4] ss:$8 sps:$4 sm:$0xff]   ;;  %v5568_v31 = vld [vmem:[%s7984_s3] ss:$8 sps:$4 sm:$0xff]  }
  0xed   :  { %1866 = vmatpush1.bf16.msra.mxu0 %v5049_v36  ;;  %1948 = vmatpush1.bf16.msra.mxu1 %v5051_v37  ;;  %v5579_v36 = vld [vmem:[%s7984_s3 + $0x34] ss:$8 sps:$4 sm:$0xff]   ;;  %v5577_v37 = vld [vmem:[%s7984_s3 + $0x30] ss:$8 sps:$4 sm:$0xff]  }
  0xee   :  { %1867 = vmatprep.subr.bf16.mxu0 %v5058_v38  ;;  %1949 = vmatprep.subr.bf16.mxu1 %v5060_v39  ;;  %v5582_v38 = vld [vmem:[%s7984_s3 + $0x44] ss:$8 sps:$4 sm:$0xff]   ;;  %v5580_v39 = vld [vmem:[%s7984_s3 + $0x40] ss:$8 sps:$4 sm:$0xff]  }
  0xf1   :  { %1868 = vmatpush1.bf16.msra.mxu0 %v5057_v44  ;;  %1950 = vmatpush1.bf16.msra.mxu1 %v5059_v45  ;;  %v5591_v44 = vld [vmem:[%s7984_s3 + $0x74] ss:$8 sps:$4 sm:$0xff]   ;;  %v5589_v45 = vld [vmem:[%s7984_s3 + $0x70] ss:$8 sps:$4 sm:$0xff]  }
  0xf2   :  { %1869 = vmatprep.subr.bf16.mxu0 %v5066_v46  ;;  %1951 = vmatprep.subr.bf16.mxu1 %v5068_v47  ;;  %v5594_v46 = vld [vmem:[%s7984_s3 + $0x84] ss:$8 sps:$4 sm:$0xff]   ;;  %v5592_v47 = vld [vmem:[%s7984_s3 + $0x80] ss:$8 sps:$4 sm:$0xff]  }
  0xf5   :  { %1870 = vmatpush1.bf16.msra.mxu0 %v5065_v52  ;;  %1952 = vmatpush1.bf16.msra.mxu1 %v5067_v54  ;;  %v5603_v52 = vld [vmem:[%s7984_s3 + $0xb4] ss:$8 sps:$4 sm:$0xff]   ;;  %v5601_v54 = vld [vmem:[%s7984_s3 + $0xb0] ss:$8 sps:$4 sm:$0xff]  }
  0xf6   :  { %1871 = vmatprep.subr.bf16.mxu0 %v5074_v55  ;;  %1953 = vmatprep.subr.bf16.mxu1 %v5076_v56  ;;  %v5606_v55 = vld [vmem:[%s7984_s3 + $0xc4] ss:$8 sps:$4 sm:$0xff]   ;;  %v5604_v56 = vld [vmem:[%s7984_s3 + $0xc0] ss:$8 sps:$4 sm:$0xff]  }
  0xf9   :  { %1872 = vmatpush1.bf16.msra.mxu0 %v5073_v62  ;;  %1954 = vmatpush1.bf16.msra.mxu1 %v5075_v63  ;;  %v5615_v62 = vld [vmem:[%s7984_s3 + $0xf4] ss:$8 sps:$4 sm:$0xff]   ;;  %v5613_v63 = vld [vmem:[%s7984_s3 + $0xf0] ss:$8 sps:$4 sm:$0xff]  }
  0xfa   :  { %1873 = vmatprep.subr.bf16.mxu0 %v5082_v0  ;;  %1955 = vmatprep.subr.bf16.mxu1 %v5084_v1  ;;  %v5618_v0 = vld [vmem:[%s7984_s3 + $0x104] ss:$8 sps:$4 sm:$0xff]   ;;  %v310_v1 = vlaneseq }
  0xfc   :  { %v6994_v2 = vshrl.u32 %v310_v1, 7 }
  0xfd   :  { %1874 = vmatpush1.bf16.msra.mxu0 %v5081_v6  ;;  %1956 = vmatpush1.bf16.msra.mxu1 %v5083_v7 }
  0xfe   :  { %1875 = vmatprep.subr.bf16.mxu0 %v5090_v8  ;;  %1957 = vmatprep.subr.bf16.mxu1 %v5092_v9  ;;  %v6997_v3 = vsub.s32 0, %v6994_v2  ;;  %v7005_v5 = vsub.s32 1, %v6994_v2  ;;  %v324_v6 = vsub.s32 3, %v6994_v2 }
 0x100   :  { %v313_v7 = vrot.slane %v7002_v4, %v6997_v3  ;;  %v317_v8 = vrot.slane %v7002_v4, %v7005_v5  ;;  %v325_v9 = vrot.slane %v7002_v4, %v324_v6  ;;  %v5666_v6 = vld [vmem:[%s7984_s3 + $0x204] ss:$8 sps:$4 sm:$0xff]  }
 0x101   :  { %1876 = vmatpush1.bf16.msra.mxu0 %v5089_v16  ;;  %1958 = vmatpush1.bf16.msra.mxu1 %v5091_v17 }
 0x102   :  { %1877 = vmatprep.subr.bf16.mxu0 %v5098_v53  ;;  %1959 = vmatprep.subr.bf16.mxu1 %v5100_v18 }
 0x105   :  { %1878 = vmatpush1.bf16.msra.mxu0 %v5097_v25  ;;  %1960 = vmatpush1.bf16.msra.mxu1 %v5099_v26 }
 0x106   :  { %1879 = vmatprep.subr.bf16.mxu0 %v5106_v27  ;;  %1961 = vmatprep.subr.bf16.mxu1 %v5108_v28  ;;  %v5616_v28 = vld [vmem:[%s7984_s3 + $0x100] ss:$8 sps:$4 sm:$0xff]  }
 0x109   :  { %1880 = vmatpush1.bf16.msra.mxu0 %v5105_v15  ;;  %1962 = vmatpush1.bf16.msra.mxu1 %v5107_v29  ;;  %v5621_v29 = vld [vmem:[%s7984_s3 + $0x114] ss:$8 sps:$4 sm:$0xff]  }
 0x10a   :  { %2768 = vmatprep.subr.bf16.mxu0 %v5570_v30 }
 0x10c   :  { %1882 = vmatmul.mubr.bf16.vlgmr.msra.gmra.mrb[4].mxu0 %v6517_v22  ;;  %1964 = vmatmul.mubr.bf16.vlgmr.msra.gmra.mrb[4].mxu1 %v6517_v22 }
 0x10d   :  { %2769 = vmatpush1.bf16.msra.mxu0 %v5568_v31  ;;  %v5619_v31 = vld [vmem:[%s7984_s3 + $0x110] ss:$8 sps:$4 sm:$0xff]  }
 0x10e   :  { %2770 = vmatprep.subr.bf16.mxu0 %v5573_v32  ;;  %v5624_v32 = vld [vmem:[%s7984_s3 + $0x124] ss:$8 sps:$4 sm:$0xff]  }
 0x111   :  { %2771 = vmatpush1.bf16.msra.mxu0 %v5571_v33  ;;  %v5622_v33 = vld [vmem:[%s7984_s3 + $0x120] ss:$8 sps:$4 sm:$0xff]  }
 0x112   :  { %2772 = vmatprep.subr.bf16.mxu0 %v5576_v34  ;;  %v5627_v34 = vld [vmem:[%s7984_s3 + $0x134] ss:$8 sps:$4 sm:$0xff]  }
 0x115   :  { %2773 = vmatpush1.bf16.msra.mxu0 %v5574_v35  ;;  %v5625_v35 = vld [vmem:[%s7984_s3 + $0x130] ss:$8 sps:$4 sm:$0xff]  }
 0x116   :  { %2774 = vmatprep.subr.bf16.mxu0 %v5579_v36  ;;  %v5630_v36 = vld [vmem:[%s7984_s3 + $0x144] ss:$8 sps:$4 sm:$0xff]  }
 0x119   :  { %2775 = vmatpush1.bf16.msra.mxu0 %v5577_v37  ;;  %v5628_v37 = vld [vmem:[%s7984_s3 + $0x140] ss:$8 sps:$4 sm:$0xff]  }
 0x11a   :  { %2776 = vmatprep.subr.bf16.mxu0 %v5582_v38  ;;  %v5633_v38 = vld [vmem:[%s7984_s3 + $0x154] ss:$8 sps:$4 sm:$0xff]  }
 0x11d   :  { %2777 = vmatpush1.bf16.msra.mxu0 %v5580_v39  ;;  %v5631_v39 = vld [vmem:[%s7984_s3 + $0x150] ss:$8 sps:$4 sm:$0xff]  }
 0x11e   :  { %2778 = vmatprep.subr.bf16.mxu0 %v5585_v40  ;;  %v5636_v40 = vld [vmem:[%s7984_s3 + $0x164] ss:$8 sps:$4 sm:$0xff]  }
 0x121   :  { %2779 = vmatpush1.bf16.msra.mxu0 %v5583_v41  ;;  %v5634_v41 = vld [vmem:[%s7984_s3 + $0x160] ss:$8 sps:$4 sm:$0xff]  }
 0x122   :  { %2780 = vmatprep.subr.bf16.mxu0 %v5588_v42  ;;  %v5639_v42 = vld [vmem:[%s7984_s3 + $0x174] ss:$8 sps:$4 sm:$0xff]  }
 0x125   :  { %2781 = vmatpush1.bf16.msra.mxu0 %v5586_v43  ;;  %v5637_v43 = vld [vmem:[%s7984_s3 + $0x170] ss:$8 sps:$4 sm:$0xff]  }
 0x126   :  { %2782 = vmatprep.subr.bf16.mxu0 %v5591_v44  ;;  %v5642_v44 = vld [vmem:[%s7984_s3 + $0x184] ss:$8 sps:$4 sm:$0xff]  }
 0x129   :  { %2783 = vmatpush1.bf16.msra.mxu0 %v5589_v45  ;;  %v5640_v45 = vld [vmem:[%s7984_s3 + $0x180] ss:$8 sps:$4 sm:$0xff]  }
 0x12a   :  { %2784 = vmatprep.subr.bf16.mxu0 %v5594_v46  ;;  %v5645_v46 = vld [vmem:[%s7984_s3 + $0x194] ss:$8 sps:$4 sm:$0xff]  }
 0x12d   :  { %2785 = vmatpush1.bf16.msra.mxu0 %v5592_v47  ;;  %v5643_v47 = vld [vmem:[%s7984_s3 + $0x190] ss:$8 sps:$4 sm:$0xff]  }
 0x12e   :  { %2786 = vmatprep.subr.bf16.mxu0 %v5597_v48  ;;  %v5648_v48 = vld [vmem:[%s7984_s3 + $0x1a4] ss:$8 sps:$4 sm:$0xff]  }
 0x131   :  { %2787 = vmatpush1.bf16.msra.mxu0 %v5595_v49  ;;  %v5646_v49 = vld [vmem:[%s7984_s3 + $0x1a0] ss:$8 sps:$4 sm:$0xff]  }
 0x132   :  { %2788 = vmatprep.subr.bf16.mxu0 %v5600_v50  ;;  %v5651_v50 = vld [vmem:[%s7984_s3 + $0x1b4] ss:$8 sps:$4 sm:$0xff]  }
 0x135   :  { %2789 = vmatpush1.bf16.msra.mxu0 %v5598_v51  ;;  %v5649_v51 = vld [vmem:[%s7984_s3 + $0x1b0] ss:$8 sps:$4 sm:$0xff]  }
 0x136   :  { %2790 = vmatprep.subr.bf16.mxu0 %v5603_v52  ;;  %v5654_v52 = vld [vmem:[%s7984_s3 + $0x1c4] ss:$8 sps:$4 sm:$0xff]  }
 0x139   :  { %2791 = vmatpush1.bf16.msra.mxu0 %v5601_v54  ;;  %v5652_v54 = vld [vmem:[%s7984_s3 + $0x1c0] ss:$8 sps:$4 sm:$0xff]  }
 0x13a   :  { %2792 = vmatprep.subr.bf16.mxu0 %v5606_v55  ;;  %v320_v55 = vsub.s32 2, %v6994_v2 }
 0x13d   :  { %2793 = vmatpush1.bf16.msra.mxu0 %v5604_v56  ;;  %v5657_v56 = vld [vmem:[%s7984_s3 + $0x1d4] ss:$8 sps:$4 sm:$0xff]  }
 0x13e   :  { %2794 = vmatprep.subr.bf16.mxu0 %v5609_v58  ;;  %v5655_v58 = vld [vmem:[%s7984_s3 + $0x1d0] ss:$8 sps:$4 sm:$0xff]  }
 0x141   :  { %2795 = vmatpush1.bf16.msra.mxu0 %v5607_v59  ;;  %v321_v59 = vrot.slane %v7002_v4, %v320_v55  ;;  %v5706_v55 = vld [vmem:[%s7984_s3 + $0x2e0] ss:$8 sps:$4 sm:$0xff]  }
 0x142   :  { %2796 = vmatprep.subr.bf16.mxu0 %v5612_v60  ;;  %v5660_v60 = vld [vmem:[%s7984_s3 + $0x1e4] ss:$8 sps:$4 sm:$0xff]  }
 0x145   :  { %2797 = vmatpush1.bf16.msra.mxu0 %v5610_v61  ;;  %v5658_v61 = vld [vmem:[%s7984_s3 + $0x1e0] ss:$8 sps:$4 sm:$0xff]  }
 0x146   :  { %2798 = vmatprep.subr.bf16.mxu0 %v5615_v62 }
 0x149   :  { %2799 = vmatpush1.bf16.msra.mxu0 %v5613_v63  ;;  %v5663_v63 = vld [vmem:[%s7984_s3 + $0x1f4] ss:$8 sps:$4 sm:$0xff]  }
 0x14a   :  { %2809 = vmatprep.subr.bf16.mxu0 %v5618_v0  ;;  %v5661_v0 = vld [vmem:[%s7984_s3 + $0x1f0] ss:$8 sps:$4 sm:$0xff]  }
 0x15f   :  { %v1719_v10 = vpop.f32.mrb[0].mxu0  ;;  %v7013_v13 = vpop.f32.mrb[0].mxu1 }
 0x160   :  { %v5516_v11 = vadd.f32 %v1719_v10, %v313_v7  ;;  %v1721_v14 = vpop.f32.mrb[1].mxu0  ;;  %v1803_v17 = vpop.f32.mrb[1].mxu1  ;;  %v5518_v62 = vadd.f32 %v7013_v13, %v321_v59  ;;  %v5664_v7 = vld [vmem:[%s7984_s3 + $0x200] ss:$8 sps:$4 sm:$0xff]   ;;  %v5667_v10 = vld [vmem:[%s7984_s3 + $0x210] ss:$8 sps:$4 sm:$0xff]  }
 0x161   :  { %v5517_v16 = vadd.f32 %v1721_v14, %v317_v8  ;;  %v1723_v53 = vpop.f32.mrb[2].mxu0  ;;  %v5519_v19 = vadd.f32 %v1803_v17, %v325_v9  ;;  %v1805_v20 = vpop.f32.mrb[2].mxu1  ;;  %v5669_v9 = vld [vmem:[%s7984_s3 + $0x214] ss:$8 sps:$4 sm:$0xff]   ;;  %v5760_v13 = vld [vmem:[%s7986_s5 + $0x40] sm:$0xff]   ;;  %v5762_v17 = vld [vmem:[%s7986_s5 + $0x48] sm:$0xff]  }
 0x162   :  { %v1972_v18 = vmax.f32 %v5516_v11, 0.0  ;;  %v1724_v23 = vpop.f32.mrb[3].mxu0  ;;  %v1806_v25 = vpop.f32.mrb[3].mxu1  ;;  %v1974_v1 = vmax.f32 %v5518_v62, 0.0  ;;  %v5672_v11 = vld [vmem:[%s7984_s3 + $0x224] ss:$8 sps:$4 sm:$0xff]   ;;  %5422 = vmatprep.subr.bf16.mxu1 %v5760_v13 }
 0x163   :  { %v1973_v24 = vmax.f32 %v5517_v16, 0.0  ;;  %v1975_v26 = vmax.f32 %v5519_v19, 0.0  ;;  %v5761_v14 = vld [vmem:[%s7986_s5] sm:$0xff]   ;;  %v5763_v53 = vld [vmem:[%s7986_s5 + $0x8] sm:$0xff]   ;;  %v5675_v19 = vld [vmem:[%s7984_s3 + $0x234] ss:$8 sps:$4 sm:$0xff]  }
 0x164   :  { %v1980_v15 = vpack.c.bf16 %v1972_v18, %v1972_v18  ;;  %v1982_v8 = vpack.c.bf16 %v1974_v1, %v1974_v1  ;;  %v5670_v16 = vld [vmem:[%s7984_s3 + $0x220] ss:$8 sps:$4 sm:$0xff]   ;;  %5423 = vmatpush3.bf16.msra.mxu1 %v5761_v14  ;;  %v5764_v18 = vld [vmem:[%s7986_s5 + $0x50] sm:$0xff]   ;;  %v5678_v25 = vld [vmem:[%s7984_s3 + $0x244] ss:$8 sps:$4 sm:$0xff]  }
 0x165   :  { %v1981_v27 = vpack.c.bf16 %v1973_v24, %v1973_v24  ;;  %v1983_v30 = vpack.c.bf16 %v1975_v26, %v1975_v26  ;;  %5424 = vmatprep.subr.bf16.mxu1 %v5762_v17  ;;  %v5673_v20 = vld [vmem:[%s7984_s3 + $0x230] ss:$8 sps:$4 sm:$0xff]   ;;  %v5676_v26 = vld [vmem:[%s7984_s3 + $0x240] ss:$8 sps:$4 sm:$0xff]   ;;  %v5711_v59 = vld [vmem:[%s7984_s3 + $0x2f4] ss:$8 sps:$4 sm:$0xff]  }
 0x166   :  { %v5765_v23 = vld [vmem:[%s7986_s5 + $0x10] sm:$0xff]   ;;  %v5766_v24 = vld [vmem:[%s7986_s5 + $0x58] sm:$0xff]   ;;  %v5714_v13 = vld [vmem:[%s7984_s3 + $0x304] ss:$8 sps:$4 sm:$0xff]  }
 0x167   :  { %2800 = vmatprep.mubr.bf16.mxu0 %v1981_v27  ;;  %v5681_v27 = vld [vmem:[%s7984_s3 + $0x254] ss:$8 sps:$4 sm:$0xff]  }
 0x168   :  { %2801 = vmatmul.mubr.bf16.vlgmr.msra.gmra.mrb[8].mxu0 %v1980_v15  ;;  %5425 = vmatpush3.bf16.msra.mxu1 %v5763_v53  ;;  %v5768_v15 = vld [vmem:[%s7986_s5 + $0x60] sm:$0xff]  }
 0x169   :  { %2810 = vmatpush1.bf16.msra.mxu0 %v5616_v28  ;;  %2841 = vmatprep.mubr.bf16.mxu0 %v1983_v30  ;;  %v5767_v28 = vld [vmem:[%s7986_s5 + $0x18] sm:$0xff]  }
 0x16a   :  { %2811 = vmatprep.subr.bf16.mxu0 %v5621_v29  ;;  %5426 = vmatprep.subr.bf16.mxu1 %v5764_v18  ;;  %v5769_v29 = vld [vmem:[%s7986_s5 + $0x20] sm:$0xff]   ;;  %v5679_v30 = vld [vmem:[%s7984_s3 + $0x250] ss:$8 sps:$4 sm:$0xff]  }
 0x16b   :  { %v5712_v18 = vld [vmem:[%s7984_s3 + $0x300] ss:$8 sps:$4 sm:$0xff]  }
 0x16c   :  { %5427 = vmatpush3.bf16.msra.mxu1 %v5765_v23 }
 0x16d   :  { %2812 = vmatpush1.bf16.msra.mxu0 %v5619_v31  ;;  %5428 = vmatprep.subr.bf16.mxu1 %v5766_v24  ;;  %v5770_v31 = vld [vmem:[%s7986_s5 + $0x68] sm:$0xff]   ;;  %v5715_v24 = vld [vmem:[%s7984_s3 + $0x310] ss:$8 sps:$4 sm:$0xff]  }
 0x16e   :  { %2813 = vmatprep.subr.bf16.mxu0 %v5624_v32  ;;  %v5684_v32 = vld [vmem:[%s7984_s3 + $0x264] ss:$8 sps:$4 sm:$0xff]  }
 0x170   :  { %5429 = vmatpush3.bf16.msra.mxu1 %v5767_v28  ;;  %v5721_v28 = vld [vmem:[%s7984_s3 + $0x330] ss:$8 sps:$4 sm:$0xff]  }
 0x171   :  { %2814 = vmatpush1.bf16.msra.mxu0 %v5622_v33  ;;  %5430 = vmatprep.subr.bf16.mxu1 %v5768_v15  ;;  %v5771_v33 = vld [vmem:[%s7986_s5 + $0x28] sm:$0xff]  }
 0x172   :  { %2815 = vmatprep.subr.bf16.mxu0 %v5627_v34  ;;  %v5682_v34 = vld [vmem:[%s7984_s3 + $0x260] ss:$8 sps:$4 sm:$0xff]   ;;  %v5726_v15 = vld [vmem:[%s7984_s3 + $0x344] ss:$8 sps:$4 sm:$0xff]  }
 0x174   :  { %5431 = vmatpush3.bf16.msra.mxu1 %v5769_v29  ;;  %v5724_v29 = vld [vmem:[%s7984_s3 + $0x340] ss:$8 sps:$4 sm:$0xff]  }
 0x175   :  { %2816 = vmatpush1.bf16.msra.mxu0 %v5625_v35  ;;  %5432 = vmatprep.subr.bf16.mxu1 %v5770_v31  ;;  %v5687_v35 = vld [vmem:[%s7984_s3 + $0x274] ss:$8 sps:$4 sm:$0xff]   ;;  %v5727_v31 = vld [vmem:[%s7984_s3 + $0x350] ss:$8 sps:$4 sm:$0xff]  }
 0x176   :  { %2817 = vmatprep.subr.bf16.mxu0 %v5630_v36  ;;  %v5685_v36 = vld [vmem:[%s7984_s3 + $0x270] ss:$8 sps:$4 sm:$0xff]  }
 0x178   :  { %5433 = vmatpush3.bf16.msra.mxu1 %v5771_v33  ;;  %v5730_v33 = vld [vmem:[%s7984_s3 + $0x360] ss:$8 sps:$4 sm:$0xff]  }
 0x179   :  { %2818 = vmatpush1.bf16.msra.mxu0 %v5628_v37  ;;  %v5690_v37 = vld [vmem:[%s7984_s3 + $0x284] ss:$8 sps:$4 sm:$0xff]  }
 0x17a   :  { %2819 = vmatprep.subr.bf16.mxu0 %v5633_v38  ;;  %v5688_v38 = vld [vmem:[%s7984_s3 + $0x280] ss:$8 sps:$4 sm:$0xff]  }
 0x17d   :  { %2820 = vmatpush1.bf16.msra.mxu0 %v5631_v39  ;;  %v5693_v39 = vld [vmem:[%s7984_s3 + $0x294] ss:$8 sps:$4 sm:$0xff]  }
 0x17e   :  { %2821 = vmatprep.subr.bf16.mxu0 %v5636_v40  ;;  %v5691_v40 = vld [vmem:[%s7984_s3 + $0x290] ss:$8 sps:$4 sm:$0xff]  }
 0x181   :  { %2822 = vmatpush1.bf16.msra.mxu0 %v5634_v41  ;;  %v5696_v41 = vld [vmem:[%s7984_s3 + $0x2a4] ss:$8 sps:$4 sm:$0xff]  }
 0x182   :  { %2823 = vmatprep.subr.bf16.mxu0 %v5639_v42  ;;  %v5694_v42 = vld [vmem:[%s7984_s3 + $0x2a0] ss:$8 sps:$4 sm:$0xff]  }
 0x185   :  { %2824 = vmatpush1.bf16.msra.mxu0 %v5637_v43  ;;  %v5699_v43 = vld [vmem:[%s7984_s3 + $0x2b4] ss:$8 sps:$4 sm:$0xff]  }
 0x186   :  { %2825 = vmatprep.subr.bf16.mxu0 %v5642_v44  ;;  %v5697_v44 = vld [vmem:[%s7984_s3 + $0x2b0] ss:$8 sps:$4 sm:$0xff]  }
 0x189   :  { %2826 = vmatpush1.bf16.msra.mxu0 %v5640_v45  ;;  %v5702_v45 = vld [vmem:[%s7984_s3 + $0x2c4] ss:$8 sps:$4 sm:$0xff]  }
 0x18a   :  { %2827 = vmatprep.subr.bf16.mxu0 %v5645_v46  ;;  %v5700_v46 = vld [vmem:[%s7984_s3 + $0x2c0] ss:$8 sps:$4 sm:$0xff]  }
 0x18d   :  { %2828 = vmatpush1.bf16.msra.mxu0 %v5643_v47  ;;  %v5705_v47 = vld [vmem:[%s7984_s3 + $0x2d4] ss:$8 sps:$4 sm:$0xff]  }
 0x18e   :  { %2829 = vmatprep.subr.bf16.mxu0 %v5648_v48  ;;  %v328_v48 = vsub.s32 4, %v6994_v2 }
 0x191   :  { %2830 = vmatpush1.bf16.msra.mxu0 %v5646_v49  ;;  %v5703_v49 = vld [vmem:[%s7984_s3 + $0x2d0] ss:$8 sps:$4 sm:$0xff]  }
 0x192   :  { %2831 = vmatprep.subr.bf16.mxu0 %v5651_v50  ;;  %v332_v50 = vsub.s32 5, %v6994_v2 }
 0x195   :  { %2832 = vmatpush1.bf16.msra.mxu0 %v5649_v51  ;;  %v5708_v51 = vld [vmem:[%s7984_s3 + $0x2e4] ss:$8 sps:$4 sm:$0xff]  }
 0x196   :  { %2833 = vmatprep.subr.bf16.mxu0 %v5654_v52  ;;  %v340_v52 = vsub.s32 7, %v6994_v2 }
 0x199   :  { %2834 = vmatpush1.bf16.msra.mxu0 %v5652_v54  ;;  %v329_v54 = vrot.slane %v7002_v4, %v328_v48  ;;  %v5751_v48 = vld [vmem:[%s7984_s3 + $0x3d0] ss:$8 sps:$4 sm:$0xff]  }
 0x19a   :  { %2835 = vmatprep.subr.bf16.mxu0 %v5657_v56  ;;  %v333_v56 = vrot.slane %v7002_v4, %v332_v50  ;;  %v5756_v50 = vld [vmem:[%s7984_s3 + $0x3e4] ss:$8 sps:$4 sm:$0xff]  }
 0x19d   :  { %2836 = vmatpush1.bf16.msra.mxu0 %v5655_v58  ;;  %v341_v58 = vrot.slane %v7002_v4, %v340_v52  ;;  %v5759_v52 = vld [vmem:[%s7984_s3 + $0x3f4] ss:$8 sps:$4 sm:$0xff]  }
 0x19e   :  { %2837 = vmatprep.subr.bf16.mxu0 %v5660_v60 }
 0x1a1   :  { %2838 = vmatpush1.bf16.msra.mxu0 %v5658_v61 }
 0x1a2   :  { %2839 = vmatprep.subr.bf16.mxu0 %v5663_v63 }
 0x1a5   :  { %2840 = vmatpush1.bf16.msra.mxu0 %v5661_v0 }
 0x1a6   :  { %2850 = vmatprep.subr.bf16.mxu0 %v5666_v6 }
 0x1a8   :  { %2842 = vmatmul.mubr.bf16.vlgmr.msra.gmra.mrb[8].mxu0 %v1982_v8 }
 0x1a9   :  { %2851 = vmatpush1.bf16.msra.mxu0 %v5664_v7  ;;  %v5709_v7 = vld [vmem:[%s7984_s3 + $0x2f0] ss:$8 sps:$4 sm:$0xff]  }
 0x1aa   :  { %2852 = vmatprep.subr.bf16.mxu0 %v5669_v9 }
 0x1ad   :  { %2853 = vmatpush1.bf16.msra.mxu0 %v5667_v10 }
 0x1ae   :  { %2854 = vmatprep.subr.bf16.mxu0 %v5672_v11 }
 0x1b1   :  { %2855 = vmatpush1.bf16.msra.mxu0 %v5670_v16 }
 0x1b2   :  { %2856 = vmatprep.subr.bf16.mxu0 %v5675_v19 }
 0x1b5   :  { %2857 = vmatpush1.bf16.msra.mxu0 %v5673_v20  ;;  %v5717_v20 = vld [vmem:[%s7984_s3 + $0x314] ss:$8 sps:$4 sm:$0xff]  }
 0x1b6   :  { %2858 = vmatprep.subr.bf16.mxu0 %v5678_v25  ;;  %v5720_v25 = vld [vmem:[%s7984_s3 + $0x324] ss:$8 sps:$4 sm:$0xff]  }
 0x1b9   :  { %2859 = vmatpush1.bf16.msra.mxu0 %v5676_v26  ;;  %v5718_v26 = vld [vmem:[%s7984_s3 + $0x320] ss:$8 sps:$4 sm:$0xff]  }
 0x1ba   :  { %2860 = vmatprep.subr.bf16.mxu0 %v5681_v27  ;;  %v5723_v27 = vld [vmem:[%s7984_s3 + $0x334] ss:$8 sps:$4 sm:$0xff]  }
 0x1bd   :  { %2861 = vmatpush1.bf16.msra.mxu0 %v5679_v30  ;;  %v5729_v30 = vld [vmem:[%s7984_s3 + $0x354] ss:$8 sps:$4 sm:$0xff]  }
 0x1be   :  { %2862 = vmatprep.subr.bf16.mxu0 %v5684_v32  ;;  %v5732_v32 = vld [vmem:[%s7984_s3 + $0x364] ss:$8 sps:$4 sm:$0xff]  }
 0x1c1   :  { %2863 = vmatpush1.bf16.msra.mxu0 %v5682_v34  ;;  %v5735_v34 = vld [vmem:[%s7984_s3 + $0x374] ss:$8 sps:$4 sm:$0xff]  }
 0x1c2   :  { %2864 = vmatprep.subr.bf16.mxu0 %v5687_v35  ;;  %v5733_v35 = vld [vmem:[%s7984_s3 + $0x370] ss:$8 sps:$4 sm:$0xff]  }
 0x1c5   :  { %2865 = vmatpush1.bf16.msra.mxu0 %v5685_v36  ;;  %v5738_v36 = vld [vmem:[%s7984_s3 + $0x384] ss:$8 sps:$4 sm:$0xff]  }
 0x1c6   :  { %2866 = vmatprep.subr.bf16.mxu0 %v5690_v37  ;;  %v5736_v37 = vld [vmem:[%s7984_s3 + $0x380] ss:$8 sps:$4 sm:$0xff]  }
 0x1c9   :  { %2867 = vmatpush1.bf16.msra.mxu0 %v5688_v38  ;;  %v5741_v38 = vld [vmem:[%s7984_s3 + $0x394] ss:$8 sps:$4 sm:$0xff]  }
 0x1ca   :  { %2868 = vmatprep.subr.bf16.mxu0 %v5693_v39  ;;  %v5739_v39 = vld [vmem:[%s7984_s3 + $0x390] ss:$8 sps:$4 sm:$0xff]  }
 0x1cd   :  { %2869 = vmatpush1.bf16.msra.mxu0 %v5691_v40  ;;  %v5744_v40 = vld [vmem:[%s7984_s3 + $0x3a4] ss:$8 sps:$4 sm:$0xff]  }
 0x1ce   :  { %2870 = vmatprep.subr.bf16.mxu0 %v5696_v41  ;;  %v5742_v41 = vld [vmem:[%s7984_s3 + $0x3a0] ss:$8 sps:$4 sm:$0xff]  }
 0x1d1   :  { %2871 = vmatpush1.bf16.msra.mxu0 %v5694_v42  ;;  %v5747_v42 = vld [vmem:[%s7984_s3 + $0x3b4] ss:$8 sps:$4 sm:$0xff]  }
 0x1d2   :  { %2872 = vmatprep.subr.bf16.mxu0 %v5699_v43  ;;  %v5745_v43 = vld [vmem:[%s7984_s3 + $0x3b0] ss:$8 sps:$4 sm:$0xff]  }
 0x1d5   :  { %2873 = vmatpush1.bf16.msra.mxu0 %v5697_v44  ;;  %v5750_v44 = vld [vmem:[%s7984_s3 + $0x3c4] ss:$8 sps:$4 sm:$0xff]  }
 0x1d6   :  { %2874 = vmatprep.subr.bf16.mxu0 %v5702_v45  ;;  %v5748_v45 = vld [vmem:[%s7984_s3 + $0x3c0] ss:$8 sps:$4 sm:$0xff]  }
 0x1d9   :  { %2875 = vmatpush1.bf16.msra.mxu0 %v5700_v46  ;;  %v336_v46 = vsub.s32 6, %v6994_v2  ;;  %v5754_v2 = vld [vmem:[%s7984_s3 + $0x3e0] ss:$8 sps:$4 sm:$0xff]  }
 0x1da   :  { %2876 = vmatprep.subr.bf16.mxu0 %v5705_v47  ;;  %v5753_v47 = vld [vmem:[%s7984_s3 + $0x3d4] ss:$8 sps:$4 sm:$0xff]  }
 0x1dd   :  { %2877 = vmatpush1.bf16.msra.mxu0 %v5703_v49  ;;  %v337_v49 = vrot.slane %v7002_v4, %v336_v46  ;;  %v5757_v4 = vld [vmem:[%s7984_s3 + $0x3f0] ss:$8 sps:$4 sm:$0xff]  }
 0x1de   :  { %2878 = vmatprep.subr.bf16.mxu0 %v5708_v51  ;;  %v5799_v46 = vld [vmem:[%s7987_s7 + $0xac] ss:$76 sps:$4 sm:$0xff]  }
 0x1df   :  { %v1883_v60 = vpop.f32.mrb[4].mxu0  ;;  %v7246_v62 = vpop.f32.mrb[4].mxu1 }
 0x1e0   :  { %v5520_v61 = vadd.f32 %v1883_v60, %v329_v54  ;;  %v1885_v63 = vpop.f32.mrb[5].mxu0  ;;  %v1967_v1 = vpop.f32.mrb[5].mxu1  ;;  %v5522_v51 = vadd.f32 %v7246_v62, %v337_v49  ;;  %v5775_v60 = vld [vmem:[%s7986_s5 + $0x38] sm:$0xff]   ;;  %v2116_v62 = vld [vmem:[%s7988_s4] sm:$0x3] }
 0x1e1   :  { %v5521_v0 = vadd.f32 %v1885_v63, %v333_v56  ;;  %2879 = vmatpush1.bf16.msra.mxu0 %v5706_v55  ;;  %v1887_v6 = vpop.f32.mrb[6].mxu0  ;;  %v5523_v9 = vadd.f32 %v1967_v1, %v341_v58  ;;  %v1969_v10 = vpop.f32.mrb[6].mxu1  ;;  %v5772_v56 = vld [vmem:[%s7986_s5 + $0x70] sm:$0xff]   ;;  %v2121_v63 = vrot.slane %v2116_v62, %v6997_v3  ;;  %v5800_v49 = vld [vmem:[%s7987_s7 + $0x140] ss:$76 sps:$4 sm:$0x3f]  }
 0x1e2   :  { %v1976_v8 = vmax.f32 %v5520_v61, 0.0  ;;  %v1888_v11 = vpop.f32.mrb[7].mxu0  ;;  %2880 = vmatprep.subr.bf16.mxu0 %v5711_v59  ;;  %v1970_v16 = vpop.f32.mrb[7].mxu1  ;;  %v1978_v54 = vmax.f32 %v5522_v51, 0.0  ;;  %v5773_v58 = vld [vmem:[%s7986_s5 + $0x30] sm:$0xff]   ;;  %5434 = vmatprep.subr.bf16.mxu1 %v5772_v56  ;;  %v5774_v59 = vld [vmem:[%s7986_s5 + $0x78] sm:$0xff]  }
 0x1e3   :  { %v1977_v14 = vmax.f32 %v5521_v0, 0.0  ;;  %v1979_v17 = vmax.f32 %v5523_v9, 0.0  ;;  %5435 = vmatpush3.bf16.msra.mxu1 %v5773_v58  ;;  %v5778_v61 = vld [vmem:[%s7987_s7 + $0x4] ss:$76 sps:$4 sm:$0xff]   ;;  %v2125_v0 = vrot.slane %v2116_v62, %v7005_v5  ;;  %v5776_v16 = vld [vmem:[%s7987_s7] ss:$76 sps:$4 sm:$0xff]  }
 0x1e4   :  { %v1984_v19 = vpack.c.bf16 %v1976_v8, %v1976_v8  ;;  %v1986_v55 = vpack.c.bf16 %v1978_v54, %v1978_v54  ;;  %5436 = vmatprep.subr.bf16.mxu1 %v5774_v59  ;;  %v5805_v51 = vld [vmem:[%s7987_s7 + $0x1c] ss:$76 sps:$4 sm:$0xff]   ;;  %v5811_v54 = vld [vmem:[%s7987_s7 + $0x14c] ss:$76 sps:$4 sm:$0x3f]   ;;  %v5891_v58 = vld [vmem:[%s7993_s11] sm:$0xff]  }
 0x1e5   :  { %v1985_v53 = vpack.c.bf16 %v1977_v14, %v1977_v14  ;;  %2881 = vmatpush1.bf16.msra.mxu0 %v5709_v7  ;;  %v1987_v23 = vpack.c.bf16 %v1979_v17, %v1979_v17  ;;  %v5806_v56 = vld [vmem:[%s7987_s7 + $0xb0] ss:$76 sps:$4 sm:$0xff]   ;;  %v5809_v59 = vld [vmem:[%s7987_s7 + $0x148] ss:$76 sps:$4 sm:$0x3f]  }
 0x1e6   :  { %2891 = vmatprep.subr.bf16.mxu0 %v5714_v13  ;;  %v5896_v62 = vld [vmem:[%s7993_s11 + $0x8] sm:$0xff]  }
 0x1e7   :  { %2882 = vmatprep.mubr.bf16.mxu0 %v1985_v53  ;;  %5437 = vmatpush3.bf16.msra.mxu1 %v5775_v60  ;;  %v5781_v53 = vld [vmem:[%s7987_s7 + $0x9c] ss:$76 sps:$4 sm:$0xff]  }
 0x1e8   :  { %2883 = vmatmul.mubr.bf16.vlgmr.msra.gmra.mrb[8].mxu0 %v1984_v19  ;;  %3507 = vmatprep.subr.bf16.mxu1 %v5778_v61  ;;  %v5784_v19 = vld [vmem:[%s7987_s7 + $0x134] ss:$76 sps:$4 sm:$0x3f]   ;;  %v5895_v61 = vld [vmem:[%s7993_s11 + $0x48] sm:$0xff]  }
 0x1e9   :  { %2892 = vmatpush1.bf16.msra.mxu0 %v5712_v18  ;;  %2923 = vmatprep.mubr.bf16.mxu0 %v1987_v23  ;;  %v5779_v18 = vld [vmem:[%s7987_s7 + $0x98] ss:$76 sps:$4 sm:$0xff]  }
 0x1ea   :  { %2893 = vmatprep.subr.bf16.mxu0 %v5717_v20  ;;  %v5991_v20 = vmov 65535  }
 0x1eb   :  { %v3448_v23 = vsel %vm3446_vm0, 4294967295, %v5991_v20  ;;  %v5915_v20 = vld [vmem:[%s7993_s11 + $0x68] sm:$0xff]  }
 0x1ed   :  { %2894 = vmatpush1.bf16.msra.mxu0 %v5715_v24  ;;  %v5782_v24 = vld [vmem:[%s7987_s7 + $0x130] ss:$76 sps:$4 sm:$0x3f]  }
 0x1ee   :  { %2895 = vmatprep.subr.bf16.mxu0 %v5720_v25  ;;  %v7386_v25 = vsel %vm3447_vm1, %v3448_v23, 0  ;;  %v5821_v23 = vld [vmem:[%s7987_s7 + $0x28] ss:$76 sps:$4 sm:$0xff]  }
 0x1ef   :  { %v3472_v60 = vand.u32 %v5811_v54, %v7386_v25  ;;  %v5844_v54 = vld [vmem:[%s7987_s7 + $0xd4] ss:$76 sps:$4 sm:$0xff]  }
 0x1f1   :  { %2896 = vmatpush1.bf16.msra.mxu0 %v5718_v26  ;;  %v3454_v26 = vand.u32 %v5784_v19, %v7386_v25  ;;  %v5823_v19 = vld [vmem:[%s7987_s7 + $0x2c] ss:$76 sps:$4 sm:$0xff]  }
 0x1f2   :  { %2897 = vmatprep.subr.bf16.mxu0 %v5723_v27  ;;  %v3451_v27 = vand.u32 %v5782_v24, %v7386_v25  ;;  %v5916_v24 = vld [vmem:[%s7993_s11 + $0x28] sm:$0xff]  }
 0x1f5   :  { %2898 = vmatpush1.bf16.msra.mxu0 %v5721_v28  ;;  %v5787_v28 = vld [vmem:[%s7987_s7 + $0xc] ss:$76 sps:$4 sm:$0xff]  }
 0x1f6   :  { %2899 = vmatprep.subr.bf16.mxu0 %v5726_v15  ;;  %v5992_v15 = vmov 0  }
 0x1f9   :  { %2900 = vmatpush1.bf16.msra.mxu0 %v5724_v29 }
 0x1fa   :  { %2901 = vmatprep.subr.bf16.mxu0 %v5729_v30  ;;  %v5237_v30 = vld [vmem:[%s7991_s6] ss:$0 sm:$0xff] }
 0x1fd   :  { %2902 = vmatpush1.bf16.msra.mxu0 %v5727_v31 }
 0x1fe   :  { %2903 = vmatprep.subr.bf16.mxu0 %v5732_v32 }
 0x201   :  { %2904 = vmatpush1.bf16.msra.mxu0 %v5730_v33 }
 0x202   :  { %2905 = vmatprep.subr.bf16.mxu0 %v5735_v34 }
 0x205   :  { %2906 = vmatpush1.bf16.msra.mxu0 %v5733_v35  ;;  %v5785_v35 = vld [vmem:[%s7987_s7 + $0x8] ss:$76 sps:$4 sm:$0xff]  }
 0x206   :  { %2907 = vmatprep.subr.bf16.mxu0 %v5738_v36 }
 0x209   :  { %2908 = vmatpush1.bf16.msra.mxu0 %v5736_v37  ;;  %v5790_v37 = vld [vmem:[%s7987_s7 + $0xa4] ss:$76 sps:$4 sm:$0xff]  }
 0x20a   :  { %2909 = vmatprep.subr.bf16.mxu0 %v5741_v38  ;;  %v5793_v38 = vld [vmem:[%s7987_s7 + $0x13c] ss:$76 sps:$4 sm:$0x3f]  }
 0x20d   :  { %2910 = vmatpush1.bf16.msra.mxu0 %v5739_v39 }
 0x20e   :  { %2911 = vmatprep.subr.bf16.mxu0 %v5744_v40  ;;  %v5788_v40 = vld [vmem:[%s7987_s7 + $0xa0] ss:$76 sps:$4 sm:$0xff]  }
 0x211   :  { %2912 = vmatpush1.bf16.msra.mxu0 %v5742_v41  ;;  %v5791_v41 = vld [vmem:[%s7987_s7 + $0x138] ss:$76 sps:$4 sm:$0x3f]  }
 0x212   :  { %2913 = vmatprep.subr.bf16.mxu0 %v5747_v42  ;;  %v3460_v42 = vand.u32 %v5793_v38, %v7386_v25  ;;  %v5931_v38 = vld [vmem:[%s7993_s11 + $0x80] sm:$0xff]  }
 0x215   :  { %2914 = vmatpush1.bf16.msra.mxu0 %v5745_v43  ;;  %v3457_v43 = vand.u32 %v5791_v41, %v7386_v25  ;;  %v5835_v41 = vld [vmem:[%s7987_s7 + $0xcc] ss:$76 sps:$4 sm:$0xff]  }
 0x216   :  { %2915 = vmatprep.subr.bf16.mxu0 %v5750_v44  ;;  %v5796_v44 = vld [vmem:[%s7987_s7 + $0x14] ss:$76 sps:$4 sm:$0xff]  }
 0x219   :  { %2916 = vmatpush1.bf16.msra.mxu0 %v5748_v45  ;;  %v5794_v45 = vld [vmem:[%s7987_s7 + $0x10] ss:$76 sps:$4 sm:$0xff]  }
 0x21a   :  { %2917 = vmatprep.subr.bf16.mxu0 %v5753_v47  ;;  %v5802_v47 = vld [vmem:[%s7987_s7 + $0x144] ss:$76 sps:$4 sm:$0x3f]  }
 0x21d   :  { %2918 = vmatpush1.bf16.msra.mxu0 %v5751_v48  ;;  %v5797_v48 = vld [vmem:[%s7987_s7 + $0xa8] ss:$76 sps:$4 sm:$0xff]  }
 0x21e   :  { %2919 = vmatprep.subr.bf16.mxu0 %v5756_v50  ;;  %v3466_v50 = vand.u32 %v5802_v47, %v7386_v25 }
 0x221   :  { %2920 = vmatpush1.bf16.msra.mxu0 %v5754_v2  ;;  %v3463_v2 = vand.u32 %v5800_v49, %v7386_v25  ;;  %v5941_v49 = vld [vmem:[%s7993_s11 + $0x90] sm:$0xff]  }
 0x222   :  { %2921 = vmatprep.subr.bf16.mxu0 %v5759_v52  ;;  %v5803_v52 = vld [vmem:[%s7987_s7 + $0x18] ss:$76 sps:$4 sm:$0xff]  }
 0x225   :  { %2922 = vmatpush1.bf16.msra.mxu0 %v5757_v4  ;;  %v5808_v4 = vld [vmem:[%s7987_s7 + $0xb4] ss:$76 sps:$4 sm:$0xff]  }
 0x228   :  { %2924 = vmatmul.mubr.bf16.vlgmr.msra.gmra.mrb[8].mxu0 %v1986_v55  ;;  %v5890_v55 = vld [vmem:[%s7993_s11 + $0x40] sm:$0xff]  }
 0x229   :  { %4779 = vmatprep.mubr.bf16.mxu0 %v6182_v57  ;;  %5452 = vmatprep.subr.bf16.mxu0 %v5890_v55  ;;  %v5847_v55 = vld [vmem:[%s7987_s7 + $0x16c] ss:$76 sps:$4 sm:$0x3f]  }
 0x22a   :  { %5453 = vmatpush3.bf16.msra.mxu0 %v5891_v58  ;;  %v5951_v58 = vld [vmem:[%s7993_s11 + $0xa0] sm:$0xff]  }
 0x22b   :  { %5454 = vmatprep.subr.bf16.mxu0 %v5895_v61  ;;  %v3496_v61 = vand.u32 %v5847_v55, %v7386_v25  ;;  %v5917_v55 = vld [vmem:[%s7990_s9 + $0xe0] ss:$8 sps:$4 sm:$0xff]  }
 0x22e   :  { %5455 = vmatpush3.bf16.msra.mxu0 %v5896_v62  ;;  %v5955_v62 = vld [vmem:[%s7993_s11 + $0xe8] sm:$0xff]  }
 0x2fb   :  { %v2925_v1 = vpop.f32.mrb[8].mxu0 }
 0x2fc   :  { %v5524_v6 = vadd.f32 %v2925_v1, %v2121_v63  ;;  %v2927_v7 = vpop.f32.mrb[9].mxu0  ;;  %v3469_v63 = vand.u32 %v5809_v59, %v7386_v25  ;;  %v5900_v1 = vld [vmem:[%s7993_s11 + $0x50] sm:$0xff]  }
 0x2fd   :  { %v5525_v8 = vadd.f32 %v2927_v7, %v2125_v0  ;;  %v2929_v9 = vpop.f32.mrb[10].mxu0  ;;  %v5814_v0 = vld [vmem:[%s7987_s7 + $0x24] ss:$76 sps:$4 sm:$0xff]   ;;  %5456 = vmatprep.subr.bf16.mxu0 %v5900_v1 }
 0x2fe   :  { %v2932_v10 = vmax.f32 %v5524_v6, 0.0  ;;  %v2930_v11 = vpop.f32.mrb[11].mxu0  ;;  %v5812_v6 = vld [vmem:[%s7987_s7 + $0x20] ss:$76 sps:$4 sm:$0xff]   ;;  %v5901_v7 = vld [vmem:[%s7993_s11 + $0x10] sm:$0xff]  }
 0x2ff   :  { %v2933_v13 = vmax.f32 %v5525_v8, 0.0  ;;  %v5817_v8 = vld [vmem:[%s7987_s7 + $0xbc] ss:$76 sps:$4 sm:$0xff]   ;;  %v5820_v9 = vld [vmem:[%s7987_s7 + $0x154] ss:$76 sps:$4 sm:$0x3f]   ;;  %5457 = vmatpush3.bf16.msra.mxu0 %v5901_v7 }
 0x300   :  { %v2934_v17 = vpack.c.bf16 %v2932_v10, %v2932_v10  ;;  %v5905_v10 = vld [vmem:[%s7993_s11 + $0x58] sm:$0xff]   ;;  %v5850_v1 = vld [vmem:[%s7987_s7 + $0x44] ss:$76 sps:$4 sm:$0xff]  }
 0x301   :  { %v2935_v14 = vpack.c.bf16 %v2933_v13, %v2933_v13  ;;  %v5815_v11 = vld [vmem:[%s7987_s7 + $0xb8] ss:$76 sps:$4 sm:$0xff]   ;;  %5458 = vmatprep.subr.bf16.mxu0 %v5905_v10  ;;  %v5842_v59 = vld [vmem:[%s7987_s7 + $0xd0] ss:$76 sps:$4 sm:$0xff]  }
 0x302   :  { %v5906_v13 = vld [vmem:[%s7993_s11 + $0x18] sm:$0xff]   ;;  %v5961_v7 = vld [vmem:[%s7993_s11 + $0xb0] sm:$0xff]  }
 0x303   :  { %3103 = vmatprep.mubr.bf16.mxu1 %v2935_v14  ;;  %v5818_v14 = vld [vmem:[%s7987_s7 + $0x150] ss:$76 sps:$4 sm:$0x3f]   ;;  %5459 = vmatpush3.bf16.msra.mxu0 %v5906_v13  ;;  %v5856_v10 = vld [vmem:[%s7987_s7 + $0x174] ss:$76 sps:$4 sm:$0x3f]  }
 0x304   :  { %3104 = vmatmul.mubr.bf16.vlgmr.msra.gmra.mrb[8].mxu1 %v2934_v17  ;;  %v5910_v17 = vld [vmem:[%s7993_s11 + $0x60] sm:$0xff]   ;;  %v5966_v13 = vld [vmem:[%s7993_s11 + $0xb8] sm:$0xff]  }
 0x305   :  { %3508 = vmatpush1.bf16.msra.mxu1 %v5776_v16  ;;  %3539 = vmatprep.mubr.bf16.mxu1 %v5992_v15  ;;  %v3478_v16 = vand.u32 %v5820_v9, %v7386_v25  ;;  %v5853_v9 = vld [vmem:[%s7987_s7 + $0xdc] ss:$76 sps:$4 sm:$0xff]  }
 0x306   :  { %3509 = vmatprep.subr.bf16.mxu1 %v5781_v53  ;;  %v5911_v53 = vld [vmem:[%s7993_s11 + $0x20] sm:$0xff]   ;;  %5460 = vmatprep.subr.bf16.mxu0 %v5910_v17  ;;  %v3502_v17 = vand.u32 %v5856_v10, %v7386_v25 }
 0x307   :  { %5461 = vmatpush3.bf16.msra.mxu0 %v5911_v53  ;;  %v5957_v10 = vld [vmem:[%s7990_s9 + $0x160] ss:$8 sps:$4 sm:$0xff]  }
 0x308   :  { %5462 = vmatprep.subr.bf16.mxu0 %v5915_v20  ;;  %v5859_v20 = vld [vmem:[%s7987_s7 + $0x178] ss:$76 sps:$4 sm:$0x3f]  }
 0x309   :  { %3510 = vmatpush1.bf16.msra.mxu1 %v5779_v18  ;;  %v3475_v18 = vand.u32 %v5818_v14, %v7386_v25  ;;  %v5851_v14 = vld [vmem:[%s7987_s7 + $0xd8] ss:$76 sps:$4 sm:$0xff]  }
 0x30a   :  { %3511 = vmatprep.subr.bf16.mxu1 %v3454_v26  ;;  %v5826_v26 = vld [vmem:[%s7987_s7 + $0xc4] ss:$76 sps:$4 sm:$0xff]  }
 0x30b   :  { %5463 = vmatpush3.bf16.msra.mxu0 %v5916_v24  ;;  %v5860_v24 = vld [vmem:[%s7989_s8] sm:$0xff]  }
 0x30d   :  { %3512 = vmatpush1.bf16.msra.mxu1 %v3451_v27  ;;  %v5829_v27 = vld [vmem:[%s7987_s7 + $0x15c] ss:$76 sps:$4 sm:$0x3f]  }
 0x30e   :  { %3548 = vmatprep.subr.bf16.mxu1 %v5787_v28  ;;  %v5920_v28 = vld [vmem:[%s7993_s11 + $0x70] sm:$0xff]  }
 0x30f   :  { %5464 = vmatprep.subr.bf16.mxu0 %v5920_v28 }
 0x3d7   :  { %v5438_v29 = vpop.f32.mrb[8].mxu1 }
 0x3d8   :  { %v5439_v31 = vpop.f32.mrb[9].mxu1 }
 0x3d9   :  { %v5440_v32 = vadd.f32 %v5439_v31, %v5438_v29  ;;  %v5441_v33 = vpop.f32.mrb[10].mxu1  ;;  %v5824_v29 = vld [vmem:[%s7987_s7 + $0xc0] ss:$76 sps:$4 sm:$0xff]   ;;  %v5827_v31 = vld [vmem:[%s7987_s7 + $0x158] ss:$76 sps:$4 sm:$0x3f]  }
 0x3da   :  { %v5442_v34 = vpop.f32.mrb[11].mxu1  ;;  %v5925_v33 = vld [vmem:[%s7993_s11 + $0x78] sm:$0xff]  }
 0x3db   :  { %v3106_v36 = vadd.f32 %v5440_v32, %v5237_v30  ;;  %v5921_v30 = vld [vmem:[%s7993_s11 + $0x30] sm:$0xff]   ;;  %v3484_v32 = vand.u32 %v5829_v27, %v7386_v25  ;;  %v5926_v34 = vld [vmem:[%s7993_s11 + $0x38] sm:$0xff]  }
 0x3dc   :  { %5465 = vmatpush3.bf16.msra.mxu0 %v5921_v30  ;;  %v5862_v27 = vld [vmem:[%s7989_s8 + $0x10] sm:$0x3f]   ;;  %v5863_v30 = vld [vmem:[%s7990_s9] ss:$8 sps:$4 sm:$0xff]  }
 0x3dd   :  { %3112 = vst.msk [vmem:[%s7992_s13] sm:$0xff] %vm3111_vm2, %v3106_v36  ;;  %v7410_v39 = vpack.c.bf16 %v3106_v36, %v3106_v36  ;;  %5466 = vmatprep.subr.bf16.mxu0 %v5925_v33  ;;  %v5832_v36 = vld [vmem:[%s7987_s7 + $0x34] ss:$76 sps:$4 sm:$0xff]   ;;  %v3960_v28 = vand.u32 %v5862_v27, %v7386_v25 }
 0x3de   :  { %v5869_v33 = vld [vmem:[%s7990_s9 + $0x20] ss:$8 sps:$4 sm:$0xff]  }
 0x3df   :  { %5311 = vmatmul.mubr.msk.bf16.vlgmr.msra.gmra.mrb[12].mxu1 %vm3111_vm2, %v7410_v39 }
 0x3e0   :  { %3549 = vmatpush1.bf16.msra.mxu1 %v5785_v35  ;;  %3580 = vmatprep.mubr.bf16.mxu1 %v5992_v15  ;;  %v3481_v35 = vand.u32 %v5827_v31, %v7386_v25  ;;  %v5868_v31 = vld [vmem:[%s7990_s9 + $0x14] ss:$8 sps:$4 sm:$0xff]  }
 0x3e1   :  { %3550 = vmatprep.subr.bf16.mxu1 %v5790_v37  ;;  %5467 = vmatpush3.bf16.msra.mxu0 %v5926_v34  ;;  %v5930_v37 = vld [vmem:[%s7993_s11 + $0xc0] sm:$0xff]  }
 0x3e2   :  { %5474 = vmatprep.subr.bf16.mxu0 %v5930_v37  ;;  %v5877_v34 = vld [vmem:[%s7990_s9 + $0x44] ss:$8 sps:$4 sm:$0xff]   ;;  %v5878_v37 = vld [vmem:[%s7990_s9 + $0x50] ss:$8 sps:$4 sm:$0xff]  }
 0x3e4   :  { %3551 = vmatpush1.bf16.msra.mxu1 %v5788_v40  ;;  %v5830_v40 = vld [vmem:[%s7987_s7 + $0x30] ss:$76 sps:$4 sm:$0xff]   ;;  %4780 = vmatmul.mubr.bf16.vlgmr.msra.gmra.mrb[12].mxu0 %v6308_v12 }
 0x3e5   :  { %3552 = vmatprep.subr.bf16.mxu1 %v3460_v42  ;;  %v5838_v42 = vld [vmem:[%s7987_s7 + $0x164] ss:$76 sps:$4 sm:$0x3f]   ;;  %5475 = vmatpush3.bf16.msra.mxu0 %v5931_v38 }
 0x3e6   :  { %4819 = vmatprep.mubr.bf16.mxu0 %v6329_v21  ;;  %v3490_v47 = vand.u32 %v5838_v42, %v7386_v25  ;;  %v5883_v38 = vld [vmem:[%s7990_s9 + $0x64] ss:$8 sps:$4 sm:$0xff]   ;;  %v5884_v42 = vld [vmem:[%s7990_s9 + $0x70] ss:$8 sps:$4 sm:$0xff]  }
 0x3e8   :  { %3553 = vmatpush1.bf16.msra.mxu1 %v3457_v43  ;;  %v5935_v43 = vld [vmem:[%s7993_s11 + $0xc8] sm:$0xff]  }
 0x3e9   :  { %3589 = vmatprep.subr.bf16.mxu1 %v5796_v44  ;;  %v5936_v44 = vld [vmem:[%s7993_s11 + $0x88] sm:$0xff]   ;;  %5476 = vmatprep.subr.bf16.mxu0 %v5935_v43 }
 0x3ea   :  { %5477 = vmatpush3.bf16.msra.mxu0 %v5936_v44  ;;  %v5889_v43 = vld [vmem:[%s7990_s9 + $0x84] ss:$8 sps:$4 sm:$0xff]   ;;  %v5887_v44 = vld [vmem:[%s7990_s9 + $0x80] ss:$8 sps:$4 sm:$0xff]  }
 0x3eb   :  { %5312 = vmatmul.mubr.msk.bf16.vlgmr.msra.gmra.mrb[16].mxu1 %vm3111_vm2, %v7410_v39 }
 0x3ec   :  { %3590 = vmatpush1.bf16.msra.mxu1 %v5794_v45  ;;  %3621 = vmatprep.mubr.bf16.mxu1 %v5992_v15  ;;  %v5833_v45 = vld [vmem:[%s7987_s7 + $0xc8] ss:$76 sps:$4 sm:$0xff]  }
 0x3ed   :  { %3591 = vmatprep.subr.bf16.mxu1 %v5799_v46  ;;  %v5836_v46 = vld [vmem:[%s7987_s7 + $0x160] ss:$76 sps:$4 sm:$0x3f]  }
 0x3f0   :  { %3592 = vmatpush1.bf16.msra.mxu1 %v5797_v48  ;;  %v5940_v48 = vld [vmem:[%s7993_s11 + $0xd0] sm:$0xff]  }
 0x3f1   :  { %3593 = vmatprep.subr.bf16.mxu1 %v3466_v50  ;;  %5478 = vmatprep.subr.bf16.mxu0 %v5940_v48  ;;  %v3487_v50 = vand.u32 %v5836_v46, %v7386_v25  ;;  %v5892_v46 = vld [vmem:[%s7990_s9 + $0x90] ss:$8 sps:$4 sm:$0xff]   ;;  %v5897_v48 = vld [vmem:[%s7990_s9 + $0xa0] ss:$8 sps:$4 sm:$0xff]  }
 0x3f2   :  { %5479 = vmatpush3.bf16.msra.mxu0 %v5941_v49  ;;  %v5904_v49 = vld [vmem:[%s7990_s9 + $0xb4] ss:$8 sps:$4 sm:$0xff]  }
 0x3f4   :  { %3594 = vmatpush1.bf16.msra.mxu1 %v3463_v2  ;;  %v5841_v2 = vld [vmem:[%s7987_s7 + $0x3c] ss:$76 sps:$4 sm:$0xff]  }
 0x3f5   :  { %3630 = vmatprep.subr.bf16.mxu1 %v5805_v51  ;;  %v5945_v51 = vld [vmem:[%s7993_s11 + $0xd8] sm:$0xff]  }
 0x3f6   :  { %5480 = vmatprep.subr.bf16.mxu0 %v5945_v51  ;;  %v5907_v51 = vld [vmem:[%s7990_s9 + $0xc0] ss:$8 sps:$4 sm:$0xff]  }
 0x3f7   :  { %5313 = vmatmul.mubr.msk.bf16.vlgmr.msra.gmra.mrb[20].mxu1 %vm3111_vm2, %v7410_v39 }
 0x3f8   :  { %3631 = vmatpush1.bf16.msra.mxu1 %v5803_v52  ;;  %3662 = vmatprep.mubr.bf16.mxu1 %v5992_v15  ;;  %v5946_v52 = vld [vmem:[%s7993_s11 + $0x98] sm:$0xff]  }
 0x3f9   :  { %3632 = vmatprep.subr.bf16.mxu1 %v5808_v4  ;;  %v5839_v4 = vld [vmem:[%s7987_s7 + $0x38] ss:$76 sps:$4 sm:$0xff]   ;;  %5481 = vmatpush3.bf16.msra.mxu0 %v5946_v52  ;;  %v5914_v52 = vld [vmem:[%s7990_s9 + $0xd4] ss:$8 sps:$4 sm:$0xff]  }
 0x3fc   :  { %3633 = vmatpush1.bf16.msra.mxu1 %v5806_v56  ;;  %v5950_v56 = vld [vmem:[%s7993_s11 + $0xe0] sm:$0xff]  }
 0x3fd   :  { %3634 = vmatprep.subr.bf16.mxu1 %v3472_v60  ;;  %5482 = vmatprep.subr.bf16.mxu0 %v5950_v56  ;;  %v5845_v60 = vld [vmem:[%s7987_s7 + $0x168] ss:$76 sps:$4 sm:$0x3f]  }
 0x3fe   :  { %5483 = vmatpush3.bf16.msra.mxu0 %v5951_v58  ;;  %v5924_v56 = vld [vmem:[%s7990_s9 + $0xf4] ss:$8 sps:$4 sm:$0xff]   ;;  %v5922_v58 = vld [vmem:[%s7990_s9 + $0xf0] ss:$8 sps:$4 sm:$0xff]  }
 0x3ff   :  { %5484 = vmatprep.subr.bf16.mxu0 %v5955_v62  ;;  %v5932_v62 = vld [vmem:[%s7990_s9 + $0x110] ss:$8 sps:$4 sm:$0xff]  }
 0x400   :  { %3635 = vmatpush1.bf16.msra.mxu1 %v3469_v63  ;;  %v5956_v63 = vld [vmem:[%s7993_s11 + $0xa8] sm:$0xff]  }
 0x401   :  { %3671 = vmatprep.subr.bf16.mxu1 %v5814_v0  ;;  %v3493_v0 = vand.u32 %v5845_v60, %v7386_v25  ;;  %v5927_v60 = vld [vmem:[%s7990_s9 + $0x100] ss:$8 sps:$4 sm:$0xff]  }
 0x402   :  { %5485 = vmatpush3.bf16.msra.mxu0 %v5956_v63  ;;  %v5939_v63 = vld [vmem:[%s7990_s9 + $0x124] ss:$8 sps:$4 sm:$0xff]  }
 0x403   :  { %5314 = vmatmul.mubr.msk.bf16.vlgmr.msra.gmra.mrb[24].mxu1 %vm3111_vm2, %v7410_v39 }
 0x404   :  { %3672 = vmatpush1.bf16.msra.mxu1 %v5812_v6  ;;  %3703 = vmatprep.mubr.bf16.mxu1 %v5992_v15  ;;  %v5960_v6 = vld [vmem:[%s7993_s11 + $0xf0] sm:$0xff]  }
 0x405   :  { %3673 = vmatprep.subr.bf16.mxu1 %v5817_v8  ;;  %5486 = vmatprep.subr.bf16.mxu0 %v5960_v6  ;;  %v5848_v8 = vld [vmem:[%s7987_s7 + $0x40] ss:$76 sps:$4 sm:$0xff]  }
 0x406   :  { %5487 = vmatpush3.bf16.msra.mxu0 %v5961_v7  ;;  %v5947_v6 = vld [vmem:[%s7990_s9 + $0x140] ss:$8 sps:$4 sm:$0xff]   ;;  %v5954_v7 = vld [vmem:[%s7990_s9 + $0x154] ss:$8 sps:$4 sm:$0xff]  }
 0x408   :  { %3674 = vmatpush1.bf16.msra.mxu1 %v5815_v11  ;;  %v5965_v11 = vld [vmem:[%s7993_s11 + $0xf8] sm:$0xff]  }
 0x409   :  { %3675 = vmatprep.subr.bf16.mxu1 %v3478_v16  ;;  %5488 = vmatprep.subr.bf16.mxu0 %v5965_v11  ;;  %v5854_v16 = vld [vmem:[%s7987_s7 + $0x170] ss:$76 sps:$4 sm:$0x3f]  }
 0x40a   :  { %5489 = vmatpush3.bf16.msra.mxu0 %v5966_v13  ;;  %v3499_v53 = vand.u32 %v5854_v16, %v7386_v25  ;;  %v5964_v11 = vld [vmem:[%s7990_s9 + $0x174] ss:$8 sps:$4 sm:$0xff]   ;;  %v5962_v13 = vld [vmem:[%s7990_s9 + $0x170] ss:$8 sps:$4 sm:$0xff]  }
 0x40c   :  { %3676 = vmatpush1.bf16.msra.mxu1 %v3475_v18  ;;  %v5857_v18 = vld [vmem:[%s7987_s7 + $0x48] ss:$76 sps:$4 sm:$0xff]  }
 0x40d   :  { %3712 = vmatprep.subr.bf16.mxu1 %v5823_v19  ;;  %4820 = vmatmul.mubr.bf16.vlgmr.msra.gmra.mrb[16].mxu0 %v6517_v22  ;;  %v5993_v19 = vmov 0.0  }
 0x40f   :  { %5315 = vmatmul.mubr.msk.bf16.vlgmr.msra.gmra.mrb[28].mxu1 %vm3111_vm2, %v7410_v39 }
 0x410   :  { %3713 = vmatpush1.bf16.msra.mxu1 %v5821_v23  ;;  %3744 = vmatprep.mubr.bf16.mxu1 %v5992_v15  ;;  %v3505_v23 = vand.u32 %v5859_v20, %v7386_v25  ;;  %v5866_v25 = vld [vmem:[%s7990_s9 + $0x10] ss:$8 sps:$4 sm:$0xff]  }
 0x411   :  { %3714 = vmatprep.subr.bf16.mxu1 %v5826_v26  ;;  %v5861_v26 = vld [vmem:[%s7989_s8 + $0x8] sm:$0xff]   ;;  %v5970_v20 = vld [vmem:[%s7990_s9 + $0x190] ss:$8 sps:$4 sm:$0xff]  }
 0x414   :  { %3715 = vmatpush1.bf16.msra.mxu1 %v5824_v29  ;;  %v5865_v29 = vld [vmem:[%s7990_s9 + $0x4] ss:$8 sps:$4 sm:$0xff]  }
 0x415   :  { %3716 = vmatprep.subr.bf16.mxu1 %v3484_v32  ;;  %v5871_v32 = vld [vmem:[%s7990_s9 + $0x24] ss:$8 sps:$4 sm:$0xff]  }
 0x418   :  { %3717 = vmatpush1.bf16.msra.mxu1 %v3481_v35  ;;  %v5875_v35 = vld [vmem:[%s7990_s9 + $0x40] ss:$8 sps:$4 sm:$0xff]  }
 0x419   :  { %3753 = vmatprep.subr.bf16.mxu1 %v5832_v36  ;;  %v5880_v36 = vld [vmem:[%s7990_s9 + $0x54] ss:$8 sps:$4 sm:$0xff]  }
 0x41b   :  { %5316 = vmatmul.mubr.msk.bf16.vlgmr.msra.gmra.mrb[32].mxu1 %vm3111_vm2, %v7410_v39 }
 0x41c   :  { %3754 = vmatpush1.bf16.msra.mxu1 %v5830_v40  ;;  %3785 = vmatprep.mubr.bf16.mxu1 %v5992_v15  ;;  %v5881_v40 = vld [vmem:[%s7990_s9 + $0x60] ss:$8 sps:$4 sm:$0xff]  }
 0x41d   :  { %3755 = vmatprep.subr.bf16.mxu1 %v5835_v41  ;;  %v5886_v41 = vld [vmem:[%s7990_s9 + $0x74] ss:$8 sps:$4 sm:$0xff]  }
 0x420   :  { %3756 = vmatpush1.bf16.msra.mxu1 %v5833_v45  ;;  %v5894_v45 = vld [vmem:[%s7990_s9 + $0x94] ss:$8 sps:$4 sm:$0xff]  }
 0x421   :  { %3757 = vmatprep.subr.bf16.mxu1 %v3490_v47  ;;  %v5899_v47 = vld [vmem:[%s7990_s9 + $0xa4] ss:$8 sps:$4 sm:$0xff]  }
 0x424   :  { %3758 = vmatpush1.bf16.msra.mxu1 %v3487_v50  ;;  %v5902_v50 = vld [vmem:[%s7990_s9 + $0xb0] ss:$8 sps:$4 sm:$0xff]  }
 0x425   :  { %3794 = vmatprep.subr.bf16.mxu1 %v5841_v2  ;;  %v5909_v2 = vld [vmem:[%s7990_s9 + $0xc4] ss:$8 sps:$4 sm:$0xff]  }
 0x427   :  { %5317 = vmatmul.mubr.msk.bf16.vlgmr.msra.gmra.mrb[36].mxu1 %vm3111_vm2, %v7410_v39 }
 0x428   :  { %3795 = vmatpush1.bf16.msra.mxu1 %v5839_v4  ;;  %3826 = vmatprep.mubr.bf16.mxu1 %v5992_v15  ;;  %v5912_v4 = vld [vmem:[%s7990_s9 + $0xd0] ss:$8 sps:$4 sm:$0xff]  }
 0x429   :  { %3796 = vmatprep.subr.bf16.mxu1 %v5844_v54  ;;  %v5919_v54 = vld [vmem:[%s7990_s9 + $0xe4] ss:$8 sps:$4 sm:$0xff]  }
 0x42c   :  { %3797 = vmatpush1.bf16.msra.mxu1 %v5842_v59  ;;  %v5929_v59 = vld [vmem:[%s7990_s9 + $0x104] ss:$8 sps:$4 sm:$0xff]  }
 0x42d   :  { %3798 = vmatprep.subr.bf16.mxu1 %v3496_v61  ;;  %v5934_v61 = vld [vmem:[%s7990_s9 + $0x114] ss:$8 sps:$4 sm:$0xff]  }
 0x430   :  { %3799 = vmatpush1.bf16.msra.mxu1 %v3493_v0  ;;  %v5937_v0 = vld [vmem:[%s7990_s9 + $0x120] ss:$8 sps:$4 sm:$0xff]  }
 0x431   :  { %3835 = vmatprep.subr.bf16.mxu1 %v5850_v1  ;;  %v5949_v1 = vld [vmem:[%s7990_s9 + $0x144] ss:$8 sps:$4 sm:$0xff]  }
 0x433   :  { %5318 = vmatmul.mubr.msk.bf16.vlgmr.msra.gmra.mrb[40].mxu1 %vm3111_vm2, %v7410_v39 }
 0x434   :  { %3836 = vmatpush1.bf16.msra.mxu1 %v5848_v8  ;;  %3867 = vmatprep.mubr.bf16.mxu1 %v5992_v15  ;;  %v5858_v15 = vld [vmem:[%s7987_s7 + $0xe0] ss:$76 sps:$4 sm:$0xff]   ;;  %v5952_v8 = vld [vmem:[%s7990_s9 + $0x150] ss:$8 sps:$4 sm:$0xff]  }
 0x435   :  { %3837 = vmatprep.subr.bf16.mxu1 %v5853_v9  ;;  %v5959_v9 = vld [vmem:[%s7990_s9 + $0x164] ss:$8 sps:$4 sm:$0xff]  }
 0x438   :  { %3838 = vmatpush1.bf16.msra.mxu1 %v5851_v14  ;;  %v5969_v14 = vld [vmem:[%s7990_s9 + $0x184] ss:$8 sps:$4 sm:$0xff]  }
 0x439   :  { %3839 = vmatprep.subr.bf16.mxu1 %v3502_v17 }
 0x43c   :  { %3840 = vmatpush1.bf16.msra.mxu1 %v3499_v53 }
 0x43d   :  { %5496 = vmatprep.subr.bf16.mxu1 %v5993_v19 }
 0x43f   :  { %5319 = vmatmul.mubr.msk.bf16.vlgmr.msra.gmra.mrb[44].mxu1 %vm3111_vm2, %v7410_v39 }
 0x440   :  { %5497 = vmatpush3.bf16.msra.mxu1 %v5857_v18  ;;  %5502 = vmatprep.mubr.msk.bf16.mxu1 %vm5994_vm3, %v5993_v19  ;;  %v5967_v18 = vld [vmem:[%s7990_s9 + $0x180] ss:$8 sps:$4 sm:$0xff]  }
 0x441   :  { %5498 = vmatprep.subr.bf16.mxu1 %v5993_v19 }
 0x444   :  { %5499 = vmatpush3.bf16.msra.mxu1 %v5858_v15  ;;  %v5972_v15 = vld [vmem:[%s7990_s9 + $0x194] ss:$8 sps:$4 sm:$0xff]  }
 0x445   :  { %5500 = vmatprep.subr.bf16.mxu1 %v5993_v19 }
 0x448   :  { %5501 = vmatpush3.bf16.msra.mxu1 %v3505_v23  ;;  %v5975_v23 = vld [vmem:[%s7990_s9 + $0x1a4] ss:$8 sps:$4 sm:$0xff]  }
 0x449   :  { %5506 = vmatprep.subr.bf16.mxu1 %v5993_v19 }
 0x44b   :  { %5503 = vmatmul.mubr.msk.bf16.vlgmr.msra.gmra.mrb[48].mxu1 %vm3111_vm2, %v7410_v39 }
 0x44c   :  { %5507 = vmatpush3.bf16.msra.mxu1 %v5860_v24  ;;  %5512 = vmatprep.mubr.msk.bf16.mxu1 %vm5994_vm3, %v5993_v19  ;;  %v5973_v24 = vld [vmem:[%s7990_s9 + $0x1a0] ss:$8 sps:$4 sm:$0xff]  }
 0x44d   :  { %5508 = vmatprep.subr.bf16.mxu1 %v5993_v19 }
 0x450   :  { %5509 = vmatpush3.bf16.msra.mxu1 %v5861_v26  ;;  %v5978_v26 = vld [vmem:[%s7990_s9 + $0x1b4] ss:$8 sps:$4 sm:$0xff]  }
 0x451   :  { %5510 = vmatprep.subr.bf16.mxu1 %v5993_v19 }
 0x454   :  { %5511 = vmatpush3.bf16.msra.mxu1 %v3960_v28 }
 0x455   :  { %4400 = vmatprep.subr.bf16.mxu1 %v5865_v29 }
 0x457   :  { %5513 = vmatmul.mubr.msk.bf16.vlgmr.msra.gmra.mrb[52].mxu1 %vm3111_vm2, %v7410_v39  ;;  %v5874_v39 = vld [vmem:[%s7990_s9 + $0x34] ss:$8 sps:$4 sm:$0xff]  }
 0x458   :  { %4401 = vmatpush1.bf16.msra.mxu1 %v5863_v30  ;;  %4432 = vmatprep.mubr.bf16.mxu1 %v6182_v57  ;;  %v5872_v57 = vld [vmem:[%s7990_s9 + $0x30] ss:$8 sps:$4 sm:$0xff]  }
 0x459   :  { %4402 = vmatprep.subr.bf16.mxu1 %v5868_v31  ;;  %v5976_v30 = vld [vmem:[%s7990_s9 + $0x1b0] ss:$8 sps:$4 sm:$0xff]  }
 0x45c   :  { %4403 = vmatpush1.bf16.msra.mxu1 %v5866_v25  ;;  %v5981_v25 = vld [vmem:[%s7990_s9 + $0x1c4] ss:$8 sps:$4 sm:$0xff]  }
 0x45d   :  { %4404 = vmatprep.subr.bf16.mxu1 %v5871_v32  ;;  %v5979_v32 = vld [vmem:[%s7990_s9 + $0x1c0] ss:$8 sps:$4 sm:$0xff]  }
 0x460   :  { %4405 = vmatpush1.bf16.msra.mxu1 %v5869_v33  ;;  %v5984_v33 = vld [vmem:[%s7990_s9 + $0x1d4] ss:$8 sps:$4 sm:$0xff]  }
 0x461   :  { %4406 = vmatprep.subr.bf16.mxu1 %v5874_v39  ;;  %v5982_v39 = vld [vmem:[%s7990_s9 + $0x1d0] ss:$8 sps:$4 sm:$0xff]  }
 0x464   :  { %4407 = vmatpush1.bf16.msra.mxu1 %v5872_v57  ;;  %v5987_v57 = vld [vmem:[%s7990_s9 + $0x1e4] ss:$8 sps:$4 sm:$0xff]  }
 0x465   :  { %4408 = vmatprep.subr.bf16.mxu1 %v5877_v34 }
 0x468   :  { %4409 = vmatpush1.bf16.msra.mxu1 %v5875_v35 }
 0x469   :  { %4410 = vmatprep.subr.bf16.mxu1 %v5880_v36 }
 0x46c   :  { %4411 = vmatpush1.bf16.msra.mxu1 %v5878_v37  ;;  %v5985_v37 = vld [vmem:[%s7990_s9 + $0x1e0] ss:$8 sps:$4 sm:$0xff]  }
 0x46d   :  { %4412 = vmatprep.subr.bf16.mxu1 %v5883_v38 }
 0x470   :  { %4413 = vmatpush1.bf16.msra.mxu1 %v5881_v40  ;;  %v5990_v40 = vld [vmem:[%s7990_s9 + $0x1f4] ss:$8 sps:$4 sm:$0xff]  }
 0x471   :  { %4414 = vmatprep.subr.bf16.mxu1 %v5886_v41  ;;  %v5988_v41 = vld [vmem:[%s7990_s9 + $0x1f0] ss:$8 sps:$4 sm:$0xff]  }
 0x474   :  { %4415 = vmatpush1.bf16.msra.mxu1 %v5884_v42 }
 0x475   :  { %4416 = vmatprep.subr.bf16.mxu1 %v5889_v43 }
 0x478   :  { %4417 = vmatpush1.bf16.msra.mxu1 %v5887_v44 }
 0x479   :  { %4418 = vmatprep.subr.bf16.mxu1 %v5894_v45 }
 0x47c   :  { %4419 = vmatpush1.bf16.msra.mxu1 %v5892_v46 }
 0x47d   :  { %4420 = vmatprep.subr.bf16.mxu1 %v5899_v47 }
 0x480   :  { %4421 = vmatpush1.bf16.msra.mxu1 %v5897_v48 }
 0x481   :  { %4422 = vmatprep.subr.bf16.mxu1 %v5904_v49 }
 0x484   :  { %4423 = vmatpush1.bf16.msra.mxu1 %v5902_v50 }
 0x485   :  { %4424 = vmatprep.subr.bf16.mxu1 %v5909_v2 }
 0x488   :  { %4425 = vmatpush1.bf16.msra.mxu1 %v5907_v51 }
 0x489   :  { %4426 = vmatprep.subr.bf16.mxu1 %v5914_v52 }
 0x48c   :  { %4427 = vmatpush1.bf16.msra.mxu1 %v5912_v4 }
 0x48d   :  { %4428 = vmatprep.subr.bf16.mxu1 %v5919_v54 }
 0x490   :  { %4429 = vmatpush1.bf16.msra.mxu1 %v5917_v55 }
 0x491   :  { %4430 = vmatprep.subr.bf16.mxu1 %v5924_v56 }
 0x494   :  { %4431 = vmatpush1.bf16.msra.mxu1 %v5922_v58 }
 0x495   :  { %4441 = vmatprep.subr.bf16.mxu1 %v5929_v59 }
 0x497   :  { %4433 = vmatmul.mubr.bf16.vlgmr.msra.gmra.mrb[56].mxu1 %v6308_v12  ;;  %v5944_v12 = vld [vmem:[%s7990_s9 + $0x134] ss:$8 sps:$4 sm:$0xff]  }
 0x498   :  { %4442 = vmatpush1.bf16.msra.mxu1 %v5927_v60  ;;  %4473 = vmatprep.mubr.bf16.mxu1 %v6329_v21  ;;  %v5942_v21 = vld [vmem:[%s7990_s9 + $0x130] ss:$8 sps:$4 sm:$0xff]  }
 0x499   :  { %4443 = vmatprep.subr.bf16.mxu1 %v5934_v61 }
 0x49c   :  { %4444 = vmatpush1.bf16.msra.mxu1 %v5932_v62 }
 0x49d   :  { %4445 = vmatprep.subr.bf16.mxu1 %v5939_v63 }
 0x4a0   :  { %4446 = vmatpush1.bf16.msra.mxu1 %v5937_v0 }
 0x4a1   :  { %4447 = vmatprep.subr.bf16.mxu1 %v5944_v12  ;;  %v5389_v12 = vld [vmem:[%s7995_s12] ss:$0 sm:$0xff] }
 0x4a4   :  { %4448 = vmatpush1.bf16.msra.mxu1 %v5942_v21 }
 0x4a5   :  { %4449 = vmatprep.subr.bf16.mxu1 %v5949_v1 }
 0x4a8   :  { %4450 = vmatpush1.bf16.msra.mxu1 %v5947_v6 }
 0x4a9   :  { %4451 = vmatprep.subr.bf16.mxu1 %v5954_v7 }
 0x4ac   :  { %4452 = vmatpush1.bf16.msra.mxu1 %v5952_v8 }
 0x4ad   :  { %4453 = vmatprep.subr.bf16.mxu1 %v5959_v9 }
 0x4b0   :  { %4454 = vmatpush1.bf16.msra.mxu1 %v5957_v10 }
 0x4b1   :  { %4455 = vmatprep.subr.bf16.mxu1 %v5964_v11 }
 0x4b2   :  { %v3541_v16 = vpop.f32.mrb[12].mxu1 }
 0x4b3   :  { %3916 = vst [vmem:[%s7994_s14] sm:$0xff] %v3541_v16  ;;  %v3543_v17 = vpop.f32.mrb[13].mxu1 }
 0x4b4   :  { %3917 = vst [vmem:[%s7994_s14 + $0x8] sm:$0xff] %v3543_v17  ;;  %4456 = vmatpush1.bf16.msra.mxu1 %v5962_v13  ;;  %v3545_v53 = vpop.f32.mrb[14].mxu1 }
 0x4b5   :  { %v3546_v19 = vpop.f32.mrb[15].mxu1  ;;  %4457 = vmatprep.subr.bf16.mxu1 %v5969_v14 }
 0x4b7   :  { %v5468_v50 = vpop.f32.mrb[12].mxu0 }
 0x4b8   :  { %4458 = vmatpush1.bf16.msra.mxu1 %v5967_v18 }
 0x4b9   :  { %4459 = vmatprep.subr.bf16.mxu1 %v5972_v15 }
 0x4bc   :  { %4460 = vmatpush1.bf16.msra.mxu1 %v5970_v20 }
 0x4bd   :  { %4461 = vmatprep.subr.bf16.mxu1 %v5975_v23 }
 0x4be   :  { %v3582_v27 = vpop.f32.mrb[16].mxu1 }
 0x4bf   :  { %3918 = vst [vmem:[%s7994_s14 + $0x10] sm:$0xff] %v3582_v27  ;;  %v3584_v28 = vpop.f32.mrb[17].mxu1  ;;  %v4068_v27 = vld [vmem:[%s7998_s10] sm:$0x3] }
 0x4c0   :  { %3919 = vst [vmem:[%s7994_s14 + $0x18] sm:$0xff] %v3584_v28  ;;  %v3586_v29 = vpop.f32.mrb[18].mxu1  ;;  %4462 = vmatpush1.bf16.msra.mxu1 %v5973_v24  ;;  %v4073_v28 = vrot.slane %v4068_v27, %v6997_v3 }
 0x4c1   :  { %v3587_v31 = vpop.f32.mrb[19].mxu1  ;;  %4463 = vmatprep.subr.bf16.mxu1 %v5978_v26  ;;  %v4077_v29 = vrot.slane %v4068_v27, %v7005_v5 }
 0x4c4   :  { %4464 = vmatpush1.bf16.msra.mxu1 %v5976_v30 }
 0x4c5   :  { %4465 = vmatprep.subr.bf16.mxu1 %v5981_v25 }
 0x4c8   :  { %4466 = vmatpush1.bf16.msra.mxu1 %v5979_v32 }
 0x4c9   :  { %4467 = vmatprep.subr.bf16.mxu1 %v5984_v33 }
 0x4ca   :  { %v3623_v34 = vpop.f32.mrb[20].mxu1 }
 0x4cb   :  { %3920 = vst [vmem:[%s7994_s14 + $0x20] sm:$0xff] %v3623_v34  ;;  %v3625_v35 = vpop.f32.mrb[21].mxu1 }
 0x4cc   :  { %3921 = vst [vmem:[%s7994_s14 + $0x28] sm:$0xff] %v3625_v35  ;;  %v3627_v36 = vpop.f32.mrb[22].mxu1  ;;  %4468 = vmatpush1.bf16.msra.mxu1 %v5982_v39 }
 0x4cd   :  { %v3628_v38 = vpop.f32.mrb[23].mxu1  ;;  %4469 = vmatprep.subr.bf16.mxu1 %v5987_v57 }
 0x4d0   :  { %4470 = vmatpush1.bf16.msra.mxu1 %v5985_v37 }
 0x4d1   :  { %4471 = vmatprep.subr.bf16.mxu1 %v5990_v40 }
 0x4d4   :  { %4472 = vmatpush1.bf16.msra.mxu1 %v5988_v41 }
 0x4d6   :  { %v3664_v42 = vpop.f32.mrb[24].mxu1 }
 0x4d7   :  { %3922 = vst [vmem:[%s7994_s14 + $0x30] sm:$0xff] %v3664_v42  ;;  %v3666_v43 = vpop.f32.mrb[25].mxu1  ;;  %4474 = vmatmul.mubr.bf16.vlgmr.msra.gmra.mrb[56].mxu1 %v6517_v22  ;;  %v5469_v22 = vpop.f32.mrb[13].mxu0 }
 0x4d8   :  { %3923 = vst [vmem:[%s7994_s14 + $0x38] sm:$0xff] %v3666_v43  ;;  %v3668_v44 = vpop.f32.mrb[26].mxu1  ;;  %v5470_v2 = vadd.f32 %v5469_v22, %v5468_v50  ;;  %v5471_v51 = vpop.f32.mrb[14].mxu0 }
 0x4d9   :  { %v3669_v45 = vpop.f32.mrb[27].mxu1  ;;  %v5472_v4 = vpop.f32.mrb[15].mxu0 }
 0x4da   :  { %v4782_v1 = vadd.f32 %v5470_v2, %v5389_v12 }
 0x4e0   :  { %v5490_v6 = vpop.f32.mrb[16].mxu0 }
 0x4e1   :  { %v5491_v7 = vpop.f32.mrb[17].mxu0 }
 0x4e2   :  { %v3705_v46 = vpop.f32.mrb[28].mxu1  ;;  %v5492_v8 = vadd.f32 %v5491_v7, %v5490_v6  ;;  %v5493_v9 = vpop.f32.mrb[18].mxu0 }
 0x4e3   :  { %3924 = vst [vmem:[%s7994_s14 + $0x40] sm:$0xff] %v3705_v46  ;;  %v3707_v47 = vpop.f32.mrb[29].mxu1  ;;  %v5494_v10 = vpop.f32.mrb[19].mxu0 }
 0x4e4   :  { %3925 = vst [vmem:[%s7994_s14 + $0x48] sm:$0xff] %v3707_v47  ;;  %v3709_v48 = vpop.f32.mrb[30].mxu1  ;;  %v4822_v11 = vadd.f32 %v5492_v8, %v4782_v1 }
 0x4e5   :  { %v3710_v49 = vpop.f32.mrb[31].mxu1 }
 0x4e6   :  { %4828 = vst.msk [vmem:[%s7996_s17] sm:$0xff] %vm4827_vm4, %v4822_v11 }
 0x4ee   :  { %v3746_v52 = vpop.f32.mrb[32].mxu1 }
 0x4ef   :  { %3926 = vst [vmem:[%s7994_s14 + $0x50] sm:$0xff] %v3746_v52  ;;  %v3748_v54 = vpop.f32.mrb[33].mxu1 }
 0x4f0   :  { %3927 = vst [vmem:[%s7994_s14 + $0x58] sm:$0xff] %v3748_v54  ;;  %v3750_v55 = vpop.f32.mrb[34].mxu1 }
 0x4f1   :  { %v3751_v56 = vpop.f32.mrb[35].mxu1 }
 0x4fa   :  { %v3787_v58 = vpop.f32.mrb[36].mxu1 }
 0x4fb   :  { %3928 = vst [vmem:[%s7994_s14 + $0x60] sm:$0xff] %v3787_v58  ;;  %v3789_v59 = vpop.f32.mrb[37].mxu1 }
 0x4fc   :  { %3929 = vst [vmem:[%s7994_s14 + $0x68] sm:$0xff] %v3789_v59  ;;  %v3791_v60 = vpop.f32.mrb[38].mxu1 }
 0x4fd   :  { %v3792_v61 = vpop.f32.mrb[39].mxu1 }
 0x506   :  { %v3828_v62 = vpop.f32.mrb[40].mxu1 }
 0x507   :  { %3930 = vst [vmem:[%s7994_s14 + $0x70] sm:$0xff] %v3828_v62  ;;  %v3830_v63 = vpop.f32.mrb[41].mxu1 }
 0x508   :  { %3931 = vst [vmem:[%s7994_s14 + $0x78] sm:$0xff] %v3830_v63  ;;  %v3832_v0 = vpop.f32.mrb[42].mxu1 }
 0x509   :  { %v3833_v21 = vpop.f32.mrb[43].mxu1 }
 0x512   :  { %v3869_v13 = vpop.f32.mrb[44].mxu1 }
 0x513   :  { %3932 = vst [vmem:[%s7994_s14 + $0x80] sm:$0xff] %v3869_v13  ;;  %v3871_v14 = vpop.f32.mrb[45].mxu1 }
 0x514   :  { %3933 = vst [vmem:[%s7994_s14 + $0x88] sm:$0xff] %v3871_v14  ;;  %v3873_v16 = vpop.f32.mrb[46].mxu1 }
 0x515   :  { %v3874_v17 = vpop.f32.mrb[47].mxu1 }
 0x51e   :  { %v3910_v53 = vpop.f32.mrb[48].mxu1 }
 0x51f   :  { %3935 = vst.msk [vmem:[%s7994_s14 + $0x90] sm:$0xff] %vm3934_vm5, %v3910_v53  ;;  %v5504_v18 = vpop.f32.mrb[49].mxu1 }
 0x520   :  { %v3913_v19 = vpop.f32.mrb[50].mxu1 }
 0x521   :  { %v5505_v15 = vpop.f32.mrb[51].mxu1 }
 0x52a   :  { %v3996_v20 = vpop.f32.mrb[52].mxu1 }
 0x52b   :  { %4003 = vst.msk [vmem:[%s7997_s15] sm:$0xff] %vm4002_vm6, %v3996_v20  ;;  %v5514_v23 = vpop.f32.mrb[53].mxu1 }
 0x52c   :  { %v3999_v24 = vpop.f32.mrb[54].mxu1 }
 0x52d   :  { %v5515_v26 = vpop.f32.mrb[55].mxu1 }
 0x5aa   :  { %v4475_v30 = vpop.f32.mrb[56].mxu1 }
 0x5ab   :  { %v5526_v31 = vadd.f32 %v4475_v30, %v4073_v28  ;;  %v4477_v25 = vpop.f32.mrb[57].mxu1 }
 0x5ac   :  { %v5527_v32 = vadd.f32 %v4477_v25, %v4077_v29  ;;  %v4479_v33 = vpop.f32.mrb[58].mxu1 }
 0x5ad   :  { %4482 = vst [vmem:[%s7999_s16] sm:$0xff] %v5526_v31  ;;  %v4480_v39 = vpop.f32.mrb[59].mxu1 }
 0x5ae   :  { %4483 = vst [vmem:[%s7999_s16 + $0x8] sm:$0xff] %v5527_v32 }

// kernel: template_hoi_forward.5
= control target key start
LH: loop header
LB: loop body
LE: loop exit
PB: predicated region body
PF: predicated region fallthrough
CT: control target
= control target key end

     0   :  { %s2759_s18 = smov 0   ;;  %s3388_s0 = inlined_call_operand.vmem [shape: bf16[2,648,136], index: 0, kind: input, shape index: {}]   ;;  %s3389_s1 = inlined_call_operand.vmem [shape: f32[2,1,256], index: 1, kind: input, shape index: {}]   ;;  %s3390_s2 = inlined_call_operand.vmem [shape: bf16[136,256], index: 2, kind: input, shape index: {}]   ;;  %s3391_s3 = inlined_call_operand.vmem [shape: bf16[256,128], index: 3, kind: input, shape index: {}]   ;;  %s3392_s4 = inlined_call_operand.vmem [shape: f32[1,128], index: 4, kind: input, shape index: {}]   ;;  %s3393_s5 = inlined_call_operand.vmem [shape: f32[2,648,128], index: 5, kind: output, shape index: {}]  }
   0x1 LB: > { %s2344_s19 = sadd.s32 4294967295, %s2726_s18   ;;  %p2348_p0 = scmp.ge.s32.totalorder %s2726_s18, 1  ;;  %s2726_s18 = sphi %s2759_s18, %s15_s18  }
   0x2   : > { %p196_p1 = scmp.lt.s32.totalorder %s2726_s18, 3 }
   0x4   : > { %p197_p2 = pnand %p2348_p0, %p196_p1 }
   0x5   : > { %v2555_v0 = vld [vmem:[%s3390_s2 + $0x4] ss:$8 sps:$4 sm:$0xff] (!%p197_p2)   ;;  %p228_p3 = scmp.lt.s32.totalorder (!%p197_p2), %s2344_s19, 1  ;;  %v2557_v1 = vld [vmem:[%s3390_s2] ss:$8 sps:$4 sm:$0xff] (!%p197_p2)   ;;  %vm804_vm0 = vcmask (!%p197_p2), 64512  }
   0x6   : > { %200 = sbr.rel (%p197_p2) target bundleno = 801 (0x321), region = 40  ;;  %935 = vmatprep.subr.bf16.mxu0 (!%p197_p2), %v2555_v0  ;;  %v2558_v2 = vld [vmem:[%s3390_s2 + $0x14] ss:$8 sps:$4 sm:$0xff] (!%p197_p2)   ;;  %v2560_v3 = vld [vmem:[%s3390_s2 + $0x10] ss:$8 sps:$4 sm:$0xff] (!%p197_p2)   ;;  %v340_v16 = vld [vmem:[%s3390_s2 + $0x80] sm:$0xff] (!%p197_p2) }
   0x7   : > { %936 = vmatpush1.bf16.msra.mxu0 (!%p197_p2), %v2557_v1  ;;  %v2561_v4 = vld [vmem:[%s3390_s2 + $0x24] ss:$8 sps:$4 sm:$0xff] (!%p197_p2)   ;;  %v2563_v5 = vld [vmem:[%s3390_s2 + $0x20] ss:$8 sps:$4 sm:$0xff] (!%p197_p2)   ;;  %v2564_v6 = vld [vmem:[%s3390_s2 + $0x34] ss:$8 sps:$4 sm:$0xff] (!%p197_p2)   ;;  %v2451_v18 = vcombine.high (!%p197_p2), %v340_v16, %v340_v16  ;;  %v2450_v19 = vcombine.low (!%p197_p2), %v340_v16, %v340_v16 }
   0x8   : > { %937 = vmatprep.subr.bf16.mxu0 (!%p197_p2), %v2558_v2  ;;  %v2566_v7 = vld [vmem:[%s3390_s2 + $0x30] ss:$8 sps:$4 sm:$0xff] (!%p197_p2)   ;;  %v2567_v8 = vld [vmem:[%s3390_s2 + $0x44] ss:$8 sps:$4 sm:$0xff] (!%p197_p2)   ;;  %v2569_v10 = vld [vmem:[%s3390_s2 + $0x40] ss:$8 sps:$4 sm:$0xff] (!%p197_p2)  }
   0x9   : > { %v2570_v11 = vld [vmem:[%s3390_s2 + $0x54] ss:$8 sps:$4 sm:$0xff] (!%p197_p2)   ;;  %v2572_v12 = vld [vmem:[%s3390_s2 + $0x50] ss:$8 sps:$4 sm:$0xff] (!%p197_p2)   ;;  %v2573_v13 = vld [vmem:[%s3390_s2 + $0x64] ss:$8 sps:$4 sm:$0xff] (!%p197_p2)  }
   0xa   : > { %v2575_v14 = vld [vmem:[%s3390_s2 + $0x60] ss:$8 sps:$4 sm:$0xff] (!%p197_p2)   ;;  %v2576_v15 = vld [vmem:[%s3390_s2 + $0x74] ss:$8 sps:$4 sm:$0xff] (!%p197_p2)   ;;  %v2578_v17 = vld [vmem:[%s3390_s2 + $0x70] ss:$8 sps:$4 sm:$0xff] (!%p197_p2)  }
   0xb   : > { %938 = vmatpush1.bf16.msra.mxu0 (!%p197_p2), %v2560_v3  ;;  %vm928_vm1 = vcmask (!%p197_p2), 1043456   ;;  %v2728_v31 = vmov (!%p197_p2), 0   ;;  %v2646_v32 = vld [vmem:[%s3391_s3] sm:$0xff] (!%p197_p2)   ;;  %v2648_v35 = vld [vmem:[%s3391_s3 + $0x8] sm:$0xff] (!%p197_p2)   ;;  %v2651_v36 = vld [vmem:[%s3391_s3 + $0x10] sm:$0xff] (!%p197_p2)  }
   0xc   : > { %939 = vmatprep.subr.bf16.mxu0 (!%p197_p2), %v2561_v4  ;;  %v930_v20 = vsel (!%p197_p2), %vm928_vm1, %v2450_v19, 0  ;;  %2513 = vmatprep.subr.bf16.mxu1 (!%p197_p2), %v2728_v31  ;;  %v2653_v39 = vld [vmem:[%s3391_s3 + $0x18] sm:$0xff] (!%p197_p2)   ;;  %v2656_v40 = vld [vmem:[%s3391_s3 + $0x20] sm:$0xff] (!%p197_p2)   ;;  %v2658_v43 = vld [vmem:[%s3391_s3 + $0x28] sm:$0xff] (!%p197_p2)  }
   0xd   : > { %s3395_s19 = smov (!%p228_p3, %s2344_s19), 1  ;;  %2529 = vmatpush1.bf16.msra.mxu1 %v2646_v32  ;;  %v2661_v44 = vld [vmem:[%s3391_s3 + $0x30] sm:$0xff]   ;;  %v2663_v47 = vld [vmem:[%s3391_s3 + $0x38] sm:$0xff]   ;;  %v2666_v48 = vld [vmem:[%s3391_s3 + $0x40] sm:$0xff]  }
   0xe   : > { %s2545_s30 = smul.u32 648, %s3395_s19  ;;  %2514 = vmatprep.subr.bf16.mxu1 %v2728_v31  ;;  %v2668_v51 = vld [vmem:[%s3391_s3 + $0x48] sm:$0xff]   ;;  %v2671_v52 = vld [vmem:[%s3391_s3 + $0x50] sm:$0xff]   ;;  %v2673_v55 = vld [vmem:[%s3391_s3 + $0x58] sm:$0xff]   ;;  %s2350_s25 = sshll.u32 %s3395_s19, 1 }
   0xf   : > { %940 = vmatpush1.bf16.msra.mxu0 %v2563_v5  ;;  %v2676_v58 = vld [vmem:[%s3391_s3 + $0x60] sm:$0xff]   ;;  %v2678_v59 = vld [vmem:[%s3391_s3 + $0x68] sm:$0xff]   ;;  %v2681_v62 = vld [vmem:[%s3391_s3 + $0x70] sm:$0xff]   ;;  %s236_s28 = scalar_lea.vmem %s3389_s1, %s2350_s25 }
  0x10   : > { %s2796_s12 = scalar_lea.vmem %s3388_s0, %s2545_s30  ;;  %941 = vmatprep.subr.bf16.mxu0 %v2564_v6  ;;  %v2683_v63 = vld [vmem:[%s3391_s3 + $0x78] sm:$0xff]   ;;  %s3171_s8 = scalar_lea.vmem %s3393_s5, %s2545_s30 }
  0x11   : > { %v2583_v9 = vld [vmem:[%s2796_s12 + $0x4] ss:$8 sps:$4 sm:$0xff]   ;;  %v2581_v21 = vld [vmem:[%s2796_s12] ss:$8 sps:$4 sm:$0xff]   ;;  %v2584_v22 = vld [vmem:[%s2796_s12 + $0x14] ss:$8 sps:$4 sm:$0xff]   ;;  %2530 = vmatpush1.bf16.msra.mxu1 %v2648_v35 }
  0x12   : > { %2453 = vmatprep.mubr.msk.bf16.mxu0 %vm804_vm0, %v2583_v9  ;;  %v2586_v23 = vld [vmem:[%s2796_s12 + $0x10] ss:$8 sps:$4 sm:$0xff]   ;;  %v2587_v24 = vld [vmem:[%s2796_s12 + $0x24] ss:$8 sps:$4 sm:$0xff]   ;;  %v2589_v25 = vld [vmem:[%s2796_s12 + $0x20] ss:$8 sps:$4 sm:$0xff]   ;;  %2515 = vmatprep.subr.bf16.mxu1 %v2728_v31 }
  0x13   : > { %942 = vmatpush1.bf16.msra.mxu0 %v2566_v7  ;;  %v2590_v26 = vld [vmem:[%s2796_s12 + $0x34] ss:$8 sps:$4 sm:$0xff]   ;;  %v2592_v27 = vld [vmem:[%s2796_s12 + $0x30] ss:$8 sps:$4 sm:$0xff]   ;;  %v2593_v28 = vld [vmem:[%s2796_s12 + $0x44] ss:$8 sps:$4 sm:$0xff]  }
  0x14   : > { %943 = vmatprep.subr.bf16.mxu0 %v2567_v8  ;;  %v2595_v29 = vld [vmem:[%s2796_s12 + $0x40] ss:$8 sps:$4 sm:$0xff]   ;;  %v2596_v30 = vld [vmem:[%s2796_s12 + $0x54] ss:$8 sps:$4 sm:$0xff]   ;;  %v2598_v33 = vld [vmem:[%s2796_s12 + $0x50] ss:$8 sps:$4 sm:$0xff]  }
  0x15   : > { %v2599_v34 = vld [vmem:[%s2796_s12 + $0x64] ss:$8 sps:$4 sm:$0xff]   ;;  %v2601_v37 = vld [vmem:[%s2796_s12 + $0x60] ss:$8 sps:$4 sm:$0xff]   ;;  %v2602_v38 = vld [vmem:[%s2796_s12 + $0x74] ss:$8 sps:$4 sm:$0xff]   ;;  %2531 = vmatpush1.bf16.msra.mxu1 %v2651_v36 }
  0x16   : > { %2516 = vmatprep.subr.bf16.mxu1 %v2728_v31  ;;  %v2604_v41 = vld [vmem:[%s2796_s12 + $0x70] ss:$8 sps:$4 sm:$0xff]   ;;  %v2605_v42 = vld [vmem:[%s2796_s12 + $0x84] ss:$8 sps:$4 sm:$0xff]   ;;  %v2607_v45 = vld [vmem:[%s2796_s12 + $0x80] ss:$8 sps:$4 sm:$0xff]  }
  0x17   : > { %944 = vmatpush1.bf16.msra.mxu0 %v2569_v10  ;;  %v2608_v46 = vld [vmem:[%s2796_s12 + $0x94] ss:$8 sps:$4 sm:$0xff]   ;;  %v2610_v49 = vld [vmem:[%s2796_s12 + $0x90] ss:$8 sps:$4 sm:$0xff]   ;;  %v2611_v50 = vld [vmem:[%s2796_s12 + $0xa4] ss:$8 sps:$4 sm:$0xff]  }
  0x18   : > { %945 = vmatprep.subr.bf16.mxu0 %v2570_v11  ;;  %v2613_v53 = vld [vmem:[%s2796_s12 + $0xa0] ss:$8 sps:$4 sm:$0xff]   ;;  %v2614_v54 = vld [vmem:[%s2796_s12 + $0xb4] ss:$8 sps:$4 sm:$0xff]   ;;  %v2616_v56 = vld [vmem:[%s2796_s12 + $0xb0] ss:$8 sps:$4 sm:$0xff]  }
  0x19   : > { %2532 = vmatpush1.bf16.msra.mxu1 %v2653_v39  ;;  %v2617_v57 = vld [vmem:[%s2796_s12 + $0xc4] ss:$8 sps:$4 sm:$0xff]   ;;  %v2619_v60 = vld [vmem:[%s2796_s12 + $0xc0] ss:$8 sps:$4 sm:$0xff]   ;;  %v2620_v61 = vld [vmem:[%s2796_s12 + $0xd4] ss:$8 sps:$4 sm:$0xff]  }
  0x1a   : > { %2517 = vmatprep.subr.bf16.mxu1 %v2728_v31  ;;  %v2622_v0 = vld [vmem:[%s2796_s12 + $0xd0] ss:$8 sps:$4 sm:$0xff]   ;;  %v2623_v1 = vld [vmem:[%s2796_s12 + $0xe4] ss:$8 sps:$4 sm:$0xff]   ;;  %v2625_v2 = vld [vmem:[%s2796_s12 + $0xe0] ss:$8 sps:$4 sm:$0xff]  }
  0x1b   : > { %946 = vmatpush1.bf16.msra.mxu0 %v2572_v12  ;;  %v2626_v3 = vld [vmem:[%s2796_s12 + $0xf4] ss:$8 sps:$4 sm:$0xff]   ;;  %v2628_v4 = vld [vmem:[%s2796_s12 + $0xf0] ss:$8 sps:$4 sm:$0xff]   ;;  %v2629_v5 = vld [vmem:[%s2796_s12 + $0x104] ss:$8 sps:$4 sm:$0xff]  }
  0x1c   : > { %947 = vmatprep.subr.bf16.mxu0 %v2573_v13  ;;  %v2631_v6 = vld [vmem:[%s2796_s12 + $0x100] ss:$8 sps:$4 sm:$0xff]   ;;  %v2632_v7 = vld [vmem:[%s2796_s12 + $0x114] ss:$8 sps:$4 sm:$0xff]   ;;  %v2634_v8 = vld [vmem:[%s2796_s12 + $0x110] ss:$8 sps:$4 sm:$0xff]  }
  0x1d   : > { %2533 = vmatpush1.bf16.msra.mxu1 %v2656_v40  ;;  %v2635_v9 = vld [vmem:[%s2796_s12 + $0x124] ss:$8 sps:$4 sm:$0xff]   ;;  %v2637_v10 = vld [vmem:[%s2796_s12 + $0x120] ss:$8 sps:$4 sm:$0xff]   ;;  %v2638_v11 = vld [vmem:[%s2796_s12 + $0x134] ss:$8 sps:$4 sm:$0xff]  }
  0x1e   : > { %2518 = vmatprep.subr.bf16.mxu1 %v2728_v31  ;;  %v2640_v12 = vld [vmem:[%s2796_s12 + $0x130] ss:$8 sps:$4 sm:$0xff]   ;;  %v2641_v13 = vld [vmem:[%s2796_s12 + $0x144] ss:$8 sps:$4 sm:$0xff]   ;;  %v2654_v19 = vld [vmem:[%s2796_s12 + $0x174] ss:$8 sps:$4 sm:$0xff]  }
  0x1f   : > { %948 = vmatpush1.bf16.msra.mxu0 %v2575_v14  ;;  %v2643_v14 = vld [vmem:[%s2796_s12 + $0x140] ss:$8 sps:$4 sm:$0xff]   ;;  %v2647_v16 = vld [vmem:[%s2796_s12 + $0x150] ss:$8 sps:$4 sm:$0xff]  }
  0x20   : > { %949 = vmatprep.subr.bf16.mxu0 %v2576_v15  ;;  %v2644_v15 = vld [vmem:[%s2796_s12 + $0x154] ss:$8 sps:$4 sm:$0xff]  }
  0x21   : > { %2534 = vmatpush1.bf16.msra.mxu1 %v2658_v43 }
  0x22   : > { %2519 = vmatprep.subr.bf16.mxu1 %v2728_v31 }
  0x23   : > { %950 = vmatpush1.bf16.msra.mxu0 %v2578_v17  ;;  %v2649_v17 = vld [vmem:[%s2796_s12 + $0x164] ss:$8 sps:$4 sm:$0xff]  }
  0x24   : > { %2452 = vmatprep.subr.msk.bf16.mxu0 %vm928_vm1, %v2451_v18  ;;  %v2652_v18 = vld [vmem:[%s2796_s12 + $0x160] ss:$8 sps:$4 sm:$0xff]  }
  0x25   : > { %2535 = vmatpush1.bf16.msra.mxu1 %v2661_v44 }
  0x26   : > { %2520 = vmatprep.subr.bf16.mxu1 %v2728_v31 }
  0x27   : > { %952 = vmatpush1.bf16.msra.mxu0 %v930_v20  ;;  %v2657_v20 = vld [vmem:[%s2796_s12 + $0x170] ss:$8 sps:$4 sm:$0xff]  }
  0x28   : > { %1755 = vmatprep.subr.bf16.mxu0 %v2728_v31 }
  0x29   : > { %2536 = vmatpush1.bf16.msra.mxu1 %v2663_v47 }
  0x2a   : > { %968 = vmatmul.mubr.bf16.vlgmr.msra.gmra.mrb[0].mxu0 %v2581_v21  ;;  %2521 = vmatprep.subr.bf16.mxu1 %v2728_v31  ;;  %v2659_v21 = vld [vmem:[%s2796_s12 + $0x184] ss:$8 sps:$4 sm:$0xff]  }
  0x2b   : > { %2454 = vmatprep.mubr.msk.bf16.mxu0 %vm804_vm0, %v2584_v22  ;;  %1756 = vmatpush1.bf16.msra.mxu0 %v2646_v32  ;;  %v2662_v22 = vld [vmem:[%s2796_s12 + $0x180] ss:$8 sps:$4 sm:$0xff]   ;;  %v2674_v32 = vld [vmem:[%s2796_s12 + $0x1b4] ss:$8 sps:$4 sm:$0xff]  }
  0x2c   : > { %1757 = vmatprep.subr.bf16.mxu0 %v2728_v31 }
  0x2d   : > { %2537 = vmatpush1.bf16.msra.mxu1 %v2666_v48 }
  0x2e   : > { %2522 = vmatprep.subr.bf16.mxu1 %v2728_v31 }
  0x2f   : > { %1758 = vmatpush1.bf16.msra.mxu0 %v2648_v35 }
  0x30   : > { %1759 = vmatprep.subr.bf16.mxu0 %v2728_v31 }
  0x31   : > { %2538 = vmatpush1.bf16.msra.mxu1 %v2668_v51 }
  0x32   : > { %978 = vmatmul.mubr.bf16.gmra.mrb[4].mxu0 %v2586_v23  ;;  %2523 = vmatprep.subr.bf16.mxu1 %v2728_v31  ;;  %v2664_v23 = vld [vmem:[%s2796_s12 + $0x194] ss:$8 sps:$4 sm:$0xff]  }
  0x33   : > { %2455 = vmatprep.mubr.msk.bf16.mxu0 %vm804_vm0, %v2587_v24  ;;  %1760 = vmatpush1.bf16.msra.mxu0 %v2651_v36  ;;  %v343_v24 = vlaneseq }
  0x34   : > { %1761 = vmatprep.subr.bf16.mxu0 %v2728_v31 }
  0x35   : > { %2539 = vmatpush1.bf16.msra.mxu1 %v2671_v52 }
  0x36   : > { %2524 = vmatprep.subr.bf16.mxu1 %v2728_v31 }
  0x37   : > { %1762 = vmatpush1.bf16.msra.mxu0 %v2653_v39 }
  0x38   : > { %1763 = vmatprep.subr.bf16.mxu0 %v2728_v31 }
  0x39   : > { %2540 = vmatpush1.bf16.msra.mxu1 %v2673_v55 }
  0x3a   : > { %988 = vmatmul.mubr.bf16.gmra.mrb[8].mxu0 %v2589_v25  ;;  %2525 = vmatprep.subr.bf16.mxu1 %v2728_v31  ;;  %v2667_v25 = vld [vmem:[%s2796_s12 + $0x190] ss:$8 sps:$4 sm:$0xff]  }
  0x3b   : > { %2456 = vmatprep.mubr.msk.bf16.mxu0 %vm804_vm0, %v2590_v26  ;;  %1764 = vmatpush1.bf16.msra.mxu0 %v2656_v40  ;;  %v2669_v26 = vld [vmem:[%s2796_s12 + $0x1a4] ss:$8 sps:$4 sm:$0xff]  }
  0x3c   : > { %1765 = vmatprep.subr.bf16.mxu0 %v2728_v31 }
  0x3d   : > { %2541 = vmatpush1.bf16.msra.mxu1 %v2676_v58 }
  0x3e   : > { %2526 = vmatprep.subr.bf16.mxu1 %v2728_v31 }
  0x3f   : > { %1766 = vmatpush1.bf16.msra.mxu0 %v2658_v43 }
  0x40   : > { %1767 = vmatprep.subr.bf16.mxu0 %v2728_v31 }
  0x41   : > { %2542 = vmatpush1.bf16.msra.mxu1 %v2678_v59 }
  0x42   : > { %998 = vmatmul.mubr.bf16.gmra.mrb[12].mxu0 %v2592_v27  ;;  %2527 = vmatprep.subr.bf16.mxu1 %v2728_v31  ;;  %v344_v27 = vshrl.u32 %v343_v24, 7 }
  0x43   : > { %2457 = vmatprep.mubr.msk.bf16.mxu0 %vm804_vm0, %v2593_v28  ;;  %1768 = vmatpush1.bf16.msra.mxu0 %v2661_v44 }
  0x44   : > { %1769 = vmatprep.subr.bf16.mxu0 %v2728_v31  ;;  %v345_v28 = vsub.s32 0, %v344_v27 }
  0x45   : > { %2543 = vmatpush1.bf16.msra.mxu1 %v2681_v62 }
  0x46   : > { %2528 = vmatprep.subr.bf16.mxu1 %v2728_v31 }
  0x47   : > { %1770 = vmatpush1.bf16.msra.mxu0 %v2663_v47 }
  0x48   : > { %1771 = vmatprep.subr.bf16.mxu0 %v2728_v31 }
  0x49   : > { %2544 = vmatpush1.bf16.msra.mxu1 %v2683_v63 }
  0x4a   : > { %1008 = vmatmul.mubr.bf16.gmra.mrb[16].mxu0 %v2595_v29  ;;  %v2672_v29 = vld [vmem:[%s2796_s12 + $0x1a0] ss:$8 sps:$4 sm:$0xff]  }
  0x4b   : > { %2458 = vmatprep.mubr.msk.bf16.mxu0 %vm804_vm0, %v2596_v30  ;;  %1772 = vmatpush1.bf16.msra.mxu0 %v2666_v48  ;;  %v341_v30 = vld [vmem:[%s236_s28] sm:$0x3] }
  0x4c   : > { %1773 = vmatprep.subr.bf16.mxu0 %v2728_v31 }
  0x4f   : > { %1774 = vmatpush1.bf16.msra.mxu0 %v2668_v51 }
  0x50   : > { %1775 = vmatprep.subr.bf16.mxu0 %v2728_v31 }
  0x52   : > { %1018 = vmatmul.mubr.bf16.gmra.mrb[20].mxu0 %v2598_v33  ;;  %v2994_v33 = vrot.slane %v341_v30, %v345_v28 }
  0x53   : > { %2459 = vmatprep.mubr.msk.bf16.mxu0 %vm804_vm0, %v2599_v34  ;;  %1776 = vmatpush1.bf16.msra.mxu0 %v2671_v52 }
  0x54   : > { %1777 = vmatprep.subr.bf16.mxu0 %v2728_v31 }
  0x57   : > { %1778 = vmatpush1.bf16.msra.mxu0 %v2673_v55 }
  0x58   : > { %1779 = vmatprep.subr.bf16.mxu0 %v2728_v31 }
  0x5a   : > { %1028 = vmatmul.mubr.bf16.gmra.mrb[24].mxu0 %v2601_v37 }
  0x5b   : > { %2460 = vmatprep.mubr.msk.bf16.mxu0 %vm804_vm0, %v2602_v38  ;;  %1780 = vmatpush1.bf16.msra.mxu0 %v2676_v58  ;;  %v2677_v38 = vld [vmem:[%s2796_s12 + $0x1b0] ss:$8 sps:$4 sm:$0xff]  }
  0x5c   : > { %1781 = vmatprep.subr.bf16.mxu0 %v2728_v31 }
  0x5f   : > { %1782 = vmatpush1.bf16.msra.mxu0 %v2678_v59 }
  0x60   : > { %1783 = vmatprep.subr.bf16.mxu0 %v2728_v31 }
  0x62   : > { %1038 = vmatmul.mubr.bf16.gmra.mrb[28].mxu0 %v2604_v41  ;;  %v2679_v41 = vld [vmem:[%s2796_s12 + $0x1c4] ss:$8 sps:$4 sm:$0xff]  }
  0x63   : > { %2461 = vmatprep.mubr.msk.bf16.mxu0 %vm804_vm0, %v2605_v42  ;;  %1784 = vmatpush1.bf16.msra.mxu0 %v2681_v62 }
  0x64   : > { %1785 = vmatprep.subr.bf16.mxu0 %v2728_v31  ;;  %v349_v31 = vsub.s32 1, %v344_v27 }
  0x66   : > { %v2996_v34 = vrot.slane %v341_v30, %v349_v31 }
  0x67   : > { %1786 = vmatpush1.bf16.msra.mxu0 %v2683_v63 }
  0x6a   : > { %1048 = vmatmul.mubr.bf16.gmra.mrb[32].mxu0 %v2607_v45 }
  0x6b   : > { %2462 = vmatprep.mubr.msk.bf16.mxu0 %vm804_vm0, %v2608_v46 }
  0x72   : > { %1058 = vmatmul.mubr.bf16.gmra.mrb[36].mxu0 %v2610_v49 }
  0x73   : > { %2463 = vmatprep.mubr.msk.bf16.mxu0 %vm804_vm0, %v2611_v50 }
  0x7a   : > { %1068 = vmatmul.mubr.bf16.gmra.mrb[40].mxu0 %v2613_v53 }
  0x7b   : > { %2464 = vmatprep.mubr.msk.bf16.mxu0 %vm804_vm0, %v2614_v54  ;;  %v2682_v54 = vld [vmem:[%s2796_s12 + $0x1c0] ss:$8 sps:$4 sm:$0xff]  }
  0x82   : > { %1078 = vmatmul.mubr.bf16.gmra.mrb[44].mxu0 %v2616_v56 }
  0x83   : > { %2465 = vmatprep.mubr.msk.bf16.mxu0 %vm804_vm0, %v2617_v57  ;;  %v2684_v57 = vld [vmem:[%s2796_s12 + $0x1d4] ss:$8 sps:$4 sm:$0xff]  }
  0x8a   : > { %1088 = vmatmul.mubr.bf16.gmra.mrb[48].mxu0 %v2619_v60 }
  0x8b   : > { %2466 = vmatprep.mubr.msk.bf16.mxu0 %vm804_vm0, %v2620_v61 }
  0x92   : > { %1098 = vmatmul.mubr.bf16.gmra.mrb[52].mxu0 %v2622_v0 }
  0x93   : > { %2467 = vmatprep.mubr.msk.bf16.mxu0 %vm804_vm0, %v2623_v1 }
  0x9a   : > { %1108 = vmatmul.mubr.bf16.gmra.mrb[56].mxu0 %v2625_v2 }
  0x9b   : > { %2468 = vmatprep.mubr.msk.bf16.mxu0 %vm804_vm0, %v2626_v3 }
  0xa2   : > { %1118 = vmatmul.mubr.bf16.gmra.mrb[60].mxu0 %v2628_v4 }
  0xa3   : > { %2469 = vmatprep.mubr.msk.bf16.mxu0 %vm804_vm0, %v2629_v5 }
  0xaa   : > { %1128 = vmatmul.mubr.bf16.gmra.mrb[64].mxu0 %v2631_v6  ;;  %v2686_v6 = vld [vmem:[%s2796_s12 + $0x1d0] ss:$8 sps:$4 sm:$0xff]  }
  0xab   : > { %2470 = vmatprep.mubr.msk.bf16.mxu0 %vm804_vm0, %v2632_v7 }
  0xb2   : > { %1138 = vmatmul.mubr.bf16.gmra.mrb[68].mxu0 %v2634_v8 }
  0xb3   : > { %2471 = vmatprep.mubr.msk.bf16.mxu0 %vm804_vm0, %v2635_v9  ;;  %v2687_v9 = vld [vmem:[%s2796_s12 + $0x1e4] ss:$8 sps:$4 sm:$0xff]  }
  0xba   : > { %1148 = vmatmul.mubr.bf16.gmra.mrb[72].mxu0 %v2637_v10 }
  0xbb   : > { %2472 = vmatprep.mubr.msk.bf16.mxu0 %vm804_vm0, %v2638_v11 }
  0xc2   : > { %1158 = vmatmul.mubr.bf16.gmra.mrb[76].mxu0 %v2640_v12 }
  0xc3   : > { %2473 = vmatprep.mubr.msk.bf16.mxu0 %vm804_vm0, %v2641_v13 }
  0xca   : > { %1168 = vmatmul.mubr.bf16.gmra.mrb[80].mxu0 %v2643_v14 }
  0xcb   : > { %2474 = vmatprep.mubr.msk.bf16.mxu0 %vm804_vm0, %v2644_v15 }
  0xd2   : > { %1178 = vmatmul.mubr.bf16.gmra.mrb[84].mxu0 %v2647_v16 }
  0xd3   : > { %2475 = vmatprep.mubr.msk.bf16.mxu0 %vm804_vm0, %v2649_v17 }
  0xda   : > { %1188 = vmatmul.mubr.bf16.gmra.mrb[88].mxu0 %v2652_v18 }
  0xdb   : > { %2476 = vmatprep.mubr.msk.bf16.mxu0 %vm804_vm0, %v2654_v19 }
  0xe2   : > { %1198 = vmatmul.mubr.bf16.gmra.mrb[92].mxu0 %v2657_v20 }
  0xe3   : > { %2477 = vmatprep.mubr.msk.bf16.mxu0 %vm804_vm0, %v2659_v21 }
  0xea   : > { %1208 = vmatmul.mubr.bf16.gmra.mrb[96].mxu0 %v2662_v22  ;;  %v2689_v22 = vld [vmem:[%s2796_s12 + $0x1e0] ss:$8 sps:$4 sm:$0xff]  }
  0xeb   : > { %2478 = vmatprep.mubr.msk.bf16.mxu0 %vm804_vm0, %v2664_v23 }
  0xf2   : > { %1218 = vmatmul.mubr.bf16.gmra.mrb[100].mxu0 %v2667_v25  ;;  %v2690_v25 = vld [vmem:[%s2796_s12 + $0x1f4] ss:$8 sps:$4 sm:$0xff]  }
  0xf3   : > { %2479 = vmatprep.mubr.msk.bf16.mxu0 %vm804_vm0, %v2669_v26 }
  0xfa   : > { %1228 = vmatmul.mubr.bf16.gmra.mrb[104].mxu0 %v2672_v29 }
  0xfb   : > { %2480 = vmatprep.mubr.msk.bf16.mxu0 %vm804_vm0, %v2674_v32 }
  0xfd   : > { %v969_v35 = vpop.f32.mrb[0].mxu0 }
  0xfe   : > { %v970_v36 = vadd.f32 %v969_v35, %v2994_v33  ;;  %v971_v37 = vpop.f32.mrb[1].mxu0 }
  0xff   : > { %v972_v39 = vadd.f32 %v971_v37, %v2996_v34  ;;  %v973_v40 = vpop.f32.mrb[2].mxu0 }
 0x100   : > { %v974_v42 = vadd.f32 %v973_v40, %v2994_v33  ;;  %v975_v43 = vpop.f32.mrb[3].mxu0  ;;  %v1376_v45 = vmax.f32 %v970_v36, 0.0  ;;  %v2692_v40 = vld [vmem:[%s2796_s12 + $0x1f0] ss:$8 sps:$4 sm:$0xff]  }
 0x101   : > { %v976_v44 = vadd.f32 %v975_v43, %v2996_v34  ;;  %v1377_v47 = vmax.f32 %v972_v39, 0.0  ;;  %v2693_v43 = vld [vmem:[%s2796_s12 + $0x204] ss:$8 sps:$4 sm:$0xff]  }
 0x102   : > { %v1378_v46 = vmax.f32 %v974_v42, 0.0  ;;  %1238 = vmatmul.mubr.bf16.gmra.mrb[108].mxu0 %v2677_v38 }
 0x103   : > { %v1379_v48 = vmax.f32 %v976_v44, 0.0  ;;  %2481 = vmatprep.mubr.msk.bf16.mxu0 %vm804_vm0, %v2679_v41 }
 0x104   : > { %v3006_v49 = vpack.c.bf16 %v1378_v46, %v1376_v45 }
 0x105   : > { %v3008_v50 = vpack.c.bf16 %v1379_v48, %v1377_v47  ;;  %v979_v51 = vpop.f32.mrb[4].mxu0 }
 0x106   : > { %v980_v52 = vadd.f32 %v979_v51, %v2994_v33  ;;  %v981_v53 = vpop.f32.mrb[5].mxu0 }
 0x107   : > { %v982_v55 = vadd.f32 %v981_v53, %v2996_v34  ;;  %v983_v56 = vpop.f32.mrb[6].mxu0 }
 0x108   : > { %v984_v58 = vadd.f32 %v983_v56, %v2994_v33  ;;  %v985_v59 = vpop.f32.mrb[7].mxu0  ;;  %v1380_v61 = vmax.f32 %v980_v52, 0.0 }
 0x109   : > { %v986_v60 = vadd.f32 %v985_v59, %v2996_v34  ;;  %v1381_v63 = vmax.f32 %v982_v55, 0.0 }
 0x10a   : > { %v1382_v62 = vmax.f32 %v984_v58, 0.0  ;;  %1248 = vmatmul.mubr.bf16.gmra.mrb[112].mxu0 %v2682_v54  ;;  %v2695_v58 = vld [vmem:[%s2796_s12 + $0x200] ss:$8 sps:$4 sm:$0xff]  }
 0x10b   : > { %v1383_v0 = vmax.f32 %v986_v60, 0.0  ;;  %2482 = vmatprep.mubr.msk.bf16.mxu0 %vm804_vm0, %v2684_v57 }
 0x10c   : > { %v1540_v1 = vpack.c.bf16 %v1382_v62, %v1380_v61  ;;  %v2696_v61 = vld [vmem:[%s2796_s12 + $0x214] ss:$8 sps:$4 sm:$0xff]  }
 0x10d   : > { %v989_v2 = vpop.f32.mrb[8].mxu0  ;;  %v1541_v3 = vpack.c.bf16 %v1383_v0, %v1381_v63 }
 0x10e   : > { %v990_v4 = vadd.f32 %v989_v2, %v2994_v33  ;;  %v991_v5 = vpop.f32.mrb[9].mxu0 }
 0x10f   : > { %v992_v7 = vadd.f32 %v991_v5, %v2996_v34  ;;  %v993_v8 = vpop.f32.mrb[10].mxu0  ;;  %1795 = vmatprep.mubr.bf16.mxu1 %v1541_v3 }
 0x110   : > { %v994_v10 = vadd.f32 %v993_v8, %v2994_v33  ;;  %v995_v11 = vpop.f32.mrb[11].mxu0  ;;  %1796 = vmatmul.mubr.bf16.vlgmr.msra.gmra.mrb[0].mxu1 %v1540_v1  ;;  %v1384_v13 = vmax.f32 %v990_v4, 0.0 }
 0x111   : > { %v996_v12 = vadd.f32 %v995_v11, %v2996_v34  ;;  %v1385_v15 = vmax.f32 %v992_v7, 0.0 }
 0x112   : > { %v1386_v14 = vmax.f32 %v994_v10, 0.0  ;;  %1258 = vmatmul.mubr.bf16.gmra.mrb[116].mxu0 %v2686_v6  ;;  %v2698_v10 = vld [vmem:[%s2796_s12 + $0x210] ss:$8 sps:$4 sm:$0xff]  }
 0x113   : > { %v1387_v16 = vmax.f32 %v996_v12, 0.0  ;;  %2483 = vmatprep.mubr.msk.bf16.mxu0 %vm804_vm0, %v2687_v9 }
 0x114   : > { %v1542_v17 = vpack.c.bf16 %v1386_v14, %v1384_v13  ;;  %v2699_v13 = vld [vmem:[%s2796_s12 + $0x224] ss:$8 sps:$4 sm:$0xff]  }
 0x115   : > { %v1543_v18 = vpack.c.bf16 %v1387_v16, %v1385_v15  ;;  %v999_v19 = vpop.f32.mrb[12].mxu0 }
 0x116   : > { %v1000_v20 = vadd.f32 %v999_v19, %v2994_v33  ;;  %v1001_v21 = vpop.f32.mrb[13].mxu0 }
 0x117   : > { %v1002_v23 = vadd.f32 %v1001_v21, %v2996_v34  ;;  %v1003_v24 = vpop.f32.mrb[14].mxu0  ;;  %1803 = vmatprep.mubr.bf16.mxu1 %v1543_v18 }
 0x118   : > { %v1004_v26 = vadd.f32 %v1003_v24, %v2994_v33  ;;  %v1005_v27 = vpop.f32.mrb[15].mxu0  ;;  %1804 = vmatmul.mubr.bf16.gmra.mrb[4].mxu1 %v1542_v17  ;;  %v1388_v29 = vmax.f32 %v1000_v20, 0.0 }
 0x119   : > { %v1006_v28 = vadd.f32 %v1005_v27, %v2996_v34  ;;  %v1389_v31 = vmax.f32 %v1002_v23, 0.0 }
 0x11a   : > { %v1390_v30 = vmax.f32 %v1004_v26, 0.0  ;;  %1268 = vmatmul.mubr.bf16.gmra.mrb[120].mxu0 %v2689_v22  ;;  %v2701_v26 = vld [vmem:[%s2796_s12 + $0x220] ss:$8 sps:$4 sm:$0xff]  }
 0x11b   : > { %v1391_v32 = vmax.f32 %v1006_v28, 0.0  ;;  %2484 = vmatprep.mubr.msk.bf16.mxu0 %vm804_vm0, %v2690_v25 }
 0x11c   : > { %v1544_v35 = vpack.c.bf16 %v1390_v30, %v1388_v29  ;;  %v2702_v29 = vld [vmem:[%s2796_s12 + $0x234] ss:$8 sps:$4 sm:$0xff]  }
 0x11d   : > { %v1545_v36 = vpack.c.bf16 %v1391_v32, %v1389_v31  ;;  %v1009_v37 = vpop.f32.mrb[16].mxu0 }
 0x11e   : > { %v1010_v38 = vadd.f32 %v1009_v37, %v2994_v33  ;;  %v1011_v39 = vpop.f32.mrb[17].mxu0 }
 0x11f   : > { %v1012_v41 = vadd.f32 %v1011_v39, %v2996_v34  ;;  %v1013_v42 = vpop.f32.mrb[18].mxu0  ;;  %1811 = vmatprep.mubr.bf16.mxu1 %v1545_v36 }
 0x120   : > { %v1014_v44 = vadd.f32 %v1013_v42, %v2994_v33  ;;  %v1015_v45 = vpop.f32.mrb[19].mxu0  ;;  %1812 = vmatmul.mubr.bf16.gmra.mrb[8].mxu1 %v1544_v35  ;;  %v1392_v47 = vmax.f32 %v1010_v38, 0.0 }
 0x121   : > { %v1016_v46 = vadd.f32 %v1015_v45, %v2996_v34  ;;  %v1393_v51 = vmax.f32 %v1012_v41, 0.0 }
 0x122   : > { %v1394_v48 = vmax.f32 %v1014_v44, 0.0  ;;  %1278 = vmatmul.mubr.bf16.gmra.mrb[124].mxu0 %v2692_v40  ;;  %v2704_v44 = vld [vmem:[%s2796_s12 + $0x230] ss:$8 sps:$4 sm:$0xff]  }
 0x123   : > { %v1395_v52 = vmax.f32 %v1016_v46, 0.0  ;;  %2485 = vmatprep.mubr.msk.bf16.mxu0 %vm804_vm0, %v2693_v43 }
 0x124   : > { %v1546_v53 = vpack.c.bf16 %v1394_v48, %v1392_v47  ;;  %v2705_v47 = vld [vmem:[%s2796_s12 + $0x244] ss:$8 sps:$4 sm:$0xff]  }
 0x125   : > { %v1547_v54 = vpack.c.bf16 %v1395_v52, %v1393_v51  ;;  %v1019_v55 = vpop.f32.mrb[20].mxu0 }
 0x126   : > { %v1020_v56 = vadd.f32 %v1019_v55, %v2994_v33  ;;  %v1021_v57 = vpop.f32.mrb[21].mxu0 }
 0x127   : > { %v1022_v59 = vadd.f32 %v1021_v57, %v2996_v34  ;;  %v1023_v60 = vpop.f32.mrb[22].mxu0  ;;  %1819 = vmatprep.mubr.bf16.mxu1 %v1547_v54 }
 0x128   : > { %v1024_v62 = vadd.f32 %v1023_v60, %v2994_v33  ;;  %v1025_v63 = vpop.f32.mrb[23].mxu0  ;;  %1820 = vmatmul.mubr.bf16.gmra.mrb[12].mxu1 %v1546_v53  ;;  %v1396_v1 = vmax.f32 %v1020_v56, 0.0 }
 0x129   : > { %v1026_v0 = vadd.f32 %v1025_v63, %v2996_v34  ;;  %v1397_v3 = vmax.f32 %v1022_v59, 0.0 }
 0x12a   : > { %v1398_v2 = vmax.f32 %v1024_v62, 0.0  ;;  %1288 = vmatmul.mubr.bf16.gmra.mrb[128].mxu0 %v2695_v58  ;;  %v2707_v62 = vld [vmem:[%s2796_s12 + $0x240] ss:$8 sps:$4 sm:$0xff]  }
 0x12b   : > { %v1399_v4 = vmax.f32 %v1026_v0, 0.0  ;;  %2486 = vmatprep.mubr.msk.bf16.mxu0 %vm804_vm0, %v2696_v61 }
 0x12c   : > { %v1548_v5 = vpack.c.bf16 %v1398_v2, %v1396_v1  ;;  %v2708_v1 = vld [vmem:[%s2796_s12 + $0x254] ss:$8 sps:$4 sm:$0xff]  }
 0x12d   : > { %v1549_v6 = vpack.c.bf16 %v1399_v4, %v1397_v3  ;;  %v1029_v7 = vpop.f32.mrb[24].mxu0 }
 0x12e   : > { %v1030_v8 = vadd.f32 %v1029_v7, %v2994_v33  ;;  %v1031_v9 = vpop.f32.mrb[25].mxu0 }
 0x12f   : > { %v1032_v11 = vadd.f32 %v1031_v9, %v2996_v34  ;;  %v1033_v12 = vpop.f32.mrb[26].mxu0  ;;  %1827 = vmatprep.mubr.bf16.mxu1 %v1549_v6 }
 0x130   : > { %v1034_v14 = vadd.f32 %v1033_v12, %v2994_v33  ;;  %v1035_v15 = vpop.f32.mrb[27].mxu0  ;;  %1828 = vmatmul.mubr.bf16.gmra.mrb[16].mxu1 %v1548_v5  ;;  %v1400_v17 = vmax.f32 %v1030_v8, 0.0 }
 0x131   : > { %v1036_v16 = vadd.f32 %v1035_v15, %v2996_v34  ;;  %v1401_v19 = vmax.f32 %v1032_v11, 0.0 }
 0x132   : > { %v1402_v18 = vmax.f32 %v1034_v14, 0.0  ;;  %1298 = vmatmul.mubr.bf16.gmra.mrb[132].mxu0 %v2698_v10  ;;  %v2710_v14 = vld [vmem:[%s2796_s12 + $0x250] ss:$8 sps:$4 sm:$0xff]  }
 0x133   : > { %v1403_v20 = vmax.f32 %v1036_v16, 0.0  ;;  %2487 = vmatprep.mubr.msk.bf16.mxu0 %vm804_vm0, %v2699_v13 }
 0x134   : > { %v1550_v21 = vpack.c.bf16 %v1402_v18, %v1400_v17  ;;  %v2711_v17 = vld [vmem:[%s2796_s12 + $0x264] ss:$8 sps:$4 sm:$0xff]  }
 0x135   : > { %v1551_v22 = vpack.c.bf16 %v1403_v20, %v1401_v19  ;;  %v1039_v23 = vpop.f32.mrb[28].mxu0 }
 0x136   : > { %v1040_v24 = vadd.f32 %v1039_v23, %v2994_v33  ;;  %v1041_v25 = vpop.f32.mrb[29].mxu0 }
 0x137   : > { %v1042_v27 = vadd.f32 %v1041_v25, %v2996_v34  ;;  %v1043_v28 = vpop.f32.mrb[30].mxu0  ;;  %1835 = vmatprep.mubr.bf16.mxu1 %v1551_v22 }
 0x138   : > { %v1044_v30 = vadd.f32 %v1043_v28, %v2994_v33  ;;  %v1045_v31 = vpop.f32.mrb[31].mxu0  ;;  %1836 = vmatmul.mubr.bf16.gmra.mrb[20].mxu1 %v1550_v21  ;;  %v1404_v35 = vmax.f32 %v1040_v24, 0.0 }
 0x139   : > { %v1046_v32 = vadd.f32 %v1045_v31, %v2996_v34  ;;  %v1405_v37 = vmax.f32 %v1042_v27, 0.0 }
 0x13a   : > { %v1406_v36 = vmax.f32 %v1044_v30, 0.0  ;;  %1308 = vmatmul.mubr.bf16.gmra.mrb[136].mxu0 %v2701_v26  ;;  %v2713_v30 = vld [vmem:[%s2796_s12 + $0x260] ss:$8 sps:$4 sm:$0xff]  }
 0x13b   : > { %v1407_v38 = vmax.f32 %v1046_v32, 0.0  ;;  %2488 = vmatprep.mubr.msk.bf16.mxu0 %vm804_vm0, %v2702_v29 }
 0x13c   : > { %v1552_v39 = vpack.c.bf16 %v1406_v36, %v1404_v35  ;;  %v2714_v35 = vld [vmem:[%s2796_s12 + $0x274] ss:$8 sps:$4 sm:$0xff]  }
 0x13d   : > { %v1553_v40 = vpack.c.bf16 %v1407_v38, %v1405_v37  ;;  %v1049_v41 = vpop.f32.mrb[32].mxu0 }
 0x13e   : > { %v1050_v42 = vadd.f32 %v1049_v41, %v2994_v33  ;;  %v1051_v43 = vpop.f32.mrb[33].mxu0 }
 0x13f   : > { %v1052_v45 = vadd.f32 %v1051_v43, %v2996_v34  ;;  %v1053_v46 = vpop.f32.mrb[34].mxu0  ;;  %1843 = vmatprep.mubr.bf16.mxu1 %v1553_v40 }
 0x140   : > { %v1054_v48 = vadd.f32 %v1053_v46, %v2994_v33  ;;  %v1055_v51 = vpop.f32.mrb[35].mxu0  ;;  %1844 = vmatmul.mubr.bf16.gmra.mrb[24].mxu1 %v1552_v39  ;;  %v1408_v53 = vmax.f32 %v1050_v42, 0.0 }
 0x141   : > { %v1056_v52 = vadd.f32 %v1055_v51, %v2996_v34  ;;  %v1409_v55 = vmax.f32 %v1052_v45, 0.0  ;;  %v2716_v51 = vld [vmem:[%s2796_s12 + $0x270] ss:$8 sps:$4 sm:$0xff]  }
 0x142   : > { %v1410_v54 = vmax.f32 %v1054_v48, 0.0  ;;  %1318 = vmatmul.mubr.bf16.gmra.mrb[140].mxu0 %v2704_v44  ;;  %v323_v44 = vld [vmem:[%s2796_s12 + $0x280] sm:$0xff] }
 0x143   : > { %v1411_v56 = vmax.f32 %v1056_v52, 0.0  ;;  %2489 = vmatprep.mubr.msk.bf16.mxu0 %vm804_vm0, %v2705_v47 }
 0x144   : > { %v1554_v57 = vpack.c.bf16 %v1410_v54, %v1408_v53  ;;  %v2433_v54 = vcombine.high %v323_v44, %v323_v44 }
 0x145   : > { %v1555_v58 = vpack.c.bf16 %v1411_v56, %v1409_v55  ;;  %v1059_v59 = vpop.f32.mrb[36].mxu0 }
 0x146   : > { %v1060_v60 = vadd.f32 %v1059_v59, %v2994_v33  ;;  %v1061_v61 = vpop.f32.mrb[37].mxu0 }
 0x147   : > { %v1062_v63 = vadd.f32 %v1061_v61, %v2996_v34  ;;  %v1063_v0 = vpop.f32.mrb[38].mxu0  ;;  %1851 = vmatprep.mubr.bf16.mxu1 %v1555_v58 }
 0x148   : > { %v1064_v2 = vadd.f32 %v1063_v0, %v2994_v33  ;;  %v1065_v3 = vpop.f32.mrb[39].mxu0  ;;  %1852 = vmatmul.mubr.bf16.gmra.mrb[28].mxu1 %v1554_v57  ;;  %v1412_v5 = vmax.f32 %v1060_v60, 0.0 }
 0x149   : > { %v1066_v4 = vadd.f32 %v1065_v3, %v2996_v34  ;;  %v1413_v7 = vmax.f32 %v1062_v63, 0.0  ;;  %v2432_v3 = vcombine.low %v323_v44, %v323_v44 }
 0x14a   : > { %v1414_v6 = vmax.f32 %v1064_v2, 0.0  ;;  %1328 = vmatmul.mubr.bf16.gmra.mrb[144].mxu0 %v2707_v62 }
 0x14b   : > { %v1415_v8 = vmax.f32 %v1066_v4, 0.0  ;;  %2490 = vmatprep.mubr.msk.bf16.mxu0 %vm804_vm0, %v2708_v1 }
 0x14c   : > { %v1556_v9 = vpack.c.bf16 %v1414_v6, %v1412_v5 }
 0x14d   : > { %v1557_v10 = vpack.c.bf16 %v1415_v8, %v1413_v7  ;;  %v1069_v11 = vpop.f32.mrb[40].mxu0 }
 0x14e   : > { %v1070_v12 = vadd.f32 %v1069_v11, %v2994_v33  ;;  %v1071_v13 = vpop.f32.mrb[41].mxu0 }
 0x14f   : > { %v1072_v15 = vadd.f32 %v1071_v13, %v2996_v34  ;;  %v1073_v16 = vpop.f32.mrb[42].mxu0  ;;  %1859 = vmatprep.mubr.bf16.mxu1 %v1557_v10 }
 0x150   : > { %v1074_v18 = vadd.f32 %v1073_v16, %v2994_v33  ;;  %v1075_v19 = vpop.f32.mrb[43].mxu0  ;;  %1860 = vmatmul.mubr.bf16.gmra.mrb[32].mxu1 %v1556_v9  ;;  %v1416_v21 = vmax.f32 %v1070_v12, 0.0 }
 0x151   : > { %v1076_v20 = vadd.f32 %v1075_v19, %v2996_v34  ;;  %v1417_v23 = vmax.f32 %v1072_v15, 0.0 }
 0x152   : > { %v1418_v22 = vmax.f32 %v1074_v18, 0.0  ;;  %1338 = vmatmul.mubr.bf16.gmra.mrb[148].mxu0 %v2710_v14 }
 0x153   : > { %v1419_v24 = vmax.f32 %v1076_v20, 0.0  ;;  %2491 = vmatprep.mubr.msk.bf16.mxu0 %vm804_vm0, %v2711_v17 }
 0x154   : > { %v1558_v25 = vpack.c.bf16 %v1418_v22, %v1416_v21 }
 0x155   : > { %v1559_v26 = vpack.c.bf16 %v1419_v24, %v1417_v23  ;;  %v1079_v27 = vpop.f32.mrb[44].mxu0 }
 0x156   : > { %v1080_v28 = vadd.f32 %v1079_v27, %v2994_v33  ;;  %v1081_v29 = vpop.f32.mrb[45].mxu0 }
 0x157   : > { %v1082_v31 = vadd.f32 %v1081_v29, %v2996_v34  ;;  %v1083_v32 = vpop.f32.mrb[46].mxu0  ;;  %1867 = vmatprep.mubr.bf16.mxu1 %v1559_v26 }
 0x158   : > { %v1084_v36 = vadd.f32 %v1083_v32, %v2994_v33  ;;  %v1085_v37 = vpop.f32.mrb[47].mxu0  ;;  %1868 = vmatmul.mubr.bf16.gmra.mrb[36].mxu1 %v1558_v25  ;;  %v1420_v39 = vmax.f32 %v1080_v28, 0.0 }
 0x159   : > { %v1086_v38 = vadd.f32 %v1085_v37, %v2996_v34  ;;  %v1421_v41 = vmax.f32 %v1082_v31, 0.0 }
 0x15a   : > { %v1422_v40 = vmax.f32 %v1084_v36, 0.0  ;;  %1348 = vmatmul.mubr.bf16.gmra.mrb[152].mxu0 %v2713_v30 }
 0x15b   : > { %v1423_v42 = vmax.f32 %v1086_v38, 0.0  ;;  %2492 = vmatprep.mubr.msk.bf16.mxu0 %vm804_vm0, %v2714_v35 }
 0x15c   : > { %v1560_v43 = vpack.c.bf16 %v1422_v40, %v1420_v39 }
 0x15d   : > { %v1561_v45 = vpack.c.bf16 %v1423_v42, %v1421_v41  ;;  %v1089_v46 = vpop.f32.mrb[48].mxu0 }
 0x15e   : > { %v1090_v47 = vadd.f32 %v1089_v46, %v2994_v33  ;;  %v1091_v48 = vpop.f32.mrb[49].mxu0 }
 0x15f   : > { %v1092_v52 = vadd.f32 %v1091_v48, %v2996_v34  ;;  %v1093_v53 = vpop.f32.mrb[50].mxu0  ;;  %1875 = vmatprep.mubr.bf16.mxu1 %v1561_v45 }
 0x160   : > { %v1094_v55 = vadd.f32 %v1093_v53, %v2994_v33  ;;  %v1095_v56 = vpop.f32.mrb[51].mxu0  ;;  %1876 = vmatmul.mubr.bf16.gmra.mrb[40].mxu1 %v1560_v43  ;;  %v1424_v58 = vmax.f32 %v1090_v47, 0.0 }
 0x161   : > { %v1096_v57 = vadd.f32 %v1095_v56, %v2996_v34  ;;  %v1425_v60 = vmax.f32 %v1092_v52, 0.0 }
 0x162   : > { %v1426_v59 = vmax.f32 %v1094_v55, 0.0  ;;  %1358 = vmatmul.mubr.bf16.gmra.mrb[156].mxu0 %v2716_v51 }
 0x163   : > { %v1427_v61 = vmax.f32 %v1096_v57, 0.0  ;;  %2493 = vmatprep.mubr.msk.bf16.mxu0 %vm804_vm0, %v2433_v54 }
 0x164   : > { %v1562_v62 = vpack.c.bf16 %v1426_v59, %v1424_v58 }
 0x165   : > { %v1563_v63 = vpack.c.bf16 %v1427_v61, %v1425_v60  ;;  %v1099_v0 = vpop.f32.mrb[52].mxu0 }
 0x166   : > { %v1100_v1 = vadd.f32 %v1099_v0, %v2994_v33  ;;  %v1101_v2 = vpop.f32.mrb[53].mxu0 }
 0x167   : > { %v1102_v4 = vadd.f32 %v1101_v2, %v2996_v34  ;;  %v1103_v5 = vpop.f32.mrb[54].mxu0  ;;  %1883 = vmatprep.mubr.bf16.mxu1 %v1563_v63 }
 0x168   : > { %v1104_v6 = vadd.f32 %v1103_v5, %v2994_v33  ;;  %v1105_v7 = vpop.f32.mrb[55].mxu0  ;;  %1884 = vmatmul.mubr.bf16.gmra.mrb[44].mxu1 %v1562_v62  ;;  %v1428_v9 = vmax.f32 %v1100_v1, 0.0 }
 0x169   : > { %v1106_v8 = vadd.f32 %v1105_v7, %v2996_v34  ;;  %v1429_v11 = vmax.f32 %v1102_v4, 0.0 }
 0x16a   : > { %v1430_v10 = vmax.f32 %v1104_v6, 0.0  ;;  %1368 = vmatmul.mubr.bf16.gmra.mrb[160].mxu0 %v2432_v3 }
 0x16b   : > { %v1431_v12 = vmax.f32 %v1106_v8, 0.0  ;;  %1787 = vmatprep.mubr.bf16.mxu0 %v3008_v50 }
 0x16c   : > { %v1564_v13 = vpack.c.bf16 %v1430_v10, %v1428_v9 }
 0x16d   : > { %v1565_v14 = vpack.c.bf16 %v1431_v12, %v1429_v11  ;;  %v1109_v15 = vpop.f32.mrb[56].mxu0 }
 0x16e   : > { %v1110_v16 = vadd.f32 %v1109_v15, %v2994_v33  ;;  %v1111_v17 = vpop.f32.mrb[57].mxu0 }
 0x16f   : > { %v1112_v18 = vadd.f32 %v1111_v17, %v2996_v34  ;;  %v1113_v19 = vpop.f32.mrb[58].mxu0  ;;  %1891 = vmatprep.mubr.bf16.mxu1 %v1565_v14 }
 0x170   : > { %v1114_v20 = vadd.f32 %v1113_v19, %v2994_v33  ;;  %v1115_v21 = vpop.f32.mrb[59].mxu0  ;;  %1892 = vmatmul.mubr.bf16.gmra.mrb[48].mxu1 %v1564_v13  ;;  %v1432_v23 = vmax.f32 %v1110_v16, 0.0 }
 0x171   : > { %v1116_v22 = vadd.f32 %v1115_v21, %v2996_v34  ;;  %v1433_v50 = vmax.f32 %v1112_v18, 0.0 }
 0x172   : > { %v1434_v24 = vmax.f32 %v1114_v20, 0.0  ;;  %1788 = vmatmul.mubr.bf16.vlgmr.msra.gmra.mrb[164].mxu0 %v3006_v49 }
 0x173   : > { %v1435_v25 = vmax.f32 %v1116_v22, 0.0 }
 0x174   : > { %v1566_v26 = vpack.c.bf16 %v1434_v24, %v1432_v23 }
 0x175   : > { %v1567_v27 = vpack.c.bf16 %v1435_v25, %v1433_v50  ;;  %v1119_v28 = vpop.f32.mrb[60].mxu0 }
 0x176   : > { %v1120_v29 = vadd.f32 %v1119_v28, %v2994_v33  ;;  %v1121_v30 = vpop.f32.mrb[61].mxu0 }
 0x177   : > { %v1122_v31 = vadd.f32 %v1121_v30, %v2996_v34  ;;  %v1123_v32 = vpop.f32.mrb[62].mxu0  ;;  %1899 = vmatprep.mubr.bf16.mxu1 %v1567_v27 }
 0x178   : > { %v1124_v35 = vadd.f32 %v1123_v32, %v2994_v33  ;;  %v1125_v36 = vpop.f32.mrb[63].mxu0  ;;  %1900 = vmatmul.mubr.bf16.gmra.mrb[52].mxu1 %v1566_v26  ;;  %v1436_v38 = vmax.f32 %v1120_v29, 0.0 }
 0x179   : > { %v1126_v37 = vadd.f32 %v1125_v36, %v2996_v34  ;;  %v1437_v39 = vmax.f32 %v1122_v31, 0.0 }
 0x17a   : > { %v1438_v49 = vmax.f32 %v1124_v35, 0.0 }
 0x17b   : > { %v1439_v40 = vmax.f32 %v1126_v37, 0.0 }
 0x17c   : > { %v1568_v41 = vpack.c.bf16 %v1438_v49, %v1436_v38 }
 0x17d   : > { %v1569_v42 = vpack.c.bf16 %v1439_v40, %v1437_v39  ;;  %v1129_v43 = vpop.f32.mrb[64].mxu0 }
 0x17e   : > { %v1130_v44 = vadd.f32 %v1129_v43, %v2994_v33  ;;  %v1131_v45 = vpop.f32.mrb[65].mxu0 }
 0x17f   : > { %v1132_v46 = vadd.f32 %v1131_v45, %v2996_v34  ;;  %v1133_v47 = vpop.f32.mrb[66].mxu0  ;;  %1907 = vmatprep.mubr.bf16.mxu1 %v1569_v42 }
 0x180   : > { %v1134_v48 = vadd.f32 %v1133_v47, %v2994_v33  ;;  %v1135_v51 = vpop.f32.mrb[67].mxu0  ;;  %1908 = vmatmul.mubr.bf16.gmra.mrb[56].mxu1 %v1568_v41  ;;  %v1440_v53 = vmax.f32 %v1130_v44, 0.0 }
 0x181   : > { %v1136_v52 = vadd.f32 %v1135_v51, %v2996_v34  ;;  %v1441_v55 = vmax.f32 %v1132_v46, 0.0 }
 0x182   : > { %v1442_v54 = vmax.f32 %v1134_v48, 0.0 }
 0x183   : > { %v1443_v56 = vmax.f32 %v1136_v52, 0.0 }
 0x184   : > { %v1570_v57 = vpack.c.bf16 %v1442_v54, %v1440_v53 }
 0x185   : > { %v1571_v58 = vpack.c.bf16 %v1443_v56, %v1441_v55  ;;  %v1139_v59 = vpop.f32.mrb[68].mxu0 }
 0x186   : > { %v1140_v60 = vadd.f32 %v1139_v59, %v2994_v33  ;;  %v1141_v61 = vpop.f32.mrb[69].mxu0 }
 0x187   : > { %v1142_v62 = vadd.f32 %v1141_v61, %v2996_v34  ;;  %v1143_v63 = vpop.f32.mrb[70].mxu0  ;;  %1915 = vmatprep.mubr.bf16.mxu1 %v1571_v58 }
 0x188   : > { %v1144_v0 = vadd.f32 %v1143_v63, %v2994_v33  ;;  %v1145_v1 = vpop.f32.mrb[71].mxu0  ;;  %1916 = vmatmul.mubr.bf16.gmra.mrb[60].mxu1 %v1570_v57  ;;  %v1444_v3 = vmax.f32 %v1140_v60, 0.0 }
 0x189   : > { %v1146_v2 = vadd.f32 %v1145_v1, %v2996_v34  ;;  %v1445_v5 = vmax.f32 %v1142_v62, 0.0 }
 0x18a   : > { %v1446_v4 = vmax.f32 %v1144_v0, 0.0 }
 0x18b   : > { %v1447_v6 = vmax.f32 %v1146_v2, 0.0 }
 0x18c   : > { %v1572_v7 = vpack.c.bf16 %v1446_v4, %v1444_v3 }
 0x18d   : > { %v1573_v8 = vpack.c.bf16 %v1447_v6, %v1445_v5  ;;  %v1149_v9 = vpop.f32.mrb[72].mxu0 }
 0x18e   : > { %v1150_v10 = vadd.f32 %v1149_v9, %v2994_v33  ;;  %v1151_v11 = vpop.f32.mrb[73].mxu0 }
 0x18f   : > { %v1152_v12 = vadd.f32 %v1151_v11, %v2996_v34  ;;  %v1153_v13 = vpop.f32.mrb[74].mxu0  ;;  %1923 = vmatprep.mubr.bf16.mxu1 %v1573_v8 }
 0x190   : > { %v1154_v14 = vadd.f32 %v1153_v13, %v2994_v33  ;;  %v1155_v15 = vpop.f32.mrb[75].mxu0  ;;  %1924 = vmatmul.mubr.bf16.gmra.mrb[64].mxu1 %v1572_v7  ;;  %v1448_v17 = vmax.f32 %v1150_v10, 0.0 }
 0x191   : > { %v1156_v16 = vadd.f32 %v1155_v15, %v2996_v34  ;;  %v1449_v19 = vmax.f32 %v1152_v12, 0.0 }
 0x192   : > { %v1450_v18 = vmax.f32 %v1154_v14, 0.0 }
 0x193   : > { %v1451_v20 = vmax.f32 %v1156_v16, 0.0 }
 0x194   : > { %v1574_v21 = vpack.c.bf16 %v1450_v18, %v1448_v17 }
 0x195   : > { %v1575_v22 = vpack.c.bf16 %v1451_v20, %v1449_v19  ;;  %v1159_v23 = vpop.f32.mrb[76].mxu0 }
 0x196   : > { %v1160_v24 = vadd.f32 %v1159_v23, %v2994_v33  ;;  %v1161_v50 = vpop.f32.mrb[77].mxu0 }
 0x197   : > { %v1162_v25 = vadd.f32 %v1161_v50, %v2996_v34  ;;  %v1163_v26 = vpop.f32.mrb[78].mxu0  ;;  %1931 = vmatprep.mubr.bf16.mxu1 %v1575_v22 }
 0x198   : > { %v1164_v27 = vadd.f32 %v1163_v26, %v2994_v33  ;;  %v1165_v28 = vpop.f32.mrb[79].mxu0  ;;  %1932 = vmatmul.mubr.bf16.gmra.mrb[68].mxu1 %v1574_v21  ;;  %v1452_v30 = vmax.f32 %v1160_v24, 0.0 }
 0x199   : > { %v1166_v29 = vadd.f32 %v1165_v28, %v2996_v34  ;;  %v1453_v32 = vmax.f32 %v1162_v25, 0.0 }
 0x19a   : > { %v1454_v31 = vmax.f32 %v1164_v27, 0.0 }
 0x19b   : > { %v1455_v35 = vmax.f32 %v1166_v29, 0.0 }
 0x19c   : > { %v1576_v36 = vpack.c.bf16 %v1454_v31, %v1452_v30 }
 0x19d   : > { %v1577_v37 = vpack.c.bf16 %v1455_v35, %v1453_v32  ;;  %v1169_v38 = vpop.f32.mrb[80].mxu0 }
 0x19e   : > { %v1170_v49 = vadd.f32 %v1169_v38, %v2994_v33  ;;  %v1171_v39 = vpop.f32.mrb[81].mxu0 }
 0x19f   : > { %v1172_v40 = vadd.f32 %v1171_v39, %v2996_v34  ;;  %v1173_v41 = vpop.f32.mrb[82].mxu0  ;;  %1939 = vmatprep.mubr.bf16.mxu1 %v1577_v37 }
 0x1a0   : > { %v1174_v42 = vadd.f32 %v1173_v41, %v2994_v33  ;;  %v1175_v43 = vpop.f32.mrb[83].mxu0  ;;  %1940 = vmatmul.mubr.bf16.gmra.mrb[72].mxu1 %v1576_v36  ;;  %v1456_v45 = vmax.f32 %v1170_v49, 0.0 }
 0x1a1   : > { %v1176_v44 = vadd.f32 %v1175_v43, %v2996_v34  ;;  %v1457_v47 = vmax.f32 %v1172_v40, 0.0 }
 0x1a2   : > { %v1458_v46 = vmax.f32 %v1174_v42, 0.0 }
 0x1a3   : > { %v1459_v48 = vmax.f32 %v1176_v44, 0.0 }
 0x1a4   : > { %v1578_v51 = vpack.c.bf16 %v1458_v46, %v1456_v45 }
 0x1a5   : > { %v1579_v52 = vpack.c.bf16 %v1459_v48, %v1457_v47  ;;  %v1179_v53 = vpop.f32.mrb[84].mxu0 }
 0x1a6   : > { %v1180_v54 = vadd.f32 %v1179_v53, %v2994_v33  ;;  %v1181_v55 = vpop.f32.mrb[85].mxu0 }
 0x1a7   : > { %v1182_v56 = vadd.f32 %v1181_v55, %v2996_v34  ;;  %v1183_v57 = vpop.f32.mrb[86].mxu0  ;;  %1947 = vmatprep.mubr.bf16.mxu1 %v1579_v52 }
 0x1a8   : > { %v1184_v58 = vadd.f32 %v1183_v57, %v2994_v33  ;;  %v1185_v59 = vpop.f32.mrb[87].mxu0  ;;  %1948 = vmatmul.mubr.bf16.gmra.mrb[76].mxu1 %v1578_v51  ;;  %v1460_v61 = vmax.f32 %v1180_v54, 0.0 }
 0x1a9   : > { %v1186_v60 = vadd.f32 %v1185_v59, %v2996_v34  ;;  %v1461_v63 = vmax.f32 %v1182_v56, 0.0 }
 0x1aa   : > { %v1462_v62 = vmax.f32 %v1184_v58, 0.0 }
 0x1ab   : > { %v1463_v0 = vmax.f32 %v1186_v60, 0.0 }
 0x1ac   : > { %v1580_v1 = vpack.c.bf16 %v1462_v62, %v1460_v61 }
 0x1ad   : > { %v1581_v2 = vpack.c.bf16 %v1463_v0, %v1461_v63  ;;  %v1189_v3 = vpop.f32.mrb[88].mxu0 }
 0x1ae   : > { %v1190_v4 = vadd.f32 %v1189_v3, %v2994_v33  ;;  %v1191_v5 = vpop.f32.mrb[89].mxu0 }
 0x1af   : > { %v1192_v6 = vadd.f32 %v1191_v5, %v2996_v34  ;;  %v1193_v7 = vpop.f32.mrb[90].mxu0  ;;  %1955 = vmatprep.mubr.bf16.mxu1 %v1581_v2 }
 0x1b0   : > { %v1194_v8 = vadd.f32 %v1193_v7, %v2994_v33  ;;  %v1195_v9 = vpop.f32.mrb[91].mxu0  ;;  %1956 = vmatmul.mubr.bf16.gmra.mrb[80].mxu1 %v1580_v1  ;;  %v1464_v11 = vmax.f32 %v1190_v4, 0.0 }
 0x1b1   : > { %v1196_v10 = vadd.f32 %v1195_v9, %v2996_v34  ;;  %v1465_v13 = vmax.f32 %v1192_v6, 0.0 }
 0x1b2   : > { %v1466_v12 = vmax.f32 %v1194_v8, 0.0 }
 0x1b3   : > { %v1467_v14 = vmax.f32 %v1196_v10, 0.0 }
 0x1b4   : > { %v1582_v15 = vpack.c.bf16 %v1466_v12, %v1464_v11 }
 0x1b5   : > { %v1583_v16 = vpack.c.bf16 %v1467_v14, %v1465_v13  ;;  %v1199_v17 = vpop.f32.mrb[92].mxu0 }
 0x1b6   : > { %v1200_v18 = vadd.f32 %v1199_v17, %v2994_v33  ;;  %v1201_v19 = vpop.f32.mrb[93].mxu0 }
 0x1b7   : > { %v1202_v20 = vadd.f32 %v1201_v19, %v2996_v34  ;;  %v1203_v21 = vpop.f32.mrb[94].mxu0  ;;  %1963 = vmatprep.mubr.bf16.mxu1 %v1583_v16 }
 0x1b8   : > { %v1204_v22 = vadd.f32 %v1203_v21, %v2994_v33  ;;  %v1205_v23 = vpop.f32.mrb[95].mxu0  ;;  %1964 = vmatmul.mubr.bf16.gmra.mrb[84].mxu1 %v1582_v15  ;;  %v1468_v50 = vmax.f32 %v1200_v18, 0.0 }
 0x1b9   : > { %v1206_v24 = vadd.f32 %v1205_v23, %v2996_v34  ;;  %v1469_v26 = vmax.f32 %v1202_v20, 0.0 }
 0x1ba   : > { %v1470_v25 = vmax.f32 %v1204_v22, 0.0 }
 0x1bb   : > { %v1471_v27 = vmax.f32 %v1206_v24, 0.0 }
 0x1bc   : > { %v1584_v28 = vpack.c.bf16 %v1470_v25, %v1468_v50 }
 0x1bd   : > { %v1585_v29 = vpack.c.bf16 %v1471_v27, %v1469_v26  ;;  %v1209_v30 = vpop.f32.mrb[96].mxu0 }
 0x1be   : > { %v1210_v31 = vadd.f32 %v1209_v30, %v2994_v33  ;;  %v1211_v32 = vpop.f32.mrb[97].mxu0 }
 0x1bf   : > { %v1212_v35 = vadd.f32 %v1211_v32, %v2996_v34  ;;  %v1213_v36 = vpop.f32.mrb[98].mxu0  ;;  %1971 = vmatprep.mubr.bf16.mxu1 %v1585_v29  ;;  %v3163_v32 = vld [vmem:[%s3392_s4] ss:$0 sm:$0xff] }
 0x1c0   : > { %v1214_v37 = vadd.f32 %v1213_v36, %v2994_v33  ;;  %v1215_v38 = vpop.f32.mrb[99].mxu0  ;;  %1972 = vmatmul.mubr.bf16.gmra.mrb[88].mxu1 %v1584_v28  ;;  %v1472_v39 = vmax.f32 %v1210_v31, 0.0 }
 0x1c1   : > { %v1216_v49 = vadd.f32 %v1215_v38, %v2996_v34  ;;  %v1473_v41 = vmax.f32 %v1212_v35, 0.0 }
 0x1c2   : > { %v1474_v40 = vmax.f32 %v1214_v37, 0.0 }
 0x1c3   : > { %v1475_v42 = vmax.f32 %v1216_v49, 0.0 }
 0x1c4   : > { %v1586_v43 = vpack.c.bf16 %v1474_v40, %v1472_v39 }
 0x1c5   : > { %v1587_v44 = vpack.c.bf16 %v1475_v42, %v1473_v41  ;;  %v1219_v45 = vpop.f32.mrb[100].mxu0 }
 0x1c6   : > { %v1220_v46 = vadd.f32 %v1219_v45, %v2994_v33  ;;  %v1221_v47 = vpop.f32.mrb[101].mxu0 }
 0x1c7   : > { %v1222_v48 = vadd.f32 %v1221_v47, %v2996_v34  ;;  %v1223_v51 = vpop.f32.mrb[102].mxu0  ;;  %1979 = vmatprep.mubr.bf16.mxu1 %v1587_v44 }
 0x1c8   : > { %v1224_v52 = vadd.f32 %v1223_v51, %v2994_v33  ;;  %v1225_v53 = vpop.f32.mrb[103].mxu0  ;;  %1980 = vmatmul.mubr.bf16.gmra.mrb[92].mxu1 %v1586_v43  ;;  %v1476_v55 = vmax.f32 %v1220_v46, 0.0 }
 0x1c9   : > { %v1226_v54 = vadd.f32 %v1225_v53, %v2996_v34  ;;  %v1477_v57 = vmax.f32 %v1222_v48, 0.0 }
 0x1ca   : > { %v1478_v56 = vmax.f32 %v1224_v52, 0.0 }
 0x1cb   : > { %v1479_v58 = vmax.f32 %v1226_v54, 0.0 }
 0x1cc   : > { %v1588_v59 = vpack.c.bf16 %v1478_v56, %v1476_v55 }
 0x1cd   : > { %v1589_v60 = vpack.c.bf16 %v1479_v58, %v1477_v57  ;;  %v1229_v61 = vpop.f32.mrb[104].mxu0 }
 0x1ce   : > { %v1230_v62 = vadd.f32 %v1229_v61, %v2994_v33  ;;  %v1231_v63 = vpop.f32.mrb[105].mxu0 }
 0x1cf   : > { %v1232_v0 = vadd.f32 %v1231_v63, %v2996_v34  ;;  %v1233_v1 = vpop.f32.mrb[106].mxu0  ;;  %1987 = vmatprep.mubr.bf16.mxu1 %v1589_v60 }
 0x1d0   : > { %v1234_v2 = vadd.f32 %v1233_v1, %v2994_v33  ;;  %v1235_v3 = vpop.f32.mrb[107].mxu0  ;;  %1988 = vmatmul.mubr.bf16.gmra.mrb[96].mxu1 %v1588_v59  ;;  %v1480_v5 = vmax.f32 %v1230_v62, 0.0 }
 0x1d1   : > { %v1236_v4 = vadd.f32 %v1235_v3, %v2996_v34  ;;  %v1481_v7 = vmax.f32 %v1232_v0, 0.0 }
 0x1d2   : > { %v1482_v6 = vmax.f32 %v1234_v2, 0.0 }
 0x1d3   : > { %v1483_v8 = vmax.f32 %v1236_v4, 0.0 }
 0x1d4   : > { %v1590_v9 = vpack.c.bf16 %v1482_v6, %v1480_v5 }
 0x1d5   : > { %v1591_v10 = vpack.c.bf16 %v1483_v8, %v1481_v7  ;;  %v1239_v11 = vpop.f32.mrb[108].mxu0 }
 0x1d6   : > { %v1240_v12 = vadd.f32 %v1239_v11, %v2994_v33  ;;  %v1241_v13 = vpop.f32.mrb[109].mxu0 }
 0x1d7   : > { %v1242_v14 = vadd.f32 %v1241_v13, %v2996_v34  ;;  %v1243_v15 = vpop.f32.mrb[110].mxu0  ;;  %1995 = vmatprep.mubr.bf16.mxu1 %v1591_v10 }
 0x1d8   : > { %v1244_v16 = vadd.f32 %v1243_v15, %v2994_v33  ;;  %v1245_v17 = vpop.f32.mrb[111].mxu0  ;;  %1996 = vmatmul.mubr.bf16.gmra.mrb[100].mxu1 %v1590_v9  ;;  %v1484_v19 = vmax.f32 %v1240_v12, 0.0 }
 0x1d9   : > { %v1246_v18 = vadd.f32 %v1245_v17, %v2996_v34  ;;  %v1485_v21 = vmax.f32 %v1242_v14, 0.0 }
 0x1da   : > { %v1486_v20 = vmax.f32 %v1244_v16, 0.0 }
 0x1db   : > { %v1487_v22 = vmax.f32 %v1246_v18, 0.0 }
 0x1dc   : > { %v1592_v23 = vpack.c.bf16 %v1486_v20, %v1484_v19 }
 0x1dd   : > { %v1593_v24 = vpack.c.bf16 %v1487_v22, %v1485_v21  ;;  %v1249_v50 = vpop.f32.mrb[112].mxu0 }
 0x1de   : > { %v1250_v25 = vadd.f32 %v1249_v50, %v2994_v33  ;;  %v1251_v26 = vpop.f32.mrb[113].mxu0 }
 0x1df   : > { %v1252_v27 = vadd.f32 %v1251_v26, %v2996_v34  ;;  %v1253_v28 = vpop.f32.mrb[114].mxu0  ;;  %2003 = vmatprep.mubr.bf16.mxu1 %v1593_v24 }
 0x1e0   : > { %v1254_v29 = vadd.f32 %v1253_v28, %v2994_v33  ;;  %v1255_v30 = vpop.f32.mrb[115].mxu0  ;;  %2004 = vmatmul.mubr.bf16.gmra.mrb[104].mxu1 %v1592_v23  ;;  %v1488_v35 = vmax.f32 %v1250_v25, 0.0 }
 0x1e1   : > { %v1256_v31 = vadd.f32 %v1255_v30, %v2996_v34  ;;  %v1489_v37 = vmax.f32 %v1252_v27, 0.0 }
 0x1e2   : > { %v1490_v36 = vmax.f32 %v1254_v29, 0.0 }
 0x1e3   : > { %v1491_v38 = vmax.f32 %v1256_v31, 0.0  ;;  %v1797_v49 = vpop.f32.mrb[0].mxu1 }
 0x1e4   : > { %v1594_v39 = vpack.c.bf16 %v1490_v36, %v1488_v35  ;;  %v1798_v40 = vadd.f32 %v3163_v32, %v1797_v49  ;;  %v1799_v41 = vpop.f32.mrb[1].mxu1 }
 0x1e5   : > { %v1595_v42 = vpack.c.bf16 %v1491_v38, %v1489_v37  ;;  %v1259_v43 = vpop.f32.mrb[116].mxu0  ;;  %v1800_v44 = vpop.f32.mrb[2].mxu1 }
 0x1e6   : > { %v2117_v45 = vmax.f32 %v1798_v40, 0.0  ;;  %v1260_v46 = vadd.f32 %v1259_v43, %v2994_v33  ;;  %v1801_v47 = vadd.f32 %v3163_v32, %v1800_v44  ;;  %v1261_v48 = vpop.f32.mrb[117].mxu0  ;;  %v1802_v51 = vpop.f32.mrb[3].mxu1 }
 0x1e7   : > { %v1262_v52 = vadd.f32 %v1261_v48, %v2996_v34  ;;  %v1263_v53 = vpop.f32.mrb[118].mxu0  ;;  %2011 = vmatprep.mubr.bf16.mxu1 %v1595_v42 }
 0x1e8   : > { %2198 = vst [vmem:[%s3171_s8 + $0x10] sm:$0xff] %v2117_v45  ;;  %v2118_v54 = vmax.f32 %v1801_v47, 0.0  ;;  %v1264_v55 = vadd.f32 %v1263_v53, %v2994_v33  ;;  %v1265_v56 = vpop.f32.mrb[119].mxu0  ;;  %2012 = vmatmul.mubr.bf16.gmra.mrb[108].mxu1 %v1594_v39  ;;  %v1492_v58 = vmax.f32 %v1260_v46, 0.0 }
 0x1e9   : > { %v1266_v57 = vadd.f32 %v1265_v56, %v2996_v34  ;;  %v1493_v60 = vmax.f32 %v1262_v52, 0.0 }
 0x1ea   : > { %2199 = vst [vmem:[%s3171_s8 + $0x18] sm:$0xff] %v2118_v54  ;;  %v1494_v59 = vmax.f32 %v1264_v55, 0.0 }
 0x1eb   : > { %v1495_v61 = vmax.f32 %v1266_v57, 0.0  ;;  %v1805_v62 = vpop.f32.mrb[4].mxu1 }
 0x1ec   : > { %v1596_v63 = vpack.c.bf16 %v1494_v59, %v1492_v58  ;;  %v1806_v0 = vadd.f32 %v3163_v32, %v1805_v62  ;;  %v1807_v1 = vpop.f32.mrb[5].mxu1 }
 0x1ed   : > { %v1597_v2 = vpack.c.bf16 %v1495_v61, %v1493_v60  ;;  %v1269_v3 = vpop.f32.mrb[120].mxu0  ;;  %v1808_v4 = vpop.f32.mrb[6].mxu1 }
 0x1ee   : > { %v2119_v5 = vmax.f32 %v1806_v0, 0.0  ;;  %v1270_v6 = vadd.f32 %v1269_v3, %v2994_v33  ;;  %v1809_v7 = vadd.f32 %v3163_v32, %v1808_v4  ;;  %v1271_v8 = vpop.f32.mrb[121].mxu0  ;;  %v1810_v9 = vpop.f32.mrb[7].mxu1 }
 0x1ef   : > { %v1272_v10 = vadd.f32 %v1271_v8, %v2996_v34  ;;  %v1273_v11 = vpop.f32.mrb[122].mxu0  ;;  %2019 = vmatprep.mubr.bf16.mxu1 %v1597_v2 }
 0x1f0   : > { %2200 = vst [vmem:[%s3171_s8 + $0x20] sm:$0xff] %v2119_v5  ;;  %v2120_v12 = vmax.f32 %v1809_v7, 0.0  ;;  %v1274_v13 = vadd.f32 %v1273_v11, %v2994_v33  ;;  %v1275_v14 = vpop.f32.mrb[123].mxu0  ;;  %2020 = vmatmul.mubr.bf16.gmra.mrb[112].mxu1 %v1596_v63  ;;  %v1496_v16 = vmax.f32 %v1270_v6, 0.0 }
 0x1f1   : > { %v1276_v15 = vadd.f32 %v1275_v14, %v2996_v34  ;;  %v1497_v18 = vmax.f32 %v1272_v10, 0.0 }
 0x1f2   : > { %2201 = vst [vmem:[%s3171_s8 + $0x28] sm:$0xff] %v2120_v12  ;;  %v1498_v17 = vmax.f32 %v1274_v13, 0.0 }
 0x1f3   : > { %v1499_v19 = vmax.f32 %v1276_v15, 0.0  ;;  %v1813_v20 = vpop.f32.mrb[8].mxu1 }
 0x1f4   : > { %v1598_v21 = vpack.c.bf16 %v1498_v17, %v1496_v16  ;;  %v1814_v22 = vadd.f32 %v3163_v32, %v1813_v20  ;;  %v1815_v23 = vpop.f32.mrb[9].mxu1 }
 0x1f5   : > { %v1599_v24 = vpack.c.bf16 %v1499_v19, %v1497_v18  ;;  %v1279_v50 = vpop.f32.mrb[124].mxu0  ;;  %v1816_v25 = vpop.f32.mrb[10].mxu1 }
 0x1f6   : > { %v2121_v26 = vmax.f32 %v1814_v22, 0.0  ;;  %v1280_v27 = vadd.f32 %v1279_v50, %v2994_v33  ;;  %v1817_v28 = vadd.f32 %v3163_v32, %v1816_v25  ;;  %v1281_v29 = vpop.f32.mrb[125].mxu0  ;;  %v1818_v30 = vpop.f32.mrb[11].mxu1 }
 0x1f7   : > { %v1282_v31 = vadd.f32 %v1281_v29, %v2996_v34  ;;  %v1283_v35 = vpop.f32.mrb[126].mxu0  ;;  %2027 = vmatprep.mubr.bf16.mxu1 %v1599_v24 }
 0x1f8   : > { %2202 = vst [vmem:[%s3171_s8 + $0x30] sm:$0xff] %v2121_v26  ;;  %v2122_v36 = vmax.f32 %v1817_v28, 0.0  ;;  %v1284_v37 = vadd.f32 %v1283_v35, %v2994_v33  ;;  %v1285_v38 = vpop.f32.mrb[127].mxu0  ;;  %2028 = vmatmul.mubr.bf16.gmra.mrb[116].mxu1 %v1598_v21  ;;  %v1500_v39 = vmax.f32 %v1280_v27, 0.0 }
 0x1f9   : > { %v1286_v49 = vadd.f32 %v1285_v38, %v2996_v34  ;;  %v1501_v41 = vmax.f32 %v1282_v31, 0.0 }
 0x1fa   : > { %2203 = vst [vmem:[%s3171_s8 + $0x38] sm:$0xff] %v2122_v36  ;;  %v1502_v40 = vmax.f32 %v1284_v37, 0.0 }
 0x1fb   : > { %v1503_v42 = vmax.f32 %v1286_v49, 0.0  ;;  %v1821_v43 = vpop.f32.mrb[12].mxu1 }
 0x1fc   : > { %v1600_v44 = vpack.c.bf16 %v1502_v40, %v1500_v39  ;;  %v1822_v45 = vadd.f32 %v3163_v32, %v1821_v43  ;;  %v1823_v46 = vpop.f32.mrb[13].mxu1 }
 0x1fd   : > { %v1601_v47 = vpack.c.bf16 %v1503_v42, %v1501_v41  ;;  %v1289_v48 = vpop.f32.mrb[128].mxu0  ;;  %v1824_v51 = vpop.f32.mrb[14].mxu1 }
 0x1fe   : > { %v2123_v52 = vmax.f32 %v1822_v45, 0.0  ;;  %v1290_v53 = vadd.f32 %v1289_v48, %v2994_v33  ;;  %v1825_v54 = vadd.f32 %v3163_v32, %v1824_v51  ;;  %v1291_v55 = vpop.f32.mrb[129].mxu0  ;;  %v1826_v56 = vpop.f32.mrb[15].mxu1 }
 0x1ff   : > { %v1292_v57 = vadd.f32 %v1291_v55, %v2996_v34  ;;  %v1293_v58 = vpop.f32.mrb[130].mxu0  ;;  %2035 = vmatprep.mubr.bf16.mxu1 %v1601_v47 }
 0x200   : > { %2204 = vst [vmem:[%s3171_s8 + $0x40] sm:$0xff] %v2123_v52  ;;  %v2124_v59 = vmax.f32 %v1825_v54, 0.0  ;;  %v1294_v60 = vadd.f32 %v1293_v58, %v2994_v33  ;;  %v1295_v61 = vpop.f32.mrb[131].mxu0  ;;  %2036 = vmatmul.mubr.bf16.gmra.mrb[120].mxu1 %v1600_v44  ;;  %v1504_v63 = vmax.f32 %v1290_v53, 0.0 }
 0x201   : > { %v1296_v62 = vadd.f32 %v1295_v61, %v2996_v34  ;;  %v1505_v1 = vmax.f32 %v1292_v57, 0.0 }
 0x202   : > { %2205 = vst [vmem:[%s3171_s8 + $0x48] sm:$0xff] %v2124_v59  ;;  %v1506_v0 = vmax.f32 %v1294_v60, 0.0 }
 0x203   : > { %v1507_v2 = vmax.f32 %v1296_v62, 0.0  ;;  %v1829_v3 = vpop.f32.mrb[16].mxu1 }
 0x204   : > { %v1602_v4 = vpack.c.bf16 %v1506_v0, %v1504_v63  ;;  %v1830_v5 = vadd.f32 %v3163_v32, %v1829_v3  ;;  %v1831_v6 = vpop.f32.mrb[17].mxu1 }
 0x205   : > { %v1603_v7 = vpack.c.bf16 %v1507_v2, %v1505_v1  ;;  %v1299_v8 = vpop.f32.mrb[132].mxu0  ;;  %v1832_v9 = vpop.f32.mrb[18].mxu1 }
 0x206   : > { %v2125_v10 = vmax.f32 %v1830_v5, 0.0  ;;  %v1300_v11 = vadd.f32 %v1299_v8, %v2994_v33  ;;  %v1833_v12 = vadd.f32 %v3163_v32, %v1832_v9  ;;  %v1301_v13 = vpop.f32.mrb[133].mxu0  ;;  %v1834_v14 = vpop.f32.mrb[19].mxu1 }
 0x207   : > { %v1302_v15 = vadd.f32 %v1301_v13, %v2996_v34  ;;  %v1303_v16 = vpop.f32.mrb[134].mxu0  ;;  %2043 = vmatprep.mubr.bf16.mxu1 %v1603_v7 }
 0x208   : > { %2206 = vst [vmem:[%s3171_s8 + $0x50] sm:$0xff] %v2125_v10  ;;  %v2126_v17 = vmax.f32 %v1833_v12, 0.0  ;;  %v1304_v18 = vadd.f32 %v1303_v16, %v2994_v33  ;;  %v1305_v19 = vpop.f32.mrb[135].mxu0  ;;  %2044 = vmatmul.mubr.bf16.gmra.mrb[124].mxu1 %v1602_v4  ;;  %v1508_v21 = vmax.f32 %v1300_v11, 0.0 }
 0x209   : > { %v1306_v20 = vadd.f32 %v1305_v19, %v2996_v34  ;;  %v1509_v23 = vmax.f32 %v1302_v15, 0.0 }
 0x20a   : > { %2207 = vst [vmem:[%s3171_s8 + $0x58] sm:$0xff] %v2126_v17  ;;  %v1510_v22 = vmax.f32 %v1304_v18, 0.0 }
 0x20b   : > { %v1511_v24 = vmax.f32 %v1306_v20, 0.0  ;;  %v1837_v50 = vpop.f32.mrb[20].mxu1 }
 0x20c   : > { %v1604_v25 = vpack.c.bf16 %v1510_v22, %v1508_v21  ;;  %v1838_v26 = vadd.f32 %v3163_v32, %v1837_v50  ;;  %v1839_v27 = vpop.f32.mrb[21].mxu1 }
 0x20d   : > { %v1605_v28 = vpack.c.bf16 %v1511_v24, %v1509_v23  ;;  %v1309_v29 = vpop.f32.mrb[136].mxu0  ;;  %v1840_v30 = vpop.f32.mrb[22].mxu1 }
 0x20e   : > { %v2127_v31 = vmax.f32 %v1838_v26, 0.0  ;;  %v1310_v35 = vadd.f32 %v1309_v29, %v2994_v33  ;;  %v1841_v36 = vadd.f32 %v3163_v32, %v1840_v30  ;;  %v1311_v37 = vpop.f32.mrb[137].mxu0  ;;  %v1842_v38 = vpop.f32.mrb[23].mxu1 }
 0x20f   : > { %v1312_v49 = vadd.f32 %v1311_v37, %v2996_v34  ;;  %v1313_v39 = vpop.f32.mrb[138].mxu0  ;;  %2051 = vmatprep.mubr.bf16.mxu1 %v1605_v28 }
 0x210   : > { %2208 = vst [vmem:[%s3171_s8 + $0x60] sm:$0xff] %v2127_v31  ;;  %v2128_v40 = vmax.f32 %v1841_v36, 0.0  ;;  %v1314_v41 = vadd.f32 %v1313_v39, %v2994_v33  ;;  %v1315_v42 = vpop.f32.mrb[139].mxu0  ;;  %2052 = vmatmul.mubr.bf16.gmra.mrb[128].mxu1 %v1604_v25  ;;  %v1512_v44 = vmax.f32 %v1310_v35, 0.0 }
 0x211   : > { %v1316_v43 = vadd.f32 %v1315_v42, %v2996_v34  ;;  %v1513_v46 = vmax.f32 %v1312_v49, 0.0 }
 0x212   : > { %2209 = vst [vmem:[%s3171_s8 + $0x68] sm:$0xff] %v2128_v40  ;;  %v1514_v45 = vmax.f32 %v1314_v41, 0.0 }
 0x213   : > { %v1515_v47 = vmax.f32 %v1316_v43, 0.0  ;;  %v1845_v48 = vpop.f32.mrb[24].mxu1 }
 0x214   : > { %v1606_v51 = vpack.c.bf16 %v1514_v45, %v1512_v44  ;;  %v1846_v52 = vadd.f32 %v3163_v32, %v1845_v48  ;;  %v1847_v53 = vpop.f32.mrb[25].mxu1 }
 0x215   : > { %v1607_v54 = vpack.c.bf16 %v1515_v47, %v1513_v46  ;;  %v1319_v55 = vpop.f32.mrb[140].mxu0  ;;  %v1848_v56 = vpop.f32.mrb[26].mxu1 }
 0x216   : > { %v2129_v57 = vmax.f32 %v1846_v52, 0.0  ;;  %v1320_v58 = vadd.f32 %v1319_v55, %v2994_v33  ;;  %v1849_v59 = vadd.f32 %v3163_v32, %v1848_v56  ;;  %v1321_v60 = vpop.f32.mrb[141].mxu0  ;;  %v1850_v61 = vpop.f32.mrb[27].mxu1 }
 0x217   : > { %v1322_v62 = vadd.f32 %v1321_v60, %v2996_v34  ;;  %v1323_v63 = vpop.f32.mrb[142].mxu0  ;;  %2059 = vmatprep.mubr.bf16.mxu1 %v1607_v54 }
 0x218   : > { %2210 = vst [vmem:[%s3171_s8 + $0x70] sm:$0xff] %v2129_v57  ;;  %v2130_v0 = vmax.f32 %v1849_v59, 0.0  ;;  %v1324_v1 = vadd.f32 %v1323_v63, %v2994_v33  ;;  %v1325_v2 = vpop.f32.mrb[143].mxu0  ;;  %2060 = vmatmul.mubr.bf16.gmra.mrb[132].mxu1 %v1606_v51  ;;  %v1516_v4 = vmax.f32 %v1320_v58, 0.0 }
 0x219   : > { %v1326_v3 = vadd.f32 %v1325_v2, %v2996_v34  ;;  %v1517_v6 = vmax.f32 %v1322_v62, 0.0 }
 0x21a   : > { %2211 = vst [vmem:[%s3171_s8 + $0x78] sm:$0xff] %v2130_v0  ;;  %v1518_v5 = vmax.f32 %v1324_v1, 0.0 }
 0x21b   : > { %v1519_v7 = vmax.f32 %v1326_v3, 0.0  ;;  %v1853_v8 = vpop.f32.mrb[28].mxu1 }
 0x21c   : > { %v1608_v9 = vpack.c.bf16 %v1518_v5, %v1516_v4  ;;  %v1854_v10 = vadd.f32 %v3163_v32, %v1853_v8  ;;  %v1855_v11 = vpop.f32.mrb[29].mxu1 }
 0x21d   : > { %v1609_v12 = vpack.c.bf16 %v1519_v7, %v1517_v6  ;;  %v1329_v13 = vpop.f32.mrb[144].mxu0  ;;  %v1856_v14 = vpop.f32.mrb[30].mxu1 }
 0x21e   : > { %v2131_v15 = vmax.f32 %v1854_v10, 0.0  ;;  %v1330_v16 = vadd.f32 %v1329_v13, %v2994_v33  ;;  %v1857_v17 = vadd.f32 %v3163_v32, %v1856_v14  ;;  %v1331_v18 = vpop.f32.mrb[145].mxu0  ;;  %v1858_v19 = vpop.f32.mrb[31].mxu1 }
 0x21f   : > { %v1332_v20 = vadd.f32 %v1331_v18, %v2996_v34  ;;  %v1333_v21 = vpop.f32.mrb[146].mxu0  ;;  %2067 = vmatprep.mubr.bf16.mxu1 %v1609_v12 }
 0x220   : > { %2212 = vst [vmem:[%s3171_s8 + $0x80] sm:$0xff] %v2131_v15  ;;  %v2132_v22 = vmax.f32 %v1857_v17, 0.0  ;;  %v1334_v23 = vadd.f32 %v1333_v21, %v2994_v33  ;;  %v1335_v24 = vpop.f32.mrb[147].mxu0  ;;  %2068 = vmatmul.mubr.bf16.gmra.mrb[136].mxu1 %v1608_v9  ;;  %v1520_v25 = vmax.f32 %v1330_v16, 0.0 }
 0x221   : > { %v1336_v50 = vadd.f32 %v1335_v24, %v2996_v34  ;;  %v1521_v27 = vmax.f32 %v1332_v20, 0.0 }
 0x222   : > { %2213 = vst [vmem:[%s3171_s8 + $0x88] sm:$0xff] %v2132_v22  ;;  %v1522_v26 = vmax.f32 %v1334_v23, 0.0 }
 0x223   : > { %v1523_v28 = vmax.f32 %v1336_v50, 0.0  ;;  %v1861_v29 = vpop.f32.mrb[32].mxu1 }
 0x224   : > { %v1610_v30 = vpack.c.bf16 %v1522_v26, %v1520_v25  ;;  %v1862_v31 = vadd.f32 %v3163_v32, %v1861_v29  ;;  %v1863_v35 = vpop.f32.mrb[33].mxu1 }
 0x225   : > { %v1611_v36 = vpack.c.bf16 %v1523_v28, %v1521_v27  ;;  %v1339_v37 = vpop.f32.mrb[148].mxu0  ;;  %v1864_v38 = vpop.f32.mrb[34].mxu1 }
 0x226   : > { %v2133_v49 = vmax.f32 %v1862_v31, 0.0  ;;  %v1340_v39 = vadd.f32 %v1339_v37, %v2994_v33  ;;  %v1865_v40 = vadd.f32 %v3163_v32, %v1864_v38  ;;  %v1341_v41 = vpop.f32.mrb[149].mxu0  ;;  %v1866_v42 = vpop.f32.mrb[35].mxu1 }
 0x227   : > { %v1342_v43 = vadd.f32 %v1341_v41, %v2996_v34  ;;  %v1343_v44 = vpop.f32.mrb[150].mxu0  ;;  %2075 = vmatprep.mubr.bf16.mxu1 %v1611_v36 }
 0x228   : > { %2214 = vst [vmem:[%s3171_s8 + $0x90] sm:$0xff] %v2133_v49  ;;  %v2134_v45 = vmax.f32 %v1865_v40, 0.0  ;;  %v1344_v46 = vadd.f32 %v1343_v44, %v2994_v33  ;;  %v1345_v47 = vpop.f32.mrb[151].mxu0  ;;  %2076 = vmatmul.mubr.bf16.gmra.mrb[140].mxu1 %v1610_v30  ;;  %v1524_v51 = vmax.f32 %v1340_v39, 0.0 }
 0x229   : > { %v1346_v48 = vadd.f32 %v1345_v47, %v2996_v34  ;;  %v1525_v53 = vmax.f32 %v1342_v43, 0.0 }
 0x22a   : > { %2215 = vst [vmem:[%s3171_s8 + $0x98] sm:$0xff] %v2134_v45  ;;  %v1526_v52 = vmax.f32 %v1344_v46, 0.0 }
 0x22b   : > { %v1527_v54 = vmax.f32 %v1346_v48, 0.0  ;;  %v1869_v55 = vpop.f32.mrb[36].mxu1 }
 0x22c   : > { %v1612_v56 = vpack.c.bf16 %v1526_v52, %v1524_v51  ;;  %v1870_v57 = vadd.f32 %v3163_v32, %v1869_v55  ;;  %v1871_v58 = vpop.f32.mrb[37].mxu1 }
 0x22d   : > { %v1613_v59 = vpack.c.bf16 %v1527_v54, %v1525_v53  ;;  %v1349_v60 = vpop.f32.mrb[152].mxu0  ;;  %v1872_v61 = vpop.f32.mrb[38].mxu1 }
 0x22e   : > { %v2135_v62 = vmax.f32 %v1870_v57, 0.0  ;;  %v1350_v63 = vadd.f32 %v1349_v60, %v2994_v33  ;;  %v1873_v0 = vadd.f32 %v3163_v32, %v1872_v61  ;;  %v1351_v1 = vpop.f32.mrb[153].mxu0  ;;  %v1874_v2 = vpop.f32.mrb[39].mxu1 }
 0x22f   : > { %v1352_v3 = vadd.f32 %v1351_v1, %v2996_v34  ;;  %v1353_v4 = vpop.f32.mrb[154].mxu0  ;;  %2083 = vmatprep.mubr.bf16.mxu1 %v1613_v59 }
 0x230   : > { %2216 = vst [vmem:[%s3171_s8 + $0xa0] sm:$0xff] %v2135_v62  ;;  %v2136_v5 = vmax.f32 %v1873_v0, 0.0  ;;  %v1354_v6 = vadd.f32 %v1353_v4, %v2994_v33  ;;  %v1355_v7 = vpop.f32.mrb[155].mxu0  ;;  %2084 = vmatmul.mubr.bf16.gmra.mrb[144].mxu1 %v1612_v56  ;;  %v1528_v9 = vmax.f32 %v1350_v63, 0.0 }
 0x231   : > { %v1356_v8 = vadd.f32 %v1355_v7, %v2996_v34  ;;  %v1529_v11 = vmax.f32 %v1352_v3, 0.0 }
 0x232   : > { %2217 = vst [vmem:[%s3171_s8 + $0xa8] sm:$0xff] %v2136_v5  ;;  %v1530_v10 = vmax.f32 %v1354_v6, 0.0 }
 0x233   : > { %v1531_v12 = vmax.f32 %v1356_v8, 0.0  ;;  %v1877_v13 = vpop.f32.mrb[40].mxu1 }
 0x234   : > { %v1614_v14 = vpack.c.bf16 %v1530_v10, %v1528_v9  ;;  %v1878_v15 = vadd.f32 %v3163_v32, %v1877_v13  ;;  %v1879_v16 = vpop.f32.mrb[41].mxu1 }
 0x235   : > { %v1615_v17 = vpack.c.bf16 %v1531_v12, %v1529_v11  ;;  %v1359_v18 = vpop.f32.mrb[156].mxu0  ;;  %v1880_v19 = vpop.f32.mrb[42].mxu1 }
 0x236   : > { %v2137_v20 = vmax.f32 %v1878_v15, 0.0  ;;  %v1360_v21 = vadd.f32 %v1359_v18, %v2994_v33  ;;  %v1881_v22 = vadd.f32 %v3163_v32, %v1880_v19  ;;  %v1361_v23 = vpop.f32.mrb[157].mxu0  ;;  %v1882_v24 = vpop.f32.mrb[43].mxu1 }
 0x237   : > { %v1362_v50 = vadd.f32 %v1361_v23, %v2996_v34  ;;  %v1363_v25 = vpop.f32.mrb[158].mxu0  ;;  %2091 = vmatprep.mubr.bf16.mxu1 %v1615_v17 }
 0x238   : > { %2218 = vst [vmem:[%s3171_s8 + $0xb0] sm:$0xff] %v2137_v20  ;;  %v2138_v26 = vmax.f32 %v1881_v22, 0.0  ;;  %v1364_v27 = vadd.f32 %v1363_v25, %v2994_v33  ;;  %v1365_v28 = vpop.f32.mrb[159].mxu0  ;;  %2092 = vmatmul.mubr.bf16.gmra.mrb[148].mxu1 %v1614_v14  ;;  %v1532_v30 = vmax.f32 %v1360_v21, 0.0 }
 0x239   : > { %v1366_v29 = vadd.f32 %v1365_v28, %v2996_v34  ;;  %v1533_v35 = vmax.f32 %v1362_v50, 0.0 }
 0x23a   : > { %2219 = vst [vmem:[%s3171_s8 + $0xb8] sm:$0xff] %v2138_v26  ;;  %v1534_v31 = vmax.f32 %v1364_v27, 0.0 }
 0x23b   : > { %v1535_v36 = vmax.f32 %v1366_v29, 0.0  ;;  %v1885_v37 = vpop.f32.mrb[44].mxu1 }
 0x23c   : > { %v1616_v38 = vpack.c.bf16 %v1534_v31, %v1532_v30  ;;  %v1886_v49 = vadd.f32 %v3163_v32, %v1885_v37  ;;  %v1887_v39 = vpop.f32.mrb[45].mxu1 }
 0x23d   : > { %v1617_v40 = vpack.c.bf16 %v1535_v36, %v1533_v35  ;;  %v1369_v41 = vpop.f32.mrb[160].mxu0  ;;  %v1888_v42 = vpop.f32.mrb[46].mxu1 }
 0x23e   : > { %v2139_v43 = vmax.f32 %v1886_v49, 0.0  ;;  %v1370_v44 = vadd.f32 %v1369_v41, %v2994_v33  ;;  %v1889_v45 = vadd.f32 %v3163_v32, %v1888_v42  ;;  %v1371_v46 = vpop.f32.mrb[161].mxu0  ;;  %v1890_v47 = vpop.f32.mrb[47].mxu1 }
 0x23f   : > { %v1372_v48 = vadd.f32 %v1371_v46, %v2996_v34  ;;  %v1373_v51 = vpop.f32.mrb[162].mxu0  ;;  %2099 = vmatprep.mubr.bf16.mxu1 %v1617_v40 }
 0x240   : > { %2220 = vst [vmem:[%s3171_s8 + $0xc0] sm:$0xff] %v2139_v43  ;;  %v2140_v52 = vmax.f32 %v1889_v45, 0.0  ;;  %v1374_v53 = vpop.f32.mrb[163].mxu0  ;;  %2100 = vmatmul.mubr.bf16.gmra.mrb[152].mxu1 %v1616_v38  ;;  %v1536_v55 = vmax.f32 %v1370_v44, 0.0 }
 0x241   : > { %v1537_v54 = vmax.f32 %v1372_v48, 0.0 }
 0x242   : > { %2221 = vst [vmem:[%s3171_s8 + $0xc8] sm:$0xff] %v2140_v52  ;;  %v1618_v34 = vpack.c.bf16 %v1536_v55, %v1536_v55 }
 0x243   : > { %v1619_v56 = vpack.c.bf16 %v1537_v54, %v1537_v54  ;;  %v1893_v57 = vpop.f32.mrb[48].mxu1 }
 0x244   : > { %v1894_v33 = vadd.f32 %v3163_v32, %v1893_v57  ;;  %v1895_v58 = vpop.f32.mrb[49].mxu1 }
 0x245   : > { %v1789_v59 = vpop.f32.mrb[164].mxu0  ;;  %v1896_v60 = vpop.f32.mrb[50].mxu1  ;;  %2107 = vmatprep.mubr.bf16.mxu1 %v1619_v56 }
 0x246   : > { %v2141_v61 = vmax.f32 %v1894_v33, 0.0  ;;  %v1790_v62 = vadd.f32 %v3163_v32, %v1789_v59  ;;  %v1897_v63 = vadd.f32 %v3163_v32, %v1896_v60  ;;  %v1791_v0 = vpop.f32.mrb[165].mxu0  ;;  %v1898_v1 = vpop.f32.mrb[51].mxu1 }
 0x247   : > { %v1792_v2 = vpop.f32.mrb[166].mxu0 }
 0x248   : > { %2222 = vst [vmem:[%s3171_s8 + $0xd0] sm:$0xff] %v2141_v61  ;;  %v2115_v3 = vmax.f32 %v1790_v62, 0.0  ;;  %v2142_v4 = vmax.f32 %v1897_v63, 0.0  ;;  %v1793_v5 = vadd.f32 %v3163_v32, %v1792_v2  ;;  %v1794_v6 = vpop.f32.mrb[167].mxu0  ;;  %2108 = vmatmul.mubr.bf16.gmra.mrb[156].mxu1 %v1618_v34 }
 0x24a   : > { %2196 = vst [vmem:[%s3171_s8] sm:$0xff] %v2115_v3  ;;  %2223 = vst [vmem:[%s3171_s8 + $0xd8] sm:$0xff] %v2142_v4  ;;  %v2116_v7 = vmax.f32 %v1793_v5, 0.0 }
 0x24b   : > { %v1901_v8 = vpop.f32.mrb[52].mxu1 }
 0x24c   : > { %2197 = vst [vmem:[%s3171_s8 + $0x8] sm:$0xff] %v2116_v7  ;;  %v1902_v9 = vadd.f32 %v3163_v32, %v1901_v8  ;;  %v1903_v10 = vpop.f32.mrb[53].mxu1 }
 0x24d   : > { %v1904_v11 = vpop.f32.mrb[54].mxu1 }
 0x24e   : > { %v2143_v12 = vmax.f32 %v1902_v9, 0.0  ;;  %v1905_v13 = vadd.f32 %v3163_v32, %v1904_v11  ;;  %v1906_v14 = vpop.f32.mrb[55].mxu1 }
 0x250   : > { %2224 = vst [vmem:[%s3171_s8 + $0xe0] sm:$0xff] %v2143_v12  ;;  %v2144_v15 = vmax.f32 %v1905_v13, 0.0 }
 0x252   : > { %2225 = vst [vmem:[%s3171_s8 + $0xe8] sm:$0xff] %v2144_v15 }
 0x253   : > { %v1909_v16 = vpop.f32.mrb[56].mxu1 }
 0x254   : > { %v1910_v17 = vadd.f32 %v3163_v32, %v1909_v16  ;;  %v1911_v18 = vpop.f32.mrb[57].mxu1 }
 0x255   : > { %v1912_v19 = vpop.f32.mrb[58].mxu1 }
 0x256   : > { %v2145_v20 = vmax.f32 %v1910_v17, 0.0  ;;  %v1913_v21 = vadd.f32 %v3163_v32, %v1912_v19  ;;  %v1914_v22 = vpop.f32.mrb[59].mxu1 }
 0x258   : > { %2226 = vst [vmem:[%s3171_s8 + $0xf0] sm:$0xff] %v2145_v20  ;;  %v2146_v23 = vmax.f32 %v1913_v21, 0.0 }
 0x25a   : > { %2227 = vst [vmem:[%s3171_s8 + $0xf8] sm:$0xff] %v2146_v23 }
 0x25b   : > { %v1917_v24 = vpop.f32.mrb[60].mxu1 }
 0x25c   : > { %v1918_v50 = vadd.f32 %v3163_v32, %v1917_v24  ;;  %v1919_v25 = vpop.f32.mrb[61].mxu1 }
 0x25d   : > { %v1920_v26 = vpop.f32.mrb[62].mxu1 }
 0x25e   : > { %v2147_v27 = vmax.f32 %v1918_v50, 0.0  ;;  %v1921_v28 = vadd.f32 %v3163_v32, %v1920_v26  ;;  %v1922_v29 = vpop.f32.mrb[63].mxu1 }
 0x260   : > { %2228 = vst [vmem:[%s3171_s8 + $0x100] sm:$0xff] %v2147_v27  ;;  %v2148_v30 = vmax.f32 %v1921_v28, 0.0 }
 0x262   : > { %2229 = vst [vmem:[%s3171_s8 + $0x108] sm:$0xff] %v2148_v30 }
 0x263   : > { %v1925_v31 = vpop.f32.mrb[64].mxu1 }
 0x264   : > { %v1926_v35 = vadd.f32 %v3163_v32, %v1925_v31  ;;  %v1927_v36 = vpop.f32.mrb[65].mxu1 }
 0x265   : > { %v1928_v37 = vpop.f32.mrb[66].mxu1 }
 0x266   : > { %v2149_v38 = vmax.f32 %v1926_v35, 0.0  ;;  %v1929_v49 = vadd.f32 %v3163_v32, %v1928_v37  ;;  %v1930_v39 = vpop.f32.mrb[67].mxu1 }
 0x268   : > { %2230 = vst [vmem:[%s3171_s8 + $0x110] sm:$0xff] %v2149_v38  ;;  %v2150_v40 = vmax.f32 %v1929_v49, 0.0 }
 0x26a   : > { %2231 = vst [vmem:[%s3171_s8 + $0x118] sm:$0xff] %v2150_v40 }
 0x26b   : > { %v1933_v41 = vpop.f32.mrb[68].mxu1 }
 0x26c   : > { %v1934_v42 = vadd.f32 %v3163_v32, %v1933_v41  ;;  %v1935_v43 = vpop.f32.mrb[69].mxu1 }
 0x26d   : > { %v1936_v44 = vpop.f32.mrb[70].mxu1 }
 0x26e   : > { %v2151_v45 = vmax.f32 %v1934_v42, 0.0  ;;  %v1937_v46 = vadd.f32 %v3163_v32, %v1936_v44  ;;  %v1938_v47 = vpop.f32.mrb[71].mxu1 }
 0x270   : > { %2232 = vst [vmem:[%s3171_s8 + $0x120] sm:$0xff] %v2151_v45  ;;  %v2152_v48 = vmax.f32 %v1937_v46, 0.0 }
 0x272   : > { %2233 = vst [vmem:[%s3171_s8 + $0x128] sm:$0xff] %v2152_v48 }
 0x273   : > { %v1941_v51 = vpop.f32.mrb[72].mxu1 }
 0x274   : > { %v1942_v52 = vadd.f32 %v3163_v32, %v1941_v51  ;;  %v1943_v53 = vpop.f32.mrb[73].mxu1 }
 0x275   : > { %v1944_v54 = vpop.f32.mrb[74].mxu1 }
 0x276   : > { %v2153_v55 = vmax.f32 %v1942_v52, 0.0  ;;  %v1945_v56 = vadd.f32 %v3163_v32, %v1944_v54  ;;  %v1946_v57 = vpop.f32.mrb[75].mxu1 }
 0x278   : > { %2234 = vst [vmem:[%s3171_s8 + $0x130] sm:$0xff] %v2153_v55  ;;  %v2154_v33 = vmax.f32 %v1945_v56, 0.0 }
 0x27a   : > { %2235 = vst [vmem:[%s3171_s8 + $0x138] sm:$0xff] %v2154_v33 }
 0x27b   : > { %v1949_v58 = vpop.f32.mrb[76].mxu1 }
 0x27c   : > { %v1950_v59 = vadd.f32 %v3163_v32, %v1949_v58  ;;  %v1951_v60 = vpop.f32.mrb[77].mxu1 }
 0x27d   : > { %v1952_v34 = vpop.f32.mrb[78].mxu1 }
 0x27e   : > { %v2155_v61 = vmax.f32 %v1950_v59, 0.0  ;;  %v1953_v62 = vadd.f32 %v3163_v32, %v1952_v34  ;;  %v1954_v63 = vpop.f32.mrb[79].mxu1 }
 0x280   : > { %2236 = vst [vmem:[%s3171_s8 + $0x140] sm:$0xff] %v2155_v61  ;;  %v2156_v0 = vmax.f32 %v1953_v62, 0.0 }
 0x282   : > { %2237 = vst [vmem:[%s3171_s8 + $0x148] sm:$0xff] %v2156_v0 }
 0x283   : > { %v1957_v1 = vpop.f32.mrb[80].mxu1 }
 0x284   : > { %v1958_v2 = vadd.f32 %v3163_v32, %v1957_v1  ;;  %v1959_v3 = vpop.f32.mrb[81].mxu1 }
 0x285   : > { %v1960_v4 = vpop.f32.mrb[82].mxu1 }
 0x286   : > { %v2157_v5 = vmax.f32 %v1958_v2, 0.0  ;;  %v1961_v6 = vadd.f32 %v3163_v32, %v1960_v4  ;;  %v1962_v7 = vpop.f32.mrb[83].mxu1 }
 0x288   : > { %2238 = vst [vmem:[%s3171_s8 + $0x150] sm:$0xff] %v2157_v5  ;;  %v2158_v8 = vmax.f32 %v1961_v6, 0.0 }
 0x28a   : > { %2239 = vst [vmem:[%s3171_s8 + $0x158] sm:$0xff] %v2158_v8 }
 0x28b   : > { %v1965_v9 = vpop.f32.mrb[84].mxu1 }
 0x28c   : > { %v1966_v10 = vadd.f32 %v3163_v32, %v1965_v9  ;;  %v1967_v11 = vpop.f32.mrb[85].mxu1 }
 0x28d   : > { %v1968_v12 = vpop.f32.mrb[86].mxu1 }
 0x28e   : > { %v2159_v13 = vmax.f32 %v1966_v10, 0.0  ;;  %v1969_v14 = vadd.f32 %v3163_v32, %v1968_v12  ;;  %v1970_v15 = vpop.f32.mrb[87].mxu1 }
 0x290   : > { %2240 = vst [vmem:[%s3171_s8 + $0x160] sm:$0xff] %v2159_v13  ;;  %v2160_v16 = vmax.f32 %v1969_v14, 0.0 }
 0x292   : > { %2241 = vst [vmem:[%s3171_s8 + $0x168] sm:$0xff] %v2160_v16 }
 0x293   : > { %v1973_v17 = vpop.f32.mrb[88].mxu1 }
 0x294   : > { %v1974_v18 = vadd.f32 %v3163_v32, %v1973_v17  ;;  %v1975_v19 = vpop.f32.mrb[89].mxu1 }
 0x295   : > { %v1976_v20 = vpop.f32.mrb[90].mxu1 }
 0x296   : > { %v2161_v21 = vmax.f32 %v1974_v18, 0.0  ;;  %v1977_v22 = vadd.f32 %v3163_v32, %v1976_v20  ;;  %v1978_v23 = vpop.f32.mrb[91].mxu1 }
 0x297   : > { %v3346_v23 = vld [vmem:[%s3392_s4] ss:$0 sm:$0xff] }
 0x298   : > { %2242 = vst [vmem:[%s3171_s8 + $0x170] sm:$0xff] %v2161_v21  ;;  %v2162_v24 = vmax.f32 %v1977_v22, 0.0 }
 0x29a   : > { %2243 = vst [vmem:[%s3171_s8 + $0x178] sm:$0xff] %v2162_v24 }
 0x29b   : > { %v1981_v50 = vpop.f32.mrb[92].mxu1 }
 0x29c   : > { %v1982_v25 = vadd.f32 %v3163_v32, %v1981_v50  ;;  %v1983_v26 = vpop.f32.mrb[93].mxu1 }
 0x29d   : > { %v1984_v27 = vpop.f32.mrb[94].mxu1 }
 0x29e   : > { %v2163_v28 = vmax.f32 %v1982_v25, 0.0  ;;  %v1985_v29 = vadd.f32 %v3163_v32, %v1984_v27  ;;  %v1986_v30 = vpop.f32.mrb[95].mxu1 }
 0x2a0   : > { %2244 = vst [vmem:[%s3171_s8 + $0x180] sm:$0xff] %v2163_v28  ;;  %v2164_v31 = vmax.f32 %v1985_v29, 0.0 }
 0x2a2   : > { %2245 = vst [vmem:[%s3171_s8 + $0x188] sm:$0xff] %v2164_v31 }
 0x2a3   : > { %v1989_v35 = vpop.f32.mrb[96].mxu1 }
 0x2a4   : > { %v1990_v36 = vadd.f32 %v3163_v32, %v1989_v35  ;;  %v1991_v37 = vpop.f32.mrb[97].mxu1 }
 0x2a5   : > { %v1992_v38 = vpop.f32.mrb[98].mxu1 }
 0x2a6   : > { %v2165_v49 = vmax.f32 %v1990_v36, 0.0  ;;  %v1993_v39 = vadd.f32 %v3163_v32, %v1992_v38  ;;  %v1994_v40 = vpop.f32.mrb[99].mxu1 }
 0x2a8   : > { %2246 = vst [vmem:[%s3171_s8 + $0x190] sm:$0xff] %v2165_v49  ;;  %v2166_v41 = vmax.f32 %v1993_v39, 0.0 }
 0x2aa   : > { %2247 = vst [vmem:[%s3171_s8 + $0x198] sm:$0xff] %v2166_v41 }
 0x2ab   : > { %v1997_v42 = vpop.f32.mrb[100].mxu1 }
 0x2ac   : > { %v1998_v43 = vadd.f32 %v3163_v32, %v1997_v42  ;;  %v1999_v44 = vpop.f32.mrb[101].mxu1 }
 0x2ad   : > { %v2000_v45 = vpop.f32.mrb[102].mxu1 }
 0x2ae   : > { %v2167_v46 = vmax.f32 %v1998_v43, 0.0  ;;  %v2001_v47 = vadd.f32 %v3163_v32, %v2000_v45  ;;  %v2002_v48 = vpop.f32.mrb[103].mxu1 }
 0x2b0   : > { %2248 = vst [vmem:[%s3171_s8 + $0x1a0] sm:$0xff] %v2167_v46  ;;  %v2168_v51 = vmax.f32 %v2001_v47, 0.0 }
 0x2b2   : > { %2249 = vst [vmem:[%s3171_s8 + $0x1a8] sm:$0xff] %v2168_v51 }
 0x2b3   : > { %v2005_v52 = vpop.f32.mrb[104].mxu1 }
 0x2b4   : > { %v2006_v53 = vadd.f32 %v3163_v32, %v2005_v52  ;;  %v2007_v54 = vpop.f32.mrb[105].mxu1 }
 0x2b5   : > { %v2008_v55 = vpop.f32.mrb[106].mxu1 }
 0x2b6   : > { %v2169_v56 = vmax.f32 %v2006_v53, 0.0  ;;  %v2009_v57 = vadd.f32 %v3163_v32, %v2008_v55  ;;  %v2010_v33 = vpop.f32.mrb[107].mxu1 }
 0x2b8   : > { %2250 = vst [vmem:[%s3171_s8 + $0x1b0] sm:$0xff] %v2169_v56  ;;  %v2170_v58 = vmax.f32 %v2009_v57, 0.0 }
 0x2ba   : > { %2251 = vst [vmem:[%s3171_s8 + $0x1b8] sm:$0xff] %v2170_v58 }
 0x2bb   : > { %v2013_v59 = vpop.f32.mrb[108].mxu1 }
 0x2bc   : > { %v2014_v60 = vadd.f32 %v3163_v32, %v2013_v59  ;;  %v2015_v34 = vpop.f32.mrb[109].mxu1 }
 0x2bd   : > { %v2016_v61 = vpop.f32.mrb[110].mxu1 }
 0x2be   : > { %v2171_v62 = vmax.f32 %v2014_v60, 0.0  ;;  %v2017_v63 = vadd.f32 %v3163_v32, %v2016_v61  ;;  %v2018_v0 = vpop.f32.mrb[111].mxu1 }
 0x2c0   : > { %2252 = vst [vmem:[%s3171_s8 + $0x1c0] sm:$0xff] %v2171_v62  ;;  %v2172_v1 = vmax.f32 %v2017_v63, 0.0 }
 0x2c2   : > { %2253 = vst [vmem:[%s3171_s8 + $0x1c8] sm:$0xff] %v2172_v1 }
 0x2c3   : > { %v2021_v2 = vpop.f32.mrb[112].mxu1 }
 0x2c4   : > { %v2022_v3 = vadd.f32 %v3163_v32, %v2021_v2  ;;  %v2023_v4 = vpop.f32.mrb[113].mxu1 }
 0x2c5   : > { %v2024_v5 = vpop.f32.mrb[114].mxu1 }
 0x2c6   : > { %v2173_v6 = vmax.f32 %v2022_v3, 0.0  ;;  %v2025_v7 = vadd.f32 %v3163_v32, %v2024_v5  ;;  %v2026_v8 = vpop.f32.mrb[115].mxu1 }
 0x2c8   : > { %2254 = vst [vmem:[%s3171_s8 + $0x1d0] sm:$0xff] %v2173_v6  ;;  %v2174_v9 = vmax.f32 %v2025_v7, 0.0 }
 0x2ca   : > { %2255 = vst [vmem:[%s3171_s8 + $0x1d8] sm:$0xff] %v2174_v9 }
 0x2cb   : > { %v2029_v10 = vpop.f32.mrb[116].mxu1 }
 0x2cc   : > { %v2030_v11 = vadd.f32 %v3163_v32, %v2029_v10  ;;  %v2031_v12 = vpop.f32.mrb[117].mxu1 }
 0x2cd   : > { %v2032_v13 = vpop.f32.mrb[118].mxu1 }
 0x2ce   : > { %v2175_v14 = vmax.f32 %v2030_v11, 0.0  ;;  %v2033_v15 = vadd.f32 %v3163_v32, %v2032_v13  ;;  %v2034_v16 = vpop.f32.mrb[119].mxu1 }
 0x2d0   : > { %2256 = vst [vmem:[%s3171_s8 + $0x1e0] sm:$0xff] %v2175_v14  ;;  %v2176_v17 = vmax.f32 %v2033_v15, 0.0 }
 0x2d2   : > { %2257 = vst [vmem:[%s3171_s8 + $0x1e8] sm:$0xff] %v2176_v17 }
 0x2d3   : > { %v2037_v18 = vpop.f32.mrb[120].mxu1 }
 0x2d4   : > { %v2038_v19 = vadd.f32 %v3163_v32, %v2037_v18  ;;  %v2039_v20 = vpop.f32.mrb[121].mxu1 }
 0x2d5   : > { %v2040_v21 = vpop.f32.mrb[122].mxu1 }
 0x2d6   : > { %v2177_v22 = vmax.f32 %v2038_v19, 0.0  ;;  %v2041_v24 = vadd.f32 %v3346_v23, %v2040_v21  ;;  %v2042_v50 = vpop.f32.mrb[123].mxu1 }
 0x2d8   : > { %2258 = vst [vmem:[%s3171_s8 + $0x1f0] sm:$0xff] %v2177_v22  ;;  %v2178_v25 = vmax.f32 %v2041_v24, 0.0 }
 0x2da   : > { %2259 = vst [vmem:[%s3171_s8 + $0x1f8] sm:$0xff] %v2178_v25 }
 0x2db   : > { %v2045_v26 = vpop.f32.mrb[124].mxu1 }
 0x2dc   : > { %v2046_v27 = vadd.f32 %v3346_v23, %v2045_v26  ;;  %v2047_v32 = vpop.f32.mrb[125].mxu1 }
 0x2dd   : > { %v2048_v28 = vpop.f32.mrb[126].mxu1 }
 0x2de   : > { %v2179_v29 = vmax.f32 %v2046_v27, 0.0  ;;  %v2049_v30 = vadd.f32 %v3346_v23, %v2048_v28  ;;  %v2050_v31 = vpop.f32.mrb[127].mxu1 }
 0x2e0   : > { %2260 = vst [vmem:[%s3171_s8 + $0x200] sm:$0xff] %v2179_v29  ;;  %v2180_v35 = vmax.f32 %v2049_v30, 0.0 }
 0x2e2   : > { %2261 = vst [vmem:[%s3171_s8 + $0x208] sm:$0xff] %v2180_v35 }
 0x2e3   : > { %v2053_v36 = vpop.f32.mrb[128].mxu1 }
 0x2e4   : > { %v2054_v37 = vadd.f32 %v3346_v23, %v2053_v36  ;;  %v2055_v38 = vpop.f32.mrb[129].mxu1 }
 0x2e5   : > { %v2056_v49 = vpop.f32.mrb[130].mxu1 }
 0x2e6   : > { %v2181_v39 = vmax.f32 %v2054_v37, 0.0  ;;  %v2057_v40 = vadd.f32 %v3346_v23, %v2056_v49  ;;  %v2058_v41 = vpop.f32.mrb[131].mxu1 }
 0x2e8   : > { %2262 = vst [vmem:[%s3171_s8 + $0x210] sm:$0xff] %v2181_v39  ;;  %v2182_v42 = vmax.f32 %v2057_v40, 0.0 }
 0x2ea   : > { %2263 = vst [vmem:[%s3171_s8 + $0x218] sm:$0xff] %v2182_v42 }
 0x2eb   : > { %v2061_v43 = vpop.f32.mrb[132].mxu1 }
 0x2ec   : > { %v2062_v44 = vadd.f32 %v3346_v23, %v2061_v43  ;;  %v2063_v45 = vpop.f32.mrb[133].mxu1 }
 0x2ed   : > { %v2064_v46 = vpop.f32.mrb[134].mxu1 }
 0x2ee   : > { %v2183_v47 = vmax.f32 %v2062_v44, 0.0  ;;  %v2065_v48 = vadd.f32 %v3346_v23, %v2064_v46  ;;  %v2066_v51 = vpop.f32.mrb[135].mxu1 }
 0x2f0   : > { %2264 = vst [vmem:[%s3171_s8 + $0x220] sm:$0xff] %v2183_v47  ;;  %v2184_v52 = vmax.f32 %v2065_v48, 0.0 }
 0x2f2   : > { %2265 = vst [vmem:[%s3171_s8 + $0x228] sm:$0xff] %v2184_v52 }
 0x2f3   : > { %v2069_v53 = vpop.f32.mrb[136].mxu1 }
 0x2f4   : > { %v2070_v54 = vadd.f32 %v3346_v23, %v2069_v53  ;;  %v2071_v55 = vpop.f32.mrb[137].mxu1 }
 0x2f5   : > { %v2072_v56 = vpop.f32.mrb[138].mxu1 }
 0x2f6   : > { %v2185_v57 = vmax.f32 %v2070_v54, 0.0  ;;  %v2073_v33 = vadd.f32 %v3346_v23, %v2072_v56  ;;  %v2074_v58 = vpop.f32.mrb[139].mxu1 }
 0x2f8   : > { %2266 = vst [vmem:[%s3171_s8 + $0x230] sm:$0xff] %v2185_v57  ;;  %v2186_v59 = vmax.f32 %v2073_v33, 0.0 }
 0x2fa   : > { %2267 = vst [vmem:[%s3171_s8 + $0x238] sm:$0xff] %v2186_v59 }
 0x2fb   : > { %v2077_v60 = vpop.f32.mrb[140].mxu1 }
 0x2fc   : > { %v2078_v34 = vadd.f32 %v3346_v23, %v2077_v60  ;;  %v2079_v61 = vpop.f32.mrb[141].mxu1 }
 0x2fd   : > { %v2080_v62 = vpop.f32.mrb[142].mxu1 }
 0x2fe   : > { %v2187_v63 = vmax.f32 %v2078_v34, 0.0  ;;  %v2081_v0 = vadd.f32 %v3346_v23, %v2080_v62  ;;  %v2082_v1 = vpop.f32.mrb[143].mxu1 }
 0x300   : > { %2268 = vst [vmem:[%s3171_s8 + $0x240] sm:$0xff] %v2187_v63  ;;  %v2188_v2 = vmax.f32 %v2081_v0, 0.0 }
 0x302   : > { %2269 = vst [vmem:[%s3171_s8 + $0x248] sm:$0xff] %v2188_v2 }
 0x303   : > { %v2085_v3 = vpop.f32.mrb[144].mxu1 }
 0x304   : > { %v2086_v4 = vadd.f32 %v3346_v23, %v2085_v3  ;;  %v2087_v5 = vpop.f32.mrb[145].mxu1 }
 0x305   : > { %v2088_v6 = vpop.f32.mrb[146].mxu1 }
 0x306   : > { %v2189_v7 = vmax.f32 %v2086_v4, 0.0  ;;  %v2089_v8 = vadd.f32 %v3346_v23, %v2088_v6  ;;  %v2090_v9 = vpop.f32.mrb[147].mxu1 }
 0x308   : > { %2270 = vst [vmem:[%s3171_s8 + $0x250] sm:$0xff] %v2189_v7  ;;  %v2190_v10 = vmax.f32 %v2089_v8, 0.0 }
 0x30a   : > { %2271 = vst [vmem:[%s3171_s8 + $0x258] sm:$0xff] %v2190_v10 }
 0x30b   : > { %v2093_v11 = vpop.f32.mrb[148].mxu1 }
 0x30c   : > { %v2094_v12 = vadd.f32 %v3346_v23, %v2093_v11  ;;  %v2095_v13 = vpop.f32.mrb[149].mxu1 }
 0x30d   : > { %v2096_v14 = vpop.f32.mrb[150].mxu1 }
 0x30e   : > { %v2191_v15 = vmax.f32 %v2094_v12, 0.0  ;;  %v2097_v16 = vadd.f32 %v3346_v23, %v2096_v14  ;;  %v2098_v17 = vpop.f32.mrb[151].mxu1 }
 0x310   : > { %2272 = vst [vmem:[%s3171_s8 + $0x260] sm:$0xff] %v2191_v15  ;;  %v2192_v18 = vmax.f32 %v2097_v16, 0.0 }
 0x312   : > { %2273 = vst [vmem:[%s3171_s8 + $0x268] sm:$0xff] %v2192_v18 }
 0x313   : > { %v2101_v19 = vpop.f32.mrb[152].mxu1 }
 0x314   : > { %v2102_v20 = vadd.f32 %v3346_v23, %v2101_v19  ;;  %v2103_v21 = vpop.f32.mrb[153].mxu1 }
 0x315   : > { %v2104_v22 = vpop.f32.mrb[154].mxu1 }
 0x316   : > { %v2193_v24 = vmax.f32 %v2102_v20, 0.0  ;;  %v2105_v50 = vadd.f32 %v3346_v23, %v2104_v22  ;;  %v2106_v25 = vpop.f32.mrb[155].mxu1 }
 0x318   : > { %2274 = vst [vmem:[%s3171_s8 + $0x270] sm:$0xff] %v2193_v24  ;;  %v2194_v26 = vmax.f32 %v2105_v50, 0.0 }
 0x31a   : > { %2275 = vst [vmem:[%s3171_s8 + $0x278] sm:$0xff] %v2194_v26 }
 0x31b   : > { %v2109_v27 = vpop.f32.mrb[156].mxu1 }
 0x31c   : > { %v2110_v32 = vadd.f32 %v3346_v23, %v2109_v27  ;;  %v2111_v28 = vpop.f32.mrb[157].mxu1 }
 0x31d   : > { %v2112_v29 = vpop.f32.mrb[158].mxu1 }
 0x31e   : > { %v2195_v30 = vmax.f32 %v2110_v32, 0.0  ;;  %v2113_v31 = vpop.f32.mrb[159].mxu1 }
 0x320   : > { %2276 = vst [vmem:[%s3171_s8 + $0x280] sm:$0xff] %v2195_v30 }
 0x321 PF: > { %s15_s18 = sadd.s32 1, %s2726_s18  }
 0x322   : > { %p12_p4 = scmp.ge.s32.totalorder %s15_s18, 4  }
 0x324   :  { %14 = sbr.rel (!%p12_p4) target bundleno = 1 (0x1), region = 73 }

</bundles_post_ra>
